<compile_context>
chip_gen: v5e
topology: v5e:2x2
jax: 0.10.0
libtpu: 0.0.40
codegen_flags: <defaults>
</compile_context>

<pallas_src>
import functools

import jax
import jax.numpy as jnp
from jax.experimental import pallas as pl
from jax.experimental.pallas import tpu as pltpu

_K = 7
_PAD = _K // 2


def _saca_kernel(x_ref, w1_ref, w2_ref, wsa_ref, o_ref, pmx_ref, pav_ref,
                 *, B, C, Cr, H, W):
    HW = H * W
    x = x_ref[...].astype(jnp.float32)                  # (B, C, HW), lane-dense

    # Per-channel (B, HW) slices, reused by CA, SA and the final product.
    x_ch = [x[:, c, :] for c in range(C)]

    # ---- Channel attention: sigmoid(2 * W2 @ relu(W1 @ x)) per pixel -------
    # C, Cr are tiny (ratio=4): unrolled VPU MACs with SMEM scalar weights.
    # TODO(synk): for large C/Cr switch this to bf16 jnp.dot on the MXU
    #             (f32 accumulation) instead of the unrolled VPU path.
    h = []
    for r in range(Cr):
        acc = w1_ref[r * C] * x_ch[0]
        for c in range(1, C):
            acc = acc + w1_ref[r * C + c] * x_ch[c]
        h.append(jnp.maximum(acc, 0.0))                  # (B, HW)
    ca = []
    for c in range(C):
        acc = w2_ref[c * Cr] * h[0]
        for r in range(1, Cr):
            acc = acc + w2_ref[c * Cr + r] * h[r]
        ca.append(jax.nn.sigmoid(2.0 * acc))             # (B, HW)

    # ---- Spatial attention: 7x7 conv (pad=3) over [max_c, mean_c] maps -----
    # Max and mean over channels computed in a single pass over the C slices.
    mx = x_ch[0]
    sm = x_ch[0]
    for c in range(1, C):
        mx = jnp.maximum(mx, x_ch[c])
        sm = sm + x_ch[c]
    av = sm * (1.0 / C)

    # Zero-padded scratch maps (zeroed each step -> safe under "parallel"
    # grid semantics; the scratch is only a few KiB).
    pmx_ref[...] = jnp.zeros_like(pmx_ref)
    pav_ref[...] = jnp.zeros_like(pav_ref)
    pmx_ref[:, _PAD:_PAD + H, _PAD:_PAD + W] = mx.reshape(B, H, W)
    pav_ref[:, _PAD:_PAD + H, _PAD:_PAD + W] = av.reshape(B, H, W)
    pm = pmx_ref[...]                                    # (B, H+6, W+6)
    pa = pav_ref[...]

    # Hoist the kx (lane-axis) shift out of the inner loop: 7 lane slices per
    # map; the inner ky loop only takes sublane slices before each MAC.
    acc = jnp.zeros((B, H, W), jnp.float32)
    for kx in range(_K):
        pm_kx = pm[:, :, kx:kx + W]                      # (B, H+6, W)
        pa_kx = pa[:, :, kx:kx + W]
        for ky in range(_K):
            wm = wsa_ref[0 * _K * _K + ky * _K + kx]     # SMEM scalars
            wa = wsa_ref[1 * _K * _K + ky * _K + kx]
            acc = (acc + wm * pm_kx[:, ky:ky + H, :]
                       + wa * pa_kx[:, ky:ky + H, :])
    sa = jax.nn.sigmoid(acc).reshape(B, HW)              # (B, HW)

    # ---- out = x * CA(x) * SA(x) --------------------------------------------
    out = jnp.stack([x_ch[c] * ca[c] * sa for c in range(C)], axis=1)
    o_ref[...] = out.astype(o_ref.dtype)                 # (B, C, HW), lane-dense


def saca_pallas(x, w1, w2, w_sa, *, block_n=None):
    """x: (N, C, H, W) f32.  w1: (Cr, C).  w2: (C, Cr).  w_sa: (2, 7, 7)."""
    N, C, H, W = x.shape
    Cr = w1.shape[0]
    HW = H * W

    if block_n is None:
        block_n = 1
        for b in range(min(N, 8), 0, -1):   # largest divisor of N up to 8
            if N % b == 0:
                block_n = b
                break
    B = block_n
    assert N % B == 0

    xf = x.reshape(N, C, HW)                             # lane-dense layout
    w1f = w1.reshape(-1).astype(jnp.float32)             # (Cr*C,) -> SMEM
    w2f = w2.reshape(-1).astype(jnp.float32)             # (C*Cr,) -> SMEM
    wsf = w_sa.reshape(-1).astype(jnp.float32)           # (98,)   -> SMEM

    kernel = functools.partial(_saca_kernel, B=B, C=C, Cr=Cr, H=H, W=W)
    out = pl.pallas_call(
        kernel,
        out_shape=jax.ShapeDtypeStruct((N, C, HW), jnp.float32),
        grid=(N // B,),
        in_specs=[
            pl.BlockSpec((B, C, HW), lambda n: (n, 0, 0)),
            pl.BlockSpec(memory_space=pltpu.MemorySpace.SMEM),
            pl.BlockSpec(memory_space=pltpu.MemorySpace.SMEM),
            pl.BlockSpec(memory_space=pltpu.MemorySpace.SMEM),
        ],
        out_specs=pl.BlockSpec((B, C, HW), lambda n: (n, 0, 0)),
        scratch_shapes=[
            pltpu.VMEM((B, H + 2 * _PAD, W + 2 * _PAD), jnp.float32),
            pltpu.VMEM((B, H + 2 * _PAD, W + 2 * _PAD), jnp.float32),
        ],
        compiler_params=pltpu.CompilerParams(
            dimension_semantics=("parallel",),
            vmem_limit_bytes=32 * 1024 * 1024),
    )(xf, w1f, w2f, wsf)
    return out.reshape(N, C, H, W)


def saca_reference(x, w1, w2, w_sa):
    """Pure-JAX reference mirroring the PyTorch SACA (name='') forward."""
    # Channel attention (MaxPool2d(1)/AvgPool2d(1) are identities).
    h = jnp.maximum(jnp.einsum("rc,nchw->nrhw", w1, x), 0.0)
    y = jnp.einsum("cr,nrhw->nchw", w2, h)
    ca = jax.nn.sigmoid(2.0 * y)
    # Spatial attention.
    mx = jnp.max(x, axis=1, keepdims=True)
    av = jnp.mean(x, axis=1, keepdims=True)
    feat = jnp.concatenate([mx, av], axis=1)              # (N, 2, H, W)
    conv = jax.lax.conv_general_dilated(
        feat, w_sa[None], window_strides=(1, 1), padding="SAME",
        dimension_numbers=("NCHW", "OIHW", "NCHW"))
    sa = jax.nn.sigmoid(conv)                             # (N, 1, H, W)
    return x * ca * sa


if __name__ == "__main__":
    key = jax.random.PRNGKey(0)
    k_x, k_w1, k_w2, k_ws = jax.random.split(key, 4)

    N, C, H, W = 2, 4, 16, 16
    Cr = max(C // 4, 1)

    x = jax.random.normal(k_x, (N, C, H, W), dtype=jnp.float32)
    # ChannelAttention.fc: Conv2d(C, Cr, 1, bias=False) then Conv2d(Cr, C, 1, bias=False)
    w1 = jax.random.normal(k_w1, (Cr, C), dtype=jnp.float32) * 0.5
    w2 = jax.random.normal(k_w2, (C, Cr), dtype=jnp.float32) * 0.5
    # SpatialAttention.conv1: Conv2d(2, 1, 7, padding=3, bias=False)
    w_sa = jax.random.normal(k_ws, (2, 7, 7), dtype=jnp.float32) * 0.1

    out = jax.block_until_ready(saca_pallas(x, w1, w2, w_sa))
    ref = jax.block_until_ready(saca_reference(x, w1, w2, w_sa))

    assert out.shape == (N, C, H, W)
    assert jnp.allclose(out, ref, rtol=1e-4, atol=1e-5), (
        float(jnp.max(jnp.abs(out - ref))))

    print("KERNEL_OK")
</pallas_src>

<mosaic_0001>
module attributes {stable_mosaic.version = 11 : i64} {
  func.func @_saca_kernel(%arg0: i32, %arg1: memref<2x4x256xf32, #tpu.memory_space<vmem>>, %arg2: memref<4xf32, #tpu.memory_space<smem>>, %arg3: memref<4xf32, #tpu.memory_space<smem>>, %arg4: memref<98xf32, #tpu.memory_space<smem>>, %arg5: memref<2x4x256xf32, #tpu.memory_space<vmem>>, %arg6: memref<2x22x22xf32, #tpu.memory_space<vmem>>, %arg7: memref<2x22x22xf32, #tpu.memory_space<vmem>>) attributes {dimension_semantics = [#tpu.dimension_semantics<parallel>], iteration_bounds = array<i64: 1>, scalar_prefetch = 0 : i64, scratch_operands = 2 : i64, tpu.core_type = #tpu.core_type<tc>, window_params = [{transform_indices = @transform_0, window_bounds = array<i64: 2, 4, 256>}, {transform_indices = @transform_1, window_bounds = array<i64: 4>}, {transform_indices = @transform_2, window_bounds = array<i64: 4>}, {transform_indices = @transform_3, window_bounds = array<i64: 98>}, {transform_indices = @transform_4, window_bounds = array<i64: 2, 4, 256>}]} {
    %c0 = arith.constant 0 : index
    %c0_0 = arith.constant 0 : index
    %c0_1 = arith.constant 0 : index
    %0 = vector.load %arg1[%c0, %c0_0, %c0_1] : memref<2x4x256xf32, #tpu.memory_space<vmem>>, vector<2x4x256xf32>
    %1 = vector.extract_strided_slice %0 {offsets = [0, 0, 0], sizes = [2, 1, 256], strides = [1, 1, 1]} : vector<2x4x256xf32> to vector<2x1x256xf32>
    %2 = vector.shape_cast %1 : vector<2x1x256xf32> to vector<2x256xf32>
    %3 = vector.extract_strided_slice %0 {offsets = [0, 1, 0], sizes = [2, 1, 256], strides = [1, 1, 1]} : vector<2x4x256xf32> to vector<2x1x256xf32>
    %4 = vector.shape_cast %3 : vector<2x1x256xf32> to vector<2x256xf32>
    %5 = vector.extract_strided_slice %0 {offsets = [0, 2, 0], sizes = [2, 1, 256], strides = [1, 1, 1]} : vector<2x4x256xf32> to vector<2x1x256xf32>
    %6 = vector.shape_cast %5 : vector<2x1x256xf32> to vector<2x256xf32>
    %7 = vector.extract_strided_slice %0 {offsets = [0, 3, 0], sizes = [2, 1, 256], strides = [1, 1, 1]} : vector<2x4x256xf32> to vector<2x1x256xf32>
    %8 = vector.shape_cast %7 : vector<2x1x256xf32> to vector<2x256xf32>
    %c0_2 = arith.constant 0 : index
    %9 = memref.load %arg2[%c0_2] : memref<4xf32, #tpu.memory_space<smem>>
    %10 = vector.broadcast %9 : f32 to vector<2x256xf32>
    %11 = arith.mulf %10, %2 : vector<2x256xf32>
    %c1 = arith.constant 1 : index
    %12 = memref.load %arg2[%c1] : memref<4xf32, #tpu.memory_space<smem>>
    %13 = vector.broadcast %12 : f32 to vector<2x256xf32>
    %14 = arith.mulf %13, %4 : vector<2x256xf32>
    %15 = arith.addf %11, %14 : vector<2x256xf32>
    %c2 = arith.constant 2 : index
    %16 = memref.load %arg2[%c2] : memref<4xf32, #tpu.memory_space<smem>>
    %17 = vector.broadcast %16 : f32 to vector<2x256xf32>
    %18 = arith.mulf %17, %6 : vector<2x256xf32>
    %19 = arith.addf %15, %18 : vector<2x256xf32>
    %c3 = arith.constant 3 : index
    %20 = memref.load %arg2[%c3] : memref<4xf32, #tpu.memory_space<smem>>
    %21 = vector.broadcast %20 : f32 to vector<2x256xf32>
    %22 = arith.mulf %21, %8 : vector<2x256xf32>
    %23 = arith.addf %19, %22 : vector<2x256xf32>
    %cst = arith.constant 0.000000e+00 : f32
    %24 = vector.broadcast %cst : f32 to vector<2x256xf32>
    %25 = arith.maximumf %23, %24 : vector<2x256xf32>
    %c0_3 = arith.constant 0 : index
    %26 = memref.load %arg3[%c0_3] : memref<4xf32, #tpu.memory_space<smem>>
    %27 = vector.broadcast %26 : f32 to vector<2x256xf32>
    %28 = arith.mulf %27, %25 : vector<2x256xf32>
    %cst_4 = arith.constant 2.000000e+00 : f32
    %29 = vector.broadcast %cst_4 : f32 to vector<2x256xf32>
    %30 = arith.mulf %29, %28 : vector<2x256xf32>
    %31 = arith.negf %30 : vector<2x256xf32>
    %32 = math.exp %31 : vector<2x256xf32>
    %cst_5 = arith.constant 1.000000e+00 : f32
    %33 = vector.broadcast %cst_5 : f32 to vector<2x256xf32>
    %34 = arith.addf %33, %32 : vector<2x256xf32>
    %35 = arith.divf %33, %34 : vector<2x256xf32>
    %c1_6 = arith.constant 1 : index
    %36 = memref.load %arg3[%c1_6] : memref<4xf32, #tpu.memory_space<smem>>
    %37 = vector.broadcast %36 : f32 to vector<2x256xf32>
    %38 = arith.mulf %37, %25 : vector<2x256xf32>
    %cst_7 = arith.constant 2.000000e+00 : f32
    %39 = vector.broadcast %cst_7 : f32 to vector<2x256xf32>
    %40 = arith.mulf %39, %38 : vector<2x256xf32>
    %41 = arith.negf %40 : vector<2x256xf32>
    %42 = math.exp %41 : vector<2x256xf32>
    %cst_8 = arith.constant 1.000000e+00 : f32
    %43 = vector.broadcast %cst_8 : f32 to vector<2x256xf32>
    %44 = arith.addf %43, %42 : vector<2x256xf32>
    %45 = arith.divf %43, %44 : vector<2x256xf32>
    %c2_9 = arith.constant 2 : index
    %46 = memref.load %arg3[%c2_9] : memref<4xf32, #tpu.memory_space<smem>>
    %47 = vector.broadcast %46 : f32 to vector<2x256xf32>
    %48 = arith.mulf %47, %25 : vector<2x256xf32>
    %cst_10 = arith.constant 2.000000e+00 : f32
    %49 = vector.broadcast %cst_10 : f32 to vector<2x256xf32>
    %50 = arith.mulf %49, %48 : vector<2x256xf32>
    %51 = arith.negf %50 : vector<2x256xf32>
    %52 = math.exp %51 : vector<2x256xf32>
    %cst_11 = arith.constant 1.000000e+00 : f32
    %53 = vector.broadcast %cst_11 : f32 to vector<2x256xf32>
    %54 = arith.addf %53, %52 : vector<2x256xf32>
    %55 = arith.divf %53, %54 : vector<2x256xf32>
    %c3_12 = arith.constant 3 : index
    %56 = memref.load %arg3[%c3_12] : memref<4xf32, #tpu.memory_space<smem>>
    %57 = vector.broadcast %56 : f32 to vector<2x256xf32>
    %58 = arith.mulf %57, %25 : vector<2x256xf32>
    %cst_13 = arith.constant 2.000000e+00 : f32
    %59 = vector.broadcast %cst_13 : f32 to vector<2x256xf32>
    %60 = arith.mulf %59, %58 : vector<2x256xf32>
    %61 = arith.negf %60 : vector<2x256xf32>
    %62 = math.exp %61 : vector<2x256xf32>
    %cst_14 = arith.constant 1.000000e+00 : f32
    %63 = vector.broadcast %cst_14 : f32 to vector<2x256xf32>
    %64 = arith.addf %63, %62 : vector<2x256xf32>
    %65 = arith.divf %63, %64 : vector<2x256xf32>
    %66 = arith.maximumf %2, %4 : vector<2x256xf32>
    %67 = arith.addf %2, %4 : vector<2x256xf32>
    %68 = arith.maximumf %66, %6 : vector<2x256xf32>
    %69 = arith.addf %67, %6 : vector<2x256xf32>
    %70 = arith.maximumf %68, %8 : vector<2x256xf32>
    %71 = arith.addf %69, %8 : vector<2x256xf32>
    %cst_15 = arith.constant 2.500000e-01 : f32
    %72 = vector.broadcast %cst_15 : f32 to vector<2x256xf32>
    %73 = arith.mulf %71, %72 : vector<2x256xf32>
    %cst_16 = arith.constant 0.000000e+00 : f32
    %74 = vector.broadcast %cst_16 : f32 to vector<2x22x22xf32>
    %c0_17 = arith.constant 0 : index
    %c0_18 = arith.constant 0 : index
    %c0_19 = arith.constant 0 : index
    %75 = vector.load %arg6[%c0_17, %c0_18, %c0_19] : memref<2x22x22xf32, #tpu.memory_space<vmem>>, vector<2x22x22xf32>
    tpu.vector_store %arg6[%c0_17, %c0_18, %c0_19], %74 {strides = array<i32>} : memref<2x22x22xf32, #tpu.memory_space<vmem>>, vector<2x22x22xf32>,
    %cst_20 = arith.constant 0.000000e+00 : f32
    %76 = vector.broadcast %cst_20 : f32 to vector<2x22x22xf32>
    %c0_21 = arith.constant 0 : index
    %c0_22 = arith.constant 0 : index
    %c0_23 = arith.constant 0 : index
    %77 = vector.load %arg7[%c0_21, %c0_22, %c0_23] : memref<2x22x22xf32, #tpu.memory_space<vmem>>, vector<2x22x22xf32>
    tpu.vector_store %arg7[%c0_21, %c0_22, %c0_23], %76 {strides = array<i32>} : memref<2x22x22xf32, #tpu.memory_space<vmem>>, vector<2x22x22xf32>,
    %78 = vector.shape_cast %70 : vector<2x256xf32> to vector<2x16x16xf32>
    %c0_24 = arith.constant 0 : index
    %c3_25 = arith.constant 3 : index
    %c3_26 = arith.constant 3 : index
    %79 = vector.load %arg6[%c0_24, %c3_25, %c3_26] : memref<2x22x22xf32, #tpu.memory_space<vmem>>, vector<2x16x16xf32>
    tpu.vector_store %arg6[%c0_24, %c3_25, %c3_26], %78 {strides = array<i32>} : memref<2x22x22xf32, #tpu.memory_space<vmem>>, vector<2x16x16xf32>,
    %80 = vector.shape_cast %73 : vector<2x256xf32> to vector<2x16x16xf32>
    %c0_27 = arith.constant 0 : index
    %c3_28 = arith.constant 3 : index
    %c3_29 = arith.constant 3 : index
    %81 = vector.load %arg7[%c0_27, %c3_28, %c3_29] : memref<2x22x22xf32, #tpu.memory_space<vmem>>, vector<2x16x16xf32>
    tpu.vector_store %arg7[%c0_27, %c3_28, %c3_29], %80 {strides = array<i32>} : memref<2x22x22xf32, #tpu.memory_space<vmem>>, vector<2x16x16xf32>,
    %c0_30 = arith.constant 0 : index
    %c0_31 = arith.constant 0 : index
    %c0_32 = arith.constant 0 : index
    %82 = vector.load %arg6[%c0_30, %c0_31, %c0_32] : memref<2x22x22xf32, #tpu.memory_space<vmem>>, vector<2x22x22xf32>
    %c0_33 = arith.constant 0 : index
    %c0_34 = arith.constant 0 : index
    %c0_35 = arith.constant 0 : index
    %83 = vector.load %arg7[%c0_33, %c0_34, %c0_35] : memref<2x22x22xf32, #tpu.memory_space<vmem>>, vector<2x22x22xf32>
    %cst_36 = arith.constant 0.000000e+00 : f32
    %84 = vector.broadcast %cst_36 : f32 to vector<2x16x16xf32>
    %85 = vector.extract_strided_slice %82 {offsets = [0, 0, 0], sizes = [2, 22, 16], strides = [1, 1, 1]} : vector<2x22x22xf32> to vector<2x22x16xf32>
    %86 = vector.extract_strided_slice %83 {offsets = [0, 0, 0], sizes = [2, 22, 16], strides = [1, 1, 1]} : vector<2x22x22xf32> to vector<2x22x16xf32>
    %c0_37 = arith.constant 0 : index
    %87 = memref.load %arg4[%c0_37] : memref<98xf32, #tpu.memory_space<smem>>
    %c49 = arith.constant 49 : index
    %88 = memref.load %arg4[%c49] : memref<98xf32, #tpu.memory_space<smem>>
    %89 = vector.extract_strided_slice %85 {offsets = [0, 0, 0], sizes = [2, 16, 16], strides = [1, 1, 1]} : vector<2x22x16xf32> to vector<2x16x16xf32>
    %90 = vector.broadcast %87 : f32 to vector<2x16x16xf32>
    %91 = arith.mulf %90, %89 : vector<2x16x16xf32>
    %92 = arith.addf %84, %91 : vector<2x16x16xf32>
    %93 = vector.extract_strided_slice %86 {offsets = [0, 0, 0], sizes = [2, 16, 16], strides = [1, 1, 1]} : vector<2x22x16xf32> to vector<2x16x16xf32>
    %94 = vector.broadcast %88 : f32 to vector<2x16x16xf32>
    %95 = arith.mulf %94, %93 : vector<2x16x16xf32>
    %96 = arith.addf %92, %95 : vector<2x16x16xf32>
    %c7 = arith.constant 7 : index
    %97 = memref.load %arg4[%c7] : memref<98xf32, #tpu.memory_space<smem>>
    %c56 = arith.constant 56 : index
    %98 = memref.load %arg4[%c56] : memref<98xf32, #tpu.memory_space<smem>>
    %99 = vector.extract_strided_slice %85 {offsets = [0, 1, 0], sizes = [2, 16, 16], strides = [1, 1, 1]} : vector<2x22x16xf32> to vector<2x16x16xf32>
    %100 = vector.broadcast %97 : f32 to vector<2x16x16xf32>
    %101 = arith.mulf %100, %99 : vector<2x16x16xf32>
    %102 = arith.addf %96, %101 : vector<2x16x16xf32>
    %103 = vector.extract_strided_slice %86 {offsets = [0, 1, 0], sizes = [2, 16, 16], strides = [1, 1, 1]} : vector<2x22x16xf32> to vector<2x16x16xf32>
    %104 = vector.broadcast %98 : f32 to vector<2x16x16xf32>
    %105 = arith.mulf %104, %103 : vector<2x16x16xf32>
    %106 = arith.addf %102, %105 : vector<2x16x16xf32>
    %c14 = arith.constant 14 : index
    %107 = memref.load %arg4[%c14] : memref<98xf32, #tpu.memory_space<smem>>
    %c63 = arith.constant 63 : index
    %108 = memref.load %arg4[%c63] : memref<98xf32, #tpu.memory_space<smem>>
    %109 = vector.extract_strided_slice %85 {offsets = [0, 2, 0], sizes = [2, 16, 16], strides = [1, 1, 1]} : vector<2x22x16xf32> to vector<2x16x16xf32>
    %110 = vector.broadcast %107 : f32 to vector<2x16x16xf32>
    %111 = arith.mulf %110, %109 : vector<2x16x16xf32>
    %112 = arith.addf %106, %111 : vector<2x16x16xf32>
    %113 = vector.extract_strided_slice %86 {offsets = [0, 2, 0], sizes = [2, 16, 16], strides = [1, 1, 1]} : vector<2x22x16xf32> to vector<2x16x16xf32>
    %114 = vector.broadcast %108 : f32 to vector<2x16x16xf32>
    %115 = arith.mulf %114, %113 : vector<2x16x16xf32>
    %116 = arith.addf %112, %115 : vector<2x16x16xf32>
    %c21 = arith.constant 21 : index
    %117 = memref.load %arg4[%c21] : memref<98xf32, #tpu.memory_space<smem>>
    %c70 = arith.constant 70 : index
    %118 = memref.load %arg4[%c70] : memref<98xf32, #tpu.memory_space<smem>>
    %119 = vector.extract_strided_slice %85 {offsets = [0, 3, 0], sizes = [2, 16, 16], strides = [1, 1, 1]} : vector<2x22x16xf32> to vector<2x16x16xf32>
    %120 = vector.broadcast %117 : f32 to vector<2x16x16xf32>
    %121 = arith.mulf %120, %119 : vector<2x16x16xf32>
    %122 = arith.addf %116, %121 : vector<2x16x16xf32>
    %123 = vector.extract_strided_slice %86 {offsets = [0, 3, 0], sizes = [2, 16, 16], strides = [1, 1, 1]} : vector<2x22x16xf32> to vector<2x16x16xf32>
    %124 = vector.broadcast %118 : f32 to vector<2x16x16xf32>
    %125 = arith.mulf %124, %123 : vector<2x16x16xf32>
    %126 = arith.addf %122, %125 : vector<2x16x16xf32>
    %c28 = arith.constant 28 : index
    %127 = memref.load %arg4[%c28] : memref<98xf32, #tpu.memory_space<smem>>
    %c77 = arith.constant 77 : index
    %128 = memref.load %arg4[%c77] : memref<98xf32, #tpu.memory_space<smem>>
    %129 = vector.extract_strided_slice %85 {offsets = [0, 4, 0], sizes = [2, 16, 16], strides = [1, 1, 1]} : vector<2x22x16xf32> to vector<2x16x16xf32>
    %130 = vector.broadcast %127 : f32 to vector<2x16x16xf32>
    %131 = arith.mulf %130, %129 : vector<2x16x16xf32>
    %132 = arith.addf %126, %131 : vector<2x16x16xf32>
    %133 = vector.extract_strided_slice %86 {offsets = [0, 4, 0], sizes = [2, 16, 16], strides = [1, 1, 1]} : vector<2x22x16xf32> to vector<2x16x16xf32>
    %134 = vector.broadcast %128 : f32 to vector<2x16x16xf32>
    %135 = arith.mulf %134, %133 : vector<2x16x16xf32>
    %136 = arith.addf %132, %135 : vector<2x16x16xf32>
    %c35 = arith.constant 35 : index
    %137 = memref.load %arg4[%c35] : memref<98xf32, #tpu.memory_space<smem>>
    %c84 = arith.constant 84 : index
    %138 = memref.load %arg4[%c84] : memref<98xf32, #tpu.memory_space<smem>>
    %139 = vector.extract_strided_slice %85 {offsets = [0, 5, 0], sizes = [2, 16, 16], strides = [1, 1, 1]} : vector<2x22x16xf32> to vector<2x16x16xf32>
    %140 = vector.broadcast %137 : f32 to vector<2x16x16xf32>
    %141 = arith.mulf %140, %139 : vector<2x16x16xf32>
    %142 = arith.addf %136, %141 : vector<2x16x16xf32>
    %143 = vector.extract_strided_slice %86 {offsets = [0, 5, 0], sizes = [2, 16, 16], strides = [1, 1, 1]} : vector<2x22x16xf32> to vector<2x16x16xf32>
    %144 = vector.broadcast %138 : f32 to vector<2x16x16xf32>
    %145 = arith.mulf %144, %143 : vector<2x16x16xf32>
    %146 = arith.addf %142, %145 : vector<2x16x16xf32>
    %c42 = arith.constant 42 : index
    %147 = memref.load %arg4[%c42] : memref<98xf32, #tpu.memory_space<smem>>
    %c91 = arith.constant 91 : index
    %148 = memref.load %arg4[%c91] : memref<98xf32, #tpu.memory_space<smem>>
    %149 = vector.extract_strided_slice %85 {offsets = [0, 6, 0], sizes = [2, 16, 16], strides = [1, 1, 1]} : vector<2x22x16xf32> to vector<2x16x16xf32>
    %150 = vector.broadcast %147 : f32 to vector<2x16x16xf32>
    %151 = arith.mulf %150, %149 : vector<2x16x16xf32>
    %152 = arith.addf %146, %151 : vector<2x16x16xf32>
    %153 = vector.extract_strided_slice %86 {offsets = [0, 6, 0], sizes = [2, 16, 16], strides = [1, 1, 1]} : vector<2x22x16xf32> to vector<2x16x16xf32>
    %154 = vector.broadcast %148 : f32 to vector<2x16x16xf32>
    %155 = arith.mulf %154, %153 : vector<2x16x16xf32>
    %156 = arith.addf %152, %155 : vector<2x16x16xf32>
    %157 = vector.extract_strided_slice %82 {offsets = [0, 0, 1], sizes = [2, 22, 16], strides = [1, 1, 1]} : vector<2x22x22xf32> to vector<2x22x16xf32>
    %158 = vector.extract_strided_slice %83 {offsets = [0, 0, 1], sizes = [2, 22, 16], strides = [1, 1, 1]} : vector<2x22x22xf32> to vector<2x22x16xf32>
    %c1_38 = arith.constant 1 : index
    %159 = memref.load %arg4[%c1_38] : memref<98xf32, #tpu.memory_space<smem>>
    %c50 = arith.constant 50 : index
    %160 = memref.load %arg4[%c50] : memref<98xf32, #tpu.memory_space<smem>>
    %161 = vector.extract_strided_slice %157 {offsets = [0, 0, 0], sizes = [2, 16, 16], strides = [1, 1, 1]} : vector<2x22x16xf32> to vector<2x16x16xf32>
    %162 = vector.broadcast %159 : f32 to vector<2x16x16xf32>
    %163 = arith.mulf %162, %161 : vector<2x16x16xf32>
    %164 = arith.addf %156, %163 : vector<2x16x16xf32>
    %165 = vector.extract_strided_slice %158 {offsets = [0, 0, 0], sizes = [2, 16, 16], strides = [1, 1, 1]} : vector<2x22x16xf32> to vector<2x16x16xf32>
    %166 = vector.broadcast %160 : f32 to vector<2x16x16xf32>
    %167 = arith.mulf %166, %165 : vector<2x16x16xf32>
    %168 = arith.addf %164, %167 : vector<2x16x16xf32>
    %c8 = arith.constant 8 : index
    %169 = memref.load %arg4[%c8] : memref<98xf32, #tpu.memory_space<smem>>
    %c57 = arith.constant 57 : index
    %170 = memref.load %arg4[%c57] : memref<98xf32, #tpu.memory_space<smem>>
    %171 = vector.extract_strided_slice %157 {offsets = [0, 1, 0], sizes = [2, 16, 16], strides = [1, 1, 1]} : vector<2x22x16xf32> to vector<2x16x16xf32>
    %172 = vector.broadcast %169 : f32 to vector<2x16x16xf32>
    %173 = arith.mulf %172, %171 : vector<2x16x16xf32>
    %174 = arith.addf %168, %173 : vector<2x16x16xf32>
    %175 = vector.extract_strided_slice %158 {offsets = [0, 1, 0], sizes = [2, 16, 16], strides = [1, 1, 1]} : vector<2x22x16xf32> to vector<2x16x16xf32>
    %176 = vector.broadcast %170 : f32 to vector<2x16x16xf32>
    %177 = arith.mulf %176, %175 : vector<2x16x16xf32>
    %178 = arith.addf %174, %177 : vector<2x16x16xf32>
    %c15 = arith.constant 15 : index
    %179 = memref.load %arg4[%c15] : memref<98xf32, #tpu.memory_space<smem>>
    %c64 = arith.constant 64 : index
    %180 = memref.load %arg4[%c64] : memref<98xf32, #tpu.memory_space<smem>>
    %181 = vector.extract_strided_slice %157 {offsets = [0, 2, 0], sizes = [2, 16, 16], strides = [1, 1, 1]} : vector<2x22x16xf32> to vector<2x16x16xf32>
    %182 = vector.broadcast %179 : f32 to vector<2x16x16xf32>
    %183 = arith.mulf %182, %181 : vector<2x16x16xf32>
    %184 = arith.addf %178, %183 : vector<2x16x16xf32>
    %185 = vector.extract_strided_slice %158 {offsets = [0, 2, 0], sizes = [2, 16, 16], strides = [1, 1, 1]} : vector<2x22x16xf32> to vector<2x16x16xf32>
    %186 = vector.broadcast %180 : f32 to vector<2x16x16xf32>
    %187 = arith.mulf %186, %185 : vector<2x16x16xf32>
    %188 = arith.addf %184, %187 : vector<2x16x16xf32>
    %c22 = arith.constant 22 : index
    %189 = memref.load %arg4[%c22] : memref<98xf32, #tpu.memory_space<smem>>
    %c71 = arith.constant 71 : index
    %190 = memref.load %arg4[%c71] : memref<98xf32, #tpu.memory_space<smem>>
    %191 = vector.extract_strided_slice %157 {offsets = [0, 3, 0], sizes = [2, 16, 16], strides = [1, 1, 1]} : vector<2x22x16xf32> to vector<2x16x16xf32>
    %192 = vector.broadcast %189 : f32 to vector<2x16x16xf32>
    %193 = arith.mulf %192, %191 : vector<2x16x16xf32>
    %194 = arith.addf %188, %193 : vector<2x16x16xf32>
    %195 = vector.extract_strided_slice %158 {offsets = [0, 3, 0], sizes = [2, 16, 16], strides = [1, 1, 1]} : vector<2x22x16xf32> to vector<2x16x16xf32>
    %196 = vector.broadcast %190 : f32 to vector<2x16x16xf32>
    %197 = arith.mulf %196, %195 : vector<2x16x16xf32>
    %198 = arith.addf %194, %197 : vector<2x16x16xf32>
    %c29 = arith.constant 29 : index
    %199 = memref.load %arg4[%c29] : memref<98xf32, #tpu.memory_space<smem>>
    %c78 = arith.constant 78 : index
    %200 = memref.load %arg4[%c78] : memref<98xf32, #tpu.memory_space<smem>>
    %201 = vector.extract_strided_slice %157 {offsets = [0, 4, 0], sizes = [2, 16, 16], strides = [1, 1, 1]} : vector<2x22x16xf32> to vector<2x16x16xf32>
    %202 = vector.broadcast %199 : f32 to vector<2x16x16xf32>
    %203 = arith.mulf %202, %201 : vector<2x16x16xf32>
    %204 = arith.addf %198, %203 : vector<2x16x16xf32>
    %205 = vector.extract_strided_slice %158 {offsets = [0, 4, 0], sizes = [2, 16, 16], strides = [1, 1, 1]} : vector<2x22x16xf32> to vector<2x16x16xf32>
    %206 = vector.broadcast %200 : f32 to vector<2x16x16xf32>
    %207 = arith.mulf %206, %205 : vector<2x16x16xf32>
    %208 = arith.addf %204, %207 : vector<2x16x16xf32>
    %c36 = arith.constant 36 : index
    %209 = memref.load %arg4[%c36] : memref<98xf32, #tpu.memory_space<smem>>
    %c85 = arith.constant 85 : index
    %210 = memref.load %arg4[%c85] : memref<98xf32, #tpu.memory_space<smem>>
    %211 = vector.extract_strided_slice %157 {offsets = [0, 5, 0], sizes = [2, 16, 16], strides = [1, 1, 1]} : vector<2x22x16xf32> to vector<2x16x16xf32>
    %212 = vector.broadcast %209 : f32 to vector<2x16x16xf32>
    %213 = arith.mulf %212, %211 : vector<2x16x16xf32>
    %214 = arith.addf %208, %213 : vector<2x16x16xf32>
    %215 = vector.extract_strided_slice %158 {offsets = [0, 5, 0], sizes = [2, 16, 16], strides = [1, 1, 1]} : vector<2x22x16xf32> to vector<2x16x16xf32>
    %216 = vector.broadcast %210 : f32 to vector<2x16x16xf32>
    %217 = arith.mulf %216, %215 : vector<2x16x16xf32>
    %218 = arith.addf %214, %217 : vector<2x16x16xf32>
    %c43 = arith.constant 43 : index
    %219 = memref.load %arg4[%c43] : memref<98xf32, #tpu.memory_space<smem>>
    %c92 = arith.constant 92 : index
    %220 = memref.load %arg4[%c92] : memref<98xf32, #tpu.memory_space<smem>>
    %221 = vector.extract_strided_slice %157 {offsets = [0, 6, 0], sizes = [2, 16, 16], strides = [1, 1, 1]} : vector<2x22x16xf32> to vector<2x16x16xf32>
    %222 = vector.broadcast %219 : f32 to vector<2x16x16xf32>
    %223 = arith.mulf %222, %221 : vector<2x16x16xf32>
    %224 = arith.addf %218, %223 : vector<2x16x16xf32>
    %225 = vector.extract_strided_slice %158 {offsets = [0, 6, 0], sizes = [2, 16, 16], strides = [1, 1, 1]} : vector<2x22x16xf32> to vector<2x16x16xf32>
    %226 = vector.broadcast %220 : f32 to vector<2x16x16xf32>
    %227 = arith.mulf %226, %225 : vector<2x16x16xf32>
    %228 = arith.addf %224, %227 : vector<2x16x16xf32>
    %229 = vector.extract_strided_slice %82 {offsets = [0, 0, 2], sizes = [2, 22, 16], strides = [1, 1, 1]} : vector<2x22x22xf32> to vector<2x22x16xf32>
    %230 = vector.extract_strided_slice %83 {offsets = [0, 0, 2], sizes = [2, 22, 16], strides = [1, 1, 1]} : vector<2x22x22xf32> to vector<2x22x16xf32>
    %c2_39 = arith.constant 2 : index
    %231 = memref.load %arg4[%c2_39] : memref<98xf32, #tpu.memory_space<smem>>
    %c51 = arith.constant 51 : index
    %232 = memref.load %arg4[%c51] : memref<98xf32, #tpu.memory_space<smem>>
    %233 = vector.extract_strided_slice %229 {offsets = [0, 0, 0], sizes = [2, 16, 16], strides = [1, 1, 1]} : vector<2x22x16xf32> to vector<2x16x16xf32>
    %234 = vector.broadcast %231 : f32 to vector<2x16x16xf32>
    %235 = arith.mulf %234, %233 : vector<2x16x16xf32>
    %236 = arith.addf %228, %235 : vector<2x16x16xf32>
    %237 = vector.extract_strided_slice %230 {offsets = [0, 0, 0], sizes = [2, 16, 16], strides = [1, 1, 1]} : vector<2x22x16xf32> to vector<2x16x16xf32>
    %238 = vector.broadcast %232 : f32 to vector<2x16x16xf32>
    %239 = arith.mulf %238, %237 : vector<2x16x16xf32>
    %240 = arith.addf %236, %239 : vector<2x16x16xf32>
    %c9 = arith.constant 9 : index
    %241 = memref.load %arg4[%c9] : memref<98xf32, #tpu.memory_space<smem>>
    %c58 = arith.constant 58 : index
    %242 = memref.load %arg4[%c58] : memref<98xf32, #tpu.memory_space<smem>>
    %243 = vector.extract_strided_slice %229 {offsets = [0, 1, 0], sizes = [2, 16, 16], strides = [1, 1, 1]} : vector<2x22x16xf32> to vector<2x16x16xf32>
    %244 = vector.broadcast %241 : f32 to vector<2x16x16xf32>
    %245 = arith.mulf %244, %243 : vector<2x16x16xf32>
    %246 = arith.addf %240, %245 : vector<2x16x16xf32>
    %247 = vector.extract_strided_slice %230 {offsets = [0, 1, 0], sizes = [2, 16, 16], strides = [1, 1, 1]} : vector<2x22x16xf32> to vector<2x16x16xf32>
    %248 = vector.broadcast %242 : f32 to vector<2x16x16xf32>
    %249 = arith.mulf %248, %247 : vector<2x16x16xf32>
    %250 = arith.addf %246, %249 : vector<2x16x16xf32>
    %c16 = arith.constant 16 : index
    %251 = memref.load %arg4[%c16] : memref<98xf32, #tpu.memory_space<smem>>
    %c65 = arith.constant 65 : index
    %252 = memref.load %arg4[%c65] : memref<98xf32, #tpu.memory_space<smem>>
    %253 = vector.extract_strided_slice %229 {offsets = [0, 2, 0], sizes = [2, 16, 16], strides = [1, 1, 1]} : vector<2x22x16xf32> to vector<2x16x16xf32>
    %254 = vector.broadcast %251 : f32 to vector<2x16x16xf32>
    %255 = arith.mulf %254, %253 : vector<2x16x16xf32>
    %256 = arith.addf %250, %255 : vector<2x16x16xf32>
    %257 = vector.extract_strided_slice %230 {offsets = [0, 2, 0], sizes = [2, 16, 16], strides = [1, 1, 1]} : vector<2x22x16xf32> to vector<2x16x16xf32>
    %258 = vector.broadcast %252 : f32 to vector<2x16x16xf32>
    %259 = arith.mulf %258, %257 : vector<2x16x16xf32>
    %260 = arith.addf %256, %259 : vector<2x16x16xf32>
    %c23 = arith.constant 23 : index
    %261 = memref.load %arg4[%c23] : memref<98xf32, #tpu.memory_space<smem>>
    %c72 = arith.constant 72 : index
    %262 = memref.load %arg4[%c72] : memref<98xf32, #tpu.memory_space<smem>>
    %263 = vector.extract_strided_slice %229 {offsets = [0, 3, 0], sizes = [2, 16, 16], strides = [1, 1, 1]} : vector<2x22x16xf32> to vector<2x16x16xf32>
    %264 = vector.broadcast %261 : f32 to vector<2x16x16xf32>
    %265 = arith.mulf %264, %263 : vector<2x16x16xf32>
    %266 = arith.addf %260, %265 : vector<2x16x16xf32>
    %267 = vector.extract_strided_slice %230 {offsets = [0, 3, 0], sizes = [2, 16, 16], strides = [1, 1, 1]} : vector<2x22x16xf32> to vector<2x16x16xf32>
    %268 = vector.broadcast %262 : f32 to vector<2x16x16xf32>
    %269 = arith.mulf %268, %267 : vector<2x16x16xf32>
    %270 = arith.addf %266, %269 : vector<2x16x16xf32>
    %c30 = arith.constant 30 : index
    %271 = memref.load %arg4[%c30] : memref<98xf32, #tpu.memory_space<smem>>
    %c79 = arith.constant 79 : index
    %272 = memref.load %arg4[%c79] : memref<98xf32, #tpu.memory_space<smem>>
    %273 = vector.extract_strided_slice %229 {offsets = [0, 4, 0], sizes = [2, 16, 16], strides = [1, 1, 1]} : vector<2x22x16xf32> to vector<2x16x16xf32>
    %274 = vector.broadcast %271 : f32 to vector<2x16x16xf32>
    %275 = arith.mulf %274, %273 : vector<2x16x16xf32>
    %276 = arith.addf %270, %275 : vector<2x16x16xf32>
    %277 = vector.extract_strided_slice %230 {offsets = [0, 4, 0], sizes = [2, 16, 16], strides = [1, 1, 1]} : vector<2x22x16xf32> to vector<2x16x16xf32>
    %278 = vector.broadcast %272 : f32 to vector<2x16x16xf32>
    %279 = arith.mulf %278, %277 : vector<2x16x16xf32>
    %280 = arith.addf %276, %279 : vector<2x16x16xf32>
    %c37 = arith.constant 37 : index
    %281 = memref.load %arg4[%c37] : memref<98xf32, #tpu.memory_space<smem>>
    %c86 = arith.constant 86 : index
    %282 = memref.load %arg4[%c86] : memref<98xf32, #tpu.memory_space<smem>>
    %283 = vector.extract_strided_slice %229 {offsets = [0, 5, 0], sizes = [2, 16, 16], strides = [1, 1, 1]} : vector<2x22x16xf32> to vector<2x16x16xf32>
    %284 = vector.broadcast %281 : f32 to vector<2x16x16xf32>
    %285 = arith.mulf %284, %283 : vector<2x16x16xf32>
    %286 = arith.addf %280, %285 : vector<2x16x16xf32>
    %287 = vector.extract_strided_slice %230 {offsets = [0, 5, 0], sizes = [2, 16, 16], strides = [1, 1, 1]} : vector<2x22x16xf32> to vector<2x16x16xf32>
    %288 = vector.broadcast %282 : f32 to vector<2x16x16xf32>
    %289 = arith.mulf %288, %287 : vector<2x16x16xf32>
    %290 = arith.addf %286, %289 : vector<2x16x16xf32>
    %c44 = arith.constant 44 : index
    %291 = memref.load %arg4[%c44] : memref<98xf32, #tpu.memory_space<smem>>
    %c93 = arith.constant 93 : index
    %292 = memref.load %arg4[%c93] : memref<98xf32, #tpu.memory_space<smem>>
    %293 = vector.extract_strided_slice %229 {offsets = [0, 6, 0], sizes = [2, 16, 16], strides = [1, 1, 1]} : vector<2x22x16xf32> to vector<2x16x16xf32>
    %294 = vector.broadcast %291 : f32 to vector<2x16x16xf32>
    %295 = arith.mulf %294, %293 : vector<2x16x16xf32>
    %296 = arith.addf %290, %295 : vector<2x16x16xf32>
    %297 = vector.extract_strided_slice %230 {offsets = [0, 6, 0], sizes = [2, 16, 16], strides = [1, 1, 1]} : vector<2x22x16xf32> to vector<2x16x16xf32>
    %298 = vector.broadcast %292 : f32 to vector<2x16x16xf32>
    %299 = arith.mulf %298, %297 : vector<2x16x16xf32>
    %300 = arith.addf %296, %299 : vector<2x16x16xf32>
    %301 = vector.extract_strided_slice %82 {offsets = [0, 0, 3], sizes = [2, 22, 16], strides = [1, 1, 1]} : vector<2x22x22xf32> to vector<2x22x16xf32>
    %302 = vector.extract_strided_slice %83 {offsets = [0, 0, 3], sizes = [2, 22, 16], strides = [1, 1, 1]} : vector<2x22x22xf32> to vector<2x22x16xf32>
    %c3_40 = arith.constant 3 : index
    %303 = memref.load %arg4[%c3_40] : memref<98xf32, #tpu.memory_space<smem>>
    %c52 = arith.constant 52 : index
    %304 = memref.load %arg4[%c52] : memref<98xf32, #tpu.memory_space<smem>>
    %305 = vector.extract_strided_slice %301 {offsets = [0, 0, 0], sizes = [2, 16, 16], strides = [1, 1, 1]} : vector<2x22x16xf32> to vector<2x16x16xf32>
    %306 = vector.broadcast %303 : f32 to vector<2x16x16xf32>
    %307 = arith.mulf %306, %305 : vector<2x16x16xf32>
    %308 = arith.addf %300, %307 : vector<2x16x16xf32>
    %309 = vector.extract_strided_slice %302 {offsets = [0, 0, 0], sizes = [2, 16, 16], strides = [1, 1, 1]} : vector<2x22x16xf32> to vector<2x16x16xf32>
    %310 = vector.broadcast %304 : f32 to vector<2x16x16xf32>
    %311 = arith.mulf %310, %309 : vector<2x16x16xf32>
    %312 = arith.addf %308, %311 : vector<2x16x16xf32>
    %c10 = arith.constant 10 : index
    %313 = memref.load %arg4[%c10] : memref<98xf32, #tpu.memory_space<smem>>
    %c59 = arith.constant 59 : index
    %314 = memref.load %arg4[%c59] : memref<98xf32, #tpu.memory_space<smem>>
    %315 = vector.extract_strided_slice %301 {offsets = [0, 1, 0], sizes = [2, 16, 16], strides = [1, 1, 1]} : vector<2x22x16xf32> to vector<2x16x16xf32>
    %316 = vector.broadcast %313 : f32 to vector<2x16x16xf32>
    %317 = arith.mulf %316, %315 : vector<2x16x16xf32>
    %318 = arith.addf %312, %317 : vector<2x16x16xf32>
    %319 = vector.extract_strided_slice %302 {offsets = [0, 1, 0], sizes = [2, 16, 16], strides = [1, 1, 1]} : vector<2x22x16xf32> to vector<2x16x16xf32>
    %320 = vector.broadcast %314 : f32 to vector<2x16x16xf32>
    %321 = arith.mulf %320, %319 : vector<2x16x16xf32>
    %322 = arith.addf %318, %321 : vector<2x16x16xf32>
    %c17 = arith.constant 17 : index
    %323 = memref.load %arg4[%c17] : memref<98xf32, #tpu.memory_space<smem>>
    %c66 = arith.constant 66 : index
    %324 = memref.load %arg4[%c66] : memref<98xf32, #tpu.memory_space<smem>>
    %325 = vector.extract_strided_slice %301 {offsets = [0, 2, 0], sizes = [2, 16, 16], strides = [1, 1, 1]} : vector<2x22x16xf32> to vector<2x16x16xf32>
    %326 = vector.broadcast %323 : f32 to vector<2x16x16xf32>
    %327 = arith.mulf %326, %325 : vector<2x16x16xf32>
    %328 = arith.addf %322, %327 : vector<2x16x16xf32>
    %329 = vector.extract_strided_slice %302 {offsets = [0, 2, 0], sizes = [2, 16, 16], strides = [1, 1, 1]} : vector<2x22x16xf32> to vector<2x16x16xf32>
    %330 = vector.broadcast %324 : f32 to vector<2x16x16xf32>
    %331 = arith.mulf %330, %329 : vector<2x16x16xf32>
    %332 = arith.addf %328, %331 : vector<2x16x16xf32>
    %c24 = arith.constant 24 : index
    %333 = memref.load %arg4[%c24] : memref<98xf32, #tpu.memory_space<smem>>
    %c73 = arith.constant 73 : index
    %334 = memref.load %arg4[%c73] : memref<98xf32, #tpu.memory_space<smem>>
    %335 = vector.extract_strided_slice %301 {offsets = [0, 3, 0], sizes = [2, 16, 16], strides = [1, 1, 1]} : vector<2x22x16xf32> to vector<2x16x16xf32>
    %336 = vector.broadcast %333 : f32 to vector<2x16x16xf32>
    %337 = arith.mulf %336, %335 : vector<2x16x16xf32>
    %338 = arith.addf %332, %337 : vector<2x16x16xf32>
    %339 = vector.extract_strided_slice %302 {offsets = [0, 3, 0], sizes = [2, 16, 16], strides = [1, 1, 1]} : vector<2x22x16xf32> to vector<2x16x16xf32>
    %340 = vector.broadcast %334 : f32 to vector<2x16x16xf32>
    %341 = arith.mulf %340, %339 : vector<2x16x16xf32>
    %342 = arith.addf %338, %341 : vector<2x16x16xf32>
    %c31 = arith.constant 31 : index
    %343 = memref.load %arg4[%c31] : memref<98xf32, #tpu.memory_space<smem>>
    %c80 = arith.constant 80 : index
    %344 = memref.load %arg4[%c80] : memref<98xf32, #tpu.memory_space<smem>>
    %345 = vector.extract_strided_slice %301 {offsets = [0, 4, 0], sizes = [2, 16, 16], strides = [1, 1, 1]} : vector<2x22x16xf32> to vector<2x16x16xf32>
    %346 = vector.broadcast %343 : f32 to vector<2x16x16xf32>
    %347 = arith.mulf %346, %345 : vector<2x16x16xf32>
    %348 = arith.addf %342, %347 : vector<2x16x16xf32>
    %349 = vector.extract_strided_slice %302 {offsets = [0, 4, 0], sizes = [2, 16, 16], strides = [1, 1, 1]} : vector<2x22x16xf32> to vector<2x16x16xf32>
    %350 = vector.broadcast %344 : f32 to vector<2x16x16xf32>
    %351 = arith.mulf %350, %349 : vector<2x16x16xf32>
    %352 = arith.addf %348, %351 : vector<2x16x16xf32>
    %c38 = arith.constant 38 : index
    %353 = memref.load %arg4[%c38] : memref<98xf32, #tpu.memory_space<smem>>
    %c87 = arith.constant 87 : index
    %354 = memref.load %arg4[%c87] : memref<98xf32, #tpu.memory_space<smem>>
    %355 = vector.extract_strided_slice %301 {offsets = [0, 5, 0], sizes = [2, 16, 16], strides = [1, 1, 1]} : vector<2x22x16xf32> to vector<2x16x16xf32>
    %356 = vector.broadcast %353 : f32 to vector<2x16x16xf32>
    %357 = arith.mulf %356, %355 : vector<2x16x16xf32>
    %358 = arith.addf %352, %357 : vector<2x16x16xf32>
    %359 = vector.extract_strided_slice %302 {offsets = [0, 5, 0], sizes = [2, 16, 16], strides = [1, 1, 1]} : vector<2x22x16xf32> to vector<2x16x16xf32>
    %360 = vector.broadcast %354 : f32 to vector<2x16x16xf32>
    %361 = arith.mulf %360, %359 : vector<2x16x16xf32>
    %362 = arith.addf %358, %361 : vector<2x16x16xf32>
    %c45 = arith.constant 45 : index
    %363 = memref.load %arg4[%c45] : memref<98xf32, #tpu.memory_space<smem>>
    %c94 = arith.constant 94 : index
    %364 = memref.load %arg4[%c94] : memref<98xf32, #tpu.memory_space<smem>>
    %365 = vector.extract_strided_slice %301 {offsets = [0, 6, 0], sizes = [2, 16, 16], strides = [1, 1, 1]} : vector<2x22x16xf32> to vector<2x16x16xf32>
    %366 = vector.broadcast %363 : f32 to vector<2x16x16xf32>
    %367 = arith.mulf %366, %365 : vector<2x16x16xf32>
    %368 = arith.addf %362, %367 : vector<2x16x16xf32>
    %369 = vector.extract_strided_slice %302 {offsets = [0, 6, 0], sizes = [2, 16, 16], strides = [1, 1, 1]} : vector<2x22x16xf32> to vector<2x16x16xf32>
    %370 = vector.broadcast %364 : f32 to vector<2x16x16xf32>
    %371 = arith.mulf %370, %369 : vector<2x16x16xf32>
    %372 = arith.addf %368, %371 : vector<2x16x16xf32>
    %373 = vector.extract_strided_slice %82 {offsets = [0, 0, 4], sizes = [2, 22, 16], strides = [1, 1, 1]} : vector<2x22x22xf32> to vector<2x22x16xf32>
    %374 = vector.extract_strided_slice %83 {offsets = [0, 0, 4], sizes = [2, 22, 16], strides = [1, 1, 1]} : vector<2x22x22xf32> to vector<2x22x16xf32>
    %c4 = arith.constant 4 : index
    %375 = memref.load %arg4[%c4] : memref<98xf32, #tpu.memory_space<smem>>
    %c53 = arith.constant 53 : index
    %376 = memref.load %arg4[%c53] : memref<98xf32, #tpu.memory_space<smem>>
    %377 = vector.extract_strided_slice %373 {offsets = [0, 0, 0], sizes = [2, 16, 16], strides = [1, 1, 1]} : vector<2x22x16xf32> to vector<2x16x16xf32>
    %378 = vector.broadcast %375 : f32 to vector<2x16x16xf32>
    %379 = arith.mulf %378, %377 : vector<2x16x16xf32>
    %380 = arith.addf %372, %379 : vector<2x16x16xf32>
    %381 = vector.extract_strided_slice %374 {offsets = [0, 0, 0], sizes = [2, 16, 16], strides = [1, 1, 1]} : vector<2x22x16xf32> to vector<2x16x16xf32>
    %382 = vector.broadcast %376 : f32 to vector<2x16x16xf32>
    %383 = arith.mulf %382, %381 : vector<2x16x16xf32>
    %384 = arith.addf %380, %383 : vector<2x16x16xf32>
    %c11 = arith.constant 11 : index
    %385 = memref.load %arg4[%c11] : memref<98xf32, #tpu.memory_space<smem>>
    %c60 = arith.constant 60 : index
    %386 = memref.load %arg4[%c60] : memref<98xf32, #tpu.memory_space<smem>>
    %387 = vector.extract_strided_slice %373 {offsets = [0, 1, 0], sizes = [2, 16, 16], strides = [1, 1, 1]} : vector<2x22x16xf32> to vector<2x16x16xf32>
    %388 = vector.broadcast %385 : f32 to vector<2x16x16xf32>
    %389 = arith.mulf %388, %387 : vector<2x16x16xf32>
    %390 = arith.addf %384, %389 : vector<2x16x16xf32>
    %391 = vector.extract_strided_slice %374 {offsets = [0, 1, 0], sizes = [2, 16, 16], strides = [1, 1, 1]} : vector<2x22x16xf32> to vector<2x16x16xf32>
    %392 = vector.broadcast %386 : f32 to vector<2x16x16xf32>
    %393 = arith.mulf %392, %391 : vector<2x16x16xf32>
    %394 = arith.addf %390, %393 : vector<2x16x16xf32>
    %c18 = arith.constant 18 : index
    %395 = memref.load %arg4[%c18] : memref<98xf32, #tpu.memory_space<smem>>
    %c67 = arith.constant 67 : index
    %396 = memref.load %arg4[%c67] : memref<98xf32, #tpu.memory_space<smem>>
    %397 = vector.extract_strided_slice %373 {offsets = [0, 2, 0], sizes = [2, 16, 16], strides = [1, 1, 1]} : vector<2x22x16xf32> to vector<2x16x16xf32>
    %398 = vector.broadcast %395 : f32 to vector<2x16x16xf32>
    %399 = arith.mulf %398, %397 : vector<2x16x16xf32>
    %400 = arith.addf %394, %399 : vector<2x16x16xf32>
    %401 = vector.extract_strided_slice %374 {offsets = [0, 2, 0], sizes = [2, 16, 16], strides = [1, 1, 1]} : vector<2x22x16xf32> to vector<2x16x16xf32>
    %402 = vector.broadcast %396 : f32 to vector<2x16x16xf32>
    %403 = arith.mulf %402, %401 : vector<2x16x16xf32>
    %404 = arith.addf %400, %403 : vector<2x16x16xf32>
    %c25 = arith.constant 25 : index
    %405 = memref.load %arg4[%c25] : memref<98xf32, #tpu.memory_space<smem>>
    %c74 = arith.constant 74 : index
    %406 = memref.load %arg4[%c74] : memref<98xf32, #tpu.memory_space<smem>>
    %407 = vector.extract_strided_slice %373 {offsets = [0, 3, 0], sizes = [2, 16, 16], strides = [1, 1, 1]} : vector<2x22x16xf32> to vector<2x16x16xf32>
    %408 = vector.broadcast %405 : f32 to vector<2x16x16xf32>
    %409 = arith.mulf %408, %407 : vector<2x16x16xf32>
    %410 = arith.addf %404, %409 : vector<2x16x16xf32>
    %411 = vector.extract_strided_slice %374 {offsets = [0, 3, 0], sizes = [2, 16, 16], strides = [1, 1, 1]} : vector<2x22x16xf32> to vector<2x16x16xf32>
    %412 = vector.broadcast %406 : f32 to vector<2x16x16xf32>
    %413 = arith.mulf %412, %411 : vector<2x16x16xf32>
    %414 = arith.addf %410, %413 : vector<2x16x16xf32>
    %c32 = arith.constant 32 : index
    %415 = memref.load %arg4[%c32] : memref<98xf32, #tpu.memory_space<smem>>
    %c81 = arith.constant 81 : index
    %416 = memref.load %arg4[%c81] : memref<98xf32, #tpu.memory_space<smem>>
    %417 = vector.extract_strided_slice %373 {offsets = [0, 4, 0], sizes = [2, 16, 16], strides = [1, 1, 1]} : vector<2x22x16xf32> to vector<2x16x16xf32>
    %418 = vector.broadcast %415 : f32 to vector<2x16x16xf32>
    %419 = arith.mulf %418, %417 : vector<2x16x16xf32>
    %420 = arith.addf %414, %419 : vector<2x16x16xf32>
    %421 = vector.extract_strided_slice %374 {offsets = [0, 4, 0], sizes = [2, 16, 16], strides = [1, 1, 1]} : vector<2x22x16xf32> to vector<2x16x16xf32>
    %422 = vector.broadcast %416 : f32 to vector<2x16x16xf32>
    %423 = arith.mulf %422, %421 : vector<2x16x16xf32>
    %424 = arith.addf %420, %423 : vector<2x16x16xf32>
    %c39 = arith.constant 39 : index
    %425 = memref.load %arg4[%c39] : memref<98xf32, #tpu.memory_space<smem>>
    %c88 = arith.constant 88 : index
    %426 = memref.load %arg4[%c88] : memref<98xf32, #tpu.memory_space<smem>>
    %427 = vector.extract_strided_slice %373 {offsets = [0, 5, 0], sizes = [2, 16, 16], strides = [1, 1, 1]} : vector<2x22x16xf32> to vector<2x16x16xf32>
    %428 = vector.broadcast %425 : f32 to vector<2x16x16xf32>
    %429 = arith.mulf %428, %427 : vector<2x16x16xf32>
    %430 = arith.addf %424, %429 : vector<2x16x16xf32>
    %431 = vector.extract_strided_slice %374 {offsets = [0, 5, 0], sizes = [2, 16, 16], strides = [1, 1, 1]} : vector<2x22x16xf32> to vector<2x16x16xf32>
    %432 = vector.broadcast %426 : f32 to vector<2x16x16xf32>
    %433 = arith.mulf %432, %431 : vector<2x16x16xf32>
    %434 = arith.addf %430, %433 : vector<2x16x16xf32>
    %c46 = arith.constant 46 : index
    %435 = memref.load %arg4[%c46] : memref<98xf32, #tpu.memory_space<smem>>
    %c95 = arith.constant 95 : index
    %436 = memref.load %arg4[%c95] : memref<98xf32, #tpu.memory_space<smem>>
    %437 = vector.extract_strided_slice %373 {offsets = [0, 6, 0], sizes = [2, 16, 16], strides = [1, 1, 1]} : vector<2x22x16xf32> to vector<2x16x16xf32>
    %438 = vector.broadcast %435 : f32 to vector<2x16x16xf32>
    %439 = arith.mulf %438, %437 : vector<2x16x16xf32>
    %440 = arith.addf %434, %439 : vector<2x16x16xf32>
    %441 = vector.extract_strided_slice %374 {offsets = [0, 6, 0], sizes = [2, 16, 16], strides = [1, 1, 1]} : vector<2x22x16xf32> to vector<2x16x16xf32>
    %442 = vector.broadcast %436 : f32 to vector<2x16x16xf32>
    %443 = arith.mulf %442, %441 : vector<2x16x16xf32>
    %444 = arith.addf %440, %443 : vector<2x16x16xf32>
    %445 = vector.extract_strided_slice %82 {offsets = [0, 0, 5], sizes = [2, 22, 16], strides = [1, 1, 1]} : vector<2x22x22xf32> to vector<2x22x16xf32>
    %446 = vector.extract_strided_slice %83 {offsets = [0, 0, 5], sizes = [2, 22, 16], strides = [1, 1, 1]} : vector<2x22x22xf32> to vector<2x22x16xf32>
    %c5 = arith.constant 5 : index
    %447 = memref.load %arg4[%c5] : memref<98xf32, #tpu.memory_space<smem>>
    %c54 = arith.constant 54 : index
    %448 = memref.load %arg4[%c54] : memref<98xf32, #tpu.memory_space<smem>>
    %449 = vector.extract_strided_slice %445 {offsets = [0, 0, 0], sizes = [2, 16, 16], strides = [1, 1, 1]} : vector<2x22x16xf32> to vector<2x16x16xf32>
    %450 = vector.broadcast %447 : f32 to vector<2x16x16xf32>
    %451 = arith.mulf %450, %449 : vector<2x16x16xf32>
    %452 = arith.addf %444, %451 : vector<2x16x16xf32>
    %453 = vector.extract_strided_slice %446 {offsets = [0, 0, 0], sizes = [2, 16, 16], strides = [1, 1, 1]} : vector<2x22x16xf32> to vector<2x16x16xf32>
    %454 = vector.broadcast %448 : f32 to vector<2x16x16xf32>
    %455 = arith.mulf %454, %453 : vector<2x16x16xf32>
    %456 = arith.addf %452, %455 : vector<2x16x16xf32>
    %c12 = arith.constant 12 : index
    %457 = memref.load %arg4[%c12] : memref<98xf32, #tpu.memory_space<smem>>
    %c61 = arith.constant 61 : index
    %458 = memref.load %arg4[%c61] : memref<98xf32, #tpu.memory_space<smem>>
    %459 = vector.extract_strided_slice %445 {offsets = [0, 1, 0], sizes = [2, 16, 16], strides = [1, 1, 1]} : vector<2x22x16xf32> to vector<2x16x16xf32>
    %460 = vector.broadcast %457 : f32 to vector<2x16x16xf32>
    %461 = arith.mulf %460, %459 : vector<2x16x16xf32>
    %462 = arith.addf %456, %461 : vector<2x16x16xf32>
    %463 = vector.extract_strided_slice %446 {offsets = [0, 1, 0], sizes = [2, 16, 16], strides = [1, 1, 1]} : vector<2x22x16xf32> to vector<2x16x16xf32>
    %464 = vector.broadcast %458 : f32 to vector<2x16x16xf32>
    %465 = arith.mulf %464, %463 : vector<2x16x16xf32>
    %466 = arith.addf %462, %465 : vector<2x16x16xf32>
    %c19 = arith.constant 19 : index
    %467 = memref.load %arg4[%c19] : memref<98xf32, #tpu.memory_space<smem>>
    %c68 = arith.constant 68 : index
    %468 = memref.load %arg4[%c68] : memref<98xf32, #tpu.memory_space<smem>>
    %469 = vector.extract_strided_slice %445 {offsets = [0, 2, 0], sizes = [2, 16, 16], strides = [1, 1, 1]} : vector<2x22x16xf32> to vector<2x16x16xf32>
    %470 = vector.broadcast %467 : f32 to vector<2x16x16xf32>
    %471 = arith.mulf %470, %469 : vector<2x16x16xf32>
    %472 = arith.addf %466, %471 : vector<2x16x16xf32>
    %473 = vector.extract_strided_slice %446 {offsets = [0, 2, 0], sizes = [2, 16, 16], strides = [1, 1, 1]} : vector<2x22x16xf32> to vector<2x16x16xf32>
    %474 = vector.broadcast %468 : f32 to vector<2x16x16xf32>
    %475 = arith.mulf %474, %473 : vector<2x16x16xf32>
    %476 = arith.addf %472, %475 : vector<2x16x16xf32>
    %c26 = arith.constant 26 : index
    %477 = memref.load %arg4[%c26] : memref<98xf32, #tpu.memory_space<smem>>
    %c75 = arith.constant 75 : index
    %478 = memref.load %arg4[%c75] : memref<98xf32, #tpu.memory_space<smem>>
    %479 = vector.extract_strided_slice %445 {offsets = [0, 3, 0], sizes = [2, 16, 16], strides = [1, 1, 1]} : vector<2x22x16xf32> to vector<2x16x16xf32>
    %480 = vector.broadcast %477 : f32 to vector<2x16x16xf32>
    %481 = arith.mulf %480, %479 : vector<2x16x16xf32>
    %482 = arith.addf %476, %481 : vector<2x16x16xf32>
    %483 = vector.extract_strided_slice %446 {offsets = [0, 3, 0], sizes = [2, 16, 16], strides = [1, 1, 1]} : vector<2x22x16xf32> to vector<2x16x16xf32>
    %484 = vector.broadcast %478 : f32 to vector<2x16x16xf32>
    %485 = arith.mulf %484, %483 : vector<2x16x16xf32>
    %486 = arith.addf %482, %485 : vector<2x16x16xf32>
    %c33 = arith.constant 33 : index
    %487 = memref.load %arg4[%c33] : memref<98xf32, #tpu.memory_space<smem>>
    %c82 = arith.constant 82 : index
    %488 = memref.load %arg4[%c82] : memref<98xf32, #tpu.memory_space<smem>>
    %489 = vector.extract_strided_slice %445 {offsets = [0, 4, 0], sizes = [2, 16, 16], strides = [1, 1, 1]} : vector<2x22x16xf32> to vector<2x16x16xf32>
    %490 = vector.broadcast %487 : f32 to vector<2x16x16xf32>
    %491 = arith.mulf %490, %489 : vector<2x16x16xf32>
    %492 = arith.addf %486, %491 : vector<2x16x16xf32>
    %493 = vector.extract_strided_slice %446 {offsets = [0, 4, 0], sizes = [2, 16, 16], strides = [1, 1, 1]} : vector<2x22x16xf32> to vector<2x16x16xf32>
    %494 = vector.broadcast %488 : f32 to vector<2x16x16xf32>
    %495 = arith.mulf %494, %493 : vector<2x16x16xf32>
    %496 = arith.addf %492, %495 : vector<2x16x16xf32>
    %c40 = arith.constant 40 : index
    %497 = memref.load %arg4[%c40] : memref<98xf32, #tpu.memory_space<smem>>
    %c89 = arith.constant 89 : index
    %498 = memref.load %arg4[%c89] : memref<98xf32, #tpu.memory_space<smem>>
    %499 = vector.extract_strided_slice %445 {offsets = [0, 5, 0], sizes = [2, 16, 16], strides = [1, 1, 1]} : vector<2x22x16xf32> to vector<2x16x16xf32>
    %500 = vector.broadcast %497 : f32 to vector<2x16x16xf32>
    %501 = arith.mulf %500, %499 : vector<2x16x16xf32>
    %502 = arith.addf %496, %501 : vector<2x16x16xf32>
    %503 = vector.extract_strided_slice %446 {offsets = [0, 5, 0], sizes = [2, 16, 16], strides = [1, 1, 1]} : vector<2x22x16xf32> to vector<2x16x16xf32>
    %504 = vector.broadcast %498 : f32 to vector<2x16x16xf32>
    %505 = arith.mulf %504, %503 : vector<2x16x16xf32>
    %506 = arith.addf %502, %505 : vector<2x16x16xf32>
    %c47 = arith.constant 47 : index
    %507 = memref.load %arg4[%c47] : memref<98xf32, #tpu.memory_space<smem>>
    %c96 = arith.constant 96 : index
    %508 = memref.load %arg4[%c96] : memref<98xf32, #tpu.memory_space<smem>>
    %509 = vector.extract_strided_slice %445 {offsets = [0, 6, 0], sizes = [2, 16, 16], strides = [1, 1, 1]} : vector<2x22x16xf32> to vector<2x16x16xf32>
    %510 = vector.broadcast %507 : f32 to vector<2x16x16xf32>
    %511 = arith.mulf %510, %509 : vector<2x16x16xf32>
    %512 = arith.addf %506, %511 : vector<2x16x16xf32>
    %513 = vector.extract_strided_slice %446 {offsets = [0, 6, 0], sizes = [2, 16, 16], strides = [1, 1, 1]} : vector<2x22x16xf32> to vector<2x16x16xf32>
    %514 = vector.broadcast %508 : f32 to vector<2x16x16xf32>
    %515 = arith.mulf %514, %513 : vector<2x16x16xf32>
    %516 = arith.addf %512, %515 : vector<2x16x16xf32>
    %517 = vector.extract_strided_slice %82 {offsets = [0, 0, 6], sizes = [2, 22, 16], strides = [1, 1, 1]} : vector<2x22x22xf32> to vector<2x22x16xf32>
    %518 = vector.extract_strided_slice %83 {offsets = [0, 0, 6], sizes = [2, 22, 16], strides = [1, 1, 1]} : vector<2x22x22xf32> to vector<2x22x16xf32>
    %c6 = arith.constant 6 : index
    %519 = memref.load %arg4[%c6] : memref<98xf32, #tpu.memory_space<smem>>
    %c55 = arith.constant 55 : index
    %520 = memref.load %arg4[%c55] : memref<98xf32, #tpu.memory_space<smem>>
    %521 = vector.extract_strided_slice %517 {offsets = [0, 0, 0], sizes = [2, 16, 16], strides = [1, 1, 1]} : vector<2x22x16xf32> to vector<2x16x16xf32>
    %522 = vector.broadcast %519 : f32 to vector<2x16x16xf32>
    %523 = arith.mulf %522, %521 : vector<2x16x16xf32>
    %524 = arith.addf %516, %523 : vector<2x16x16xf32>
    %525 = vector.extract_strided_slice %518 {offsets = [0, 0, 0], sizes = [2, 16, 16], strides = [1, 1, 1]} : vector<2x22x16xf32> to vector<2x16x16xf32>
    %526 = vector.broadcast %520 : f32 to vector<2x16x16xf32>
    %527 = arith.mulf %526, %525 : vector<2x16x16xf32>
    %528 = arith.addf %524, %527 : vector<2x16x16xf32>
    %c13 = arith.constant 13 : index
    %529 = memref.load %arg4[%c13] : memref<98xf32, #tpu.memory_space<smem>>
    %c62 = arith.constant 62 : index
    %530 = memref.load %arg4[%c62] : memref<98xf32, #tpu.memory_space<smem>>
    %531 = vector.extract_strided_slice %517 {offsets = [0, 1, 0], sizes = [2, 16, 16], strides = [1, 1, 1]} : vector<2x22x16xf32> to vector<2x16x16xf32>
    %532 = vector.broadcast %529 : f32 to vector<2x16x16xf32>
    %533 = arith.mulf %532, %531 : vector<2x16x16xf32>
    %534 = arith.addf %528, %533 : vector<2x16x16xf32>
    %535 = vector.extract_strided_slice %518 {offsets = [0, 1, 0], sizes = [2, 16, 16], strides = [1, 1, 1]} : vector<2x22x16xf32> to vector<2x16x16xf32>
    %536 = vector.broadcast %530 : f32 to vector<2x16x16xf32>
    %537 = arith.mulf %536, %535 : vector<2x16x16xf32>
    %538 = arith.addf %534, %537 : vector<2x16x16xf32>
    %c20 = arith.constant 20 : index
    %539 = memref.load %arg4[%c20] : memref<98xf32, #tpu.memory_space<smem>>
    %c69 = arith.constant 69 : index
    %540 = memref.load %arg4[%c69] : memref<98xf32, #tpu.memory_space<smem>>
    %541 = vector.extract_strided_slice %517 {offsets = [0, 2, 0], sizes = [2, 16, 16], strides = [1, 1, 1]} : vector<2x22x16xf32> to vector<2x16x16xf32>
    %542 = vector.broadcast %539 : f32 to vector<2x16x16xf32>
    %543 = arith.mulf %542, %541 : vector<2x16x16xf32>
    %544 = arith.addf %538, %543 : vector<2x16x16xf32>
    %545 = vector.extract_strided_slice %518 {offsets = [0, 2, 0], sizes = [2, 16, 16], strides = [1, 1, 1]} : vector<2x22x16xf32> to vector<2x16x16xf32>
    %546 = vector.broadcast %540 : f32 to vector<2x16x16xf32>
    %547 = arith.mulf %546, %545 : vector<2x16x16xf32>
    %548 = arith.addf %544, %547 : vector<2x16x16xf32>
    %c27 = arith.constant 27 : index
    %549 = memref.load %arg4[%c27] : memref<98xf32, #tpu.memory_space<smem>>
    %c76 = arith.constant 76 : index
    %550 = memref.load %arg4[%c76] : memref<98xf32, #tpu.memory_space<smem>>
    %551 = vector.extract_strided_slice %517 {offsets = [0, 3, 0], sizes = [2, 16, 16], strides = [1, 1, 1]} : vector<2x22x16xf32> to vector<2x16x16xf32>
    %552 = vector.broadcast %549 : f32 to vector<2x16x16xf32>
    %553 = arith.mulf %552, %551 : vector<2x16x16xf32>
    %554 = arith.addf %548, %553 : vector<2x16x16xf32>
    %555 = vector.extract_strided_slice %518 {offsets = [0, 3, 0], sizes = [2, 16, 16], strides = [1, 1, 1]} : vector<2x22x16xf32> to vector<2x16x16xf32>
    %556 = vector.broadcast %550 : f32 to vector<2x16x16xf32>
    %557 = arith.mulf %556, %555 : vector<2x16x16xf32>
    %558 = arith.addf %554, %557 : vector<2x16x16xf32>
    %c34 = arith.constant 34 : index
    %559 = memref.load %arg4[%c34] : memref<98xf32, #tpu.memory_space<smem>>
    %c83 = arith.constant 83 : index
    %560 = memref.load %arg4[%c83] : memref<98xf32, #tpu.memory_space<smem>>
    %561 = vector.extract_strided_slice %517 {offsets = [0, 4, 0], sizes = [2, 16, 16], strides = [1, 1, 1]} : vector<2x22x16xf32> to vector<2x16x16xf32>
    %562 = vector.broadcast %559 : f32 to vector<2x16x16xf32>
    %563 = arith.mulf %562, %561 : vector<2x16x16xf32>
    %564 = arith.addf %558, %563 : vector<2x16x16xf32>
    %565 = vector.extract_strided_slice %518 {offsets = [0, 4, 0], sizes = [2, 16, 16], strides = [1, 1, 1]} : vector<2x22x16xf32> to vector<2x16x16xf32>
    %566 = vector.broadcast %560 : f32 to vector<2x16x16xf32>
    %567 = arith.mulf %566, %565 : vector<2x16x16xf32>
    %568 = arith.addf %564, %567 : vector<2x16x16xf32>
    %c41 = arith.constant 41 : index
    %569 = memref.load %arg4[%c41] : memref<98xf32, #tpu.memory_space<smem>>
    %c90 = arith.constant 90 : index
    %570 = memref.load %arg4[%c90] : memref<98xf32, #tpu.memory_space<smem>>
    %571 = vector.extract_strided_slice %517 {offsets = [0, 5, 0], sizes = [2, 16, 16], strides = [1, 1, 1]} : vector<2x22x16xf32> to vector<2x16x16xf32>
    %572 = vector.broadcast %569 : f32 to vector<2x16x16xf32>
    %573 = arith.mulf %572, %571 : vector<2x16x16xf32>
    %574 = arith.addf %568, %573 : vector<2x16x16xf32>
    %575 = vector.extract_strided_slice %518 {offsets = [0, 5, 0], sizes = [2, 16, 16], strides = [1, 1, 1]} : vector<2x22x16xf32> to vector<2x16x16xf32>
    %576 = vector.broadcast %570 : f32 to vector<2x16x16xf32>
    %577 = arith.mulf %576, %575 : vector<2x16x16xf32>
    %578 = arith.addf %574, %577 : vector<2x16x16xf32>
    %c48 = arith.constant 48 : index
    %579 = memref.load %arg4[%c48] : memref<98xf32, #tpu.memory_space<smem>>
    %c97 = arith.constant 97 : index
    %580 = memref.load %arg4[%c97] : memref<98xf32, #tpu.memory_space<smem>>
    %581 = vector.extract_strided_slice %517 {offsets = [0, 6, 0], sizes = [2, 16, 16], strides = [1, 1, 1]} : vector<2x22x16xf32> to vector<2x16x16xf32>
    %582 = vector.broadcast %579 : f32 to vector<2x16x16xf32>
    %583 = arith.mulf %582, %581 : vector<2x16x16xf32>
    %584 = arith.addf %578, %583 : vector<2x16x16xf32>
    %585 = vector.extract_strided_slice %518 {offsets = [0, 6, 0], sizes = [2, 16, 16], strides = [1, 1, 1]} : vector<2x22x16xf32> to vector<2x16x16xf32>
    %586 = vector.broadcast %580 : f32 to vector<2x16x16xf32>
    %587 = arith.mulf %586, %585 : vector<2x16x16xf32>
    %588 = arith.addf %584, %587 : vector<2x16x16xf32>
    %589 = arith.negf %588 : vector<2x16x16xf32>
    %590 = math.exp %589 : vector<2x16x16xf32>
    %cst_41 = arith.constant 1.000000e+00 : f32
    %591 = vector.broadcast %cst_41 : f32 to vector<2x16x16xf32>
    %592 = arith.addf %591, %590 : vector<2x16x16xf32>
    %593 = arith.divf %591, %592 : vector<2x16x16xf32>
    %594 = vector.shape_cast %593 : vector<2x16x16xf32> to vector<2x256xf32>
    %595 = arith.mulf %2, %35 : vector<2x256xf32>
    %596 = arith.mulf %595, %594 : vector<2x256xf32>
    %597 = arith.mulf %4, %45 : vector<2x256xf32>
    %598 = arith.mulf %597, %594 : vector<2x256xf32>
    %599 = arith.mulf %6, %55 : vector<2x256xf32>
    %600 = arith.mulf %599, %594 : vector<2x256xf32>
    %601 = arith.mulf %8, %65 : vector<2x256xf32>
    %602 = arith.mulf %601, %594 : vector<2x256xf32>
    %603 = vector.shape_cast %596 : vector<2x256xf32> to vector<2x1x256xf32>
    %604 = vector.shape_cast %598 : vector<2x256xf32> to vector<2x1x256xf32>
    %605 = vector.shape_cast %600 : vector<2x256xf32> to vector<2x1x256xf32>
    %606 = vector.shape_cast %602 : vector<2x256xf32> to vector<2x1x256xf32>
    %607 = tpu.concatenate %603, %604, %605, %606 in 1 : vector<2x1x256xf32>, vector<2x1x256xf32>, vector<2x1x256xf32>, vector<2x1x256xf32> -> vector<2x4x256xf32>
    %c0_42 = arith.constant 0 : index
    %c0_43 = arith.constant 0 : index
    %c0_44 = arith.constant 0 : index
    %608 = vector.load %arg5[%c0_42, %c0_43, %c0_44] : memref<2x4x256xf32, #tpu.memory_space<vmem>>, vector<2x4x256xf32>
    tpu.vector_store %arg5[%c0_42, %c0_43, %c0_44], %607 {strides = array<i32>} : memref<2x4x256xf32, #tpu.memory_space<vmem>>, vector<2x4x256xf32>,
    return
  }
  func.func @transform_0(%arg0: i32) -> (i32, i32, i32) {
    %c0_i32 = arith.constant 0 : i32
    %c0_i32_0 = arith.constant 0 : i32
    %c0_i32_1 = arith.constant 0 : i32
    return %arg0, %c0_i32, %c0_i32_0 : i32, i32, i32
  }
  func.func @transform_1(%arg0: i32) -> i32 {
    %c0_i32 = arith.constant 0 : i32
    %c0_i32_0 = arith.constant 0 : i32
    return %c0_i32 : i32
  }
  func.func @transform_2(%arg0: i32) -> i32 {
    %c0_i32 = arith.constant 0 : i32
    %c0_i32_0 = arith.constant 0 : i32
    return %c0_i32 : i32
  }
  func.func @transform_3(%arg0: i32) -> i32 {
    %c0_i32 = arith.constant 0 : i32
    %c0_i32_0 = arith.constant 0 : i32
    return %c0_i32 : i32
  }
  func.func @transform_4(%arg0: i32) -> (i32, i32, i32) {
    %c0_i32 = arith.constant 0 : i32
    %c0_i32_0 = arith.constant 0 : i32
    %c0_i32_1 = arith.constant 0 : i32
    return %arg0, %c0_i32, %c0_i32_0 : i32, i32, i32
  }
}

</mosaic_0001>

<bundles_post_ra>
// kernel: tpu_custom_call.1
= control target key start
LH: loop header
LB: loop body
LE: loop exit
PB: predicated region body
PF: predicated region fallthrough
CT: control target
= control target key end

     0   :  { %9 = vsyncpa [#allocation5], 0  ;;  %s8580_s0 = inlined_call_operand.hbm [shape: f32[2,4,256], index: 0, kind: input, shape index: {}]   ;;  %s8581_s1 = inlined_call_operand.hbm [shape: f32[4], index: 1, kind: input, shape index: {}]   ;;  %s8582_s2 = inlined_call_operand.vmem [shape: f32[4], index: 2, kind: input, shape index: {}]   ;;  %s8583_s3 = inlined_call_operand.vmem [shape: f32[98], index: 3, kind: input, shape index: {}]   ;;  %s8584_s4 = inlined_call_operand.hbm [shape: f32[2,4,256], index: 4, kind: output, shape index: {}]  }
   0x1   :  { %10 = vsyncpa [#allocation7], 0 }
   0x2   :  { %11 = vsyncpa [#allocation8], 0 }
   0x3   :  { %12 = vsyncpa [#allocation12], 0 }
   0x4   :  { %13 = vsyncpa [#allocation6], 0  ;;  %s18_s17 = sshll.u32 %s8580_s0, 4  ;;  %s5157_s18 = smov [#allocation4]   ;;  %s19_s17 = int_to_ptr.hbm [resolvable:$true] %s18_s17 }
   0x5   :  { %s20_s19 = sshll.u32 %s5157_s18, 4  ;;  %s32_s22 = sshll.u32 %s8581_s1, 4  ;;  %s21_s19 = int_to_ptr.vmem [resolvable:$true] %s20_s19  ;;  %s33_s22 = int_to_ptr.hbm [resolvable:$true] %s32_s22 }
   0x6   :  { %s5158_s23 = smov 128   ;;  %s5159_s24 = smov 8  }
   0x7   :  { %26 = dma.hbm_to_vmem [thread:$0]  %s19_s17, 256, %s21_s19, [#allocation5], %s5158_s23, %s5158_s23, %s5159_s24  }
   0x8   :  { %s5160_s25 = smov [#allocation9]   ;;  %s41_s0 = sshll.u32 %s8582_s2, 4  ;;  %s42_s0 = int_to_ptr.vmem [resolvable:$true] %s41_s0 }
   0x9   :  { %35 = dma.hbm_to_smem %s33_s22, 16, %s5160_s25, [#allocation7]  }
   0xa   :  { %s50_s30 = sshll.u32 %s8583_s3, 4  ;;  %s5161_s5 = smov [#allocation10]   ;;  %s51_s30 = int_to_ptr.vmem [resolvable:$true] %s50_s30 }
   0xb   :  { %44 = dma.vmem_to_smem %s42_s0, 16, %s5161_s5, [#allocation8]  }
   0xc   :  { %s5162_s1 = smov [#allocation11]  }
   0xd   :  { %53 = dma.vmem_to_smem %s51_s30, 16, %s5162_s1, [#allocation12]  }
   0xe   :  { %5147 = dma.done.wait [#allocation5], 256  }
   0xf   :  { %5148 = vsyncadd [#allocation5], 4294967040 }
  0x10   :  { %5149 = dma.done.wait [#allocation7], 16  }
  0x11   :  { %5150 = vsyncadd [#allocation7], 4294967280 }
  0x12   :  { %5151 = dma.done.wait [#allocation8], 16  }
  0x13   :  { %5152 = vsyncadd [#allocation8], 4294967280 }
  0x14   :  { %5153 = dma.done.wait [#allocation12], 16  }
  0x15   :  { %5154 = vsyncadd [#allocation12], 4294967280 }
  0x16   :  { %70 = sfence }
  0x17   :  { %v71_v0 = vld [vmem:[#allocation4] sm:$0xff]  ;;  %v72_v1 = vld [vmem:[#allocation4 + $0x8] sm:$0xff]  ;;  %s5163_s2 = smov 96   ;;  %s5164_s3 = smov 112   ;;  %vm392_vm0 = vcmask 1041409   ;;  %vm394_vm1 = vcmask 1045509  }
  0x18   :  { %v299_v2 = vrot.slane %v71_v0, 5  ;;  %v309_v3 = vrot.slane %v71_v0, 6  ;;  %v319_v4 = vrot.slane %v71_v0, 7  ;;  %v301_v5 = vrot.slane %v72_v1, 5  ;;  %s5165_s6 = smov 80   ;;  %s5166_s7 = smov 64  }
  0x19   :  { %v311_v9 = vrot.slane %v72_v1, 6  ;;  %v321_v15 = vrot.slane %v72_v1, 7  ;;  %s5167_s8 = smov 48   ;;  %s5168_s9 = smov 32   ;;  %v5170_v41 = vmov 1983009808  }
  0x1a   :  { %v300_v6 = vrot.slane %v299_v2, 4  ;;  %v310_v7 = vrot.slane %v309_v3, 4  ;;  %v302_v8 = vrot.slane %v301_v5, 4  ;;  %v320_v11 = vrot.slane %v319_v4, 4  ;;  %s5169_s10 = smov 16   ;;  %s5172_s11 = smov 3  }
  0x1b   :  { %v312_v14 = vrot.slane %v311_v9, 4  ;;  %v322_v18 = vrot.slane %v321_v15, 4  ;;  %v461_v42 = vunpack.c.l.s4 %v5170_v41  ;;  %vm458_vm2 = vcmask 1047556   ;;  %s4853_s12 = sld [smem:[#allocation11 + $0x1]]  ;;  %s5174_s14 = smov 127  }
  0x1c   :  { %v305_v10 = vmax.f32 %v71_v0, %v300_v6  ;;  %v306_v13 = vmax.f32 %v72_v1, %v302_v8  ;;  %v307_v20 = vadd.f32 %v300_v6, %v71_v0  ;;  %v308_v22 = vadd.f32 %v302_v8, %v72_v1  ;;  %s4867_s13 = sld [smem:[#allocation11 + $0x2]]  ;;  %s5175_s15 = smov 126  }
  0x1d   :  { %v5292_v47 = vunpack.c.0.s8 %v461_v42  ;;  %v5171_v60 = vmov 1934713408   ;;  %vm331_vm3 = vcmask 179200   ;;  %vm334_vm4 = vcmask 177152   ;;  %s4855_s16 = sld [smem:[#allocation11 + $0x8]] }
  0x1e   :  { %v315_v12 = vmax.f32 %v305_v10, %v310_v7  ;;  %v316_v17 = vmax.f32 %v306_v13, %v312_v14  ;;  %v317_v21 = vadd.f32 %v310_v7, %v307_v20  ;;  %v318_v24 = vadd.f32 %v312_v14, %v308_v22  ;;  %s4857_s17 = sld [smem:[#allocation11 + $0xf]] }
  0x1f   :  { %8611 = vst [vmem:[#allocation19_spill] sm:$0xff] %v5292_v47  ;;  %v473_v61 = vunpack.c.l.s4 %v5171_v60  ;;  %vm577_vm5 = vcmask 154648   ;;  %vm862_vm6 = vcmask 1046528   ;;  %s4859_s18 = sld [smem:[#allocation11 + $0x16]]  ;;  %vm927_vm7 = vcmask 1045504  }
  0x20   :  { %v5221_v16 = vmax.f32 %v315_v12, %v320_v11  ;;  %v5229_v19 = vmax.f32 %v316_v17, %v322_v18  ;;  %v327_v23 = vadd.f32 %v320_v11, %v317_v21  ;;  %v328_v26 = vadd.f32 %v322_v18, %v318_v24  ;;  %s4861_s19 = sld [smem:[#allocation11 + $0x1d]] }
  0x21   :  { %v5312_v15 = vunpack.c.0.s8 %v473_v61  ;;  %s4863_s20 = sld [smem:[#allocation11 + $0x24]]  ;;  %vm992_vm8 = vcmask 1044480   ;;  %vm1057_vm9 = vcmask 1043456   ;;  %vm1122_vm10 = vcmask 1042432  }
  0x22   :  { %355 = vrot.lane.b32.xlu1 %v5221_v16, %s5163_s2  ;;  %349 = vrot.lane.b32.xlu0 %v5221_v16, %s5164_s3  ;;  %v5249_v25 = vmul.f32 0.25, %v327_v23  ;;  %v5257_v27 = vmul.f32 0.25, %v328_v26  ;;  %v348_v36 = vrot.slane %v5229_v19, 4  ;;  %v391_v38 = vrot.slane %v5229_v19, 7  ;;  %s4865_s21 = sld [smem:[#allocation11 + $0x2b]] }
  0x23   :  { %361 = vrot.lane.b32.xlu2 %v5221_v16, %s5165_s6  ;;  %v347_v43 = vrot.slane %v5221_v16, 4  ;;  %8612 = vst [vmem:[#allocation20_spill] sm:$0xff] %v5312_v15  ;;  %s4869_s22 = sld [smem:[#allocation11 + $0x9]]  ;;  %vm1187_vm11 = vcmask 1041408  }
  0x24   :  { %v417_v40 = vrot.slane %v348_v36, 7  ;;  %v393_v49 = vsel %vm392_vm0, %v391_v38, %v5221_v16  ;;  %s4871_s25 = sld [smem:[#allocation11 + $0x10]] }
  0x25   :  { %v395_v2 = vsel %vm394_vm1, %v391_v38, %v393_v49  ;;  %s4854_s26 = sld [smem:[#allocation11 + $0x32]] }
  0x26   :  { %v418_v50 = vsel %vm392_vm0, %v417_v40, %v347_v43  ;;  %s4868_s27 = sld [smem:[#allocation11 + $0x33]] }
  0x27   :  { %v419_v9 = vsel %vm394_vm1, %v417_v40, %v418_v50  ;;  %s4856_s0 = sld [smem:[#allocation11 + $0x39]] }
  0x28   :  { %s4858_s28 = sld [smem:[#allocation11 + $0x40]] }
  0x29   :  { %s4860_s29 = sld [smem:[#allocation11 + $0x47]] }
  0x2a   :  { %357 = vrot.lane.b32.xlu1 %v5229_v19, %s5163_s2  ;;  %351 = vrot.lane.b32.xlu0 %v5229_v19, %s5164_s3  ;;  %s4862_s30 = sld [smem:[#allocation11 + $0x4e]] }
  0x2b   :  { %363 = vrot.lane.b32.xlu2 %v5229_v19, %s5165_s6  ;;  %s4864_s5 = sld [smem:[#allocation11 + $0x55]] }
  0x2c   :  { %s4866_s1 = sld [smem:[#allocation11 + $0x5c]] }
  0x32   :  { %369 = vrot.lane.b32.xlu1 %v5229_v19, %s5166_s7  ;;  %367 = vrot.lane.b32.xlu0 %v5221_v16, %s5166_s7 }
  0x33   :  { %373 = vrot.lane.b32.xlu2 %v5221_v16, %s5167_s8 }
  0x3a   :  { %379 = vrot.lane.b32.xlu1 %v5221_v16, %s5168_s9  ;;  %375 = vrot.lane.b32.xlu0 %v5229_v19, %s5167_s8 }
  0x3b   :  { %381 = vrot.lane.b32.xlu2 %v5229_v19, %s5168_s9 }
  0x42   :  { %387 = vrot.lane.b32.xlu1 %v5229_v19, %s5169_s10  ;;  %385 = vrot.lane.b32.xlu0 %v5221_v16, %s5169_s10 }
  0x43   :  { %592 = vrot.lane.b32.xlu2 %v5249_v25, %s5163_s2 }
  0x4a   :  { %588 = vrot.lane.b32.xlu1 %v5257_v27, %s5164_s3  ;;  %586 = vrot.lane.b32.xlu0 %v5249_v25, %s5164_s3 }
  0x4b   :  { %600 = vrot.lane.b32.xlu2 %v5257_v27, %s5165_s6 }
  0x52   :  { %598 = vrot.lane.b32.xlu1 %v5249_v25, %s5165_s6  ;;  %594 = vrot.lane.b32.xlu0 %v5257_v27, %s5163_s2 }
  0x53   :  { %610 = vrot.lane.b32.xlu2 %v5249_v25, %s5167_s8 }
  0x5a   :  { %606 = vrot.lane.b32.xlu1 %v5257_v27, %s5166_s7  ;;  %604 = vrot.lane.b32.xlu0 %v5249_v25, %s5166_s7 }
  0x5b   :  { %618 = vrot.lane.b32.xlu2 %v5257_v27, %s5168_s9 }
  0x62   :  { %616 = vrot.lane.b32.xlu1 %v5249_v25, %s5168_s9  ;;  %612 = vrot.lane.b32.xlu0 %v5257_v27, %s5167_s8 }
  0x6a   :  { %624 = vrot.lane.b32.xlu1 %v5257_v27, %s5169_s10  ;;  %622 = vrot.lane.b32.xlu0 %v5249_v25, %s5169_s10 }
  0x7d   :  { %v362_v28 = vpop.permute.xlu2 %361 }
  0x7e   :  { %v365_v32 = vrot.slane %v362_v28, 4 }
  0x85   :  { %v364_v29 = vpop.permute.xlu2 %363 }
  0x86   :  { %v366_v30 = vrot.slane %v364_v29, 4  ;;  %v402_v31 = vrot.slane %v364_v29, 7 }
  0x88   :  { %v426_v35 = vrot.slane %v366_v30, 7  ;;  %v403_v37 = vsel %vm392_vm0, %v402_v31, %v362_v28 }
  0x89   :  { %v404_v44 = vsel %vm394_vm1, %v402_v31, %v403_v37 }
  0x8a   :  { %v427_v39 = vsel %vm392_vm0, %v426_v35, %v365_v32  ;;  %v464_v46 = vrot.slane %v404_v44, 4 }
  0x8b   :  { %v428_v45 = vsel %vm394_vm1, %v426_v35, %v427_v39 }
  0x8c   :  { %v504_v59 = vrot.slane %v428_v45, 4 }
  0x8d   :  { %v5297_v56 = vpop.permute.xlu2 %373 }
  0x8e   :  { %v377_v49 = vrot.slane %v5297_v56, 4 }
  0x94   :  { %v356_v33 = vpop.permute.xlu1 %355  ;;  %v350_v34 = vpop.permute.xlu0 %349 }
  0x95   :  { %v359_v57 = vrot.slane %v356_v33, 4  ;;  %v353_v58 = vrot.slane %v350_v34, 4  ;;  %v382_v29 = vpop.permute.xlu2 %381 }
  0x96   :  { %v384_v32 = vrot.slane %v382_v29, 4  ;;  %v411_v38 = vrot.slane %v382_v29, 7  ;;  %v585_v29 = vrot.slane %v5257_v27, 4 }
  0x98   :  { %v435_v39 = vrot.slane %v384_v32, 7  ;;  %v628_v32 = vrot.slane %v5257_v27, 7 }
  0x9c   :  { %v358_v48 = vpop.permute.xlu1 %357  ;;  %v352_v51 = vpop.permute.xlu0 %351 }
  0x9d   :  { %v360_v52 = vrot.slane %v358_v48, 4  ;;  %v399_v53 = vrot.slane %v358_v48, 7  ;;  %v354_v54 = vrot.slane %v352_v51, 4  ;;  %v396_v55 = vrot.slane %v352_v51, 7  ;;  %v5325_v42 = vpop.permute.xlu2 %592 }
  0x9f   :  { %v400_v62 = vsel %vm392_vm0, %v399_v53, %v356_v33  ;;  %v423_v63 = vrot.slane %v360_v52, 7  ;;  %v397_v0 = vsel %vm392_vm0, %v396_v55, %v350_v34  ;;  %v420_v1 = vrot.slane %v354_v54, 7 }
  0xa0   :  { %v401_v3 = vsel %vm394_vm1, %v399_v53, %v400_v62  ;;  %v398_v4 = vsel %vm394_vm1, %v396_v55, %v397_v0 }
  0xa1   :  { %v424_v5 = vsel %vm392_vm0, %v423_v63, %v359_v57  ;;  %v457_v6 = vrot.slane %v401_v3, 4  ;;  %v421_v7 = vsel %vm392_vm0, %v420_v1, %v353_v58  ;;  %v465_v8 = vsel %vm458_vm2, %v464_v46, %v398_v4 }
  0xa2   :  { %v425_v10 = vsel %vm394_vm1, %v423_v63, %v424_v5  ;;  %v422_v11 = vsel %vm394_vm1, %v420_v1, %v421_v7  ;;  %v469_v12 = vperm.slane %v465_v8, %v5292_v47 }
  0xa3   :  { %v459_v13 = vsel %vm458_vm2, %v457_v6, %v395_v2  ;;  %v498_v14 = vrot.slane %v425_v10, 4  ;;  %v505_v16 = vsel %vm458_vm2, %v504_v59, %v422_v11 }
  0xa4   :  { %v463_v17 = vperm.slane %v459_v13, %v5292_v47  ;;  %v470_v18 = vrot.slane %v469_v12, 4  ;;  %v509_v19 = vperm.slane %v505_v16, %v5292_v47  ;;  %v370_v20 = vpop.permute.xlu1 %369  ;;  %v368_v21 = vpop.permute.xlu0 %367 }
  0xa5   :  { %v499_v22 = vsel %vm458_vm2, %v498_v14, %v419_v9  ;;  %v372_v43 = vrot.slane %v370_v20, 4  ;;  %v405_v46 = vrot.slane %v370_v20, 7  ;;  %v371_v52 = vrot.slane %v368_v21, 4  ;;  %v601_v9 = vpop.permute.xlu2 %600 }
  0xa6   :  { %v503_v23 = vperm.slane %v499_v22, %v5292_v47  ;;  %v471_v24 = vsel %vm458_vm2, %v470_v18, %v463_v17  ;;  %v510_v26 = vrot.slane %v509_v19, 4 }
  0xa7   :  { %v475_v28 = vperm.slane %v471_v24, %v5312_v15  ;;  %v429_v51 = vrot.slane %v372_v43, 7  ;;  %v406_v62 = vsel %vm392_vm0, %v405_v46, %v368_v21  ;;  %v637_v43 = vrot.slane %v601_v9, 7 }
  0xa8   :  { %v511_v30 = vsel %vm458_vm2, %v510_v26, %v503_v23  ;;  %v407_v10 = vsel %vm394_vm1, %v405_v46, %v406_v62 }
  0xa9   :  { %v515_v31 = vperm.slane %v511_v30, %v5312_v15  ;;  %546 = vst [vmem:[#allocation1] ss:$2 sm:$0xff] %v475_v28  ;;  %v476_v33 = vrot.slane %v475_v28, 4  ;;  %v430_v3 = vsel %vm392_vm0, %v429_v51, %v371_v52  ;;  %v629_v52 = vsel %vm392_vm0, %v628_v32, %v5249_v25 }
  0xaa   :  { %v431_v12 = vsel %vm394_vm1, %v429_v51, %v430_v3  ;;  %v596_v51 = vrot.slane %v5325_v42, 4 }
  0xab   :  { %550 = vst [vmem:[#allocation1 + $0x10] ss:$2 sm:$0xff] %v515_v31  ;;  %v516_v34 = vrot.slane %v515_v31, 4  ;;  %v477_v37 = vsel %vm458_vm2, 0.0, %v476_v33  ;;  %v603_v33 = vrot.slane %v601_v9, 4 }
  0xac   :  { %v380_v35 = vpop.permute.xlu1 %379  ;;  %v376_v36 = vpop.permute.xlu0 %375  ;;  %556 = vst [vmem:[#allocation1 + $0x20] ss:$2 sm:$0xff] %v477_v37 }
  0xad   :  { %v383_v40 = vrot.slane %v380_v35, 4  ;;  %v517_v41 = vsel %vm458_vm2, 0.0, %v516_v34  ;;  %v378_v44 = vrot.slane %v376_v36, 4  ;;  %v412_v45 = vsel %vm392_vm0, %v411_v38, %v380_v35 }
  0xae   :  { %560 = vst [vmem:[#allocation1 + $0x30] ss:$2 sm:$0xff] %v517_v41  ;;  %v408_v50 = vrot.slane %v376_v36, 7  ;;  %v413_v53 = vsel %vm394_vm1, %v411_v38, %v412_v45  ;;  %v652_v41 = vrot.slane %v585_v29, 7  ;;  %v661_v46 = vrot.slane %v603_v33, 7 }
  0xaf   :  { %v436_v48 = vsel %vm392_vm0, %v435_v39, %v383_v40  ;;  %v432_v54 = vrot.slane %v378_v44, 7  ;;  %v478_v63 = vrot.slane %v413_v53, 4  ;;  %v584_v40 = vrot.slane %v5249_v25, 4 }
  0xb0   :  { %v437_v58 = vsel %vm394_vm1, %v435_v39, %v436_v48  ;;  %v409_v0 = vsel %vm392_vm0, %v408_v50, %v5297_v56  ;;  %v5361_v48 = vpop.permute.xlu2 %610 }
  0xb1   :  { %v518_v4 = vrot.slane %v437_v58, 4  ;;  %v433_v6 = vsel %vm392_vm0, %v432_v54, %v377_v49  ;;  %v410_v11 = vsel %vm394_vm1, %v408_v50, %v409_v0  ;;  %v479_v13 = vsel %vm458_vm2, %v478_v63, %v407_v10 }
  0xb2   :  { %v434_v18 = vsel %vm394_vm1, %v432_v54, %v433_v6  ;;  %v483_v24 = vperm.slane %v479_v13, %v5292_v47  ;;  %v630_v6 = vsel %vm394_vm1, %v628_v32, %v629_v52 }
  0xb3   :  { %v519_v17 = vsel %vm458_vm2, %v518_v4, %v431_v12 }
  0xb4   :  { %v388_v55 = vpop.permute.xlu1 %387  ;;  %v386_v57 = vpop.permute.xlu0 %385  ;;  %v523_v30 = vperm.slane %v519_v17, %v5292_v47 }
  0xb5   :  { %v390_v59 = vrot.slane %v388_v55, 4  ;;  %v414_v60 = vrot.slane %v388_v55, 7  ;;  %v389_v61 = vrot.slane %v386_v57, 4 }
  0xb7   :  { %v438_v1 = vrot.slane %v390_v59, 7  ;;  %v415_v2 = vsel %vm392_vm0, %v414_v60, %v386_v57 }
  0xb8   :  { %v416_v5 = vsel %vm394_vm1, %v414_v60, %v415_v2  ;;  %v653_v60 = vsel %vm392_vm0, %v652_v41, %v584_v40 }
  0xb9   :  { %v439_v7 = vsel %vm392_vm0, %v438_v1, %v389_v61  ;;  %v484_v8 = vrot.slane %v416_v5, 4  ;;  %v654_v10 = vsel %vm394_vm1, %v652_v41, %v653_v60 }
  0xba   :  { %v440_v56 = vsel %vm394_vm1, %v438_v1, %v439_v7 }
  0xbb   :  { %v485_v14 = vsel %vm458_vm2, %v484_v8, %v410_v11  ;;  %v524_v16 = vrot.slane %v440_v56, 4 }
  0xbc   :  { %v489_v19 = vperm.slane %v485_v14, %v5292_v47  ;;  %v589_v20 = vpop.permute.xlu1 %588  ;;  %v587_v21 = vpop.permute.xlu0 %586 }
  0xbd   :  { %v525_v22 = vsel %vm458_vm2, %v524_v16, %v434_v18  ;;  %v591_v23 = vrot.slane %v589_v20, 4  ;;  %v631_v31 = vrot.slane %v589_v20, 7  ;;  %v590_v37 = vrot.slane %v587_v21, 4 }
  0xbe   :  { %v490_v26 = vrot.slane %v489_v19, 4  ;;  %v529_v28 = vperm.slane %v525_v22, %v5292_v47 }
  0xbf   :  { %v655_v36 = vrot.slane %v591_v23, 7  ;;  %v632_v27 = vsel %vm392_vm0, %v631_v31, %v587_v21 }
  0xc0   :  { %v491_v34 = vsel %vm458_vm2, %v490_v26, %v483_v24  ;;  %v530_v35 = vrot.slane %v529_v28, 4  ;;  %v633_v59 = vsel %vm394_vm1, %v631_v31, %v632_v27 }
  0xc1   :  { %v495_v38 = vperm.slane %v491_v34, %v5312_v15  ;;  %v656_v49 = vsel %vm392_vm0, %v655_v36, %v590_v37 }
  0xc2   :  { %v531_v39 = vsel %vm458_vm2, %v530_v35, %v523_v30  ;;  %v657_v2 = vsel %vm394_vm1, %v655_v36, %v656_v49  ;;  %v619_v30 = vpop.permute.xlu2 %618 }
  0xc3   :  { %v496_v44 = vrot.slane %v495_v38, 4  ;;  %v535_v45 = vperm.slane %v531_v39, %v5312_v15  ;;  %548 = vst [vmem:[#allocation1 + $0x1] ss:$2 sm:$0xff] %v495_v38  ;;  %v621_v35 = vrot.slane %v619_v30, 4  ;;  %v646_v39 = vrot.slane %v619_v30, 7 }
  0xc4   :  { %v599_v50 = vpop.permute.xlu1 %598  ;;  %v595_v53 = vpop.permute.xlu0 %594 }
  0xc5   :  { %v497_v54 = vsel %vm458_vm2, 0.0, %v496_v44  ;;  %v536_v55 = vrot.slane %v535_v45, 4  ;;  %552 = vst [vmem:[#allocation1 + $0x11] ss:$2 sm:$0xff] %v535_v45  ;;  %v602_v57 = vrot.slane %v599_v50, 4  ;;  %v597_v58 = vrot.slane %v595_v53, 4 }
  0xc6   :  { %558 = vst [vmem:[#allocation1 + $0x21] ss:$2 sm:$0xff] %v497_v54  ;;  %v634_v61 = vrot.slane %v595_v53, 7  ;;  %v638_v62 = vsel %vm392_vm0, %v637_v43, %v599_v50 }
  0xc7   :  { %v537_v63 = vsel %vm458_vm2, 0.0, %v536_v55  ;;  %v658_v0 = vrot.slane %v597_v58, 7  ;;  %v639_v25 = vsel %vm394_vm1, %v637_v43, %v638_v62  ;;  %v662_v1 = vsel %vm392_vm0, %v661_v46, %v602_v57 }
  0xc8   :  { %562 = vst [vmem:[#allocation1 + $0x31] ss:$2 sm:$0xff] %v537_v63  ;;  %v635_v3 = vsel %vm392_vm0, %v634_v61, %v5325_v42  ;;  %v663_v4 = vsel %vm394_vm1, %v661_v46, %v662_v1  ;;  %v698_v5 = vrot.slane %v639_v25, 4  ;;  %v670_v46 = vrot.slane %v621_v35, 7 }
  0xc9   :  { %v636_v7 = vsel %vm394_vm1, %v634_v61, %v635_v3  ;;  %v659_v8 = vsel %vm392_vm0, %v658_v0, %v596_v51  ;;  %v738_v9 = vrot.slane %v663_v4, 4  ;;  %v614_v57 = vrot.slane %v5361_v48, 4 }
  0xca   :  { %v660_v11 = vsel %vm394_vm1, %v658_v0, %v659_v8  ;;  %v692_v56 = vrot.slane %v636_v7, 4  ;;  %v553_v12 = vld.sshfl [vmem:[#allocation1] sm:$0xff pattern:$0x75316420]  ;;  %v699_v13 = vsel %vm458_vm2, %v698_v5, %v633_v59  ;;  %v5173_v1 = vmov 0.0  }
  0xcb   :  { %v732_v14 = vrot.slane %v660_v11, 4  ;;  %565 = vrot.lane.b32.xlu2 %v553_v12, %s5172_s11  ;;  %v703_v42 = vperm.slane %v699_v13, %v5292_v47  ;;  %v739_v16 = vsel %vm458_vm2, %v738_v9, %v657_v2  ;;  %332 = vst.msk [vmem:[#allocation2] sm:$0xff] %vm331_vm3, %v5173_v1 }
  0xcc   :  { %v693_v17 = vsel %vm458_vm2, %v692_v56, %v630_v6  ;;  %v607_v18 = vpop.permute.xlu1 %606  ;;  %v554_v19 = vld.sshfl [vmem:[#allocation1 + $0x10] sm:$0xff pattern:$0x75316420]  ;;  %v743_v20 = vperm.slane %v739_v16, %v5292_v47  ;;  %v605_v21 = vpop.permute.xlu0 %604  ;;  %333 = vst.msk [vmem:[#allocation2 + $0x8] sm:$0xff] %vm331_vm3, %v5173_v1 }
  0xcd   :  { %v697_v22 = vperm.slane %v693_v17, %v5292_v47  ;;  %v733_v23 = vsel %vm458_vm2, %v732_v14, %v654_v10  ;;  %567 = vrot.lane.b32.xlu0 %v554_v19, %s5172_s11  ;;  %v563_v24 = vld.sshfl [vmem:[#allocation1 + $0x20] sm:$0xff pattern:$0x75316420]  ;;  %v704_v28 = vrot.slane %v703_v42, 4  ;;  %v609_v40 = vrot.slane %v607_v18, 4  ;;  %336 = vst.msk [vmem:[#allocation2 + $0x18] sm:$0xff] %vm331_vm3, %v5173_v1 }
  0xce   :  { %v737_v26 = vperm.slane %v733_v23, %v5292_v47  ;;  %v744_v29 = vrot.slane %v743_v20, 4  ;;  %569 = vrot.lane.b32.xlu1 %v563_v24, %s5172_s11  ;;  %v640_v49 = vrot.slane %v607_v18, 7  ;;  %v608_v53 = vrot.slane %v605_v21, 4  ;;  %337 = vst.msk [vmem:[#allocation2 + $0x20] sm:$0xff] %vm331_vm3, %v5173_v1 }
  0xcf   :  { %v705_v31 = vsel %vm458_vm2, %v704_v28, %v697_v22  ;;  %v564_v36 = vld.sshfl [vmem:[#allocation1 + $0x30] sm:$0xff pattern:$0x75316420]  ;;  %v664_v52 = vrot.slane %v609_v40, 7  ;;  %339 = vst.msk [vmem:[#allocation3] sm:$0xff] %vm331_vm3, %v5173_v1 }
  0xd0   :  { %v745_v32 = vsel %vm458_vm2, %v744_v29, %v737_v26  ;;  %v709_v33 = vperm.slane %v705_v31, %v5312_v15  ;;  %v641_v59 = vsel %vm392_vm0, %v640_v49, %v605_v21  ;;  %340 = vst.msk [vmem:[#allocation3 + $0x8] sm:$0xff] %vm331_vm3, %v5173_v1 }
  0xd1   :  { %v749_v34 = vperm.slane %v745_v32, %v5312_v15  ;;  %v665_v61 = vsel %vm392_vm0, %v664_v52, %v608_v53  ;;  %v642_v6 = vsel %vm394_vm1, %v640_v49, %v641_v59  ;;  %342 = vst.msk [vmem:[#allocation3 + $0x18] sm:$0xff] %vm331_vm3, %v5173_v1 }
  0xd2   :  { %v710_v37 = vrot.slane %v709_v33, 4  ;;  %780 = vst [vmem:[#allocation1] ss:$2 sm:$0xff] %v709_v33  ;;  %v666_v10 = vsel %vm394_vm1, %v664_v52, %v665_v61 }
  0xd3   :  { %v750_v38 = vrot.slane %v749_v34, 4  ;;  %571 = vrot.lane.b32.xlu2 %v564_v36, %s5172_s11  ;;  %784 = vst [vmem:[#allocation1 + $0x10] ss:$2 sm:$0xff] %v749_v34 }
  0xd4   :  { %v617_v41 = vpop.permute.xlu1 %616  ;;  %v613_v43 = vpop.permute.xlu0 %612  ;;  %v711_v44 = vsel %vm458_vm2, 0.0, %v710_v37  ;;  %343 = vst.msk [vmem:[#allocation3 + $0x20] sm:$0xff] %vm331_vm3, %v5173_v1 }
  0xd5   :  { %v751_v45 = vsel %vm458_vm2, 0.0, %v750_v38  ;;  %v620_v27 = vrot.slane %v617_v41, 4  ;;  %790 = vst [vmem:[#allocation1 + $0x20] ss:$2 sm:$0xff] %v711_v44  ;;  %v615_v50 = vrot.slane %v613_v43, 4  ;;  %v647_v51 = vsel %vm392_vm0, %v646_v39, %v617_v41 }
  0xd6   :  { %794 = vst [vmem:[#allocation1 + $0x30] ss:$2 sm:$0xff] %v751_v45  ;;  %v643_v54 = vrot.slane %v613_v43, 7  ;;  %v648_v58 = vsel %vm394_vm1, %v646_v39, %v647_v51  ;;  %v1239_v43 = vstv %s4853_s12  ;;  %v5446_v44 = vstv %s4867_s13  ;;  %s4872_s12 = sld [smem:[#allocation11 + $0x41]] }
  0xd7   :  { %v671_v55 = vsel %vm392_vm0, %v670_v46, %v620_v27  ;;  %v667_v60 = vrot.slane %v615_v50, 7  ;;  %v712_v4 = vrot.slane %v648_v58, 4  ;;  %338 = vst.msk [vmem:[#allocation2 + $0x28] sm:$0x3f] %vm334_vm4, %v5173_v1  ;;  %v5466_v58 = vstv %s4855_s16  ;;  %s4873_s13 = sld [smem:[#allocation11 + $0x17]] }
  0xd8   :  { %v644_v62 = vsel %vm392_vm0, %v643_v54, %v5361_v48  ;;  %v672_v0 = vsel %vm394_vm1, %v670_v46, %v671_v55  ;;  %335 = vst.msk [vmem:[#allocation2 + $0x10] sm:$0x3f] %vm334_vm4, %v5173_v1  ;;  %s4875_s16 = sld [smem:[#allocation11 + $0x1e]] }
  0xd9   :  { %v668_v7 = vsel %vm392_vm0, %v667_v60, %v614_v57  ;;  %v752_v8 = vrot.slane %v672_v0, 4  ;;  %v645_v11 = vsel %vm394_vm1, %v643_v54, %v644_v62  ;;  %v713_v12 = vsel %vm458_vm2, %v712_v4, %v642_v6  ;;  %341 = vst.msk [vmem:[#allocation3 + $0x10] sm:$0x3f] %vm334_vm4, %v5173_v1 }
  0xda   :  { %v669_v42 = vsel %vm394_vm1, %v667_v60, %v668_v7  ;;  %v717_v20 = vperm.slane %v713_v12, %v5292_v47  ;;  %344 = vst.msk [vmem:[#allocation3 + $0x28] sm:$0x3f] %vm334_vm4, %v5173_v1  ;;  %v5498_v12 = vstv %s4859_s18  ;;  %s4877_s18 = sld [smem:[#allocation11 + $0x25]] }
  0xdb   :  { %v753_v17 = vsel %vm458_vm2, %v752_v8, %v666_v10 }
  0xdc   :  { %v625_v63 = vpop.permute.xlu1 %624  ;;  %v623_v25 = vpop.permute.xlu0 %622  ;;  %v757_v23 = vperm.slane %v753_v17, %v5292_v47 }
  0xdd   :  { %v627_v2 = vrot.slane %v625_v63, 4  ;;  %v649_v3 = vrot.slane %v625_v63, 7  ;;  %v626_v5 = vrot.slane %v623_v25, 4 }
  0xdf   :  { %v673_v48 = vrot.slane %v627_v2, 7  ;;  %v650_v9 = vsel %vm392_vm0, %v649_v3, %v623_v25 }
  0xe0   :  { %v651_v56 = vsel %vm394_vm1, %v649_v3, %v650_v9  ;;  %v5483_v3 = vstv %s4857_s17  ;;  %s4876_s17 = sld [smem:[#allocation11 + $0x4f]] }
  0xe1   :  { %v674_v13 = vsel %vm392_vm0, %v673_v48, %v626_v5  ;;  %v718_v14 = vrot.slane %v651_v56, 4 }
  0xe2   :  { %v675_v16 = vsel %vm394_vm1, %v673_v48, %v674_v13  ;;  %v5500_v13 = vstv %s4861_s19  ;;  %s4878_s19 = sld [smem:[#allocation11 + $0x56]] }
  0xe3   :  { %v719_v18 = vsel %vm458_vm2, %v718_v14, %v645_v11  ;;  %v758_v19 = vrot.slane %v675_v16, 4 }
  0xe4   :  { %v723_v21 = vperm.slane %v719_v18, %v5292_v47 }
  0xe5   :  { %v759_v22 = vsel %vm458_vm2, %v758_v19, %v669_v42 }
  0xe6   :  { %v724_v24 = vrot.slane %v723_v21, 4  ;;  %v763_v26 = vperm.slane %v759_v22, %v5292_v47 }
  0xe8   :  { %v725_v28 = vsel %vm458_vm2, %v724_v24, %v717_v20  ;;  %v764_v29 = vrot.slane %v763_v26, 4 }
  0xe9   :  { %v729_v30 = vperm.slane %v725_v28, %v5312_v15 }
  0xea   :  { %v765_v31 = vsel %vm458_vm2, %v764_v29, %v757_v23  ;;  %v5518_v29 = vstv %s4863_s20  ;;  %s4879_s20 = sld [smem:[#allocation11 + $0x2c]] }
  0xeb   :  { %v730_v32 = vrot.slane %v729_v30, 4  ;;  %v769_v33 = vperm.slane %v765_v31, %v5312_v15  ;;  %782 = vst [vmem:[#allocation1 + $0x1] ss:$2 sm:$0xff] %v729_v30 }
  0xed   :  { %v731_v34 = vsel %vm458_vm2, 0.0, %v730_v32  ;;  %v770_v35 = vrot.slane %v769_v33, 4  ;;  %786 = vst [vmem:[#allocation1 + $0x11] ss:$2 sm:$0xff] %v769_v33 }
  0xee   :  { %792 = vst [vmem:[#allocation1 + $0x21] ss:$2 sm:$0xff] %v731_v34 }
  0xef   :  { %v771_v36 = vsel %vm458_vm2, 0.0, %v770_v35 }
  0xf0   :  { %796 = vst [vmem:[#allocation1 + $0x31] ss:$2 sm:$0xff] %v771_v36 }
  0xf2   :  { %v787_v37 = vld.sshfl [vmem:[#allocation1] sm:$0xff pattern:$0x75316420] }
  0xf3   :  { %799 = vrot.lane.b32.xlu2 %v787_v37, %s5172_s11 }
  0xf4   :  { %v788_v38 = vld.sshfl [vmem:[#allocation1 + $0x10] sm:$0xff pattern:$0x75316420] }
  0xf5   :  { %801 = vrot.lane.b32.xlu0 %v788_v38, %s5172_s11  ;;  %v797_v39 = vld.sshfl [vmem:[#allocation1 + $0x20] sm:$0xff pattern:$0x75316420] }
  0xf6   :  { %803 = vrot.lane.b32.xlu1 %v797_v39, %s5172_s11 }
  0xf7   :  { %v798_v40 = vld.sshfl [vmem:[#allocation1 + $0x30] sm:$0xff pattern:$0x75316420] }
  0xfb   :  { %805 = vrot.lane.b32.xlu2 %v798_v40, %s5172_s11  ;;  %s4870_s11 = sld [smem:[#allocation11 + $0x3a]] }
 0x125   :  { %v566_v41 = vpop.permute.xlu2 %565 }
 0x126   :  { %578 = vst.msk [vmem:[#allocation2 + $0x3] sm:$0xff] %vm577_vm5, %v566_v41 }
 0x12d   :  { %v5448_v45 = vld [vmem:[#allocation2] sm:$0xff]  ;;  %v572_v27 = vpop.permute.xlu2 %571 }
 0x12e   :  { %581 = vst.msk [vmem:[#allocation2 + $0x23] sm:$0xff] %vm577_vm5, %v572_v27  ;;  %v1240_v46 = vmul.f32 %v1239_v43, %v5448_v45  ;;  %v1772_v49 = vmul.f32 %v5446_v44, %v5448_v45  ;;  %v1292_v60 = vmul.f32 %v5466_v58, %v5448_v45  ;;  %v1372_v48 = vmul.f32 %v5483_v3, %v5448_v45 }
 0x12f   :  { %v1452_v20 = vmul.f32 %v5498_v12, %v5448_v45  ;;  %v1532_v21 = vmul.f32 %v5500_v13, %v5448_v45  ;;  %v1612_v36 = vmul.f32 %v5518_v29, %v5448_v45  ;;  %v5535_v27 = vstv %s4865_s21  ;;  %s4880_s21 = sld [smem:[#allocation11 + $0x5d]] }
 0x130   :  { %1248 = vrot.lane.b32.xlu0 %v1240_v46, %s5174_s14  ;;  %1780 = vrot.lane.b32.xlu2 %v1772_v49, %s5175_s15  ;;  %v1304_v2 = vrot.slane %v1292_v60, 1  ;;  %v1384_v56 = vrot.slane %v1372_v48, 2 }
 0x131   :  { %v1464_v26 = vrot.slane %v1452_v20, 3  ;;  %v1544_v28 = vrot.slane %v1532_v21, 4  ;;  %v1624_v41 = vrot.slane %v1612_v36, 5 }
 0x13f   :  { %v568_v50 = vpop.permute.xlu0 %567 }
 0x140   :  { %579 = vst.msk [vmem:[#allocation2 + $0xb] sm:$0xff] %vm577_vm5, %v568_v50  ;;  %v570_v51 = vpop.permute.xlu1 %569 }
 0x141   :  { %580 = vst.msk [vmem:[#allocation2 + $0x1b] sm:$0xff] %vm577_vm5, %v570_v51 }
 0x147   :  { %v5458_v52 = vld [vmem:[#allocation2 + $0x8] sm:$0xff]  ;;  %v5477_v63 = vld [vmem:[#allocation2 + $0x10] sm:$0x3f] }
 0x148   :  { %v5460_v53 = vld [vmem:[#allocation2 + $0x18] sm:$0xff]  ;;  %v1241_v54 = vmul.f32 %v1239_v43, %v5458_v52  ;;  %v1773_v55 = vmul.f32 %v5446_v44, %v5458_v52  ;;  %v1293_v59 = vmul.f32 %v5466_v58, %v5458_v52  ;;  %v5475_v61 = vld [vmem:[#allocation2 + $0x20] sm:$0xff]  ;;  %v1373_v4 = vmul.f32 %v5483_v3, %v5458_v52 }
 0x149   :  { %v1242_v57 = vmul.f32 %v1239_v43, %v5460_v53  ;;  %v1774_v25 = vmul.f32 %v5446_v44, %v5460_v53  ;;  %v1243_v1 = vmul.f32 %v1239_v43, %v5475_v61  ;;  %v1294_v5 = vmul.f32 %v5466_v58, %v5477_v63 }
 0x14a   :  { %1250 = vrot.lane.b32.xlu1 %v1241_v54, %s5174_s14  ;;  %1782 = vrot.lane.b32.xlu0 %v1773_v55, %s5175_s15  ;;  %v1305_v0 = vrot.slane %v1293_v59, 1  ;;  %v1374_v7 = vmul.f32 %v5483_v3, %v5477_v63  ;;  %v1385_v8 = vrot.slane %v1373_v4, 2  ;;  %v1453_v16 = vmul.f32 %v5498_v12, %v5458_v52 }
 0x14b   :  { %1252 = vrot.lane.b32.xlu2 %v1242_v57, %s5174_s14  ;;  %v1307_v9 = vrot.slane %v1294_v5, 1  ;;  %v1454_v17 = vmul.f32 %v5498_v12, %v5477_v63  ;;  %v1533_v19 = vmul.f32 %v5500_v13, %v5458_v52  ;;  %v1613_v32 = vmul.f32 %v5518_v29, %v5458_v52 }
 0x14c   :  { %v1306_v6 = vsel %vm862_vm6, %v1304_v2, %v1305_v0  ;;  %v1387_v11 = vrot.slane %v1374_v7, 2  ;;  %v1386_v14 = vsel %vm927_vm7, %v1384_v56, %v1385_v8  ;;  %v1465_v22 = vrot.slane %v1453_v16, 3 }
 0x14d   :  { %v800_v62 = vpop.permute.xlu2 %799  ;;  %v1308_v42 = vsel %vm862_vm6, %v1305_v0, %v1307_v9  ;;  %v1467_v23 = vrot.slane %v1454_v17, 3  ;;  %v1545_v24 = vrot.slane %v1533_v19, 4  ;;  %v1534_v33 = vmul.f32 %v5500_v13, %v5477_v63 }
 0x14e   :  { %811 = vst.msk [vmem:[#allocation3 + $0x3] sm:$0xff] %vm577_vm5, %v800_v62  ;;  %v1388_v18 = vsel %vm927_vm7, %v1385_v8, %v1387_v11  ;;  %v1466_v31 = vsel %vm992_vm8, %v1464_v26, %v1465_v22  ;;  %v1614_v35 = vmul.f32 %v5518_v29, %v5477_v63  ;;  %v1625_v37 = vrot.slane %v1613_v32, 5 }
 0x14f   :  { %v1468_v30 = vsel %vm992_vm8, %v1465_v22, %v1467_v23  ;;  %v1546_v34 = vsel %vm1057_vm9, %v1544_v28, %v1545_v24  ;;  %v1547_v38 = vrot.slane %v1534_v33, 4  ;;  %v1693_v50 = vmul.f32 %v5535_v27, %v5458_v52 }
 0x150   :  { %v1627_v39 = vrot.slane %v1614_v35, 5  ;;  %v1626_v46 = vsel %vm1122_vm10, %v1624_v41, %v1625_v37  ;;  %v1694_v51 = vmul.f32 %v5535_v27, %v5477_v63  ;;  %v1692_v55 = vmul.f32 %v5535_v27, %v5448_v45 }
 0x151   :  { %v1548_v49 = vsel %vm1057_vm9, %v1545_v24, %v1547_v38  ;;  %v1705_v57 = vrot.slane %v1693_v50, 6  ;;  %v1775_v62 = vmul.f32 %v5446_v44, %v5475_v61  ;;  %v5552_v0 = vstv %s4869_s22  ;;  %s4881_s22 = sld [smem:[#allocation11 + $0x3]] }
 0x152   :  { %1784 = vrot.lane.b32.xlu1 %v1774_v25, %s5175_s15  ;;  %1254 = vrot.lane.b32.xlu0 %v1243_v1, %s5174_s14  ;;  %v1628_v54 = vsel %vm1122_vm10, %v1625_v37, %v1627_v39  ;;  %v1707_v59 = vrot.slane %v1694_v51, 6  ;;  %v1704_v60 = vrot.slane %v1692_v55, 6  ;;  %v5554_v25 = vstv %s4871_s25  ;;  %s4882_s25 = sld [smem:[#allocation11 + $0x34]] }
 0x153   :  { %1314 = vrot.lane.b32.xlu2 %v1306_v6, %s5174_s14  ;;  %v1825_v4 = vmul.f32 %v5552_v0, %v5458_v52  ;;  %v1905_v5 = vmul.f32 %v5554_v25, %v5458_v52  ;;  %v1826_v44 = vmul.f32 %v5552_v0, %v5477_v63  ;;  %v1824_v6 = vmul.f32 %v5552_v0, %v5448_v45 }
 0x154   :  { %v1708_v1 = vsel %vm1187_vm11, %v1705_v57, %v1707_v59  ;;  %v1706_v2 = vsel %vm1187_vm11, %v1704_v60, %v1705_v57  ;;  %v1904_v7 = vmul.f32 %v5554_v25, %v5448_v45  ;;  %v1906_v56 = vmul.f32 %v5554_v25, %v5477_v63 }
 0x155   :  { %v806_v10 = vpop.permute.xlu2 %805  ;;  %v1837_v48 = vrot.slane %v1825_v4, 1  ;;  %v1917_v8 = vrot.slane %v1905_v5, 2  ;;  %v1839_v9 = vrot.slane %v1826_v44, 1  ;;  %v1375_v17 = vmul.f32 %v5483_v3, %v5460_v53  ;;  %v5603_v39 = vld [vmem:[#allocation3] sm:$0xff] }
 0x156   :  { %814 = vst.msk [vmem:[#allocation3 + $0x23] sm:$0xff] %vm577_vm5, %v806_v10  ;;  %v1836_v10 = vrot.slane %v1824_v6, 1  ;;  %v1916_v11 = vrot.slane %v1904_v7, 2  ;;  %v1296_v20 = vmul.f32 %v5466_v58, %v5475_v61  ;;  %v1919_v22 = vrot.slane %v1906_v56, 2 }
 0x157   :  { %v1840_v19 = vsel %vm862_vm6, %v1837_v48, %v1839_v9  ;;  %v1389_v23 = vrot.slane %v1375_v17, 2  ;;  %v1456_v32 = vmul.f32 %v5498_v12, %v5475_v61  ;;  %v5601_v37 = vstv %s4854_s26  ;;  %s5176_s26 = smov 125  }
 0x158   :  { %v1918_v16 = vsel %vm927_vm7, %v1916_v11, %v1917_v8  ;;  %v1310_v26 = vrot.slane %v1296_v20, 1  ;;  %v1265_v41 = vmul.f32 %v5601_v37, %v5603_v39  ;;  %v1536_v51 = vmul.f32 %v5500_v13, %v5475_v61 }
 0x159   :  { %v1470_v36 = vrot.slane %v1456_v32, 3  ;;  %v1695_v5 = vmul.f32 %v5535_v27, %v5460_v53  ;;  %v1535_v56 = vmul.f32 %v5500_v13, %v5460_v53  ;;  %v5652_v17 = vstv %s4868_s27  ;;  %s4883_s27 = sld [smem:[#allocation11 + $0xa]] }
 0x15a   :  { %1394 = vrot.lane.b32.xlu1 %v1386_v14, %s5174_s14  ;;  %1316 = vrot.lane.b32.xlu0 %v1308_v42, %s5174_s14  ;;  %v5573_v14 = vld [vmem:[#allocation2 + $0x28] sm:$0x3f]  ;;  %v1838_v42 = vsel %vm862_vm6, %v1836_v10, %v1837_v48  ;;  %v1550_v60 = vrot.slane %v1536_v51, 4  ;;  %v1797_v20 = vmul.f32 %v5652_v17, %v5603_v39  ;;  %v5696_v51 = vstv %s4858_s28  ;;  %s4886_s28 = sld [smem:[#allocation11 + $0x42]] }
 0x15b   :  { %1396 = vrot.lane.b32.xlu2 %v1388_v18, %s5174_s14  ;;  %v1376_v18 = vmul.f32 %v5483_v3, %v5475_v61  ;;  %v1297_v21 = vmul.f32 %v5466_v58, %v5573_v14  ;;  %v1457_v35 = vmul.f32 %v5498_v12, %v5573_v14  ;;  %v1697_v44 = vmul.f32 %v5535_v27, %v5573_v14 }
 0x15c   :  { %v1377_v6 = vmul.f32 %v5483_v3, %v5573_v14  ;;  %v1709_v48 = vrot.slane %v1695_v5, 6  ;;  %v1907_v3 = vmul.f32 %v5554_v25, %v5460_v53 }
 0x15d   :  { %v1390_v24 = vrot.slane %v1376_v18, 2  ;;  %v1312_v28 = vrot.slane %v1297_v21, 1 }
 0x15e   :  { %v1392_v9 = vrot.slane %v1377_v6, 2  ;;  %v1921_v18 = vrot.slane %v1907_v3, 2  ;;  %v5718_v6 = vstv %s4860_s29  ;;  %s4887_s29 = sld [smem:[#allocation11 + $0x18]] }
 0x15f   :  { %v1313_v33 = vsel %vm862_vm6, %v1310_v26, %v1312_v28 }
 0x160   :  { %v1393_v11 = vsel %vm927_vm7, %v1390_v24, %v1392_v9 }
 0x162   :  { %1476 = vrot.lane.b32.xlu1 %v1468_v30, %s5174_s14  ;;  %1474 = vrot.lane.b32.xlu0 %v1466_v31, %s5174_s14  ;;  %v1920_v30 = vsel %vm927_vm7, %v1917_v8, %v1919_v22  ;;  %v1391_v31 = vsel %vm927_vm7, %v1389_v23, %v1390_v24  ;;  %v1712_v8 = vrot.slane %v1697_v44, 6  ;;  %v1827_v22 = vmul.f32 %v5552_v0, %v5460_v53 }
 0x163   :  { %1554 = vrot.lane.b32.xlu2 %v1546_v34, %s5174_s14  ;;  %v1455_v34 = vmul.f32 %v5498_v12, %v5460_v53  ;;  %v1295_v12 = vmul.f32 %v5466_v58, %v5460_v53  ;;  %v1828_v23 = vmul.f32 %v5552_v0, %v5475_v61 }
 0x165   :  { %v1469_v38 = vrot.slane %v1455_v34, 3  ;;  %v1309_v59 = vrot.slane %v1295_v12, 1 }
 0x167   :  { %v802_v40 = vpop.permute.xlu0 %801  ;;  %v1471_v50 = vsel %vm992_vm8, %v1469_v38, %v1470_v36 }
 0x168   :  { %812 = vst.msk [vmem:[#allocation3 + $0xb] sm:$0xff] %vm577_vm5, %v802_v40  ;;  %v804_v43 = vpop.permute.xlu1 %803  ;;  %v1472_v40 = vrot.slane %v1457_v35, 3 }
 0x169   :  { %813 = vst.msk [vmem:[#allocation3 + $0x1b] sm:$0xff] %vm577_vm5, %v804_v43 }
 0x16a   :  { %1634 = vrot.lane.b32.xlu1 %v1626_v46, %s5174_s14  ;;  %1556 = vrot.lane.b32.xlu0 %v1548_v49, %s5174_s14  ;;  %v1473_v43 = vsel %vm992_vm8, %v1470_v36, %v1472_v40  ;;  %v1615_v46 = vmul.f32 %v5518_v29, %v5460_v53  ;;  %v1616_v49 = vmul.f32 %v5518_v29, %v5475_v61 }
 0x16b   :  { %1636 = vrot.lane.b32.xlu2 %v1628_v54, %s5174_s14  ;;  %v1537_v54 = vmul.f32 %v5500_v13, %v5573_v14  ;;  %v1549_v13 = vrot.slane %v1535_v56, 4 }
 0x16c   :  { %v1629_v55 = vrot.slane %v1615_v46, 5  ;;  %v1630_v57 = vrot.slane %v1616_v49, 5  ;;  %v5689_v46 = vstv %s4856_s0  ;;  %s4885_s0 = sld [smem:[#allocation11 + $0x11]] }
 0x16d   :  { %v1551_v21 = vsel %vm1057_vm9, %v1549_v13, %v1550_v60 }
 0x16e   :  { %v1631_v58 = vsel %vm1122_vm10, %v1629_v55, %v1630_v57 }
 0x16f   :  { %v5672_v32 = vld [vmem:[#allocation3 + $0x8] sm:$0xff] }
 0x170   :  { %v1266_v36 = vmul.f32 %v5601_v37, %v5672_v32  ;;  %v5685_v40 = vld [vmem:[#allocation3 + $0x18] sm:$0xff] }
 0x171   :  { %v1799_v12 = vmul.f32 %v5652_v17, %v5685_v40 }
 0x172   :  { %1716 = vrot.lane.b32.xlu1 %v1708_v1, %s5174_s14  ;;  %1714 = vrot.lane.b32.xlu0 %v1706_v2, %s5174_s14  ;;  %v1311_v1 = vsel %vm862_vm6, %v1309_v59, %v1310_v26  ;;  %v1696_v2 = vmul.f32 %v5535_v27, %v5475_v61  ;;  %v1617_v26 = vmul.f32 %v5518_v29, %v5573_v14 }
 0x173   :  { %1786 = vrot.lane.b32.xlu2 %v1775_v62, %s5175_s15  ;;  %v1552_v62 = vrot.slane %v1537_v54, 4  ;;  %v1829_v29 = vmul.f32 %v5552_v0, %v5573_v14  ;;  %v1412_v0 = vmul.f32 %v5696_v51, %v5672_v32  ;;  %v1331_v54 = vmul.f32 %v5689_v46, %v5603_v39 }
 0x174   :  { %v1710_v7 = vrot.slane %v1696_v2, 6  ;;  %v1798_v2 = vmul.f32 %v5652_v17, %v5672_v32 }
 0x175   :  { %v1553_v4 = vsel %vm1057_vm9, %v1550_v60, %v1552_v62  ;;  %v5711_v62 = vld [vmem:[#allocation3 + $0x10] sm:$0x3f] }
 0x176   :  { %v1713_v10 = vsel %vm1187_vm11, %v1710_v7, %v1712_v8  ;;  %v1711_v27 = vsel %vm1187_vm11, %v1709_v48, %v1710_v7  ;;  %v1413_v44 = vmul.f32 %v5696_v51, %v5711_v62  ;;  %v1492_v48 = vmul.f32 %v5718_v6, %v5672_v32 }
 0x177   :  { %v1493_v8 = vmul.f32 %v5718_v6, %v5711_v62 }
 0x178   :  { %v1504_v3 = vrot.slane %v1492_v48, 3 }
 0x179   :  { %v1506_v13 = vrot.slane %v1493_v8, 3 }
 0x17a   :  { %1846 = vrot.lane.b32.xlu1 %v1838_v42, %s5175_s15  ;;  %1926 = vrot.lane.b32.xlu0 %v1918_v16, %s5175_s15  ;;  %v5647_v42 = vmul.f32 %v5554_v25, %v5475_v61 }
 0x17b   :  { %1848 = vrot.lane.b32.xlu2 %v1840_v19, %s5175_s15 }
 0x17c   :  { %v8585_v19 = vrot.slane %v5647_v42, 2 }
 0x17e   :  { %v1923_v24 = vsel %vm927_vm7, %v1921_v18, %v8585_v19 }
 0x182   :  { %1928 = vrot.lane.b32.xlu1 %v1920_v30, %s5175_s15  ;;  %1398 = vrot.lane.b32.xlu0 %v1391_v31, %s5174_s14  ;;  %v1841_v30 = vrot.slane %v1827_v22, 1  ;;  %v1842_v31 = vrot.slane %v1828_v23, 1  ;;  %v1333_v23 = vmul.f32 %v5689_v46, %v5711_v62 }
 0x183   :  { %1320 = vrot.lane.b32.xlu2 %v1313_v33, %s5174_s14  ;;  %v1632_v33 = vrot.slane %v1617_v26, 5  ;;  %v1507_v26 = vsel %vm992_vm8, %v1504_v3, %v1506_v13 }
 0x184   :  { %v1843_v34 = vsel %vm862_vm6, %v1841_v30, %v1842_v31 }
 0x185   :  { %v1633_v35 = vsel %vm1122_vm10, %v1630_v57, %v1632_v33  ;;  %v1411_v57 = vmul.f32 %v5696_v51, %v5603_v39 }
 0x18a   :  { %1480 = vrot.lane.b32.xlu0 %v1473_v43, %s5174_s14  ;;  %1273 = vrot.lane.b32.xlu1 %v1265_v41, %s5174_s14  ;;  %v5650_v16 = vpop.permute.xlu2 %1780  ;;  %v1844_v41 = vrot.slane %v1829_v29, 1  ;;  %v1267_v43 = vmul.f32 %v5601_v37, %v5685_v40  ;;  %v1346_v29 = vrot.slane %v1333_v23, 1 }
 0x18b   :  { %1478 = vrot.lane.b32.xlu2 %v1471_v50, %s5174_s14  ;;  %8613 = vst [vmem:[#allocation21_spill] sm:$0xff] %v5650_v16  ;;  %v1332_v50 = vmul.f32 %v5689_v46, %v5672_v32 }
 0x18c   :  { %v1845_v49 = vsel %vm862_vm6, %v1842_v31, %v1844_v41 }
 0x18d   :  { %v1344_v60 = vrot.slane %v1332_v50, 1 }
 0x18f   :  { %v1347_v50 = vsel %vm862_vm6, %v1344_v60, %v1346_v29 }
 0x192   :  { %1638 = vrot.lane.b32.xlu0 %v1631_v58, %s5174_s14  ;;  %1318 = vrot.lane.b32.xlu1 %v1311_v1, %s5174_s14  ;;  %v1424_v58 = vrot.slane %v1412_v0, 2  ;;  %v1343_v1 = vrot.slane %v1331_v54, 1  ;;  %v5767_v54 = vstv %s4866_s1  ;;  %s4890_s1 = sld [smem:[#allocation11 + $0x50]] }
 0x193   :  { %1560 = vrot.lane.b32.xlu2 %v1553_v4, %s5174_s14  ;;  %v1423_v4 = vrot.slane %v1411_v57, 2 }
 0x194   :  { %v1345_v5 = vsel %vm862_vm6, %v1343_v1, %v1344_v60  ;;  %v1733_v1 = vmul.f32 %v5767_v54, %v5711_v62  ;;  %v1491_v60 = vmul.f32 %v5718_v6, %v5603_v39 }
 0x195   :  { %v1425_v7 = vsel %vm927_vm7, %v1423_v4, %v1424_v58 }
 0x196   :  { %v1746_v48 = vrot.slane %v1733_v1, 6  ;;  %v1503_v8 = vrot.slane %v1491_v60, 3 }
 0x198   :  { %v1505_v13 = vsel %vm992_vm8, %v1503_v8, %v1504_v3 }
 0x19a   :  { %1720 = vrot.lane.b32.xlu0 %v1713_v10, %s5174_s14  ;;  %1400 = vrot.lane.b32.xlu1 %v1393_v11, %s5174_s14  ;;  %v5732_v11 = vld [vmem:[#allocation3 + $0x20] sm:$0xff] }
 0x19b   :  { %1718 = vrot.lane.b32.xlu2 %v1711_v27, %s5174_s14  ;;  %v1426_v27 = vrot.slane %v1413_v44, 2  ;;  %v1268_v18 = vmul.f32 %v5601_v37, %v5732_v11 }
 0x1a2   :  { %1805 = vrot.lane.b32.xlu0 %v1797_v20, %s5175_s15  ;;  %1558 = vrot.lane.b32.xlu1 %v1551_v21, %s5174_s14  ;;  %v5705_v55 = vpop.permute.xlu0 %1248  ;;  %v5738_v20 = vstv %s4862_s30  ;;  %v1427_v21 = vsel %vm927_vm7, %v1424_v58, %v1426_v27  ;;  %v1732_v58 = vmul.f32 %v5767_v54, %v5672_v32  ;;  %s4888_s30 = sld [smem:[#allocation11 + $0x49]] }
 0x1a3   :  { %1930 = vrot.lane.b32.xlu2 %v1923_v24, %s5175_s15  ;;  %8616 = vst [vmem:[#allocation24_spill] sm:$0xff] %v5705_v55  ;;  %v1572_v22 = vmul.f32 %v5738_v20, %v5672_v32  ;;  %v5745_v24 = vstv %s4864_s5  ;;  %v1571_v30 = vmul.f32 %v5738_v20, %v5603_v39  ;;  %s4889_s5 = sld [smem:[#allocation11 + $0x1f]] }
 0x1a4   :  { %v1652_v37 = vmul.f32 %v5745_v24, %v5672_v32  ;;  %v1653_v0 = vmul.f32 %v5745_v24, %v5711_v62 }
 0x1a5   :  { %v5670_v28 = vpop.permute.xlu2 %1252 }
 0x1a6   :  { %8614 = vst [vmem:[#allocation22_spill] sm:$0xff] %v5670_v28  ;;  %v1664_v41 = vrot.slane %v1652_v37, 5  ;;  %v1666_v44 = vrot.slane %v1653_v0, 5  ;;  %v1334_v0 = vmul.f32 %v5689_v46, %v5685_v40 }
 0x1a8   :  { %v1667_v27 = vsel %vm1122_vm10, %v1664_v41, %v1666_v44  ;;  %v1348_v44 = vrot.slane %v1334_v0, 1 }
 0x1aa   :  { %1850 = vrot.lane.b32.xlu0 %v1843_v34, %s5175_s15  ;;  %1640 = vrot.lane.b32.xlu1 %v1633_v35, %s5174_s14  ;;  %v1651_v34 = vmul.f32 %v5745_v24, %v5603_v39 }
 0x1ab   :  { %1275 = vrot.lane.b32.xlu2 %v1266_v36, %s5174_s14  ;;  %v1584_v36 = vrot.slane %v1572_v22, 4 }
 0x1ad   :  { %v5683_v38 = vpop.permute.xlu2 %1314 }
 0x1ae   :  { %8615 = vst [vmem:[#allocation23_spill] sm:$0xff] %v5683_v38 }
 0x1b2   :  { %1277 = vrot.lane.b32.xlu0 %v1267_v43, %s5174_s14  ;;  %1852 = vrot.lane.b32.xlu1 %v1845_v49, %s5175_s15  ;;  %v1583_v43 = vrot.slane %v1571_v30, 4  ;;  %v1663_v49 = vrot.slane %v1651_v34, 5 }
 0x1b3   :  { %1809 = vrot.lane.b32.xlu2 %v1799_v12, %s5175_s15 }
 0x1b4   :  { %v1585_v12 = vsel %vm1057_vm9, %v1583_v43, %v1584_v36  ;;  %v1665_v57 = vsel %vm1122_vm10, %v1663_v49, %v1664_v41  ;;  %v1800_v41 = vmul.f32 %v5652_v17, %v5732_v11  ;;  %v1731_v17 = vmul.f32 %v5767_v54, %v5603_v39 }
 0x1b5   :  { %v5709_v59 = vpop.permute.xlu2 %1396 }
 0x1b6   :  { %8617 = vst [vmem:[#allocation25_spill] sm:$0xff] %v5709_v59  ;;  %v1743_v8 = vrot.slane %v1731_v17, 6 }
 0x1ba   :  { %1353 = vrot.lane.b32.xlu0 %v1345_v5, %s5174_s14  ;;  %1807 = vrot.lane.b32.xlu1 %v1798_v2, %s5175_s15 }
 0x1bb   :  { %1433 = vrot.lane.b32.xlu2 %v1425_v7, %s5174_s14  ;;  %v1744_v7 = vrot.slane %v1732_v58, 6 }
 0x1bc   :  { %v5728_v9 = vpop.permute.xlu1 %1250  ;;  %v5730_v10 = vpop.permute.xlu0 %1782 }
 0x1bd   :  { %8618 = vst [vmem:[#allocation26_spill] sm:$0xff] %v5728_v9  ;;  %v5734_v56 = vpop.permute.xlu2 %1554  ;;  %v1747_v22 = vsel %vm1187_vm11, %v1744_v7, %v1746_v48 }
 0x1be   :  { %8619 = vst [vmem:[#allocation27_spill] sm:$0xff] %v5730_v10 }
 0x1bf   :  { %8620 = vst [vmem:[#allocation28_spill] sm:$0xff] %v5734_v56 }
 0x1c2   :  { %1435 = vrot.lane.b32.xlu0 %v1427_v21, %s5174_s14  ;;  %1279 = vrot.lane.b32.xlu1 %v1268_v18, %s5174_s14  ;;  %v1573_v18 = vmul.f32 %v5738_v20, %v5711_v62  ;;  %v5789_v21 = vstv %s4870_s11  ;;  %s4891_s11 = sld [smem:[#allocation11 + $0x26]] }
 0x1c3   :  { %1515 = vrot.lane.b32.xlu2 %v1507_v26, %s5174_s14  ;;  %v1864_v23 = vmul.f32 %v5789_v21, %v5672_v32  ;;  %v1863_v3 = vmul.f32 %v5789_v21, %v5603_v39 }
 0x1c4   :  { %v5755_v31 = vpop.permute.xlu1 %1784  ;;  %v5757_v33 = vpop.permute.xlu0 %1254  ;;  %v1586_v34 = vrot.slane %v1573_v18, 4  ;;  %v1745_v18 = vsel %vm1187_vm11, %v1743_v8, %v1744_v7 }
 0x1c5   :  { %8621 = vst [vmem:[#allocation29_spill] sm:$0xff] %v5755_v31  ;;  %v5761_v35 = vpop.permute.xlu2 %1636  ;;  %v1876_v29 = vrot.slane %v1864_v23, 1  ;;  %v1875_v43 = vrot.slane %v1863_v3, 1  ;;  %v1415_v23 = vmul.f32 %v5696_v51, %v5732_v11  ;;  %v2102_v31 = vstv %s4876_s17  ;;  %s4845_s17 = sld [smem:[#allocation11 + $0x15]] }
 0x1c6   :  { %8622 = vst [vmem:[#allocation30_spill] sm:$0xff] %v5757_v33  ;;  %v1587_v49 = vsel %vm1057_vm9, %v1584_v36, %v1586_v34  ;;  %v2107_v16 = vmul.f32 %v2102_v31, %v5732_v11 }
 0x1c7   :  { %8623 = vst [vmem:[#allocation31_spill] sm:$0xff] %v5761_v35 }
 0x1ca   :  { %1593 = vrot.lane.b32.xlu0 %v1585_v12, %s5174_s14  ;;  %1355 = vrot.lane.b32.xlu1 %v1347_v50, %s5174_s14  ;;  %v1865_v12 = vmul.f32 %v5789_v21, %v5711_v62  ;;  %v1877_v50 = vsel %vm862_vm6, %v1875_v43, %v1876_v29 }
 0x1cb   :  { %1673 = vrot.lane.b32.xlu2 %v1665_v57, %s5174_s14  ;;  %v1335_v57 = vmul.f32 %v5689_v46, %v5732_v11 }
 0x1cc   :  { %v5779_v2 = vpop.permute.xlu1 %1394  ;;  %v5781_v4 = vpop.permute.xlu0 %1316  ;;  %v1878_v60 = vrot.slane %v1865_v12, 1  ;;  %v1429_v12 = vrot.slane %v1415_v23, 2 }
 0x1cd   :  { %8624 = vst [vmem:[#allocation32_spill] sm:$0xff] %v5779_v2  ;;  %v5783_v5 = vpop.permute.xlu2 %1786  ;;  %v1349_v48 = vrot.slane %v1335_v57, 1 }
 0x1ce   :  { %8625 = vst [vmem:[#allocation33_spill] sm:$0xff] %v5781_v4 }
 0x1cf   :  { %8626 = vst [vmem:[#allocation34_spill] sm:$0xff] %v5783_v5  ;;  %v1350_v3 = vsel %vm862_vm6, %v1348_v44, %v1349_v48  ;;  %v1574_v44 = vmul.f32 %v5738_v20, %v5685_v40  ;;  %v2106_v5 = vmul.f32 %v2102_v31, %v5685_v40 }
 0x1d2   :  { %1675 = vrot.lane.b32.xlu0 %v1667_v27, %s5174_s14  ;;  %1513 = vrot.lane.b32.xlu1 %v1505_v13, %s5174_s14  ;;  %v5826_v27 = vld [vmem:[#allocation3 + $0x28] sm:$0x3f]  ;;  %v1879_v13 = vsel %vm862_vm6, %v1876_v29, %v1878_v60  ;;  %v1495_v60 = vmul.f32 %v5718_v6, %v5732_v11 }
 0x1d3   :  { %1755 = vrot.lane.b32.xlu2 %v1747_v22, %s5174_s14  ;;  %v1414_v22 = vmul.f32 %v5696_v51, %v5685_v40  ;;  %v1336_v34 = vmul.f32 %v5689_v46, %v5826_v27  ;;  %v1494_v46 = vmul.f32 %v5718_v6, %v5685_v40  ;;  %v1496_v8 = vmul.f32 %v5718_v6, %v5826_v27 }
 0x1d4   :  { %v5797_v26 = vpop.permute.xlu1 %1476  ;;  %v5799_v37 = vpop.permute.xlu0 %1474  ;;  %v1655_v6 = vmul.f32 %v5745_v24, %v5732_v11 }
 0x1d5   :  { %8627 = vst [vmem:[#allocation35_spill] sm:$0xff] %v5797_v26  ;;  %v5803_v30 = vpop.permute.xlu2 %1848  ;;  %v1508_v23 = vrot.slane %v1494_v46, 3 }
 0x1d6   :  { %8628 = vst [vmem:[#allocation36_spill] sm:$0xff] %v5799_v37 }
 0x1d7   :  { %8629 = vst [vmem:[#allocation37_spill] sm:$0xff] %v5803_v30 }
 0x1da   :  { %1811 = vrot.lane.b32.xlu0 %v1800_v41, %s5175_s15  ;;  %1595 = vrot.lane.b32.xlu1 %v1587_v49, %s5174_s14  ;;  %v1416_v41 = vmul.f32 %v5696_v51, %v5826_v27  ;;  %v1428_v49 = vrot.slane %v1414_v22, 2 }
 0x1db   :  { %1885 = vrot.lane.b32.xlu2 %v1877_v50, %s5175_s15  ;;  %v1351_v50 = vrot.slane %v1336_v34, 1  ;;  %v1588_v34 = vrot.slane %v1574_v44, 4 }
 0x1dc   :  { %v5820_v36 = vpop.permute.xlu1 %1634  ;;  %v5822_v58 = vpop.permute.xlu0 %1556  ;;  %v1431_v0 = vrot.slane %v1416_v41, 2  ;;  %v1430_v17 = vsel %vm927_vm7, %v1428_v49, %v1429_v12  ;;  %v1511_v49 = vrot.slane %v1496_v8, 3  ;;  %v1669_v8 = vrot.slane %v1655_v6, 5 }
 0x1dd   :  { %8630 = vst [vmem:[#allocation38_spill] sm:$0xff] %v5820_v36  ;;  %v5824_v1 = vpop.permute.xlu2 %1320  ;;  %v1352_v57 = vsel %vm862_vm6, %v1349_v48, %v1351_v50  ;;  %v1575_v48 = vmul.f32 %v5738_v20, %v5732_v11 }
 0x1de   :  { %8631 = vst [vmem:[#allocation39_spill] sm:$0xff] %v5822_v58  ;;  %v1432_v51 = vsel %vm927_vm7, %v1429_v12, %v1431_v0  ;;  %v1654_v0 = vmul.f32 %v5745_v24, %v5685_v40 }
 0x1df   :  { %8632 = vst [vmem:[#allocation40_spill] sm:$0xff] %v5824_v1  ;;  %v1589_v41 = vrot.slane %v1575_v48, 4  ;;  %v6681_v1 = vld [vmem:[#allocation2 + $0x18] sm:$0xff] }
 0x1e0   :  { %v1668_v48 = vrot.slane %v1654_v0, 5 }
 0x1e2   :  { %1887 = vrot.lane.b32.xlu0 %v1879_v13, %s5175_s15  ;;  %1753 = vrot.lane.b32.xlu1 %v1745_v18, %s5174_s14 }
 0x1e3   :  { %1357 = vrot.lane.b32.xlu2 %v1350_v3, %s5174_s14  ;;  %v1509_v3 = vrot.slane %v1495_v60, 3 }
 0x1e4   :  { %v5840_v29 = vpop.permute.xlu1 %1716  ;;  %v5842_v7 = vpop.permute.xlu0 %1714 }
 0x1e5   :  { %8633 = vst [vmem:[#allocation41_spill] sm:$0xff] %v5840_v29  ;;  %v5846_v43 = vpop.permute.xlu2 %1478  ;;  %v1510_v12 = vsel %vm992_vm8, %v1508_v23, %v1509_v3  ;;  %v1512_v50 = vsel %vm992_vm8, %v1509_v3, %v1511_v49  ;;  %v1670_v49 = vsel %vm1122_vm10, %v1668_v48, %v1669_v8  ;;  %v2182_v29 = vstv %s4878_s19  ;;  %s6379_s19 = sld [smem:[#allocation11 + $0x23]] }
 0x1e6   :  { %8634 = vst [vmem:[#allocation42_spill] sm:$0xff] %v5842_v7 }
 0x1e7   :  { %8635 = vst [vmem:[#allocation43_spill] sm:$0xff] %v5846_v43 }
 0x1ea   :  { %1359 = vrot.lane.b32.xlu0 %v1352_v57, %s5174_s14  ;;  %1437 = vrot.lane.b32.xlu1 %v1430_v17, %s5174_s14  ;;  %v1590_v57 = vsel %vm1057_vm9, %v1588_v34, %v1589_v41  ;;  %v1576_v17 = vmul.f32 %v5738_v20, %v5826_v27  ;;  %v1734_v20 = vmul.f32 %v5767_v54, %v5685_v40 }
 0x1eb   :  { %1439 = vrot.lane.b32.xlu2 %v1432_v51, %s5174_s14  ;;  %v1656_v51 = vmul.f32 %v5745_v24, %v5826_v27 }
 0x1ec   :  { %v5864_v13 = vpop.permute.xlu1 %1846  ;;  %v5866_v18 = vpop.permute.xlu0 %1926  ;;  %v1591_v23 = vrot.slane %v1576_v17, 4 }
 0x1ed   :  { %8636 = vst [vmem:[#allocation44_spill] sm:$0xff] %v5864_v13  ;;  %v5868_v22 = vpop.permute.xlu2 %1560  ;;  %v1671_v3 = vrot.slane %v1656_v51, 5  ;;  %v1748_v51 = vrot.slane %v1734_v20, 6 }
 0x1ee   :  { %8637 = vst [vmem:[#allocation45_spill] sm:$0xff] %v5866_v18  ;;  %v1592_v34 = vsel %vm1057_vm9, %v1589_v41, %v1591_v23  ;;  %v1736_v41 = vmul.f32 %v5767_v54, %v5826_v27 }
 0x1ef   :  { %8638 = vst [vmem:[#allocation46_spill] sm:$0xff] %v5868_v22  ;;  %v1672_v24 = vsel %vm1122_vm10, %v1669_v8, %v1671_v3 }
 0x1f0   :  { %v1751_v23 = vrot.slane %v1736_v41, 6 }
 0x1f2   :  { %1517 = vrot.lane.b32.xlu0 %v1510_v12, %s5174_s14  ;;  %1519 = vrot.lane.b32.xlu1 %v1512_v50, %s5174_s14  ;;  %v1735_v12 = vmul.f32 %v5767_v54, %v5732_v11  ;;  %v1867_v50 = vmul.f32 %v5789_v21, %v5732_v11  ;;  %v1866_v54 = vmul.f32 %v5789_v21, %v5685_v40 }
 0x1f3   :  { %1597 = vrot.lane.b32.xlu2 %v1590_v57, %s5174_s14  ;;  %v1868_v57 = vmul.f32 %v5789_v21, %v5826_v27 }
 0x1f4   :  { %v5882_v46 = vpop.permute.xlu1 %1928  ;;  %v5884_v60 = vpop.permute.xlu0 %1398  ;;  %v1749_v48 = vrot.slane %v1735_v12, 6  ;;  %v1881_v8 = vrot.slane %v1867_v50, 1  ;;  %v1909_v50 = vmul.f32 %v5554_v25, %v5573_v14 }
 0x1f5   :  { %8639 = vst [vmem:[#allocation47_spill] sm:$0xff] %v5882_v46  ;;  %v5888_v44 = vpop.permute.xlu2 %1718  ;;  %v1883_v3 = vrot.slane %v1868_v57, 1 }
 0x1f6   :  { %8640 = vst [vmem:[#allocation48_spill] sm:$0xff] %v5884_v60 }
 0x1f7   :  { %8641 = vst [vmem:[#allocation49_spill] sm:$0xff] %v5888_v44  ;;  %v1884_v19 = vsel %vm862_vm6, %v1881_v8, %v1883_v3  ;;  %v1983_v3 = vstv %s4873_s13  ;;  %s6355_s13 = sld [smem:[#allocation11]] }
 0x1f8   :  { %v1986_v18 = vmul.f32 %v1983_v3, %v5477_v63  ;;  %v1988_v46 = vmul.f32 %v1983_v3, %v5475_v61 }
 0x1fa   :  { %1599 = vrot.lane.b32.xlu0 %v1592_v34, %s5174_s14  ;;  %1677 = vrot.lane.b32.xlu1 %v1670_v49, %s5174_s14  ;;  %v1750_v34 = vsel %vm1187_vm11, %v1748_v51, %v1749_v48  ;;  %v1752_v49 = vsel %vm1187_vm11, %v1749_v48, %v1751_v23  ;;  %v1880_v51 = vrot.slane %v1866_v54, 1 }
 0x1fb   :  { %1679 = vrot.lane.b32.xlu2 %v1672_v24, %s5174_s14  ;;  %v1942_v24 = vstv %s4872_s12  ;;  %s4892_s12 = sld [smem:[#allocation11 + $0x57]] }
 0x1fc   :  { %v5904_v0 = vpop.permute.xlu0 %1480  ;;  %v5906_v6 = vpop.permute.xlu1 %1273  ;;  %v1944_v20 = vmul.f32 %v1942_v24, %v5672_v32  ;;  %v1945_v12 = vmul.f32 %v1942_v24, %v5711_v62  ;;  %v1946_v47 = vmul.f32 %v1942_v24, %v5685_v40  ;;  %v1947_v25 = vmul.f32 %v1942_v24, %v5732_v11 }
 0x1fd   :  { %8642 = vst [vmem:[#allocation50_spill] sm:$0xff] %v5904_v0  ;;  %v5910_v17 = vpop.permute.xlu2 %1930 }
 0x1fe   :  { %8643 = vst [vmem:[#allocation51_spill] sm:$0xff] %v5906_v6  ;;  %v1956_v48 = vrot.slane %v1944_v20, 2  ;;  %v1958_v23 = vrot.slane %v1945_v12, 2  ;;  %v1985_v20 = vmul.f32 %v1983_v3, %v5458_v52 }
 0x1ff   :  { %8644 = vst [vmem:[#allocation52_spill] sm:$0xff] %v5910_v17 }
 0x200   :  { %v1959_v54 = vsel %vm927_vm7, %v1956_v48, %v1958_v23 }
 0x202   :  { %1757 = vrot.lane.b32.xlu0 %v1750_v34, %s5174_s14  ;;  %1759 = vrot.lane.b32.xlu1 %v1752_v49, %s5174_s14  ;;  %v1924_v34 = vrot.slane %v1909_v50, 2  ;;  %v8648_v49 = vrot.slane %v5647_v42, 2  ;;  %v1943_v42 = vmul.f32 %v1942_v24, %v5603_v39  ;;  %s4874_s14 = sld [smem:[#allocation11 + $0x48]] }
 0x203   :  { %1891 = vrot.lane.b32.xlu2 %v1884_v19, %s5175_s15  ;;  %v1882_v19 = vsel %vm862_vm6, %v1880_v51, %v1881_v8  ;;  %v1984_v8 = vmul.f32 %v1983_v3, %v5448_v45 }
 0x204   :  { %v5924_v41 = vpop.permute.xlu0 %1638  ;;  %v5926_v57 = vpop.permute.xlu1 %1318  ;;  %v1925_v15 = vsel %vm927_vm7, %v8648_v49, %v1924_v34  ;;  %v1960_v34 = vrot.slane %v1946_v47, 2  ;;  %v1997_v49 = vrot.slane %v1985_v20, 3  ;;  %v1948_v47 = vmul.f32 %v1942_v24, %v5826_v27 }
 0x205   :  { %8645 = vst [vmem:[#allocation53_spill] sm:$0xff] %v5924_v41  ;;  %v5928_v21 = vpop.permute.xlu2 %1275  ;;  %v1996_v17 = vrot.slane %v1984_v8, 3  ;;  %v1999_v8 = vrot.slane %v1986_v18, 3  ;;  %v1987_v24 = vmul.f32 %v1983_v3, %v5460_v53  ;;  %v2223_v41 = vstv %s4879_s20  ;;  %s6381_s20 = sld [smem:[#allocation11 + $0x2a]] }
 0x206   :  { %8646 = vst [vmem:[#allocation54_spill] sm:$0xff] %v5926_v57 }
 0x207   :  { %8647 = vst [vmem:[#allocation55_spill] sm:$0xff] %v5928_v21  ;;  %v1998_v45 = vsel %vm992_vm8, %v1996_v17, %v1997_v49  ;;  %v2000_v17 = vsel %vm992_vm8, %v1997_v49, %v1999_v8  ;;  %v2001_v8 = vrot.slane %v1987_v24, 3  ;;  %v6687_v21 = vld [vmem:[#allocation2 + $0x20] sm:$0xff] }
 0x20a   :  { %1932 = vrot.lane.b32.xlu0 %v1925_v15, %s5175_s15  ;;  %1889 = vrot.lane.b32.xlu1 %v1882_v19, %s5175_s15  ;;  %v1961_v15 = vrot.slane %v1947_v25, 2  ;;  %v1955_v19 = vrot.slane %v1943_v42, 2 }
 0x20b   :  { %1967 = vrot.lane.b32.xlu2 %v1959_v54, %s5175_s15 }
 0x20c   :  { %v5942_v12 = vpop.permute.xlu0 %1720  ;;  %v5944_v50 = vpop.permute.xlu1 %1400  ;;  %v1962_v23 = vsel %vm927_vm7, %v1960_v34, %v1961_v15  ;;  %v1957_v54 = vsel %vm927_vm7, %v1955_v19, %v1956_v48  ;;  %v1989_v48 = vmul.f32 %v1983_v3, %v5573_v14  ;;  %v2002_v34 = vrot.slane %v1988_v46, 3 }
 0x20d   :  { %8649 = vst [vmem:[#allocation56_spill] sm:$0xff] %v5942_v12  ;;  %v5947_v51 = vpop.permute.xlu2 %1809  ;;  %v1963_v19 = vrot.slane %v1948_v47, 2 }
 0x20e   :  { %8650 = vst [vmem:[#allocation57_spill] sm:$0xff] %v5944_v50  ;;  %v2003_v30 = vsel %vm992_vm8, %v2001_v8, %v2002_v34 }
 0x20f   :  { %8651 = vst [vmem:[#allocation58_spill] sm:$0xff] %v5947_v51  ;;  %v1964_v13 = vsel %vm927_vm7, %v1961_v15, %v1963_v19 }
 0x212   :  { %1969 = vrot.lane.b32.xlu0 %v1962_v23, %s5175_s15  ;;  %1965 = vrot.lane.b32.xlu1 %v1957_v54, %s5175_s15  ;;  %v2004_v23 = vrot.slane %v1989_v48, 3  ;;  %v2022_v54 = vstv %s4874_s14  ;;  %s6360_s14 = sld [smem:[#allocation11 + $0x7]] }
 0x213   :  { %2006 = vrot.lane.b32.xlu2 %v1998_v45, %s5175_s15  ;;  %v2024_v45 = vmul.f32 %v2022_v54, %v5672_v32  ;;  %v2026_v18 = vmul.f32 %v2022_v54, %v5685_v40  ;;  %v2027_v46 = vmul.f32 %v2022_v54, %v5732_v11  ;;  %v2023_v49 = vmul.f32 %v2022_v54, %v5603_v39 }
 0x214   :  { %v5958_v25 = vpop.permute.xlu0 %1805  ;;  %v5960_v20 = vpop.permute.xlu1 %1558  ;;  %v2005_v51 = vsel %vm992_vm8, %v2002_v34, %v2004_v23 }
 0x215   :  { %8652 = vst [vmem:[#allocation59_spill] sm:$0xff] %v5958_v25  ;;  %v5963_v42 = vpop.permute.xlu2 %1433  ;;  %v2036_v48 = vrot.slane %v2024_v45, 3  ;;  %v2040_v19 = vrot.slane %v2026_v18, 3  ;;  %v2025_v25 = vmul.f32 %v2022_v54, %v5711_v62  ;;  %v2028_v18 = vmul.f32 %v2022_v54, %v5826_v27 }
 0x216   :  { %8653 = vst [vmem:[#allocation60_spill] sm:$0xff] %v5960_v20 }
 0x217   :  { %8654 = vst [vmem:[#allocation61_spill] sm:$0xff] %v5963_v42  ;;  %v2038_v8 = vrot.slane %v2025_v25, 3  ;;  %v2104_v25 = vmul.f32 %v2102_v31, %v5672_v32 }
 0x21a   :  { %2008 = vrot.lane.b32.xlu0 %v2000_v17, %s5175_s15  ;;  %1971 = vrot.lane.b32.xlu1 %v1964_v13, %s5175_s15  ;;  %v2041_v13 = vrot.slane %v2027_v46, 3  ;;  %v2035_v17 = vrot.slane %v2023_v49, 3 }
 0x21b   :  { %2012 = vrot.lane.b32.xlu2 %v2005_v51, %s5175_s15  ;;  %v2063_v51 = vstv %s4875_s16  ;;  %s6366_s16 = sld [smem:[#allocation11 + $0xe]] }
 0x21c   :  { %v5976_v15 = vpop.permute.xlu0 %1850  ;;  %v5978_v47 = vpop.permute.xlu1 %1640  ;;  %v2037_v23 = vsel %vm992_vm8, %v2035_v17, %v2036_v48  ;;  %v2065_v45 = vmul.f32 %v2063_v51, %v5458_v52  ;;  %v2066_v24 = vmul.f32 %v2063_v51, %v5477_v63  ;;  %v2039_v63 = vsel %vm992_vm8, %v2036_v48, %v2038_v8 }
 0x21d   :  { %8655 = vst [vmem:[#allocation62_spill] sm:$0xff] %v5976_v15  ;;  %v5980_v3 = vpop.permute.xlu2 %1515  ;;  %v2042_v15 = vsel %vm992_vm8, %v2040_v19, %v2041_v13  ;;  %v2067_v19 = vmul.f32 %v2063_v51, %v5460_v53 }
 0x21e   :  { %8656 = vst [vmem:[#allocation63_spill] sm:$0xff] %v5978_v47  ;;  %v2077_v17 = vrot.slane %v2065_v45, 4  ;;  %v6007_v45 = vld [vmem:[#allocation2] sm:$0xff] }
 0x21f   :  { %8657 = vst [vmem:[#allocation64_spill] sm:$0xff] %v5980_v3  ;;  %v2064_v53 = vmul.f32 %v6007_v45, %v2063_v51 }
 0x222   :  { %2045 = vrot.lane.b32.xlu0 %v2037_v23, %s5175_s15  ;;  %2010 = vrot.lane.b32.xlu1 %v2003_v30, %s5175_s15  ;;  %v2079_v23 = vrot.slane %v2066_v24, 4  ;;  %v2043_v30 = vrot.slane %v2028_v18, 3  ;;  %v2081_v18 = vrot.slane %v2067_v19, 4  ;;  %v2069_v19 = vmul.f32 %v2063_v51, %v5573_v14 }
 0x223   :  { %2049 = vrot.lane.b32.xlu2 %v2042_v15, %s5175_s15  ;;  %v2068_v15 = vmul.f32 %v2063_v51, %v5475_v61  ;;  %v2103_v61 = vmul.f32 %v2102_v31, %v5603_v39 }
 0x224   :  { %v5992_v46 = vpop.permute.xlu0 %1277  ;;  %v5994_v34 = vpop.permute.xlu1 %1852  ;;  %v2044_v52 = vsel %vm992_vm8, %v2041_v13, %v2043_v30  ;;  %v2080_v54 = vsel %vm1057_vm9, %v2077_v17, %v2079_v23  ;;  %v2116_v30 = vrot.slane %v2104_v25, 4  ;;  %v2076_v23 = vrot.slane %v2064_v53, 4 }
 0x225   :  { %8658 = vst [vmem:[#allocation65_spill] sm:$0xff] %v5992_v46  ;;  %v5996_v49 = vpop.permute.xlu2 %1673  ;;  %v2082_v8 = vrot.slane %v2068_v15, 4 }
 0x226   :  { %8659 = vst [vmem:[#allocation66_spill] sm:$0xff] %v5994_v34  ;;  %v2105_v34 = vmul.f32 %v2102_v31, %v5711_v62 }
 0x227   :  { %8660 = vst [vmem:[#allocation67_spill] sm:$0xff] %v5996_v49  ;;  %v6058_v49 = vld [vmem:[#allocation2 + $0x10] sm:$0x3f] }
 0x228   :  { %v2226_v35 = vmul.f32 %v6058_v49, %v2223_v41 }
 0x22a   :  { %2051 = vrot.lane.b32.xlu0 %v2044_v52, %s5175_s15  ;;  %2047 = vrot.lane.b32.xlu1 %v2039_v63, %s5175_s15  ;;  %v2115_v52 = vrot.slane %v2103_v61, 4  ;;  %v2083_v63 = vsel %vm1057_vm9, %v2081_v18, %v2082_v8  ;;  %v2118_v61 = vrot.slane %v2105_v34, 4  ;;  %v2121_v18 = vrot.slane %v2107_v16, 4  ;;  %v6042_v34 = vld [vmem:[#allocation2 + $0x18] sm:$0xff] }
 0x22b   :  { %2088 = vrot.lane.b32.xlu2 %v2080_v54, %s5175_s15  ;;  %v2078_v54 = vsel %vm1057_vm9, %v2076_v23, %v2077_v17  ;;  %v2108_v17 = vmul.f32 %v2102_v31, %v5826_v27  ;;  %v2084_v23 = vrot.slane %v2069_v19, 4 }
 0x22c   :  { %v6010_v13 = vpop.permute.xlu0 %1353  ;;  %v6012_v48 = vpop.permute.xlu1 %1807 }
 0x22d   :  { %8661 = vst [vmem:[#allocation68_spill] sm:$0xff] %v6010_v13  ;;  %v6015_v24 = vpop.permute.xlu2 %1755  ;;  %v2085_v10 = vsel %vm1057_vm9, %v2082_v8, %v2084_v23 }
 0x22e   :  { %8662 = vst [vmem:[#allocation69_spill] sm:$0xff] %v6012_v48  ;;  %v2117_v48 = vsel %vm1057_vm9, %v2115_v52, %v2116_v30  ;;  %v2119_v52 = vsel %vm1057_vm9, %v2116_v30, %v2118_v61  ;;  %v6045_v30 = vld [vmem:[#allocation2 + $0x20] sm:$0xff] }
 0x22f   :  { %8663 = vst [vmem:[#allocation70_spill] sm:$0xff] %v6015_v24 }
 0x232   :  { %2090 = vrot.lane.b32.xlu0 %v2083_v63, %s5175_s15  ;;  %2086 = vrot.lane.b32.xlu1 %v2078_v54, %s5175_s15  ;;  %v2123_v63 = vrot.slane %v2108_v17, 4  ;;  %v2143_v54 = vstv %s4877_s18  ;;  %s4847_s18 = sld [smem:[#allocation11 + $0x1c]] }
 0x233   :  { %2125 = vrot.lane.b32.xlu2 %v2117_v48, %s5175_s15  ;;  %v6035_v48 = vld [vmem:[#allocation2 + $0x8] sm:$0xff]  ;;  %v2147_v19 = vmul.f32 %v6042_v34, %v2143_v54  ;;  %v2148_v8 = vmul.f32 %v6045_v30, %v2143_v54  ;;  %v2144_v17 = vmul.f32 %v6007_v45, %v2143_v54 }
 0x234   :  { %v6026_v15 = vpop.permute.xlu0 %1435  ;;  %v6028_v25 = vpop.permute.xlu1 %1279  ;;  %v2145_v51 = vmul.f32 %v6035_v48, %v2143_v54  ;;  %v2124_v16 = vsel %vm1057_vm9, %v2121_v18, %v2123_v63  ;;  %v2120_v63 = vrot.slane %v2106_v5, 4  ;;  %v2184_v5 = vmul.f32 %v2182_v29, %v5672_v32 }
 0x235   :  { %8664 = vst [vmem:[#allocation71_spill] sm:$0xff] %v6026_v15  ;;  %v6031_v53 = vpop.permute.xlu2 %1885  ;;  %v2156_v44 = vrot.slane %v2144_v17, 5 }
 0x236   :  { %8665 = vst [vmem:[#allocation72_spill] sm:$0xff] %v6028_v25  ;;  %v2122_v24 = vsel %vm1057_vm9, %v2120_v63, %v2121_v18 }
 0x237   :  { %8666 = vst [vmem:[#allocation73_spill] sm:$0xff] %v6031_v53  ;;  %v2162_v53 = vrot.slane %v2148_v8, 5 }
 0x23a   :  { %2127 = vrot.lane.b32.xlu0 %v2119_v52, %s5175_s15  ;;  %2092 = vrot.lane.b32.xlu1 %v2085_v10, %s5175_s15  ;;  %v2157_v10 = vrot.slane %v2145_v51, 5  ;;  %v2161_v52 = vrot.slane %v2147_v19, 5  ;;  %v2185_v19 = vmul.f32 %v2182_v29, %v5711_v62 }
 0x23b   :  { %2131 = vrot.lane.b32.xlu2 %v2124_v16, %s5175_s15  ;;  %v2146_v16 = vmul.f32 %v6058_v49, %v2143_v54 }
 0x23c   :  { %v6050_v31 = vpop.permute.xlu0 %1593  ;;  %v6052_v61 = vpop.permute.xlu1 %1355  ;;  %v2158_v7 = vsel %vm1122_vm10, %v2156_v44, %v2157_v10  ;;  %v2163_v51 = vsel %vm1122_vm10, %v2161_v52, %v2162_v53  ;;  %v2149_v44 = vmul.f32 %v2143_v54, %v5573_v14  ;;  %v2198_v12 = vrot.slane %v2185_v19, 5 }
 0x23d   :  { %8667 = vst [vmem:[#allocation74_spill] sm:$0xff] %v6050_v31  ;;  %v6054_v23 = vpop.permute.xlu2 %1357  ;;  %v2159_v63 = vrot.slane %v2146_v16, 5  ;;  %v2186_v31 = vmul.f32 %v2182_v29, %v5685_v40  ;;  %v2225_v16 = vmul.f32 %v6035_v48, %v2223_v41 }
 0x23e   :  { %8668 = vst [vmem:[#allocation75_spill] sm:$0xff] %v6052_v61 }
 0x23f   :  { %8669 = vst [vmem:[#allocation76_spill] sm:$0xff] %v6054_v23  ;;  %v2160_v36 = vsel %vm1122_vm10, %v2157_v10, %v2159_v63  ;;  %v2224_v10 = vmul.f32 %v6007_v45, %v2223_v41  ;;  %v2200_v63 = vrot.slane %v2186_v31, 5  ;;  %v2188_v31 = vmul.f32 %v2182_v29, %v5826_v27 }
 0x242   :  { %2166 = vrot.lane.b32.xlu0 %v2158_v7, %s5175_s15  ;;  %2129 = vrot.lane.b32.xlu1 %v2122_v24, %s5175_s15  ;;  %v2196_v7 = vrot.slane %v2184_v5, 5  ;;  %v2164_v24 = vrot.slane %v2149_v44, 5  ;;  %v2183_v5 = vmul.f32 %v2182_v29, %v5603_v39 }
 0x243   :  { %2170 = vrot.lane.b32.xlu2 %v2163_v51, %s5175_s15  ;;  %v2187_v51 = vmul.f32 %v2182_v29, %v5732_v11  ;;  %v2227_v29 = vmul.f32 %v6042_v34, %v2223_v41 }
 0x244   :  { %v6068_v18 = vpop.permute.xlu0 %1675  ;;  %v6070_v8 = vpop.permute.xlu1 %1513  ;;  %v2165_v52 = vsel %vm1122_vm10, %v2162_v53, %v2164_v24  ;;  %v2199_v54 = vsel %vm1122_vm10, %v2196_v7, %v2198_v12 }
 0x245   :  { %8670 = vst [vmem:[#allocation77_spill] sm:$0xff] %v6068_v18  ;;  %v6072_v17 = vpop.permute.xlu2 %1439  ;;  %v2201_v24 = vrot.slane %v2187_v51, 5  ;;  %v2236_v18 = vrot.slane %v2224_v10, 6  ;;  %v2239_v10 = vrot.slane %v2226_v35, 6 }
 0x246   :  { %8671 = vst [vmem:[#allocation78_spill] sm:$0xff] %v6070_v8 }
 0x247   :  { %8672 = vst [vmem:[#allocation79_spill] sm:$0xff] %v6072_v17  ;;  %v2202_v12 = vsel %vm1122_vm10, %v2200_v63, %v2201_v24 }
 0x24a   :  { %2172 = vrot.lane.b32.xlu0 %v2165_v52, %s5175_s15  ;;  %2168 = vrot.lane.b32.xlu1 %v2160_v36, %s5175_s15  ;;  %v2237_v52 = vrot.slane %v2225_v16, 6  ;;  %v2195_v36 = vrot.slane %v2183_v5, 5 }
 0x24b   :  { %2207 = vrot.lane.b32.xlu2 %v2199_v54, %s5175_s15 }
 0x24c   :  { %v6084_v19 = vpop.permute.xlu0 %1811  ;;  %v6086_v53 = vpop.permute.xlu1 %1595  ;;  %v2197_v54 = vsel %vm1122_vm10, %v2195_v36, %v2196_v7  ;;  %v2229_v7 = vmul.f32 %v2223_v41, %v5573_v14  ;;  %v2203_v36 = vrot.slane %v2188_v31, 5 }
 0x24d   :  { %8673 = vst [vmem:[#allocation80_spill] sm:$0xff] %v6084_v19  ;;  %v6089_v44 = vpop.permute.xlu2 %1597  ;;  %v2238_v19 = vsel %vm1187_vm11, %v2236_v18, %v2237_v52  ;;  %v2240_v18 = vsel %vm1187_vm11, %v2237_v52, %v2239_v10  ;;  %v2241_v10 = vrot.slane %v2227_v29, 6 }
 0x24e   :  { %8674 = vst [vmem:[#allocation81_spill] sm:$0xff] %v6086_v53  ;;  %v2204_v47 = vsel %vm1122_vm10, %v2201_v24, %v2203_v36  ;;  %v2435_v53 = vstv %s4885_s0  ;;  %s6482_s0 = sld [smem:[#allocation11 + $0x46]] }
 0x24f   :  { %8675 = vst [vmem:[#allocation82_spill] sm:$0xff] %v6089_v44  ;;  %v2228_v44 = vmul.f32 %v6045_v30, %v2223_v41 }
 0x251   :  { %v2242_v63 = vrot.slane %v2228_v44, 6 }
 0x252   :  { %2209 = vrot.lane.b32.xlu0 %v2202_v12, %s5175_s15  ;;  %2205 = vrot.lane.b32.xlu1 %v2197_v54, %s5175_s15  ;;  %v2244_v12 = vrot.slane %v2229_v7, 6  ;;  %v2262_v54 = vstv %s4880_s21  ;;  %s6389_s21 = sld [smem:[#allocation11 + $0x2d]] }
 0x253   :  { %2246 = vrot.lane.b32.xlu2 %v2238_v19, %s5175_s15  ;;  %v2264_v19 = vmul.f32 %v2262_v54, %v5672_v32  ;;  %v2266_v35 = vmul.f32 %v2262_v54, %v5685_v40  ;;  %v2267_v44 = vmul.f32 %v2262_v54, %v5732_v11  ;;  %v2263_v52 = vmul.f32 %v2262_v54, %v5603_v39 }
 0x254   :  { %v6100_v51 = vpop.permute.xlu0 %1887  ;;  %v6102_v16 = vpop.permute.xlu1 %1753  ;;  %v2245_v14 = vsel %vm1187_vm11, %v2242_v63, %v2244_v12 }
 0x255   :  { %8676 = vst [vmem:[#allocation83_spill] sm:$0xff] %v6100_v51  ;;  %v6105_v5 = vpop.permute.xlu2 %1679  ;;  %v2276_v41 = vrot.slane %v2264_v19, 6  ;;  %v2280_v36 = vrot.slane %v2266_v35, 6  ;;  %v2243_v51 = vsel %vm1187_vm11, %v2241_v10, %v2242_v63  ;;  %v2268_v19 = vmul.f32 %v2262_v54, %v5826_v27 }
 0x256   :  { %8677 = vst [vmem:[#allocation84_spill] sm:$0xff] %v6102_v16  ;;  %v2303_v10 = vstv %s4881_s22  ;;  %s6418_s22 = sld [smem:[#allocation11 + $0x31]] }
 0x257   :  { %8678 = vst [vmem:[#allocation85_spill] sm:$0xff] %v6105_v5  ;;  %v2283_v63 = vrot.slane %v2268_v19, 6  ;;  %v6152_v19 = vld [vmem:[#allocation3] sm:$0xff] }
 0x258   :  { %v6451_v22 = vstv %s6389_s21  ;;  %s4906_s21 = sld [smem:[#allocation11 + $0x58]] }
 0x259   :  { %v6460_v37 = vmul.f32 %v6035_v48, %v6451_v22 }
 0x25a   :  { %2248 = vrot.lane.b32.xlu0 %v2240_v18, %s5175_s15  ;;  %2211 = vrot.lane.b32.xlu1 %v2204_v47, %s5175_s15  ;;  %v2281_v47 = vrot.slane %v2267_v44, 6  ;;  %v2275_v18 = vrot.slane %v2263_v52, 6 }
 0x25b   :  { %2252 = vrot.lane.b32.xlu2 %v2245_v14, %s5175_s15  ;;  %v2265_v14 = vmul.f32 %v2262_v54, %v5711_v62 }
 0x25c   :  { %v6118_v31 = vpop.permute.xlu0 %1359  ;;  %v6120_v24 = vpop.permute.xlu1 %1437  ;;  %v2277_v12 = vsel %vm1187_vm11, %v2275_v18, %v2276_v41  ;;  %v2282_v39 = vsel %vm1187_vm11, %v2280_v36, %v2281_v47  ;;  %v2284_v18 = vsel %vm1187_vm11, %v2281_v47, %v2283_v63  ;;  %v2305_v36 = vmul.f32 %v6035_v48, %v2303_v10 }
 0x25d   :  { %8679 = vst [vmem:[#allocation86_spill] sm:$0xff] %v6118_v31  ;;  %v6122_v7 = vpop.permute.xlu2 %1891  ;;  %v2278_v52 = vrot.slane %v2265_v14, 6  ;;  %v2306_v47 = vmul.f32 %v6042_v34, %v2303_v10  ;;  %v6510_v42 = vstv %s6418_s22  ;;  %s4907_s22 = sld [smem:[#allocation11 + $0x2e]] }
 0x25e   :  { %8680 = vst [vmem:[#allocation87_spill] sm:$0xff] %v6120_v24 }
 0x25f   :  { %8681 = vst [vmem:[#allocation88_spill] sm:$0xff] %v6122_v7 }
 0x262   :  { %2285 = vrot.lane.b32.xlu0 %v2277_v12, %s5175_s15  ;;  %2250 = vrot.lane.b32.xlu1 %v2243_v51, %s5175_s15  ;;  %v2279_v51 = vsel %vm1187_vm11, %v2276_v41, %v2278_v52  ;;  %v2304_v41 = vmul.f32 %v6007_v45, %v2303_v10 }
 0x263   :  { %2289 = vrot.lane.b32.xlu2 %v2282_v39, %s5175_s15  ;;  %v2328_v39 = vstv %s4882_s25  ;;  %s6429_s25 = sld [smem:[#allocation11 + $0x38]] }
 0x264   :  { %v6132_v29 = vpop.permute.xlu0 %1517  ;;  %v6134_v35 = vpop.permute.xlu1 %1519  ;;  %v2329_v52 = vmul.f32 %v6152_v19, %v2328_v39  ;;  %v2332_v7 = vmul.f32 %v2328_v39, %v5732_v11 }
 0x265   :  { %8682 = vst [vmem:[#allocation89_spill] sm:$0xff] %v6132_v29  ;;  %v6136_v44 = vpop.permute.xlu2 %1967  ;;  %v2554_v29 = vstv %s4888_s30  ;;  %s6532_s30 = sld [smem:[#allocation11 + $0x5b]] }
 0x266   :  { %8683 = vst [vmem:[#allocation90_spill] sm:$0xff] %v6134_v35 }
 0x267   :  { %8684 = vst [vmem:[#allocation91_spill] sm:$0xff] %v6136_v44  ;;  %v2355_v44 = vstv %s4883_s27  ;;  %s6453_s27 = sld [smem:[#allocation11 + $0x5e]] }
 0x268   :  { %v2357_v16 = vmul.f32 %v6035_v48, %v2355_v44  ;;  %v2358_v56 = vmul.f32 %v6058_v49, %v2355_v44 }
 0x269   :  { %v6514_v23 = vstv %s6429_s25  ;;  %s4908_s25 = sld [smem:[#allocation11 + $0x5f]] }
 0x26a   :  { %2291 = vrot.lane.b32.xlu0 %v2284_v18, %s5175_s15  ;;  %2287 = vrot.lane.b32.xlu1 %v2279_v51, %s5175_s15  ;;  %s4884_s15 = sld [smem:[#allocation11 + $0x3b]] }
 0x26b   :  { %2314 = vrot.lane.b32.xlu2 %v2305_v36, %s5176_s26  ;;  %v2330_v36 = vmul.f32 %v2328_v39, %v5672_v32 }
 0x26c   :  { %v6144_v54 = vpop.permute.xlu0 %1599  ;;  %v6146_v12 = vpop.permute.xlu1 %1677 }
 0x26d   :  { %8685 = vst [vmem:[#allocation92_spill] sm:$0xff] %v6144_v54  ;;  %v6148_v14 = vpop.permute.xlu2 %2006 }
 0x26e   :  { %8686 = vst [vmem:[#allocation93_spill] sm:$0xff] %v6146_v12 }
 0x26f   :  { %8687 = vst [vmem:[#allocation94_spill] sm:$0xff] %v6148_v14  ;;  %v2307_v14 = vmul.f32 %v6045_v30, %v2303_v10 }
 0x272   :  { %2316 = vrot.lane.b32.xlu0 %v2306_v47, %s5176_s26  ;;  %2312 = vrot.lane.b32.xlu1 %v2304_v41, %s5176_s26  ;;  %v2359_v47 = vmul.f32 %v6042_v34, %v2355_v44  ;;  %v2360_v41 = vmul.f32 %v6045_v30, %v2355_v44 }
 0x273   :  { %2337 = vrot.lane.b32.xlu2 %v2329_v52, %s5176_s26  ;;  %v2356_v52 = vmul.f32 %v6007_v45, %v2355_v44 }
 0x274   :  { %v6158_v63 = vpop.permute.xlu0 %1757  ;;  %v6160_v18 = vpop.permute.xlu1 %1759  ;;  %v2373_v12 = vrot.slane %v2359_v47, 1  ;;  %v2374_v5 = vrot.slane %v2360_v41, 1  ;;  %v6189_v47 = vld [vmem:[#allocation2 + $0x28] sm:$0x3f] }
 0x275   :  { %8688 = vst [vmem:[#allocation95_spill] sm:$0xff] %v6158_v63  ;;  %v6162_v51 = vpop.permute.xlu2 %2012 }
 0x276   :  { %8689 = vst [vmem:[#allocation96_spill] sm:$0xff] %v6160_v18  ;;  %v2369_v18 = vrot.slane %v2357_v16, 1 }
 0x277   :  { %8690 = vst [vmem:[#allocation97_spill] sm:$0xff] %v6162_v51 }
 0x27a   :  { %2339 = vrot.lane.b32.xlu0 %v2330_v36, %s5176_s26  ;;  %2318 = vrot.lane.b32.xlu1 %v2307_v14, %s5176_s26  ;;  %v2368_v36 = vrot.slane %v2356_v52, 1  ;;  %v2331_v14 = vmul.f32 %v2328_v39, %v5685_v40  ;;  %v2361_v39 = vmul.f32 %v6189_v47, %v2355_v44 }
 0x27b   :  { %2343 = vrot.lane.b32.xlu2 %v2332_v7, %s5176_s26  ;;  %v2394_v7 = vstv %s4884_s15  ;;  %s6464_s15 = sld [smem:[#allocation11 + $0x3f]] }
 0x27c   :  { %v6174_v51 = vpop.permute.xlu0 %1932  ;;  %v6176_v10 = vpop.permute.xlu1 %1889  ;;  %v2370_v20 = vsel %vm862_vm6, %v2368_v36, %v2369_v18  ;;  %v2397_v16 = vmul.f32 %v2394_v7, %v5711_v62  ;;  %v2399_v54 = vmul.f32 %v2394_v7, %v5732_v11 }
 0x27d   :  { %8691 = vst [vmem:[#allocation98_spill] sm:$0xff] %v6174_v51  ;;  %v6178_v63 = vpop.permute.xlu2 %2049 }
 0x27e   :  { %8692 = vst [vmem:[#allocation99_spill] sm:$0xff] %v6176_v10  ;;  %v2375_v10 = vsel %vm862_vm6, %v2373_v12, %v2374_v5  ;;  %v2410_v51 = vrot.slane %v2397_v16, 1  ;;  %v2376_v12 = vrot.slane %v2361_v39, 1 }
 0x27f   :  { %8693 = vst [vmem:[#allocation100_spill] sm:$0xff] %v6178_v63  ;;  %v2396_v63 = vmul.f32 %v2394_v7, %v5672_v32 }
 0x280   :  { %v2377_v32 = vsel %vm862_vm6, %v2374_v5, %v2376_v12 }
 0x282   :  { %2378 = vrot.lane.b32.xlu0 %v2370_v20, %s5176_s26  ;;  %2341 = vrot.lane.b32.xlu1 %v2331_v14, %s5176_s26  ;;  %v2371_v20 = vrot.slane %v2358_v56, 1  ;;  %v2408_v14 = vrot.slane %v2396_v63, 1  ;;  %v2437_v56 = vmul.f32 %v6035_v48, %v2435_v53  ;;  %v2395_v63 = vmul.f32 %v6152_v19, %v2394_v7 }
 0x283   :  { %2382 = vrot.lane.b32.xlu2 %v2375_v10, %s5176_s26  ;;  %v2398_v10 = vmul.f32 %v2394_v7, %v5685_v40  ;;  %v2436_v40 = vmul.f32 %v6007_v45, %v2435_v53 }
 0x284   :  { %v6192_v41 = vpop.permute.xlu0 %1969  ;;  %v6194_v52 = vpop.permute.xlu1 %1965  ;;  %v2372_v62 = vsel %vm862_vm6, %v2369_v18, %v2371_v20  ;;  %v2411_v44 = vsel %vm862_vm6, %v2408_v14, %v2410_v51  ;;  %v2413_v20 = vrot.slane %v2399_v54, 1  ;;  %v2449_v12 = vrot.slane %v2437_v56, 2 }
 0x285   :  { %8694 = vst [vmem:[#allocation101_spill] sm:$0xff] %v6192_v41  ;;  %v6196_v36 = vpop.permute.xlu2 %2088  ;;  %v2412_v39 = vrot.slane %v2398_v10, 1  ;;  %v2400_v54 = vmul.f32 %v2394_v7, %v5826_v27 }
 0x286   :  { %8695 = vst [vmem:[#allocation102_spill] sm:$0xff] %v6194_v52 }
 0x287   :  { %8696 = vst [vmem:[#allocation103_spill] sm:$0xff] %v6196_v36  ;;  %v2414_v51 = vsel %vm862_vm6, %v2412_v39, %v2413_v20  ;;  %v2438_v36 = vmul.f32 %v6058_v49, %v2435_v53 }
 0x28a   :  { %2384 = vrot.lane.b32.xlu0 %v2377_v32, %s5176_s26  ;;  %2380 = vrot.lane.b32.xlu1 %v2372_v62, %s5176_s26  ;;  %v2407_v32 = vrot.slane %v2395_v63, 1  ;;  %v2448_v62 = vrot.slane %v2436_v40, 2  ;;  %v2451_v40 = vrot.slane %v2438_v36, 2 }
 0x28b   :  { %2419 = vrot.lane.b32.xlu2 %v2411_v44, %s5176_s26 }
 0x28c   :  { %v6208_v16 = vpop.permute.xlu0 %2008  ;;  %v6210_v5 = vpop.permute.xlu1 %1971  ;;  %v2409_v44 = vsel %vm862_vm6, %v2407_v32, %v2408_v14  ;;  %v2450_v52 = vsel %vm927_vm7, %v2448_v62, %v2449_v12  ;;  %v2441_v14 = vmul.f32 %v6189_v47, %v2435_v53  ;;  %v2415_v32 = vrot.slane %v2400_v54, 1 }
 0x28d   :  { %8697 = vst [vmem:[#allocation104_spill] sm:$0xff] %v6208_v16  ;;  %v6213_v18 = vpop.permute.xlu2 %2125  ;;  %v2452_v62 = vsel %vm927_vm7, %v2449_v12, %v2451_v40 }
 0x28e   :  { %8698 = vst [vmem:[#allocation105_spill] sm:$0xff] %v6210_v5  ;;  %v2416_v41 = vsel %vm862_vm6, %v2413_v20, %v2415_v32  ;;  %v2515_v5 = vstv %s4887_s29  ;;  %s6500_s29 = sld [smem:[#allocation11 + $0x54]] }
 0x28f   :  { %8699 = vst [vmem:[#allocation106_spill] sm:$0xff] %v6213_v18  ;;  %v2440_v18 = vmul.f32 %v6045_v30, %v2435_v53 }
 0x291   :  { %v2454_v39 = vrot.slane %v2440_v18, 2  ;;  %v6240_v18 = vld [vmem:[#allocation3 + $0x18] sm:$0xff] }
 0x292   :  { %2421 = vrot.lane.b32.xlu0 %v2414_v51, %s5176_s26  ;;  %2417 = vrot.lane.b32.xlu1 %v2409_v44, %s5176_s26  ;;  %v2456_v51 = vrot.slane %v2441_v14, 2  ;;  %v2474_v44 = vstv %s4886_s28  ;;  %s6491_s28 = sld [smem:[#allocation11 + $0x4d]]  ;;  %v841_v33 = vmul.f32 %v6240_v18, %v6510_v42 }
 0x293   :  { %2458 = vrot.lane.b32.xlu2 %v2450_v52, %s5176_s26  ;;  %v6233_v52 = vld [vmem:[#allocation3 + $0x8] sm:$0xff]  ;;  %v2478_v54 = vmul.f32 %v6240_v18, %v2474_v44  ;;  %v2479_v12 = vmul.f32 %v2474_v44, %v5732_v11  ;;  %v2475_v20 = vmul.f32 %v6152_v19, %v2474_v44  ;;  %v6254_v11 = vld [vmem:[#allocation3 + $0x10] sm:$0x3f] }
 0x294   :  { %v6224_v10 = vpop.permute.xlu0 %2045  ;;  %v6226_v56 = vpop.permute.xlu1 %2010  ;;  %v2476_v7 = vmul.f32 %v6233_v52, %v2474_v44  ;;  %v2457_v36 = vsel %vm927_vm7, %v2454_v39, %v2456_v51  ;;  %v6583_v46 = vstv %s6500_s29  ;;  %s4912_s29 = sld [smem:[#allocation11 + $0x3d]] }
 0x295   :  { %8700 = vst [vmem:[#allocation107_spill] sm:$0xff] %v6224_v10  ;;  %v6229_v63 = vpop.permute.xlu2 %2131  ;;  %v2439_v10 = vmul.f32 %v6042_v34, %v2435_v53  ;;  %v2493_v51 = vrot.slane %v2479_v12, 2 }
 0x296   :  { %8701 = vst [vmem:[#allocation108_spill] sm:$0xff] %v6226_v56  ;;  %v2488_v32 = vrot.slane %v2476_v7, 2 }
 0x297   :  { %8702 = vst [vmem:[#allocation109_spill] sm:$0xff] %v6229_v63  ;;  %v2487_v63 = vrot.slane %v2475_v20, 2 }
 0x298   :  { %v6571_v57 = vstv %s6491_s28  ;;  %8744 = vst [vmem:[#allocation149_spill] sm:$0xff] %v6583_v46  ;;  %s4911_s28 = sld [smem:[#allocation11 + $0xc]] }
 0x299   :  { %v2489_v56 = vsel %vm927_vm7, %v2487_v63, %v2488_v32  ;;  %v2480_v63 = vmul.f32 %v2474_v44, %v5826_v27  ;;  %8741 = vst [vmem:[#allocation147_spill] sm:$0xff] %v6571_v57 }
 0x29a   :  { %2460 = vrot.lane.b32.xlu0 %v2452_v62, %s5176_s26  ;;  %2423 = vrot.lane.b32.xlu1 %v2416_v41, %s5176_s26  ;;  %v2453_v41 = vrot.slane %v2439_v10, 2  ;;  %v2492_v62 = vrot.slane %v2478_v54, 2  ;;  %v2517_v10 = vmul.f32 %v6035_v48, %v2515_v5  ;;  %v2518_v54 = vmul.f32 %v6058_v49, %v2515_v5 }
 0x29b   :  { %2464 = vrot.lane.b32.xlu2 %v2457_v36, %s5176_s26  ;;  %v2477_v36 = vmul.f32 %v6254_v11, %v2474_v44 }
 0x29c   :  { %v6246_v14 = vpop.permute.xlu0 %2051  ;;  %v6248_v53 = vpop.permute.xlu1 %2047  ;;  %v2455_v16 = vsel %vm927_vm7, %v2453_v41, %v2454_v39  ;;  %v2494_v7 = vsel %vm927_vm7, %v2492_v62, %v2493_v51  ;;  %v2519_v62 = vmul.f32 %v6042_v34, %v2515_v5 }
 0x29d   :  { %8703 = vst [vmem:[#allocation110_spill] sm:$0xff] %v6246_v14  ;;  %v6250_v40 = vpop.permute.xlu2 %2170  ;;  %v2490_v41 = vrot.slane %v2477_v36, 2  ;;  %v2556_v36 = vmul.f32 %v6233_v52, %v2554_v29 }
 0x29e   :  { %8704 = vst [vmem:[#allocation111_spill] sm:$0xff] %v6248_v53 }
 0x29f   :  { %8705 = vst [vmem:[#allocation112_spill] sm:$0xff] %v6250_v40  ;;  %v2531_v40 = vrot.slane %v2518_v54, 3  ;;  %v2491_v14 = vsel %vm927_vm7, %v2488_v32, %v2490_v41  ;;  %v2555_v32 = vmul.f32 %v6152_v19, %v2554_v29  ;;  %v2533_v41 = vrot.slane %v2519_v62, 3 }
 0x2a2   :  { %2497 = vrot.lane.b32.xlu0 %v2489_v56, %s5176_s26  ;;  %2462 = vrot.lane.b32.xlu1 %v2455_v16, %s5176_s26  ;;  %v2529_v56 = vrot.slane %v2517_v10, 3  ;;  %v2495_v16 = vrot.slane %v2480_v63, 2  ;;  %v2516_v10 = vmul.f32 %v6007_v45, %v2515_v5 }
 0x2a3   :  { %2501 = vrot.lane.b32.xlu2 %v2494_v7, %s5176_s26  ;;  %v2520_v7 = vmul.f32 %v6045_v30, %v2515_v5 }
 0x2a4   :  { %v6264_v39 = vpop.permute.xlu0 %2090  ;;  %v6266_v12 = vpop.permute.xlu1 %2086  ;;  %v2496_v53 = vsel %vm927_vm7, %v2493_v51, %v2495_v16  ;;  %v2532_v44 = vsel %vm992_vm8, %v2529_v56, %v2531_v40  ;;  %v2568_v16 = vrot.slane %v2556_v36, 3 }
 0x2a5   :  { %8706 = vst [vmem:[#allocation113_spill] sm:$0xff] %v6264_v39  ;;  %v6268_v20 = vpop.permute.xlu2 %2207 }
 0x2a6   :  { %8707 = vst [vmem:[#allocation114_spill] sm:$0xff] %v6266_v12  ;;  %v2557_v12 = vmul.f32 %v6254_v11, %v2554_v29 }
 0x2a7   :  { %8708 = vst [vmem:[#allocation115_spill] sm:$0xff] %v6268_v20  ;;  %v2567_v20 = vrot.slane %v2555_v32, 3 }
 0x2a9   :  { %v2569_v39 = vsel %vm992_vm8, %v2567_v20, %v2568_v16 }
 0x2aa   :  { %2503 = vrot.lane.b32.xlu0 %v2496_v53, %s5176_s26  ;;  %2499 = vrot.lane.b32.xlu1 %v2491_v14, %s5176_s26  ;;  %v2534_v53 = vrot.slane %v2520_v7, 3  ;;  %v2528_v14 = vrot.slane %v2516_v10, 3  ;;  %v2521_v7 = vmul.f32 %v6189_v47, %v2515_v5  ;;  %v2558_v5 = vmul.f32 %v6240_v18, %v2554_v29 }
 0x2ab   :  { %2540 = vrot.lane.b32.xlu2 %v2532_v44, %s5176_s26 }
 0x2ac   :  { %v6280_v54 = vpop.permute.xlu0 %2127  ;;  %v6282_v51 = vpop.permute.xlu1 %2092  ;;  %v2535_v40 = vsel %vm992_vm8, %v2533_v41, %v2534_v53  ;;  %v2530_v44 = vsel %vm992_vm8, %v2528_v14, %v2529_v56  ;;  %v2560_v56 = vmul.f32 %v2554_v29, %v5826_v27  ;;  %v2570_v41 = vrot.slane %v2557_v12, 3 }
 0x2ad   :  { %8709 = vst [vmem:[#allocation116_spill] sm:$0xff] %v6280_v54  ;;  %v6285_v63 = vpop.permute.xlu2 %2246  ;;  %v6293_v54 = vld [vmem:[#allocation3 + $0x20] sm:$0xff] }
 0x2ae   :  { %8710 = vst [vmem:[#allocation117_spill] sm:$0xff] %v6282_v51  ;;  %v2559_v62 = vmul.f32 %v6293_v54, %v2554_v29  ;;  %v2575_v20 = vrot.slane %v2560_v56, 3 }
 0x2af   :  { %8711 = vst [vmem:[#allocation118_spill] sm:$0xff] %v6285_v63  ;;  %v2571_v63 = vsel %vm992_vm8, %v2568_v16, %v2570_v41 }
 0x2b0   :  { %v2573_v14 = vrot.slane %v2559_v62, 3 }
 0x2b2   :  { %2542 = vrot.lane.b32.xlu0 %v2535_v40, %s5176_s26  ;;  %2538 = vrot.lane.b32.xlu1 %v2530_v44, %s5176_s26  ;;  %v2536_v40 = vrot.slane %v2521_v7, 3  ;;  %v2595_v44 = vstv %s4889_s5  ;;  %v2576_v27 = vsel %vm992_vm8, %v2573_v14, %v2575_v20  ;;  %s6660_s5 = sld [smem:[#allocation11 + $0x4]] }
 0x2b3   :  { %2577 = vrot.lane.b32.xlu2 %v2569_v39, %s5176_s26  ;;  %v2597_v39 = vmul.f32 %v6035_v48, %v2595_v44  ;;  %v2599_v12 = vmul.f32 %v6042_v34, %v2595_v44  ;;  %v2600_v62 = vmul.f32 %v6045_v30, %v2595_v44  ;;  %v2596_v16 = vmul.f32 %v6007_v45, %v2595_v44 }
 0x2b4   :  { %v6298_v36 = vpop.permute.xlu0 %2166  ;;  %v6300_v10 = vpop.permute.xlu1 %2129  ;;  %v2537_v51 = vsel %vm992_vm8, %v2534_v53, %v2536_v40  ;;  %v2601_v20 = vmul.f32 %v6189_v47, %v2595_v44 }
 0x2b5   :  { %8712 = vst [vmem:[#allocation119_spill] sm:$0xff] %v6298_v36  ;;  %v6303_v32 = vpop.permute.xlu2 %2252  ;;  %v2609_v56 = vrot.slane %v2597_v39, 4  ;;  %v2613_v41 = vrot.slane %v2599_v12, 4  ;;  %v2608_v40 = vrot.slane %v2596_v16, 4 }
 0x2b6   :  { %8713 = vst [vmem:[#allocation120_spill] sm:$0xff] %v6300_v10  ;;  %v2634_v10 = vstv %s4890_s1  ;;  %s6766_s1 = sld [smem:[#allocation11 + $0x35]] }
 0x2b7   :  { %8714 = vst [vmem:[#allocation121_spill] sm:$0xff] %v6303_v32  ;;  %v2610_v32 = vsel %vm1057_vm9, %v2608_v40, %v2609_v56  ;;  %v2637_v12 = vmul.f32 %v6254_v11, %v2634_v10 }
 0x2b8   :  { %v2835_v9 = vstv %s6660_s5  ;;  %s7730_s5 = sld [smem:[#allocation11 + $0x44]] }
 0x2ba   :  { %2579 = vrot.lane.b32.xlu0 %v2571_v63, %s5176_s26  ;;  %2544 = vrot.lane.b32.xlu1 %v2537_v51, %s5176_s26  ;;  %v2572_v63 = vrot.slane %v2558_v5, 3  ;;  %v2614_v51 = vrot.slane %v2600_v62, 4  ;;  %v2636_v5 = vmul.f32 %v6233_v52, %v2634_v10 }
 0x2bb   :  { %2583 = vrot.lane.b32.xlu2 %v2576_v27, %s5176_s26  ;;  %v2598_v27 = vmul.f32 %v6058_v49, %v2595_v44 }
 0x2bc   :  { %v6316_v53 = vpop.permute.xlu0 %2172  ;;  %v6318_v7 = vpop.permute.xlu1 %2168  ;;  %v2574_v36 = vsel %vm992_vm8, %v2572_v63, %v2573_v14  ;;  %v2615_v39 = vsel %vm1057_vm9, %v2613_v41, %v2614_v51  ;;  %v2616_v63 = vrot.slane %v2601_v20, 4  ;;  %v2648_v40 = vrot.slane %v2636_v5, 4 }
 0x2bd   :  { %8715 = vst [vmem:[#allocation122_spill] sm:$0xff] %v6316_v53  ;;  %v6320_v29 = vpop.permute.xlu2 %2289  ;;  %v2611_v44 = vrot.slane %v2598_v27, 4  ;;  %v2675_v53 = vstv %s4891_s11  ;;  %v2635_v20 = vmul.f32 %v6152_v19, %v2634_v10  ;;  %s6771_s11 = sld [smem:[#allocation11 + $0xb]] }
 0x2be   :  { %8716 = vst [vmem:[#allocation123_spill] sm:$0xff] %v6318_v7  ;;  %v2639_v7 = vmul.f32 %v6293_v54, %v2634_v10  ;;  %v2677_v27 = vmul.f32 %v6035_v48, %v2675_v53  ;;  %v2676_v5 = vmul.f32 %v6007_v45, %v2675_v53 }
 0x2bf   :  { %8717 = vst [vmem:[#allocation124_spill] sm:$0xff] %v6320_v29  ;;  %v2612_v41 = vsel %vm1057_vm9, %v2609_v56, %v2611_v44  ;;  %v2638_v29 = vmul.f32 %v6240_v18, %v2634_v10 }
 0x2c1   :  { %v2652_v44 = vrot.slane %v2638_v29, 4  ;;  %v2680_v29 = vmul.f32 %v6045_v30, %v2675_v53 }
 0x2c2   :  { %2618 = vrot.lane.b32.xlu0 %v2610_v32, %s5176_s26  ;;  %2581 = vrot.lane.b32.xlu1 %v2574_v36, %s5176_s26  ;;  %v2650_v32 = vrot.slane %v2637_v12, 4  ;;  %v2617_v36 = vsel %vm1057_vm9, %v2614_v51, %v2616_v63  ;;  %v2653_v63 = vrot.slane %v2639_v7, 4 }
 0x2c3   :  { %2622 = vrot.lane.b32.xlu2 %v2615_v39, %s5176_s26 }
 0x2c4   :  { %v6332_v62 = vpop.permute.xlu0 %2209  ;;  %v6334_v16 = vpop.permute.xlu1 %2205  ;;  %v2651_v39 = vsel %vm1057_vm9, %v2648_v40, %v2650_v32  ;;  %v2654_v32 = vsel %vm1057_vm9, %v2652_v44, %v2653_v63  ;;  %v2681_v44 = vmul.f32 %v6189_v47, %v2675_v53 }
 0x2c5   :  { %8718 = vst [vmem:[#allocation125_spill] sm:$0xff] %v6332_v62  ;;  %v6336_v14 = vpop.permute.xlu2 %2314 }
 0x2c6   :  { %8719 = vst [vmem:[#allocation126_spill] sm:$0xff] %v6334_v16  ;;  %v2678_v16 = vmul.f32 %v6058_v49, %v2675_v53 }
 0x2c7   :  { %8720 = vst [vmem:[#allocation127_spill] sm:$0xff] %v6336_v14  ;;  %v2688_v14 = vrot.slane %v2676_v5, 5 }
 0x2ca   :  { %2624 = vrot.lane.b32.xlu0 %v2617_v36, %s5176_s26  ;;  %2620 = vrot.lane.b32.xlu1 %v2612_v41, %s5176_s26  ;;  %v2689_v36 = vrot.slane %v2677_v27, 5  ;;  %v2647_v41 = vrot.slane %v2635_v20, 4  ;;  %v6369_v27 = vld [vmem:[#allocation3 + $0x28] sm:$0x3f] }
 0x2cb   :  { %2659 = vrot.lane.b32.xlu2 %v2651_v39, %s5176_s26 }
 0x2cc   :  { %v6348_v51 = vpop.permute.xlu0 %2248  ;;  %v6350_v56 = vpop.permute.xlu1 %2211  ;;  %v2649_v39 = vsel %vm1057_vm9, %v2647_v41, %v2648_v40  ;;  %v2690_v7 = vsel %vm1122_vm10, %v2688_v14, %v2689_v36  ;;  %v2640_v40 = vmul.f32 %v6369_v27, %v2634_v10  ;;  %v2691_v14 = vrot.slane %v2678_v16, 5 }
 0x2cd   :  { %8721 = vst [vmem:[#allocation128_spill] sm:$0xff] %v6348_v51  ;;  %v6353_v12 = vpop.permute.xlu2 %2337  ;;  %v2696_v10 = vrot.slane %v2681_v44, 5  ;;  %v6410_v44 = vstv %s4845_s17  ;;  %s7223_s17 = sld [smem:[#allocation11 + $0x4a]] }
 0x2ce   :  { %8722 = vst [vmem:[#allocation129_spill] sm:$0xff] %v6350_v56  ;;  %v6421_v56 = vstv %s6355_s13  ;;  %v6685_v6 = vmul.f32 %v6681_v1, %v6410_v44  ;;  %s6990_s13 = sld [smem:[#allocation11 + $0x12]] }
 0x2cf   :  { %8723 = vst [vmem:[#allocation130_spill] sm:$0xff] %v6353_v12  ;;  %v2692_v12 = vsel %vm1122_vm10, %v2689_v36, %v2691_v14  ;;  %v6412_v14 = vstv %s4847_s18  ;;  %s7266_s18 = sld [smem:[#allocation11 + $0x20]] }
 0x2d0   :  { %v6530_v0 = vmul.f32 %v6035_v48, %v6412_v14 }
 0x2d2   :  { %2661 = vrot.lane.b32.xlu0 %v2654_v32, %s5176_s26  ;;  %2657 = vrot.lane.b32.xlu1 %v2649_v39, %s5176_s26  ;;  %v2694_v32 = vrot.slane %v2680_v29, 5  ;;  %v2655_v39 = vrot.slane %v2640_v40, 4  ;;  %v6404_v40 = vstv %s6366_s16  ;;  %8735 = vst [vmem:[#allocation142_spill] sm:$0xff] %v6530_v0  ;;  %s7160_s16 = sld [smem:[#allocation11 + $0x19]] }
 0x2d3   :  { %2698 = vrot.lane.b32.xlu2 %v2690_v7, %s5176_s26  ;;  %v2714_v7 = vstv %s4892_s12  ;;  %v6497_v26 = vmul.f32 %v6035_v48, %v6404_v40  ;;  %s5177_s12 = smov 124  }
 0x2d4   :  { %v6372_v20 = vpop.permute.xlu0 %2285  ;;  %v6374_v5 = vpop.permute.xlu1 %2250  ;;  %v2697_v16 = vsel %vm1122_vm10, %v2694_v32, %v2696_v10  ;;  %v2718_v29 = vmul.f32 %v6240_v18, %v2714_v7  ;;  %v6396_v36 = vmul.f32 %v6293_v54, %v2714_v7  ;;  %v2717_v58 = vmul.f32 %v6254_v11, %v2714_v7 }
 0x2d5   :  { %8724 = vst [vmem:[#allocation131_spill] sm:$0xff] %v6372_v20  ;;  %v6377_v41 = vpop.permute.xlu2 %2343  ;;  %v2656_v20 = vsel %vm1057_vm9, %v2653_v63, %v2655_v39  ;;  %v6401_v63 = vstv %s6360_s14  ;;  %v8743_v50 = vrot.slane %v6497_v26, 2  ;;  %s7048_s14 = sld [smem:[#allocation11 + $0x43]] }
 0x2d6   :  { %8725 = vst [vmem:[#allocation132_spill] sm:$0xff] %v6374_v5  ;;  %v6386_v5 = vmul.f32 %v6233_v52, %v2714_v7  ;;  %v2732_v62 = vrot.slane %v2718_v29, 5  ;;  %v2733_v51 = vrot.slane %v6396_v36, 5  ;;  %v6445_v29 = vmul.f32 %v6007_v45, %v6412_v14 }
 0x2d7   :  { %8726 = vst [vmem:[#allocation133_spill] sm:$0xff] %v6377_v41  ;;  %v2679_v41 = vmul.f32 %v6042_v34, %v2675_v53  ;;  %v2715_v53 = vmul.f32 %v6152_v19, %v2714_v7  ;;  %v2730_v60 = vrot.slane %v2717_v58, 5 }
 0x2d8   :  { %v2728_v10 = vrot.slane %v6386_v5, 5  ;;  %v6437_v5 = vmul.f32 %v6007_v45, %v6404_v40  ;;  %v2734_v43 = vsel %vm1122_vm10, %v2732_v62, %v2733_v51  ;;  %v2720_v62 = vmul.f32 %v6369_v27, %v2714_v7 }
 0x2d9   :  { %v2727_v8 = vrot.slane %v2715_v53, 5 }
 0x2da   :  { %2700 = vrot.lane.b32.xlu0 %v2692_v12, %s5176_s26  ;;  %2663 = vrot.lane.b32.xlu1 %v2656_v20, %s5176_s26 }
 0x2db   :  { %2704 = vrot.lane.b32.xlu2 %v2697_v16, %s5176_s26  ;;  %v2693_v16 = vrot.slane %v2679_v41, 5  ;;  %v6441_v41 = vmul.f32 %v6007_v45, %v6410_v44  ;;  %v2729_v36 = vsel %vm1122_vm10, %v2727_v8, %v2728_v10  ;;  %v2758_v8 = vmul.f32 %v6058_v49, %v6451_v22 }
 0x2dc   :  { %v6406_v12 = vpop.permute.xlu0 %2291  ;;  %v6408_v20 = vpop.permute.xlu1 %2287  ;;  %v6480_v49 = vmul.f32 %v6035_v48, %v6401_v63 }
 0x2dd   :  { %8727 = vst [vmem:[#allocation134_spill] sm:$0xff] %v6406_v12  ;;  %v6414_v39 = vpop.permute.xlu2 %2382  ;;  %v6424_v12 = vstv %s6379_s19  ;;  %v2695_v53 = vsel %vm1122_vm10, %v2693_v16, %v2694_v32  ;;  %v993_v7 = vrot.slane %v6441_v41, 3  ;;  %v6505_v41 = vmul.f32 %v6035_v48, %v6410_v44  ;;  %s4904_s19 = sld [smem:[#allocation11 + $0x51]] }
 0x2de   :  { %8728 = vst [vmem:[#allocation135_spill] sm:$0xff] %v6408_v20  ;;  %v6427_v20 = vstv %s6381_s20  ;;  %v6468_v32 = vmul.f32 %v6007_v45, %v6424_v12  ;;  %v8740_v17 = vrot.slane %v6480_v49, 1  ;;  %s4905_s20 = sld [smem:[#allocation11 + $0x27]] }
 0x2df   :  { %8729 = vst [vmem:[#allocation136_spill] sm:$0xff] %v6414_v39  ;;  %v6433_v39 = vmul.f32 %v6007_v45, %v6401_v63  ;;  %v6472_v16 = vmul.f32 %v6007_v45, %v6427_v20 }
 0x2e0   :  { %8730 = vst [vmem:[#allocation137_spill] sm:$0xff] %v6424_v12 }
 0x2e1   :  { %v863_v35 = vrot.slane %v6433_v39, 1  ;;  %v2769_v39 = vrot.slane %v6460_v37, 6  ;;  %8734 = vst [vmem:[#allocation141_spill] sm:$0xff] %v6505_v41  ;;  %v1188_v58 = vrot.slane %v6472_v16, 6  ;;  %v6525_v16 = vstv %s6453_s27  ;;  %s4909_s27 = sld [smem:[#allocation11 + $0x5]] }
 0x2e2   :  { %2737 = vrot.lane.b32.xlu0 %v2729_v36, %s5176_s26  ;;  %2702 = vrot.lane.b32.xlu1 %v2695_v53, %s5176_s26  ;;  %v830_v36 = vmul.f32 %v6007_v45, %v6421_v56  ;;  %v2798_v4 = vmul.f32 %v6240_v18, %v6525_v16 }
 0x2e3   :  { %2741 = vrot.lane.b32.xlu2 %v2734_v43, %s5176_s26  ;;  %v928_v43 = vrot.slane %v6437_v5, 2  ;;  %v2771_v5 = vrot.slane %v2758_v8, 6  ;;  %v2731_v8 = vsel %vm1122_vm10, %v2728_v10, %v2730_v60  ;;  %v6544_v10 = vmul.f32 %v6035_v48, %v6424_v12 }
 0x2e4   :  { %v6484_v53 = vpop.permute.xlu0 %2316  ;;  %v6486_v3 = vpop.permute.xlu1 %2312  ;;  %v2812_v25 = vrot.slane %v2798_v4, 6 }
 0x2e5   :  { %8731 = vst [vmem:[#allocation138_spill] sm:$0xff] %v6484_v53  ;;  %v6493_v24 = vpop.permute.xlu2 %2419  ;;  %v1123_v53 = vrot.slane %v6468_v32, 5  ;;  %v6522_v32 = vmul.f32 %v6045_v30, %v6451_v22  ;;  %v2772_v60 = vsel %vm1187_vm11, %v2769_v39, %v2771_v5  ;;  %v2756_v5 = vmul.f32 %v6007_v45, %v6451_v22 }
 0x2e6   :  { %8732 = vst [vmem:[#allocation139_spill] sm:$0xff] %v6486_v3  ;;  %v1058_v3 = vrot.slane %v6445_v29, 4  ;;  %v2759_v29 = vmul.f32 %v6042_v34, %v6451_v22 }
 0x2e7   :  { %8733 = vst [vmem:[#allocation140_spill] sm:$0xff] %v6493_v24  ;;  %v2735_v24 = vrot.slane %v2720_v62, 5  ;;  %v6548_v62 = vmul.f32 %v6035_v48, %v6427_v20  ;;  %v2795_v48 = vmul.f32 %v6152_v19, %v6525_v16  ;;  %v2774_v13 = vrot.slane %v6522_v32, 6 }
 0x2e8   :  { %8736 = vst [vmem:[#allocation143_spill] sm:$0xff] %v6544_v10  ;;  %v2773_v59 = vrot.slane %v2759_v29, 6  ;;  %v8590_v29 = vrot.slane %v6544_v10, 5  ;;  %v6615_v32 = vstv %s6532_s30  ;;  %s7670_s30 = sld [smem:[#allocation11 + $0x13]] }
 0x2e9   :  { %v2736_v37 = vsel %vm1122_vm10, %v2733_v51, %v2735_v24  ;;  %v6539_v24 = vmul.f32 %v6233_v52, %v6525_v16  ;;  %8737 = vst [vmem:[#allocation144_spill] sm:$0xff] %v6548_v62  ;;  %v839_v51 = vmul.f32 %v6152_v19, %v6510_v42 }
 0x2ea   :  { %2743 = vrot.lane.b32.xlu0 %v2736_v37, %s5176_s26  ;;  %2739 = vrot.lane.b32.xlu1 %v2731_v8, %s5176_s26  ;;  %v6554_v37 = vstv %s6464_s15  ;;  %v6557_v8 = vstv %s6482_s0  ;;  %8747 = vst [vmem:[#allocation150_spill] sm:$0xff] %v6615_v32  ;;  %s5178_s15 = smov 123   ;;  %s4910_s0 = sld [smem:[#allocation11 + $0x36]] }
 0x2eb   :  { %2780 = vrot.lane.b32.xlu2 %v2772_v60, %s5176_s26  ;;  %v865_v60 = vsel %vm862_vm6, %v863_v35, %v8740_v17  ;;  %v2808_v38 = vrot.slane %v6539_v24, 6  ;;  %v8745_v17 = vrot.slane %v6505_v41, 3  ;;  %v843_v28 = vadd.f32 %v839_v51, %v830_v36 }
 0x2ec   :  { %v6561_v15 = vpop.permute.xlu0 %2339  ;;  %v6563_v2 = vpop.permute.xlu1 %2318  ;;  %v2807_v24 = vrot.slane %v2795_v48, 6  ;;  %v2797_v36 = vmul.f32 %v6254_v11, %v6525_v16  ;;  %v8746_v51 = vrot.slane %v6530_v0, 4  ;;  %v6763_v0 = vld [vmem:[#allocation2] sm:$0xff] }
 0x2ed   :  { %8738 = vst [vmem:[#allocation145_spill] sm:$0xff] %v6561_v15  ;;  %v6573_v45 = vpop.permute.xlu2 %2458  ;;  %v6579_v15 = vsel %vm927_vm7, %v928_v43, %v8743_v50  ;;  %v6589_v35 = vsel %vm992_vm8, %v993_v7, %v8745_v17  ;;  %v6595_v50 = vmul.f32 %v6152_v19, %v6514_v23  ;;  %v6599_v43 = vmul.f32 %v6152_v19, %v6554_v37 }
 0x2ee   :  { %8739 = vst [vmem:[#allocation146_spill] sm:$0xff] %v6563_v2  ;;  %v6603_v2 = vmul.f32 %v6152_v19, %v6557_v8  ;;  %v2775_v7 = vsel %vm1187_vm11, %v2773_v59, %v2774_v13  ;;  %v2809_v48 = vsel %vm1187_vm11, %v2807_v24, %v2808_v38  ;;  %v6622_v59 = vmul.f32 %v6293_v54, %v6525_v16 }
 0x2ef   :  { %8742 = vst [vmem:[#allocation148_spill] sm:$0xff] %v6573_v45  ;;  %v2768_v45 = vrot.slane %v2756_v5, 6  ;;  %v6612_v5 = vsel %vm1057_vm9, %v1058_v3, %v8746_v51  ;;  %v8749_v3 = vrot.slane %v6548_v62, 6  ;;  %v2761_v24 = vmul.f32 %v6189_v47, %v6451_v22 }
 0x2f0   :  { %v877_v61 = vadd.f32 %v865_v60, %v843_v28  ;;  %v6656_v22 = vmul.f32 %v6152_v19, %v6615_v32  ;;  %v2810_v51 = vrot.slane %v2797_v36, 6  ;;  %v6670_v28 = vmul.f32 %v6045_v30, %v6401_v63  ;;  %8764 = vst [vmem:[#allocation163_spill] sm:$0xff] %v6763_v0 }
 0x2f1   :  { %v2770_v17 = vsel %vm1187_vm11, %v2768_v45, %v2769_v39  ;;  %v6627_v39 = vsel %vm1122_vm10, %v1123_v53, %v8590_v29  ;;  %v6632_v45 = vsel %vm1187_vm11, %v1188_v58, %v8749_v3  ;;  %v6645_v53 = vmul.f32 %v6152_v19, %v6583_v46 }
 0x2f2   :  { %2782 = vrot.lane.b32.xlu0 %v2775_v7, %s5176_s26  ;;  %2778 = vrot.lane.b32.xlu1 %v2770_v17, %s5176_s26  ;;  %8748 = vst [vmem:[#allocation151_spill] sm:$0xff] %v6627_v39  ;;  %v6636_v7 = vmul.f32 %v6152_v19, %v6571_v57  ;;  %v894_v17 = vrot.slane %v6595_v50, 1  ;;  %v2800_v3 = vmul.f32 %v6369_v27, %v6525_v16  ;;  %v2813_v60 = vrot.slane %v6622_v59, 6 }
 0x2f3   :  { %8750 = vst [vmem:[#allocation152_spill] sm:$0xff] %v6632_v45  ;;  %2817 = vrot.lane.b32.xlu2 %v2809_v48, %s5176_s26  ;;  %v918_v36 = vmul.f32 %v6042_v34, %v6404_v40  ;;  %v2776_v31 = vrot.slane %v2761_v24, 6  ;;  %v6691_v59 = vmul.f32 %v6687_v21, %v6410_v44  ;;  %v6713_v16 = vmul.f32 %v6233_v52, %v6554_v37 }
 0x2f4   :  { %v6647_v29 = vpop.permute.xlu0 %2378  ;;  %v6649_v58 = vpop.permute.xlu1 %2341  ;;  %v8762_v45 = vrot.slane %v6670_v28, 1  ;;  %v6761_v39 = vmul.f32 %v6293_v54, %v6514_v23 }
 0x2f5   :  { %8751 = vst [vmem:[#allocation153_spill] sm:$0xff] %v6647_v29  ;;  %v6658_v50 = vpop.permute.xlu2 %2464  ;;  %v6664_v29 = vmul.f32 %v6233_v52, %v6514_v23  ;;  %v2777_v24 = vsel %vm1187_vm11, %v2774_v13, %v2776_v31  ;;  %v933_v48 = vrot.slane %v918_v36, 2  ;;  %v1048_v13 = vmul.f32 %v6681_v1, %v6412_v14 }
 0x2f6   :  { %8752 = vst [vmem:[#allocation154_spill] sm:$0xff] %v6649_v58  ;;  %v853_v58 = vmul.f32 %v6042_v34, %v6401_v63  ;;  %v2815_v34 = vrot.slane %v2800_v3, 6  ;;  %v6708_v31 = vmul.f32 %v6687_v21, %v6412_v14 }
 0x2f7   :  { %8753 = vst [vmem:[#allocation155_spill] sm:$0xff] %v6658_v50  ;;  %v6678_v50 = vmul.f32 %v6045_v30, %v6404_v40  ;;  %v2811_v30 = vsel %vm1187_vm11, %v2808_v38, %v2810_v51  ;;  %v832_v51 = vmul.f32 %v6681_v1, %v6421_v56 }
 0x2f8   :  { %v868_v55 = vrot.slane %v853_v58, 1  ;;  %v2816_v3 = vsel %vm1187_vm11, %v2813_v60, %v2815_v34  ;;  %8754 = vst [vmem:[#allocation156_spill] sm:$0xff] %v6708_v31  ;;  %v998_v58 = vrot.slane %v6685_v6, 3  ;;  %v8759_v6 = vrot.slane %v6664_v29, 1 }
 0x2f9   :  { %v8763_v4 = vrot.slane %v6678_v50, 2  ;;  %v845_v41 = vadd.f32 %v841_v33, %v832_v51 }
 0x2fa   :  { %2819 = vrot.lane.b32.xlu0 %v2811_v30, %s5176_s26  ;;  %2784 = vrot.lane.b32.xlu1 %v2777_v24, %s5176_s26  ;;  %v6725_v24 = vmul.f32 %v6233_v52, %v6557_v8  ;;  %v896_v36 = vsel %vm862_vm6, %v894_v17, %v8759_v6  ;;  %v1063_v17 = vrot.slane %v1048_v13, 4  ;;  %v2814_v13 = vsel %vm1187_vm11, %v2812_v25, %v2813_v60 }
 0x2fb   :  { %2823 = vrot.lane.b32.xlu2 %v2816_v3, %s5176_s26  ;;  %v6729_v3 = vmul.f32 %v6233_v52, %v6571_v57  ;;  %v6753_v62 = vsel %vm927_vm7, %v933_v48, %v8763_v4  ;;  %v2838_v4 = vmul.f32 %v6681_v1, %v2835_v9  ;;  %v6782_v25 = vmul.f32 %v6293_v54, %v6554_v37 }
 0x2fc   :  { %v6719_v34 = vpop.permute.xlu0 %2384  ;;  %v6721_v30 = vpop.permute.xlu1 %2380  ;;  %v6786_v60 = vmul.f32 %v6681_v1, %v6424_v12 }
 0x2fd   :  { %8755 = vst [vmem:[#allocation157_spill] sm:$0xff] %v6719_v34  ;;  %v6731_v38 = vpop.permute.xlu2 %2501  ;;  %v6739_v34 = vmul.f32 %v6233_v52, %v6583_v46  ;;  %v6801_v46 = vmul.f32 %v6681_v1, %v6427_v20 }
 0x2fe   :  { %8756 = vst [vmem:[#allocation158_spill] sm:$0xff] %v6721_v30  ;;  %v6743_v30 = vmul.f32 %v6233_v52, %v6615_v32  ;;  %v885_v32 = vmul.f32 %v6240_v18, %v6514_v23 }
 0x2ff   :  { %8757 = vst [vmem:[#allocation159_spill] sm:$0xff] %v6729_v3 }
 0x300   :  { %8758 = vst [vmem:[#allocation160_spill] sm:$0xff] %v6731_v38  ;;  %v870_v38 = vsel %vm862_vm6, %v868_v55, %v8762_v45  ;;  %v2836_v55 = vmul.f32 %v6763_v0, %v2835_v9  ;;  %v908_v45 = vadd.f32 %v896_v36, %v877_v61  ;;  %v950_v61 = vmul.f32 %v6240_v18, %v6554_v37 }
 0x301   :  { %8760 = vst [vmem:[#allocation161_spill] sm:$0xff] %v6739_v34  ;;  %v6790_v36 = vmul.f32 %v6687_v21, %v6424_v12  ;;  %v899_v33 = vrot.slane %v885_v32, 1  ;;  %v8770_v32 = vrot.slane %v6599_v43, 2  ;;  %v8771_v12 = vrot.slane %v6725_v24, 3 }
 0x302   :  { %8761 = vst [vmem:[#allocation162_spill] sm:$0xff] %v6743_v30  ;;  %2844 = vrot.lane.b32.xlu0 %v2836_v55, %s5177_s12  ;;  %2821 = vrot.lane.b32.xlu1 %v2814_v13, %s5176_s26  ;;  %v8765_v55 = vrot.slane %v6691_v59, 3  ;;  %v942_v48 = vadd.f32 %v6579_v15, %v908_v45  ;;  %v8776_v15 = vrot.slane %v6729_v3, 4  ;;  %v8777_v43 = vrot.slane %v6636_v7, 4  ;;  %s6919_s26 = sld [smem:[#allocation11 + $0x3c]] }
 0x303   :  { %2848 = vrot.lane.b32.xlu2 %v2838_v4, %s5177_s12  ;;  %8766 = vst [vmem:[#allocation164_spill] sm:$0xff] %v6801_v46  ;;  %v8769_v4 = vrot.slane %v6713_v16, 2  ;;  %v8773_v46 = vrot.slane %v6708_v31, 4  ;;  %v964_v7 = vrot.slane %v950_v61, 2  ;;  %v842_v3 = vmul.f32 %v6293_v54, %v6510_v42 }
 0x304   :  { %v6797_v13 = vsel %vm992_vm8, %v998_v58, %v8765_v55  ;;  %v6803_v10 = vpop.permute.xlu0 %2421  ;;  %v6805_v6 = vpop.permute.xlu1 %2417  ;;  %v8772_v58 = vrot.slane %v6603_v2, 3  ;;  %v6830_v45 = vsel %vm1057_vm9, %v8777_v43, %v8776_v15  ;;  %v8779_v2 = vrot.slane %v6645_v53, 5 }
 0x305   :  { %8767 = vst [vmem:[#allocation165_spill] sm:$0xff] %v6803_v10  ;;  %v961_v51 = vsel %vm927_vm7, %v8770_v32, %v8769_v4  ;;  %v6821_v10 = vsel %vm1057_vm9, %v1063_v17, %v8773_v46  ;;  %v8778_v4 = vrot.slane %v6739_v34, 5  ;;  %v8781_v46 = vrot.slane %v6743_v30, 6 }
 0x306   :  { %8768 = vst [vmem:[#allocation166_spill] sm:$0xff] %v6805_v6  ;;  %v1026_v55 = vsel %vm992_vm8, %v8772_v58, %v8771_v12  ;;  %v6823_v6 = vpop.permute.xlu2 %2540  ;;  %v8782_v17 = vrot.slane %v6656_v22, 6  ;;  %v879_v58 = vadd.f32 %v870_v38, %v845_v41  ;;  %v1015_v43 = vmul.f32 %v6240_v18, %v6557_v8 }
 0x307   :  { %8774 = vst [vmem:[#allocation167_spill] sm:$0xff] %v6821_v10  ;;  %v6837_v12 = vsel %vm1122_vm10, %v8779_v2, %v8778_v4  ;;  %v6851_v53 = vmul.f32 %v6293_v54, %v6557_v8  ;;  %v8784_v4 = vrot.slane %v6761_v39, 1  ;;  %v2839_v22 = vmul.f32 %v6687_v21, %v2835_v9 }
 0x308   :  { %8775 = vst [vmem:[#allocation168_spill] sm:$0xff] %v6823_v6  ;;  %v6844_v32 = vsel %vm1187_vm11, %v8782_v17, %v8781_v46  ;;  %v6857_v6 = vld [vmem:[#allocation2 + $0x8] sm:$0xff]  ;;  %v6861_v38 = vstv %s6766_s1  ;;  %v973_v61 = vadd.f32 %v961_v51, %v942_v48  ;;  %v1080_v46 = vmul.f32 %v6240_v18, %v6571_v57  ;;  %s7758_s1 = sld [smem:[#allocation11 + $0x1a]] }
 0x309   :  { %8780 = vst [vmem:[#allocation169_spill] sm:$0xff] %v6837_v12  ;;  %v901_v2 = vsel %vm862_vm6, %v899_v33, %v8784_v4  ;;  %v2837_v41 = vmul.f32 %v6857_v6, %v2835_v9  ;;  %v2862_v17 = vmul.f32 %v6233_v52, %v6861_v38  ;;  %v6868_v15 = vstv %s6771_s11  ;;  %v6874_v4 = vld [vmem:[#allocation2 + $0x10] sm:$0x3f]  ;;  %s7830_s11 = sld [smem:[#allocation11 + $0x4b]] }
 0x30a   :  { %8783 = vst [vmem:[#allocation170_spill] sm:$0xff] %v6844_v32  ;;  %v6872_v33 = vmul.f32 %v6293_v54, %v6571_v57  ;;  %v852_v9 = vmul.f32 %v6874_v4, %v6401_v63  ;;  %2850 = vrot.lane.b32.xlu0 %v2839_v22, %s5177_s12  ;;  %v6882_v48 = vmul.f32 %v6857_v6, %v6868_v15  ;;  %v1029_v32 = vrot.slane %v1015_v43, 3 }
 0x30b   :  { %2846 = vrot.lane.b32.xlu1 %v2837_v41, %s5177_s12  ;;  %v910_v51 = vadd.f32 %v901_v2, %v879_v58  ;;  %v840_v30 = vmul.f32 %v6233_v52, %v6510_v42  ;;  %v884_v34 = vmul.f32 %v6254_v11, %v6514_v23  ;;  %2871 = vrot.lane.b32.xlu2 %v2862_v17, %s5177_s12  ;;  %v8785_v12 = vrot.slane %v6782_v25, 2 }
 0x30c   :  { %v6895_v10 = vpop.permute.xlu0 %2460  ;;  %v6897_v58 = vpop.permute.xlu1 %2423  ;;  %v2888_v43 = vmul.f32 %v6763_v0, %v6868_v15  ;;  %v1007_v2 = vadd.f32 %v6589_v35, %v973_v61  ;;  %v1094_v31 = vrot.slane %v1080_v46, 4  ;;  %v831_v17 = vmul.f32 %v6857_v6, %v6421_v56 }
 0x30d   :  { %v966_v22 = vsel %vm927_vm7, %v964_v7, %v8785_v12  ;;  %8786 = vst [vmem:[#allocation171_spill] sm:$0xff] %v6895_v10  ;;  %v855_v12 = vmul.f32 %v6189_v47, %v6401_v63  ;;  %v866_v41 = vrot.slane %v852_v9, 1  ;;  %v833_v10 = vmul.f32 %v6687_v21, %v6421_v56 }
 0x30e   :  { %8787 = vst [vmem:[#allocation172_spill] sm:$0xff] %v6897_v58  ;;  %v6906_v7 = vpop.permute.xlu2 %2577  ;;  %v2901_v58 = vrot.slane %v6882_v48, 1  ;;  %v944_v0 = vadd.f32 %v6753_v62, %v910_v51  ;;  %v844_v35 = vadd.f32 %v840_v30, %v831_v17  ;;  %v897_v61 = vrot.slane %v884_v34, 1 }
 0x30f   :  { %v887_v46 = vmul.f32 %v6369_v27, %v6514_v23  ;;  %v846_v57 = vadd.f32 %v842_v3, %v833_v10  ;;  %v2863_v63 = vmul.f32 %v6240_v18, %v6861_v38  ;;  %v2861_v42 = vmul.f32 %v6152_v19, %v6861_v38 }
 0x310   :  { %v2900_v9 = vrot.slane %v2888_v43, 1  ;;  %v1038_v56 = vadd.f32 %v1026_v55, %v1007_v2  ;;  %v917_v48 = vmul.f32 %v6874_v4, %v6404_v40  ;;  %v871_v62 = vrot.slane %v855_v12, 1 }
 0x311   :  { %v2890_v34 = vmul.f32 %v6874_v4, %v6868_v15  ;;  %v8788_v23 = vrot.slane %v6480_v49, 1  ;;  %v6933_v30 = vmul.f32 %v6687_v21, %v6868_v15  ;;  %v920_v55 = vmul.f32 %v6189_v47, %v6404_v40 }
 0x312   :  { %2873 = vrot.lane.b32.xlu0 %v2863_v63, %s5177_s12  ;;  %v2902_v19 = vsel %vm862_vm6, %v2900_v9, %v2901_v58  ;;  %v8789_v51 = vrot.slane %v6670_v28, 1  ;;  %v902_v43 = vrot.slane %v887_v46, 1  ;;  %v8791_v17 = vrot.slane %v6664_v29, 1 }
 0x313   :  { %v867_v10 = vsel %vm862_vm6, %v8788_v23, %v866_v41  ;;  %2869 = vrot.lane.b32.xlu1 %v2861_v42, %s5177_s12  ;;  %2910 = vrot.lane.b32.xlu2 %v2902_v19, %s5177_s12  ;;  %v8790_v41 = vrot.slane %v6851_v53, 3  ;;  %v2893_v28 = vmul.f32 %v6189_v47, %v6868_v15  ;;  %v8792_v46 = vrot.slane %v6872_v33, 4 }
 0x314   :  { %v878_v3 = vadd.f32 %v867_v10, %v844_v35  ;;  %v872_v49 = vsel %vm862_vm6, %v8789_v51, %v871_v62  ;;  %v898_v12 = vsel %vm862_vm6, %v8791_v17, %v897_v61  ;;  %v6949_v35 = vpop.permute.xlu0 %2497  ;;  %v6951_v40 = vpop.permute.xlu1 %2462  ;;  %v8793_v29 = vrot.slane %v6761_v39, 1  ;;  %v7007_v17 = vld [vmem:[#allocation3] sm:$0xff] }
 0x315   :  { %v6944_v2 = vsel %vm992_vm8, %v1029_v32, %v8790_v41  ;;  %v880_v42 = vadd.f32 %v872_v49, %v846_v57  ;;  %v6958_v63 = vsel %vm1057_vm9, %v1094_v31, %v8792_v46  ;;  %v6962_v32 = vmul.f32 %v6687_v21, %v6427_v20 }
 0x316   :  { %v903_v57 = vsel %vm862_vm6, %v8793_v29, %v902_v43  ;;  %v6967_v61 = vpop.permute.xlu2 %2583  ;;  %v2903_v9 = vrot.slane %v2890_v34, 1  ;;  %v6970_v62 = vadd.f32 %v6612_v5, %v1038_v56  ;;  %v975_v47 = vadd.f32 %v966_v22, %v944_v0 }
 0x317   :  { %v6974_v31 = vmul.f32 %v6874_v4, %v6410_v44  ;;  %v2906_v23 = vrot.slane %v6933_v30, 1  ;;  %v931_v10 = vrot.slane %v917_v48, 2  ;;  %v909_v19 = vadd.f32 %v898_v12, %v878_v3 }
 0x318   :  { %v949_v39 = vmul.f32 %v6254_v11, %v6554_v37  ;;  %v936_v51 = vrot.slane %v920_v55, 2  ;;  %v911_v49 = vadd.f32 %v903_v57, %v880_v42  ;;  %v2864_v34 = vmul.f32 %v6293_v54, %v6861_v38 }
 0x319   :  { %v2908_v43 = vrot.slane %v2893_v28, 1  ;;  %v2926_v5 = vstv %s6919_s26  ;;  %v952_v0 = vmul.f32 %v6369_v27, %v6554_v37  ;;  %v2904_v22 = vsel %vm862_vm6, %v2901_v58, %v2903_v9  ;;  %v7011_v28 = vld [vmem:[#allocation2 + $0x28] sm:$0x3f]  ;;  %s4918_s26 = sld [smem:[#allocation11 + $0x52]] }
 0x31a   :  { %v6986_v56 = vmul.f32 %v6233_v52, %v2926_v5  ;;  %v2891_v48 = vmul.f32 %v6681_v1, %v6868_v15  ;;  %2912 = vrot.lane.b32.xlu0 %v2904_v22, %s5177_s12  ;;  %v2930_v37 = vmul.f32 %v6240_v18, %v2926_v5  ;;  %v6998_v58 = vmul.f32 %v6293_v54, %v2926_v5 }
 0x31b   :  { %2875 = vrot.lane.b32.xlu1 %v2864_v34, %s5177_s12  ;;  %v2909_v38 = vsel %vm862_vm6, %v2906_v23, %v2908_v43  ;;  %v8794_v52 = vrot.slane %v6497_v26, 2  ;;  %v962_v15 = vrot.slane %v949_v39, 2  ;;  %v8795_v55 = vrot.slane %v6678_v50, 2 }
 0x31c   :  { %2916 = vrot.lane.b32.xlu2 %v2909_v38, %s5177_s12  ;;  %v2927_v12 = vmul.f32 %v7007_v17, %v2926_v5  ;;  %v1009_v18 = vadd.f32 %v6797_v13, %v975_v47  ;;  %v985_v26 = vmul.f32 %v7011_v28, %v6410_v44  ;;  %v7015_v29 = vpop.permute.xlu0 %2503  ;;  %v7017_v50 = vpop.permute.xlu1 %2499  ;;  %v7021_v57 = vmul.f32 %v6874_v4, %v6412_v14 }
 0x31d   :  { %v932_v3 = vsel %vm927_vm7, %v8794_v52, %v931_v10  ;;  %v937_v41 = vsel %vm927_vm7, %v8795_v55, %v936_v51  ;;  %v967_v9 = vrot.slane %v952_v0, 2  ;;  %v2940_v13 = vrot.slane %v6986_v56, 1 }
 0x31e   :  { %v943_v42 = vadd.f32 %v932_v3, %v909_v19  ;;  %v945_v46 = vadd.f32 %v937_v41, %v911_v49  ;;  %v7023_v10 = vpop.permute.xlu2 %2622  ;;  %v2905_v47 = vrot.slane %v2891_v48, 1  ;;  %v996_v19 = vrot.slane %v6974_v31, 3 }
 0x31f   :  { %v7029_v44 = vmul.f32 %v7011_v28, %v6412_v14  ;;  %v2944_v39 = vrot.slane %v2930_v37, 1  ;;  %v2945_v51 = vrot.slane %v6998_v58, 1  ;;  %v8796_v49 = vrot.slane %v6713_v16, 2 }
 0x320   :  { %v1014_v43 = vmul.f32 %v6254_v11, %v6557_v8  ;;  %v8797_v0 = vrot.slane %v6782_v25, 2  ;;  %v2939_v56 = vrot.slane %v2927_v12, 1  ;;  %v1001_v48 = vrot.slane %v985_v26, 3 }
 0x321   :  { %v963_v34 = vsel %vm927_vm7, %v8796_v49, %v962_v15  ;;  %v1017_v14 = vmul.f32 %v6369_v27, %v6557_v8  ;;  %v2907_v16 = vsel %vm862_vm6, %v2905_v47, %v2906_v23  ;;  %v2929_v58 = vmul.f32 %v6254_v11, %v2926_v5  ;;  %v8798_v11 = vld [vmem:[#allocation141_spill] sm:$0xff] }
 0x322   :  { %v968_v22 = vsel %vm927_vm7, %v8797_v0, %v967_v9  ;;  %v974_v31 = vadd.f32 %v963_v34, %v943_v42  ;;  %v2941_v37 = vsel %vm862_vm6, %v2939_v56, %v2940_v13  ;;  %v7046_v52 = vstv %s6990_s13  ;;  %v7070_v9 = vld [vmem:[#allocation3 + $0x18] sm:$0xff]  ;;  %v8801_v47 = vld [vmem:[#allocation149_spill] sm:$0xff]  ;;  %s4919_s13 = sld [smem:[#allocation11 + $0x28]] }
 0x323   :  { %v976_v38 = vadd.f32 %v968_v22, %v945_v46  ;;  %v8609_v25 = vrot.slane %v6790_v36, 5  ;;  %2949 = vrot.lane.b32.xlu0 %v2941_v37, %s5177_s12  ;;  %2914 = vrot.lane.b32.xlu1 %v2907_v16, %s5177_s12  ;;  %v2946_v3 = vsel %vm862_vm6, %v2944_v39, %v2945_v51  ;;  %v7056_v8 = vmul.f32 %v6857_v6, %v7046_v52 }
 0x324   :  { %v2970_v23 = vmul.f32 %v6874_v4, %v7046_v52  ;;  %v8799_v15 = vrot.slane %v8798_v11, 3  ;;  %v1027_v41 = vrot.slane %v1014_v43, 3  ;;  %v8800_v12 = vrot.slane %v6691_v59, 3  ;;  %2953 = vrot.lane.b32.xlu2 %v2946_v3, %s5177_s12  ;;  %v7076_v34 = vpop.permute.xlu0 %2542  ;;  %v7078_v59 = vpop.permute.xlu1 %2538 }
 0x325   :  { %v2932_v26 = vmul.f32 %v6369_v27, %v2926_v5  ;;  %v1103_v46 = vadd.f32 %v6830_v45, %v6970_v62  ;;  %v7074_v39 = vmul.f32 %v7070_v9, %v8801_v47  ;;  %v1040_v43 = vadd.f32 %v6944_v2, %v1009_v18  ;;  %v7093_v18 = vld [vmem:[#allocation3 + $0x10] sm:$0x3f] }
 0x326   :  { %v997_v55 = vsel %vm992_vm8, %v8799_v15, %v996_v19  ;;  %v1002_v42 = vsel %vm992_vm8, %v8800_v12, %v1001_v48  ;;  %v7083_v5 = vmul.f32 %v6293_v54, %v8801_v47  ;;  %v1032_v0 = vrot.slane %v1017_v14, 3  ;;  %v7085_v45 = vpop.permute.xlu2 %2659  ;;  %v8803_v54 = vld [vmem:[#allocation147_spill] sm:$0xff] }
 0x327   :  { %v1008_v49 = vadd.f32 %v997_v55, %v974_v31  ;;  %v1010_v19 = vadd.f32 %v1002_v42, %v976_v38  ;;  %v2942_v62 = vrot.slane %v2929_v58, 1  ;;  %v1061_v22 = vrot.slane %v7021_v57, 4  ;;  %v8805_v55 = vld [vmem:[#allocation137_spill] sm:$0xff]  ;;  %v8806_v42 = vld [vmem:[#allocation142_spill] sm:$0xff] }
 0x328   :  { %v1066_v56 = vrot.slane %v7029_v44, 4  ;;  %v2981_v31 = vrot.slane %v7056_v8, 2  ;;  %v2983_v48 = vrot.slane %v2970_v23, 2  ;;  %v8802_v38 = vrot.slane %v6725_v24, 3 }
 0x329   :  { %v1079_v14 = vmul.f32 %v7093_v18, %v8803_v54  ;;  %v8804_v37 = vrot.slane %v6851_v53, 3  ;;  %v2947_v57 = vrot.slane %v2932_v26, 1  ;;  %v1082_v44 = vmul.f32 %v6369_v27, %v8803_v54 }
 0x32a   :  { %v1028_v2 = vsel %vm992_vm8, %v8802_v38, %v1027_v41  ;;  %v2971_v24 = vmul.f32 %v6681_v1, %v7046_v52  ;;  %v2943_v23 = vsel %vm862_vm6, %v2940_v13, %v2942_v62  ;;  %v7108_v11 = vmul.f32 %v6687_v21, %v7046_v52 }
 0x32b   :  { %v1033_v16 = vsel %vm992_vm8, %v8804_v37, %v1032_v0  ;;  %v1039_v58 = vadd.f32 %v1028_v2, %v1008_v49  ;;  %v2948_v8 = vsel %vm862_vm6, %v2945_v51, %v2947_v57  ;;  %v7111_v53 = vstv %s7048_s14  ;;  %2951 = vrot.lane.b32.xlu1 %v2943_v23, %s5177_s12  ;;  %v7119_v51 = vld [vmem:[#allocation3 + $0x8] sm:$0xff]  ;;  %v8808_v0 = vld [vmem:[#allocation156_spill] sm:$0xff]  ;;  %v8810_v2 = vld [vmem:[#allocation163_spill] sm:$0xff]  ;;  %s4920_s14 = sld [smem:[#allocation11 + $0x59]] }
 0x32c   :  { %v1041_v3 = vadd.f32 %v1033_v16, %v1010_v19  ;;  %v1112_v41 = vmul.f32 %v6874_v4, %v8805_v55  ;;  %2955 = vrot.lane.b32.xlu0 %v2948_v8, %s5177_s12  ;;  %v2984_v12 = vsel %vm927_vm7, %v2981_v31, %v2983_v48  ;;  %v7123_v13 = vmul.f32 %v7119_v51, %v7111_v53  ;;  %v7136_v57 = vpop.permute.xlu0 %2579  ;;  %v7138_v8 = vpop.permute.xlu1 %2544 }
 0x32d   :  { %v8807_v26 = vrot.slane %v8806_v42, 4  ;;  %v1092_v19 = vrot.slane %v1079_v14, 4  ;;  %v8809_v62 = vrot.slane %v8808_v0, 4  ;;  %2992 = vrot.lane.b32.xlu2 %v2984_v12, %s5177_s12  ;;  %v2968_v48 = vmul.f32 %v8810_v2, %v7046_v52  ;;  %v8811_v14 = vld [vmem:[#allocation151_spill] sm:$0xff] }
 0x32e   :  { %v1115_v37 = vmul.f32 %v7011_v28, %v8805_v55  ;;  %v1137_v23 = vadd.f32 %v8811_v14, %v1103_v46  ;;  %v7143_v42 = vpop.permute.xlu2 %2698  ;;  %v2985_v12 = vrot.slane %v2971_v24, 2  ;;  %v1126_v0 = vrot.slane %v1112_v41, 5 }
 0x32f   :  { %v1062_v49 = vsel %vm1057_vm9, %v8807_v26, %v1061_v22  ;;  %v1067_v38 = vsel %vm1057_vm9, %v8809_v62, %v1066_v56  ;;  %v3007_v22 = vmul.f32 %v7007_v17, %v7111_v53  ;;  %v1097_v56 = vrot.slane %v1082_v44, 4  ;;  %8812 = vst [vmem:[#allocation141_spill] sm:$0xff] %v7143_v42  ;;  %v8814_v62 = vld [vmem:[#allocation159_spill] sm:$0xff] }
 0x330   :  { %v1073_v54 = vadd.f32 %v1062_v49, %v1039_v58  ;;  %v1075_v16 = vadd.f32 %v1067_v38, %v1041_v3  ;;  %v2986_v26 = vrot.slane %v7108_v11, 2  ;;  %v8813_v58 = vld [vmem:[#allocation167_spill] sm:$0xff]  ;;  %v7149_v3 = vmul.f32 %v6874_v4, %v6427_v20 }
 0x331   :  { %v1074_v49 = vadd.f32 %v8813_v58, %v1040_v43  ;;  %v3020_v55 = vrot.slane %v7123_v13, 2  ;;  %v8815_v38 = vrot.slane %v8814_v62, 4  ;;  %v1144_v46 = vmul.f32 %v7093_v18, %v8801_v47 }
 0x332   :  { %v8816_v44 = vrot.slane %v6872_v33, 4  ;;  %v2980_v11 = vrot.slane %v2968_v48, 2  ;;  %v1131_v41 = vrot.slane %v1115_v37, 5  ;;  %v3019_v58 = vrot.slane %v3007_v22, 2 }
 0x333   :  { %v1093_v30 = vsel %vm1057_vm9, %v8815_v38, %v1092_v19  ;;  %v1147_v13 = vmul.f32 %v6369_v27, %v8801_v47  ;;  %v2987_v62 = vsel %vm927_vm7, %v2985_v12, %v2986_v26  ;;  %v3009_v38 = vmul.f32 %v7093_v18, %v7111_v53  ;;  %v8819_v12 = vld [vmem:[#allocation150_spill] sm:$0xff] }
 0x334   :  { %v1098_v24 = vsel %vm1057_vm9, %v8816_v44, %v1097_v56  ;;  %v1104_v43 = vadd.f32 %v1093_v30, %v1073_v54  ;;  %v2982_v19 = vsel %vm927_vm7, %v2980_v11, %v2981_v31  ;;  %v8610_v33 = vrot.slane %v7083_v5, 5  ;;  %2994 = vrot.lane.b32.xlu0 %v2987_v62, %s5177_s12  ;;  %v7174_v54 = vld [vmem:[#allocation3 + $0x20] sm:$0xff]  ;;  %v8817_v31 = vld [vmem:[#allocation143_spill] sm:$0xff]  ;;  %v7195_v62 = vpop.permute.xlu1 %2581 }
 0x335   :  { %v1106_v14 = vadd.f32 %v1098_v24, %v1075_v16  ;;  %v1180_v30 = vmul.f32 %v7011_v28, %v6427_v20  ;;  %2990 = vrot.lane.b32.xlu1 %v2982_v19, %s5177_s12  ;;  %v3021_v48 = vsel %vm927_vm7, %v3019_v58, %v3020_v55  ;;  %v7178_v47 = vmul.f32 %v7174_v54, %v7111_v53  ;;  %v7193_v58 = vpop.permute.xlu0 %2618 }
 0x336   :  { %v8818_v37 = vrot.slane %v8817_v31, 5  ;;  %v1157_v22 = vrot.slane %v1144_v46, 5  ;;  %v1132_v20 = vsel %vm1122_vm10, %v8609_v25, %v1131_v41  ;;  %3029 = vrot.lane.b32.xlu2 %v3021_v48, %s5177_s12  ;;  %v2973_v56 = vmul.f32 %v7011_v28, %v7046_v52  ;;  %v8820_v46 = vld [vmem:[#allocation169_spill] sm:$0xff]  ;;  %v7201_v52 = vpop.permute.xlu2 %2704 }
 0x337   :  { %v7191_v44 = vmul.f32 %v7174_v54, %v8819_v12  ;;  %v1140_v11 = vadd.f32 %v1132_v20, %v1106_v14  ;;  %v1168_v41 = vadd.f32 %v8820_v46, %v1137_v23  ;;  %v1105_v19 = vadd.f32 %v6958_v63, %v1074_v49  ;;  %v8821_v20 = vld [vmem:[#allocation161_spill] sm:$0xff] }
 0x338   :  { %v1127_v16 = vsel %vm1122_vm10, %v8818_v37, %v1126_v0  ;;  %v3012_v0 = vmul.f32 %v6369_v27, %v7111_v53  ;;  %v1162_v48 = vrot.slane %v1147_v13, 5  ;;  %v3022_v31 = vrot.slane %v3009_v38, 2 }
 0x339   :  { %v1138_v24 = vadd.f32 %v1127_v16, %v1104_v43  ;;  %v1191_v37 = vrot.slane %v7149_v3, 6  ;;  %v1209_v43 = vmul.f32 %v7093_v18, %v8819_v12  ;;  %v1196_v14 = vrot.slane %v1180_v30, 6 }
 0x33a   :  { %v3025_v16 = vrot.slane %v7178_v47, 2  ;;  %v8822_v25 = vrot.slane %v8821_v20, 5  ;;  %v1163_v63 = vsel %vm1122_vm10, %v8610_v33, %v1162_v48  ;;  %v1212_v23 = vmul.f32 %v6369_v27, %v8819_v12  ;;  %v8830_v33 = vld [vmem:[#allocation152_spill] sm:$0xff] }
 0x33b   :  { %v2988_v49 = vrot.slane %v2973_v56, 2  ;;  %v1171_v3 = vadd.f32 %v1163_v63, %v1140_v11  ;;  %v3027_v38 = vrot.slane %v3012_v0, 2  ;;  %v3047_v46 = vstv %s7160_s16  ;;  %v8826_v63 = vld [vmem:[#allocation164_spill] sm:$0xff]  ;;  %s4921_s16 = sld [smem:[#allocation11 + $0x2f]] }
 0x33c   :  { %v1158_v15 = vsel %vm1122_vm10, %v8822_v25, %v1157_v22  ;;  %v3023_v30 = vsel %vm927_vm7, %v3020_v55, %v3022_v31  ;;  %v7219_v20 = vmul.f32 %v6857_v6, %v3047_v46  ;;  %v3010_v25 = vmul.f32 %v7070_v9, %v7111_v53  ;;  %v8823_v55 = vld [vmem:[#allocation144_spill] sm:$0xff] }
 0x33d   :  { %v1169_v13 = vadd.f32 %v1158_v15, %v1138_v24  ;;  %v2989_v47 = vsel %vm927_vm7, %v2986_v26, %v2988_v49  ;;  %3031 = vrot.lane.b32.xlu0 %v3023_v30, %s5177_s12  ;;  %v3028_v27 = vsel %vm927_vm7, %v3025_v16, %v3027_v38  ;;  %v3051_v15 = vmul.f32 %v6681_v1, %v3047_v46 }
 0x33e   :  { %2996 = vrot.lane.b32.xlu1 %v2989_v47, %s5177_s12  ;;  %v3052_v26 = vmul.f32 %v6687_v21, %v3047_v46  ;;  %v8824_v56 = vrot.slane %v8823_v55, 6  ;;  %v1222_v11 = vrot.slane %v1209_v43, 6  ;;  %v8825_v53 = vrot.slane %v6962_v32, 6  ;;  %3035 = vrot.lane.b32.xlu2 %v3028_v27, %s5177_s12  ;;  %v7241_v47 = vpop.permute.xlu0 %2624  ;;  %v7243_v55 = vpop.permute.xlu1 %2620 }
 0x33f   :  { %v3048_v48 = vmul.f32 %v8810_v2, %v3047_v46  ;;  %v1159_v31 = vrot.slane %v7074_v39, 5  ;;  %v1193_v49 = vrot.slane %v8826_v63, 6  ;;  %v8828_v43 = vrot.slane %v6786_v60, 5  ;;  %v7250_v27 = vpop.permute.xlu2 %2741 }
 0x340   :  { %v1192_v24 = vsel %vm1187_vm11, %v8824_v56, %v1191_v37  ;;  %v1197_v0 = vsel %vm1187_vm11, %v8825_v53, %v1196_v14  ;;  %v8827_v37 = vrot.slane %v6790_v36, 5  ;;  %v1227_v56 = vrot.slane %v1212_v23, 6  ;;  %8829 = vst [vmem:[#allocation149_spill] sm:$0xff] %v7250_v27  ;;  %v8831_v36 = vld [vmem:[#allocation162_spill] sm:$0xff] }
 0x341   :  { %v1203_v38 = vadd.f32 %v1192_v24, %v1169_v13  ;;  %v1205_v30 = vadd.f32 %v1197_v0, %v1171_v3  ;;  %v3061_v53 = vrot.slane %v7219_v20, 3  ;;  %v3024_v39 = vrot.slane %v3010_v25, 2 }
 0x342   :  { %v1130_v14 = vsel %vm1122_vm10, %v8828_v43, %v8827_v37  ;;  %v1202_v63 = vadd.f32 %v8830_v33, %v1168_v41  ;;  %v1210_v13 = vmul.f32 %v7070_v9, %v8819_v12  ;;  %v3065_v3 = vrot.slane %v3051_v15, 3 }
 0x343   :  { %v3066_v24 = vrot.slane %v3052_v26, 3  ;;  %v1139_v0 = vadd.f32 %v1130_v14, %v1105_v19  ;;  %v8832_v22 = vrot.slane %v8831_v36, 6  ;;  %v8833_v23 = vrot.slane %v7191_v44, 6 }
 0x344   :  { %v3060_v43 = vrot.slane %v3048_v48, 3  ;;  %v8834_v20 = vrot.slane %v7083_v5, 5  ;;  %v3053_v12 = vmul.f32 %v7011_v28, %v3047_v46  ;;  %v3026_v15 = vsel %vm927_vm7, %v3024_v39, %v3025_v16  ;;  %v8836_v16 = vld [vmem:[#allocation30_spill] sm:$0xff] }
 0x345   :  { %v1223_v60 = vsel %vm1187_vm11, %v8832_v22, %v1222_v11  ;;  %v1228_v37 = vsel %vm1187_vm11, %v8833_v23, %v1227_v56  ;;  %v3050_v22 = vmul.f32 %v6874_v4, %v3047_v46  ;;  %v7272_v26 = vstv %s7223_s17  ;;  %v8837_v56 = vld [vmem:[#allocation26_spill] sm:$0xff]  ;;  %s4922_s17 = sld [smem:[#allocation11 + $0x60]] }
 0x346   :  { %v1161_v33 = vsel %vm1122_vm10, %v1159_v31, %v8834_v20  ;;  %v1234_v41 = vadd.f32 %v1223_v60, %v1203_v38  ;;  %v1236_v25 = vadd.f32 %v1228_v37, %v1205_v30  ;;  %v3062_v19 = vsel %vm992_vm8, %v3060_v43, %v3061_v53  ;;  %3033 = vrot.lane.b32.xlu1 %v3026_v15, %s5177_s12  ;;  %v8835_v31 = vld [vmem:[#allocation170_spill] sm:$0xff]  ;;  %v7285_v36 = vpop.permute.xlu0 %2661  ;;  %v8838_v60 = vld [vmem:[#allocation24_spill] sm:$0xff] }
 0x347   :  { %3070 = vrot.lane.b32.xlu0 %v3062_v19, %s5177_s12  ;;  %v3067_v5 = vsel %vm992_vm8, %v3065_v3, %v3066_v24  ;;  %v3088_v11 = vmul.f32 %v7119_v51, %v7272_v26  ;;  %v3089_v48 = vmul.f32 %v7093_v18, %v7272_v26  ;;  %v1233_v38 = vadd.f32 %v8835_v31, %v1202_v63  ;;  %v7287_v3 = vpop.permute.xlu1 %2657  ;;  %v8840_v63 = vld [vmem:[#allocation72_spill] sm:$0xff]  ;;  %v7294_v20 = vpop.permute.xlu2 %2780 }
 0x348   :  { %v1170_v30 = vadd.f32 %v1161_v33, %v1139_v0  ;;  %v1263_v14 = vadd.f32 %v8836_v16, %v1236_v25  ;;  %3074 = vrot.lane.b32.xlu2 %v3067_v5, %s5177_s12  ;;  %v1224_v46 = vrot.slane %v1210_v13, 6  ;;  %v1261_v39 = vadd.f32 %v8837_v56, %v1234_v41  ;;  %8841 = vst [vmem:[#allocation147_spill] sm:$0xff] %v7294_v20  ;;  %v8842_v25 = vld [vmem:[#allocation55_spill] sm:$0xff]  ;;  %v8875_v20 = vld [vmem:[#allocation78_spill] sm:$0xff] }
 0x349   :  { %v1260_v23 = vadd.f32 %v8838_v60, %v1233_v38  ;;  %v8839_v37 = vrot.slane %v6962_v32, 6  ;;  %v3063_v33 = vrot.slane %v3050_v22, 3  ;;  %v3068_v19 = vrot.slane %v3053_v12, 3  ;;  %v8844_v38 = vld [vmem:[#allocation51_spill] sm:$0xff]  ;;  %v8845_v60 = vld [vmem:[#allocation40_spill] sm:$0xff] }
 0x34a   :  { %v1288_v0 = vadd.f32 %v8840_v63, %v1263_v14  ;;  %v1286_v13 = vadd.f32 %v8842_v25, %v1261_v39  ;;  %v3100_v41 = vrot.slane %v3088_v11, 3  ;;  %v3102_v15 = vrot.slane %v3089_v48, 3  ;;  %v8846_v11 = vld [vmem:[#allocation33_spill] sm:$0xff]  ;;  %v8849_v25 = vld [vmem:[#allocation22_spill] sm:$0xff] }
 0x34b   :  { %v1195_v43 = vsel %vm1187_vm11, %v1193_v49, %v8839_v37  ;;  %v8843_v31 = vrot.slane %v7191_v44, 6  ;;  %v1285_v56 = vadd.f32 %v8844_v38, %v1260_v23  ;;  %v3069_v32 = vsel %vm992_vm8, %v3066_v24, %v3068_v19  ;;  %v8848_v23 = vld [vmem:[#allocation75_spill] sm:$0xff] }
 0x34c   :  { %v1204_v5 = vadd.f32 %v1195_v43, %v1170_v30  ;;  %v3127_v49 = vstv %s7266_s18  ;;  %v1329_v14 = vadd.f32 %v8845_v60, %v1288_v0  ;;  %v3064_v37 = vsel %vm992_vm8, %v3061_v53, %v3063_v33  ;;  %s4923_s18 = sld [smem:[#allocation11 + $0x6]] }
 0x34d   :  { %v1226_v16 = vsel %vm1187_vm11, %v1224_v46, %v8843_v31  ;;  %v3090_v22 = vmul.f32 %v7070_v9, %v7272_v26  ;;  %v3091_v12 = vmul.f32 %v7174_v54, %v7272_v26  ;;  %v1327_v48 = vadd.f32 %v8846_v11, %v1286_v13  ;;  %v8847_v46 = vld [vmem:[#allocation86_spill] sm:$0xff]  ;;  %v8851_v31 = vld [vmem:[#allocation23_spill] sm:$0xff] }
 0x34e   :  { %3072 = vrot.lane.b32.xlu1 %v3064_v37, %s5177_s12  ;;  %v3103_v44 = vsel %vm992_vm8, %v3100_v41, %v3102_v15  ;;  %v3129_v24 = vmul.f32 %v6857_v6, %v3127_v49  ;;  %v1235_v30 = vadd.f32 %v1226_v16, %v1204_v5  ;;  %v1368_v39 = vadd.f32 %v8847_v46, %v1329_v14  ;;  %v7319_v63 = vpop.permute.xlu0 %2700  ;;  %v8853_v14 = vld [vmem:[#allocation57_spill] sm:$0xff] }
 0x34f   :  { %3076 = vrot.lane.b32.xlu0 %v3069_v32, %s5177_s12  ;;  %v3087_v53 = vmul.f32 %v7007_v17, %v7272_v26  ;;  %v1366_v43 = vadd.f32 %v8848_v23, %v1327_v48  ;;  %v7321_v0 = vpop.permute.xlu1 %2663  ;;  %v3128_v33 = vmul.f32 %v8810_v2, %v3127_v49  ;;  %v7325_v19 = vpop.permute.xlu2 %2817  ;;  %v3104_v15 = vrot.slane %v3090_v22, 3  ;;  %v8852_v32 = vld [vmem:[#allocation65_spill] sm:$0xff]  ;;  %v8854_v48 = vld [vmem:[#allocation68_spill] sm:$0xff] }
 0x350   :  { %3111 = vrot.lane.b32.xlu2 %v3103_v44, %s5177_s12  ;;  %v1262_v13 = vadd.f32 %v8849_v25, %v1235_v30  ;;  %8850 = vst [vmem:[#allocation137_spill] sm:$0xff] %v7325_v19  ;;  %v3105_v5 = vrot.slane %v3091_v12, 3  ;;  %v1326_v16 = vadd.f32 %v8851_v31, %v1285_v56  ;;  %v3141_v38 = vrot.slane %v3129_v24, 4  ;;  %v8855_v46 = vld [vmem:[#allocation25_spill] sm:$0xff]  ;;  %v8856_v24 = vld [vmem:[#allocation54_spill] sm:$0xff]  ;;  %v8859_v31 = vld [vmem:[#allocation71_spill] sm:$0xff] }
 0x351   :  { %v1409_v37 = vadd.f32 %v8853_v14, %v1368_v39  ;;  %v3099_v11 = vrot.slane %v3087_v53, 3  ;;  %v1407_v23 = vadd.f32 %v8855_v46, %v1366_v43  ;;  %v3140_v27 = vrot.slane %v3128_v33, 4  ;;  %v8857_v53 = vld [vmem:[#allocation79_spill] sm:$0xff]  ;;  %v7342_v33 = vld [vmem:[#allocation3 + $0x28] sm:$0x3f]  ;;  %v8866_v19 = vld [vmem:[#allocation48_spill] sm:$0xff] }
 0x352   :  { %v1287_v60 = vadd.f32 %v8852_v32, %v1262_v13  ;;  %v1365_v44 = vadd.f32 %v8854_v48, %v1326_v16  ;;  %v3106_v30 = vsel %vm992_vm8, %v3104_v15, %v3105_v5  ;;  %v3130_v22 = vmul.f32 %v6874_v4, %v3127_v49  ;;  %v8858_v13 = vld [vmem:[#allocation32_spill] sm:$0xff] }
 0x353   :  { %v3101_v25 = vsel %vm992_vm8, %v3099_v11, %v3100_v41  ;;  %v3142_v56 = vsel %vm1057_vm9, %v3140_v27, %v3141_v38  ;;  %v3132_v12 = vmul.f32 %v6687_v21, %v3127_v49  ;;  %v1448_v43 = vadd.f32 %v8857_v53, %v1409_v37 }
 0x354   :  { %v1328_v39 = vadd.f32 %v8856_v24, %v1287_v60  ;;  %v3092_v41 = vmul.f32 %v7342_v33, %v7272_v26  ;;  %v1406_v15 = vadd.f32 %v8858_v13, %v1365_v44  ;;  %v1446_v16 = vadd.f32 %v8859_v31, %v1407_v23  ;;  %v8861_v60 = vld [vmem:[#allocation76_spill] sm:$0xff]  ;;  %v8864_v44 = vld [vmem:[#allocation61_spill] sm:$0xff]  ;;  %v8865_v24 = vld [vmem:[#allocation35_spill] sm:$0xff] }
 0x355   :  { %v3133_v14 = vmul.f32 %v7011_v28, %v3127_v49  ;;  %v3143_v48 = vrot.slane %v3130_v22, 4  ;;  %v3146_v46 = vrot.slane %v3132_v12, 4  ;;  %v3131_v26 = vmul.f32 %v6681_v1, %v3127_v49 }
 0x356   :  { %3109 = vrot.lane.b32.xlu1 %v3101_v25, %s5177_s12  ;;  %v7348_v32 = vpop.permute.xlu0 %2737  ;;  %v1367_v11 = vadd.f32 %v8861_v60, %v1328_v39  ;;  %v1445_v23 = vadd.f32 %v8864_v44, %v1406_v15  ;;  %v1487_v53 = vadd.f32 %v8865_v24, %v1446_v16  ;;  %v3166_v31 = vstv %s4904_s19  ;;  %v8868_v16 = vld [vmem:[#allocation90_spill] sm:$0xff]  ;;  %v8871_v24 = vld [vmem:[#allocation36_spill] sm:$0xff]  ;;  %s4924_s19 = sld [smem:[#allocation11 + $0x37]] }
 0x357   :  { %3113 = vrot.lane.b32.xlu0 %v3106_v30, %s5177_s12  ;;  %8860 = vst [vmem:[#allocation142_spill] sm:$0xff] %v7348_v32  ;;  %v7350_v27 = vpop.permute.xlu1 %2702  ;;  %v7354_v37 = vpop.permute.xlu2 %2823  ;;  %v8863_v30 = vld [vmem:[#allocation50_spill] sm:$0xff]  ;;  %v3148_v13 = vrot.slane %v3133_v14, 4  ;;  %v3144_v39 = vsel %vm1057_vm9, %v3141_v38, %v3143_v48  ;;  %v3168_v22 = vmul.f32 %v7119_v51, %v3166_v31  ;;  %v3170_v12 = vmul.f32 %v7070_v9, %v3166_v31  ;;  %v8869_v38 = vld [vmem:[#allocation64_spill] sm:$0xff] }
 0x358   :  { %3150 = vrot.lane.b32.xlu2 %v3142_v56, %s5177_s12  ;;  %8862 = vst [vmem:[#allocation156_spill] sm:$0xff] %v7354_v37  ;;  %v1489_v25 = vadd.f32 %v8863_v30, %v1448_v43  ;;  %v3107_v56 = vrot.slane %v3092_v41, 3  ;;  %v1408_v32 = vadd.f32 %v8866_v19, %v1367_v11  ;;  %v3171_v43 = vmul.f32 %v7174_v54, %v3166_v31  ;;  %v8867_v41 = vld [vmem:[#allocation87_spill] sm:$0xff] }
 0x359   :  { %v3149_v49 = vsel %vm1057_vm9, %v3146_v46, %v3148_v13  ;;  %v1526_v14 = vadd.f32 %v8869_v38, %v1487_v53  ;;  %v3145_v30 = vrot.slane %v3131_v26, 4  ;;  %v3180_v44 = vrot.slane %v3168_v22, 4  ;;  %v8874_v53 = vld [vmem:[#allocation39_spill] sm:$0xff] }
 0x35a   :  { %v3108_v60 = vsel %vm992_vm8, %v3105_v5, %v3107_v56  ;;  %v1447_v15 = vadd.f32 %v8867_v41, %v1408_v32  ;;  %v1528_v19 = vadd.f32 %v8868_v16, %v1489_v25  ;;  %v3167_v5 = vmul.f32 %v7007_v17, %v3166_v31  ;;  %v8873_v41 = vld [vmem:[#allocation46_spill] sm:$0xff] }
 0x35b   :  { %v1486_v13 = vadd.f32 %v8871_v24, %v1445_v23  ;;  %v3185_v32 = vrot.slane %v3171_v43, 4  ;;  %v7383_v37 = vstv %s4905_s20  ;;  %v1567_v38 = vadd.f32 %v8874_v53, %v1526_v14  ;;  %v8878_v14 = vld [vmem:[#allocation81_spill] sm:$0xff]  ;;  %s5179_s20 = smov 122  }
 0x35c   :  { %v3179_v16 = vrot.slane %v3167_v5, 4  ;;  %v3147_v26 = vsel %vm1057_vm9, %v3145_v30, %v3146_v46  ;;  %v3209_v22 = vmul.f32 %v6857_v6, %v7383_v37  ;;  %v3172_v46 = vmul.f32 %v7342_v33, %v3166_v31 }
 0x35d   :  { %v1525_v42 = vadd.f32 %v8875_v20, %v1486_v13  ;;  %v3210_v5 = vmul.f32 %v6874_v4, %v7383_v37  ;;  %v1606_v30 = vadd.f32 %v8878_v14, %v1567_v38  ;;  %v8886_v14 = vld [vmem:[#allocation74_spill] sm:$0xff] }
 0x35e   :  { %3115 = vrot.lane.b32.xlu1 %v3108_v60, %s5177_s12  ;;  %v7374_v11 = vpop.permute.xlu0 %2743  ;;  %v8872_v60 = vld [vmem:[#allocation43_spill] sm:$0xff]  ;;  %v3187_v53 = vrot.slane %v3172_v46, 4 }
 0x35f   :  { %3152 = vrot.lane.b32.xlu0 %v3144_v39, %s5177_s12  ;;  %v7376_v48 = vpop.permute.xlu1 %2739  ;;  %v7378_v56 = vpop.permute.xlu2 %2848  ;;  %v3184_v39 = vrot.slane %v3170_v12, 4  ;;  %v1488_v25 = vadd.f32 %v8872_v60, %v1447_v15  ;;  %v8877_v12 = vld [vmem:[#allocation92_spill] sm:$0xff]  ;;  %v3181_v15 = vsel %vm1057_vm9, %v3179_v16, %v3180_v44 }
 0x360   :  { %3156 = vrot.lane.b32.xlu2 %v3149_v49, %s5177_s12  ;;  %8870 = vst [vmem:[#allocation163_spill] sm:$0xff] %v7378_v56  ;;  %v1569_v49 = vadd.f32 %v8873_v41, %v1528_v19  ;;  %v8876_v56 = vld [vmem:[#allocation89_spill] sm:$0xff]  ;;  %v3169_v19 = vmul.f32 %v7093_v18, %v3166_v31 }
 0x361   :  { %v1527_v23 = vadd.f32 %v8876_v56, %v1488_v25  ;;  %v3186_v20 = vsel %vm1057_vm9, %v3184_v39, %v3185_v32  ;;  %v8879_v56 = vld [vmem:[#allocation28_spill] sm:$0xff] }
 0x362   :  { %v1608_v43 = vadd.f32 %v8877_v12, %v1569_v49  ;;  %v1566_v24 = vadd.f32 %v8879_v56, %v1525_v42  ;;  %v8882_v25 = vld [vmem:[#allocation60_spill] sm:$0xff]  ;;  %v8883_v49 = vld [vmem:[#allocation63_spill] sm:$0xff]  ;;  %v3182_v31 = vrot.slane %v3169_v19, 4  ;;  %v3223_v12 = vrot.slane %v3210_v5, 5  ;;  %v8889_v5 = vld [vmem:[#allocation77_spill] sm:$0xff] }
 0x363   :  { %v1568_v41 = vadd.f32 %v8882_v25, %v1527_v23  ;;  %v3188_v42 = vsel %vm1057_vm9, %v3185_v32, %v3187_v53  ;;  %v3211_v56 = vmul.f32 %v6681_v1, %v7383_v37  ;;  %v3212_v23 = vmul.f32 %v6687_v21, %v7383_v37  ;;  %v8887_v25 = vld [vmem:[#allocation82_spill] sm:$0xff] }
 0x364   :  { %v1649_v16 = vadd.f32 %v8883_v49, %v1608_v43  ;;  %v8888_v49 = vld [vmem:[#allocation85_spill] sm:$0xff]  ;;  %v3183_v19 = vsel %vm1057_vm9, %v3180_v44, %v3182_v31  ;;  %v3208_v21 = vmul.f32 %v8810_v2, %v7383_v37 }
 0x365   :  { %v1607_v43 = vadd.f32 %v8887_v25, %v1568_v41  ;;  %v3226_v31 = vrot.slane %v3212_v23, 5 }
 0x366   :  { %3154 = vrot.lane.b32.xlu1 %v3147_v26, %s5177_s12  ;;  %v7403_v13 = vpop.permute.xlu0 %2782  ;;  %v3221_v26 = vrot.slane %v3209_v22, 5  ;;  %v3246_v22 = vstv %s4906_s21  ;;  %v3220_v2 = vrot.slane %v3208_v21, 5  ;;  %s4925_s21 = sld [smem:[#allocation11 + $0xd]] }
 0x367   :  { %3189 = vrot.lane.b32.xlu0 %v3181_v15, %s5177_s12  ;;  %8880 = vst [vmem:[#allocation151_spill] sm:$0xff] %v7403_v13  ;;  %v7405_v60 = vpop.permute.xlu1 %2778  ;;  %v7409_v39 = vpop.permute.xlu2 %2871  ;;  %v8885_v15 = vld [vmem:[#allocation31_spill] sm:$0xff]  ;;  %v3248_v32 = vmul.f32 %v7119_v51, %v3246_v22  ;;  %v3247_v53 = vmul.f32 %v7007_v17, %v3246_v22  ;;  %v3251_v21 = vmul.f32 %v7174_v54, %v3246_v22 }
 0x368   :  { %3193 = vrot.lane.b32.xlu2 %v3186_v20, %s5177_s12  ;;  %8881 = vst [vmem:[#allocation167_spill] sm:$0xff] %v7405_v60  ;;  %v1647_v38 = vadd.f32 %v8885_v15, %v1606_v30  ;;  %v1605_v20 = vadd.f32 %v8886_v14, %v1566_v24  ;;  %v3224_v46 = vsel %vm1122_vm10, %v3221_v26, %v3223_v12  ;;  %v8890_v30 = vld [vmem:[#allocation38_spill] sm:$0xff]  ;;  %v8892_v12 = vld [vmem:[#allocation53_spill] sm:$0xff]  ;;  %v8893_v14 = vld [vmem:[#allocation56_spill] sm:$0xff] }
 0x369   :  { %8884 = vst [vmem:[#allocation159_spill] sm:$0xff] %v7409_v39  ;;  %v1688_v39 = vadd.f32 %v8888_v49, %v1649_v16  ;;  %v3225_v16 = vrot.slane %v3211_v56, 5  ;;  %v1648_v15 = vadd.f32 %v8892_v12, %v1607_v43  ;;  %v3260_v25 = vrot.slane %v3248_v32, 5  ;;  %v8895_v49 = vld [vmem:[#allocation41_spill] sm:$0xff]  ;;  %v8898_v60 = vld [vmem:[#allocation96_spill] sm:$0xff] }
 0x36a   :  { %v1686_v1 = vadd.f32 %v8889_v5, %v1647_v38  ;;  %v1646_v24 = vadd.f32 %v8890_v30, %v1605_v20  ;;  %v8896_v20 = vld [vmem:[#allocation67_spill] sm:$0xff]  ;;  %v3259_v30 = vrot.slane %v3247_v53, 5  ;;  %v8897_v56 = vld [vmem:[#allocation93_spill] sm:$0xff]  ;;  %v3222_v43 = vsel %vm1122_vm10, %v3220_v2, %v3221_v26 }
 0x36b   :  { %v3227_v5 = vsel %vm1122_vm10, %v3225_v16, %v3226_v31  ;;  %v1687_v23 = vadd.f32 %v8897_v56, %v1648_v15  ;;  %v3252_v15 = vmul.f32 %v7342_v33, %v3246_v22  ;;  %v3265_v56 = vrot.slane %v3251_v21, 5 }
 0x36c   :  { %v3261_v32 = vsel %vm1122_vm10, %v3259_v30, %v3260_v25  ;;  %v3250_v21 = vmul.f32 %v7070_v9, %v3246_v22 }
 0x36e   :  { %3191 = vrot.lane.b32.xlu1 %v3183_v19, %s5177_s12  ;;  %v7430_v41 = vpop.permute.xlu0 %2819  ;;  %v1727_v19 = vadd.f32 %v8895_v49, %v1686_v1  ;;  %v3213_v1 = vmul.f32 %v7011_v28, %v7383_v37  ;;  %v8904_v49 = vld [vmem:[#allocation34_spill] sm:$0xff] }
 0x36f   :  { %3195 = vrot.lane.b32.xlu0 %v3188_v42, %s5177_s12  ;;  %8891 = vst [vmem:[#allocation143_spill] sm:$0xff] %v7430_v41  ;;  %v7432_v44 = vpop.permute.xlu1 %2784  ;;  %v1729_v42 = vadd.f32 %v8893_v14, %v1688_v39  ;;  %v7437_v38 = vpop.permute.xlu2 %2910  ;;  %v3249_v39 = vmul.f32 %v7093_v18, %v3246_v22  ;;  %v8903_v14 = vld [vmem:[#allocation49_spill] sm:$0xff]  ;;  %v8920_v41 = vld [vmem:[#allocation88_spill] sm:$0xff] }
 0x370   :  { %3232 = vrot.lane.b32.xlu2 %v3224_v46, %s5177_s12  ;;  %8894 = vst [vmem:[#allocation150_spill] sm:$0xff] %v7437_v38  ;;  %v1685_v46 = vadd.f32 %v8896_v20, %v1646_v24  ;;  %v8899_v24 = vld [vmem:[#allocation70_spill] sm:$0xff]  ;;  %v8912_v22 = vld [vmem:[#allocation29_spill] sm:$0xff] }
 0x371   :  { %v1768_v13 = vadd.f32 %v8898_v60, %v1729_v42  ;;  %v1766_v16 = vadd.f32 %v8899_v24, %v1727_v19  ;;  %v8900_v60 = vld [vmem:[#allocation42_spill] sm:$0xff]  ;;  %v1728_v42 = vadd.f32 %v8903_v14, %v1687_v23  ;;  %v3262_v37 = vrot.slane %v3249_v39, 5  ;;  %v8909_v39 = vld [vmem:[#allocation80_spill] sm:$0xff] }
 0x372   :  { %v1726_v53 = vadd.f32 %v8900_v60, %v1685_v46  ;;  %v3228_v19 = vrot.slane %v3213_v1, 5  ;;  %v8908_v46 = vld [vmem:[#allocation95_spill] sm:$0xff]  ;;  %v3287_v60 = vstv %s4907_s22  ;;  %v7471_v23 = vld [vmem:[#allocation2 + $0x18] sm:$0xff]  ;;  %s4926_s22 = sld [smem:[#allocation11 + $0x3e]] }
 0x373   :  { %v1795_v2 = vadd.f32 %v8904_v49, %v1768_v13  ;;  %v1767_v24 = vadd.f32 %v8908_v46, %v1728_v42  ;;  %v3291_v13 = vmul.f32 %v7471_v23, %v3287_v60  ;;  %v3263_v1 = vsel %vm1122_vm10, %v3260_v25, %v3262_v37  ;;  %v7484_v42 = vld [vmem:[#allocation2] sm:$0xff]  ;;  %v8911_v25 = vld [vmem:[#allocation69_spill] sm:$0xff] }
 0x374   :  { %v3229_v38 = vsel %vm1122_vm10, %v3226_v31, %v3228_v19  ;;  %v8910_v31 = vld [vmem:[#allocation21_spill] sm:$0xff]  ;;  %v3288_v49 = vmul.f32 %v7484_v42, %v3287_v60 }
 0x375   :  { %v1820_v14 = vadd.f32 %v8909_v39, %v1795_v2  ;;  %v1794_v37 = vadd.f32 %v8912_v22, %v1767_v24  ;;  %v3305_v39 = vrot.slane %v3291_v13, 6  ;;  %v8919_v22 = vld [vmem:[#allocation58_spill] sm:$0xff]  ;;  %v8921_v13 = vld [vmem:[#allocation44_spill] sm:$0xff] }
 0x376   :  { %3230 = vrot.lane.b32.xlu1 %v3222_v43, %s5177_s12  ;;  %v7455_v26 = vpop.permute.xlu0 %2844  ;;  %v8907_v43 = vld [vmem:[#allocation27_spill] sm:$0xff] }
 0x377   :  { %3234 = vrot.lane.b32.xlu0 %v3227_v5, %s5177_s12  ;;  %8901 = vst [vmem:[#allocation169_spill] sm:$0xff] %v7455_v26  ;;  %v7457_v12 = vpop.permute.xlu1 %2821  ;;  %v7462_v20 = vpop.permute.xlu2 %2916  ;;  %v8906_v5 = vld [vmem:[#allocation84_spill] sm:$0xff]  ;;  %v3267_v26 = vrot.slane %v3252_v15, 5 }
 0x378   :  { %3269 = vrot.lane.b32.xlu2 %v3261_v32, %s5177_s12  ;;  %8902 = vst [vmem:[#allocation161_spill] sm:$0xff] %v7457_v12  ;;  %v1765_v30 = vadd.f32 %v8906_v5, %v1726_v53  ;;  %v1793_v32 = vadd.f32 %v8907_v43, %v1766_v16  ;;  %v7469_v12 = vmul.f32 %v6857_v6, %v3287_v60  ;;  %v7477_v16 = vld [vmem:[#allocation2 + $0x20] sm:$0xff]  ;;  %v8915_v43 = vld [vmem:[#allocation66_spill] sm:$0xff] }
 0x379   :  { %8905 = vst [vmem:[#allocation144_spill] sm:$0xff] %v7462_v20  ;;  %v3292_v53 = vmul.f32 %v7477_v16, %v3287_v60  ;;  %v3268_v6 = vsel %vm1122_vm10, %v3265_v56, %v3267_v26  ;;  %v3264_v26 = vrot.slane %v3250_v21, 5  ;;  %v3326_v21 = vstv %s4908_s25  ;;  %s4927_s25 = sld [smem:[#allocation11 + $0x14]] }
 0x37a   :  { %v1792_v15 = vadd.f32 %v8910_v31, %v1765_v30  ;;  %v1818_v2 = vadd.f32 %v8911_v25, %v1793_v32  ;;  %v3301_v30 = vrot.slane %v7469_v12, 6  ;;  %v8917_v31 = vld [vmem:[#allocation59_spill] sm:$0xff]  ;;  %v3300_v32 = vrot.slane %v3288_v49, 6  ;;  %v8918_v25 = vld [vmem:[#allocation37_spill] sm:$0xff] }
 0x37b   :  { %v3329_v49 = vmul.f32 %v7093_v18, %v3326_v21 }
 0x37c   :  { %v1817_v20 = vadd.f32 %v8917_v31, %v1792_v15  ;;  %v1859_v24 = vadd.f32 %v8918_v25, %v1818_v2  ;;  %v3328_v15 = vmul.f32 %v7119_v51, %v3326_v21  ;;  %v8922_v2 = vld [vmem:[#allocation83_spill] sm:$0xff] }
 0x37e   :  { %3236 = vrot.lane.b32.xlu1 %v3229_v38, %s5177_s12  ;;  %v7490_v5 = vpop.permute.xlu0 %2850  ;;  %v1861_v38 = vadd.f32 %v8915_v43, %v1820_v14  ;;  %v3266_v14 = vsel %vm1122_vm10, %v3264_v26, %v3265_v56  ;;  %v3340_v25 = vrot.slane %v3328_v15, 6 }
 0x37f   :  { %3271 = vrot.lane.b32.xlu0 %v3263_v1, %s5177_s12  ;;  %8913 = vst [vmem:[#allocation164_spill] sm:$0xff] %v7490_v5  ;;  %v7492_v19 = vpop.permute.xlu1 %2846  ;;  %v7496_v46 = vpop.permute.xlu2 %2953  ;;  %v3306_v1 = vrot.slane %v3292_v53, 6  ;;  %v3302_v5 = vsel %vm1187_vm11, %v3300_v32, %v3301_v30  ;;  %v1858_v53 = vadd.f32 %v8921_v13, %v1817_v20  ;;  %v8926_v20 = vld [vmem:[#allocation98_spill] sm:$0xff]  ;;  %v8928_v32 = vld [vmem:[#allocation73_spill] sm:$0xff] }
 0x380   :  { %3275 = vrot.lane.b32.xlu2 %v3268_v6, %s5177_s12  ;;  %8914 = vst [vmem:[#allocation152_spill] sm:$0xff] %v7492_v19  ;;  %v1819_v6 = vadd.f32 %v8919_v22, %v1794_v37  ;;  %v3290_v19 = vmul.f32 %v6874_v4, %v3287_v60  ;;  %v1900_v12 = vadd.f32 %v8920_v41, %v1861_v38  ;;  %v8923_v4 = vld [vmem:[#allocation62_spill] sm:$0xff]  ;;  %v8929_v22 = vld [vmem:[#allocation47_spill] sm:$0xff]  ;;  %v8931_v13 = vld [vmem:[#allocation105_spill] sm:$0xff] }
 0x381   :  { %8916 = vst [vmem:[#allocation162_spill] sm:$0xff] %v7496_v46  ;;  %v3307_v43 = vsel %vm1187_vm11, %v3305_v39, %v3306_v1  ;;  %v1898_v37 = vadd.f32 %v8922_v2, %v1859_v24  ;;  %v3293_v41 = vmul.f32 %v7011_v28, %v3287_v60  ;;  %v1897_v18 = vadd.f32 %v8928_v32, %v1858_v53  ;;  %v8932_v46 = vld [vmem:[#allocation91_spill] sm:$0xff]  ;;  %v8933_v53 = vld [vmem:[#allocation45_spill] sm:$0xff] }
 0x382   :  { %v1860_v31 = vadd.f32 %v8923_v4, %v1819_v6  ;;  %v3303_v39 = vrot.slane %v3290_v19, 6  ;;  %v3342_v24 = vrot.slane %v3329_v49, 6  ;;  %v3330_v2 = vmul.f32 %v7070_v9, %v3326_v21  ;;  %v8936_v32 = vld [vmem:[#allocation97_spill] sm:$0xff] }
 0x383   :  { %v1939_v6 = vadd.f32 %v8929_v22, %v1898_v37  ;;  %v3308_v60 = vrot.slane %v3293_v41, 6  ;;  %v3331_v4 = vmul.f32 %v7174_v54, %v3326_v21  ;;  %v1938_v15 = vadd.f32 %v8933_v53, %v1897_v18  ;;  %v8934_v37 = vld [vmem:[#allocation52_spill] sm:$0xff] }
 0x384   :  { %v3304_v19 = vsel %vm1187_vm11, %v3301_v30, %v3303_v39  ;;  %v3343_v49 = vsel %vm1187_vm11, %v3340_v25, %v3342_v24  ;;  %v8935_v41 = vld [vmem:[#allocation104_spill] sm:$0xff]  ;;  %v3344_v39 = vrot.slane %v3330_v2, 6  ;;  %v8938_v24 = vld [vmem:[#allocation102_spill] sm:$0xff] }
 0x385   :  { %v3345_v18 = vrot.slane %v3331_v4, 6  ;;  %v8942_v53 = vld [vmem:[#allocation108_spill] sm:$0xff]  ;;  %v8944_v2 = vld [vmem:[#allocation94_spill] sm:$0xff] }
 0x386   :  { %3273 = vrot.lane.b32.xlu1 %v3266_v14, %s5177_s12  ;;  %v7515_v56 = vpop.permute.xlu0 %2873  ;;  %v8930_v14 = vld [vmem:[#allocation99_spill] sm:$0xff] }
 0x387   :  { %3310 = vrot.lane.b32.xlu0 %v3302_v5, %s5177_s12  ;;  %8924 = vst [vmem:[#allocation170_spill] sm:$0xff] %v7515_v56  ;;  %v7517_v38 = vpop.permute.xlu1 %2869  ;;  %v1941_v5 = vadd.f32 %v8926_v20, %v1900_v12  ;;  %v7520_v26 = vpop.permute.xlu2 %2992  ;;  %v1978_v12 = vadd.f32 %v8932_v46, %v1939_v6  ;;  %v3309_v20 = vsel %vm1187_vm11, %v3306_v1, %v3308_v60  ;;  %v3367_v6 = vstv %s4909_s27  ;;  %s4928_s27 = sld [smem:[#allocation11 + $0x45]] }
 0x388   :  { %3314 = vrot.lane.b32.xlu2 %v3307_v43, %s5177_s12  ;;  %8925 = vst [vmem:[#allocation30_spill] sm:$0xff] %v7517_v38  ;;  %v1899_v43 = vadd.f32 %v8930_v14, %v1860_v31  ;;  %v3327_v46 = vmul.f32 %v7007_v17, %v3326_v21  ;;  %v8937_v14 = vld [vmem:[#allocation101_spill] sm:$0xff]  ;;  %v1977_v60 = vadd.f32 %v8938_v24, %v1938_v15  ;;  %v8945_v38 = vld [vmem:[#allocation103_spill] sm:$0xff]  ;;  %v8948_v24 = vld [vmem:[#allocation116_spill] sm:$0xff] }
 0x389   :  { %8927 = vst [vmem:[#allocation26_spill] sm:$0xff] %v7520_v26  ;;  %v1980_v28 = vadd.f32 %v8931_v13, %v1941_v5  ;;  %v2019_v5 = vadd.f32 %v8935_v41, %v1978_v12  ;;  %v8940_v12 = vld [vmem:[#allocation111_spill] sm:$0xff]  ;;  %v3368_v26 = vmul.f32 %v7484_v42, %v3367_v6 }
 0x38a   :  { %v1940_v31 = vadd.f32 %v8934_v37, %v1899_v43  ;;  %v8939_v43 = vld [vmem:[#allocation110_spill] sm:$0xff]  ;;  %v8943_v37 = vld [vmem:[#allocation117_spill] sm:$0xff]  ;;  %v2018_v4 = vadd.f32 %v8944_v2, %v1977_v60 }
 0x38b   :  { %v2021_v22 = vadd.f32 %v8936_v32, %v1980_v28  ;;  %v3339_v32 = vrot.slane %v3327_v46, 6 }
 0x38c   :  { %v1979_v13 = vadd.f32 %v8937_v14, %v1940_v31  ;;  %v3346_v31 = vsel %vm1187_vm11, %v3344_v39, %v3345_v18  ;;  %v8951_v39 = vld [vmem:[#allocation113_spill] sm:$0xff] }
 0x38d   :  { %v3341_v15 = vsel %vm1187_vm11, %v3339_v32, %v3340_v25  ;;  %v8954_v32 = vld [vmem:[#allocation123_spill] sm:$0xff] }
 0x38e   :  { %3312 = vrot.lane.b32.xlu1 %v3304_v19, %s5177_s12  ;;  %v7540_v1 = vpop.permute.xlu0 %2912  ;;  %v2058_v19 = vadd.f32 %v8940_v12, %v2019_v5  ;;  %v3332_v5 = vmul.f32 %v7342_v33, %v3326_v21 }
 0x38f   :  { %3316 = vrot.lane.b32.xlu0 %v3309_v20, %s5177_s12  ;;  %v7542_v30 = vpop.permute.xlu1 %2875  ;;  %v2060_v20 = vadd.f32 %v8939_v43, %v2021_v22  ;;  %v8946_v22 = vld [vmem:[#allocation107_spill] sm:$0xff] }
 0x390   :  { %3351 = vrot.lane.b32.xlu2 %v3343_v49, %s5177_s12  ;;  %v7548_v28 = vpop.permute.xlu2 %3029  ;;  %v2020_v49 = vadd.f32 %v8942_v53, %v1979_v13  ;;  %v2099_v56 = vadd.f32 %v8945_v38, %v2058_v19  ;;  %v2057_v14 = vadd.f32 %v8946_v22, %v2018_v4  ;;  %v8947_v13 = vld [vmem:[#allocation100_spill] sm:$0xff]  ;;  %v8952_v19 = vld [vmem:[#allocation114_spill] sm:$0xff]  ;;  %v8957_v4 = vld [vmem:[#allocation129_spill] sm:$0xff] }
 0x391   :  { %8941 = vst [vmem:[#allocation24_spill] sm:$0xff] %v7548_v28  ;;  %v2101_v41 = vadd.f32 %v8943_v37, %v2060_v20  ;;  %v8949_v20 = vld [vmem:[#allocation109_spill] sm:$0xff]  ;;  %v8953_v53 = vld [vmem:[#allocation122_spill] sm:$0xff] }
 0x392   :  { %v2059_v46 = vadd.f32 %v8947_v13, %v2020_v49  ;;  %v2138_v43 = vadd.f32 %v8948_v24, %v2099_v56  ;;  %v2098_v21 = vadd.f32 %v8952_v19, %v2057_v14  ;;  %v8956_v56 = vld [vmem:[#allocation120_spill] sm:$0xff]  ;;  %v8958_v13 = vld [vmem:[#allocation106_spill] sm:$0xff] }
 0x393   :  { %v2140_v60 = vadd.f32 %v8949_v20, %v2101_v41  ;;  %v8962_v19 = vld [vmem:[#allocation128_spill] sm:$0xff] }
 0x394   :  { %v2100_v12 = vadd.f32 %v8951_v39, %v2059_v46  ;;  %v2179_v49 = vadd.f32 %v8954_v32, %v2138_v43  ;;  %v2137_v24 = vadd.f32 %v8958_v13, %v2098_v21  ;;  %v8959_v46 = vld [vmem:[#allocation115_spill] sm:$0xff]  ;;  %v8966_v13 = vld [vmem:[#allocation134_spill] sm:$0xff] }
 0x395   :  { %v2181_v37 = vadd.f32 %v8953_v53, %v2140_v60  ;;  %v3371_v60 = vmul.f32 %v7477_v16, %v3367_v6  ;;  %v8960_v43 = vld [vmem:[#allocation119_spill] sm:$0xff] }
 0x396   :  { %3349 = vrot.lane.b32.xlu1 %v3341_v15, %s5177_s12  ;;  %v7565_v38 = vpop.permute.xlu0 %2949  ;;  %v2139_v41 = vadd.f32 %v8956_v56, %v2100_v12  ;;  %v7577_v15 = vld [vmem:[#allocation2 + $0x8] sm:$0xff]  ;;  %v2218_v20 = vadd.f32 %v8959_v46, %v2179_v49  ;;  %v2178_v39 = vadd.f32 %v8960_v43, %v2137_v24  ;;  %v3392_v49 = vstv %s4910_s0  ;;  %v8964_v56 = vld [vmem:[#allocation125_spill] sm:$0xff]  ;;  %v8967_v24 = vld [vmem:[#allocation135_spill] sm:$0xff]  ;;  %s4930_s0 = sld [smem:[#allocation11 + $0x4c]] }
 0x397   :  { %3353 = vrot.lane.b32.xlu0 %v3346_v31, %s5177_s12  ;;  %8950 = vst [vmem:[#allocation72_spill] sm:$0xff] %v7565_v38  ;;  %v7567_v25 = vpop.permute.xlu1 %2914  ;;  %v2220_v31 = vadd.f32 %v8957_v4, %v2181_v37  ;;  %v3369_v22 = vmul.f32 %v7577_v15, %v3367_v6  ;;  %v8963_v37 = vld [vmem:[#allocation121_spill] sm:$0xff]  ;;  %v8982_v38 = vld [vmem:[#allocation158_spill] sm:$0xff] }
 0x398   :  { %3376 = vrot.lane.b32.xlu2 %v3368_v26, %s5178_s15  ;;  %v7573_v2 = vpop.permute.xlu2 %3035  ;;  %v3347_v26 = vrot.slane %v3332_v5, 6  ;;  %v8961_v5 = vld [vmem:[#allocation112_spill] sm:$0xff]  ;;  %v2259_v53 = vadd.f32 %v8962_v19, %v2218_v20  ;;  %v3370_v19 = vmul.f32 %v7471_v23, %v3367_v6  ;;  %v8973_v6 = vld [vmem:[#allocation131_spill] sm:$0xff] }
 0x399   :  { %8955 = vst [vmem:[#allocation55_spill] sm:$0xff] %v7573_v2  ;;  %v2180_v12 = vadd.f32 %v8961_v5, %v2139_v41  ;;  %v2261_v32 = vadd.f32 %v8963_v37, %v2220_v31  ;;  %v8969_v20 = vld [vmem:[#allocation132_spill] sm:$0xff]  ;;  %v8970_v31 = vld [vmem:[#allocation146_spill] sm:$0xff]  ;;  %v8972_v2 = vld [vmem:[#allocation127_spill] sm:$0xff] }
 0x39a   :  { %v3348_v14 = vsel %vm1187_vm11, %v3345_v18, %v3347_v26  ;;  %v8965_v26 = vld [vmem:[#allocation126_spill] sm:$0xff] }
 0x39b   :  { %v2219_v4 = vadd.f32 %v8964_v56, %v2180_v12  ;;  %v2300_v46 = vadd.f32 %v8966_v13, %v2261_v32  ;;  %v8971_v37 = vld [vmem:[#allocation118_spill] sm:$0xff]  ;;  %v7608_v56 = vstv %s4911_s28  ;;  %v7614_v32 = vld [vmem:[#allocation2 + $0x10] sm:$0x3f]  ;;  %s4931_s28 = sld [smem:[#allocation11 + $0x22]] }
 0x39c   :  { %v8976_v13 = vld [vmem:[#allocation133_spill] sm:$0xff] }
 0x39d   :  { %v2260_v43 = vadd.f32 %v8969_v20, %v2219_v4  ;;  %v2327_v5 = vadd.f32 %v8970_v31, %v2300_v46  ;;  %v8979_v20 = vld [vmem:[#allocation138_spill] sm:$0xff] }
 0x39e   :  { %3355 = vrot.lane.b32.xlu1 %v3348_v14, %s5177_s12  ;;  %v7591_v21 = vpop.permute.xlu0 %2955  ;;  %v2298_v14 = vadd.f32 %v8967_v24, %v2259_v53  ;;  %v3421_v53 = vmul.f32 %v7577_v15, %v7608_v56  ;;  %s4917_s12 = sld [smem:[#allocation11 + $0x21]] }
 0x39f   :  { %3378 = vrot.lane.b32.xlu0 %v3369_v22, %s5178_s15  ;;  %v7593_v18 = vpop.permute.xlu1 %2951  ;;  %v2217_v22 = vadd.f32 %v8965_v26, %v2178_v39  ;;  %v3395_v39 = vmul.f32 %v7070_v9, %v3392_v49  ;;  %v8975_v9 = vld [vmem:[#allocation145_spill] sm:$0xff]  ;;  %v2352_v46 = vadd.f32 %v8976_v13, %v2327_v5  ;;  %v3396_v13 = vmul.f32 %v7174_v54, %v3392_v49 }
 0x3a0   :  { %3382 = vrot.lane.b32.xlu2 %v3371_v60, %s5178_s15  ;;  %v3393_v60 = vmul.f32 %v7007_v17, %v3392_v49  ;;  %v2325_v12 = vadd.f32 %v8972_v2, %v2298_v14  ;;  %v3422_v17 = vmul.f32 %v7614_v32, %v7608_v56  ;;  %v8974_v2 = vld [vmem:[#allocation124_spill] sm:$0xff] }
 0x3a1   :  { %v2258_v28 = vadd.f32 %v8971_v37, %v2217_v22  ;;  %v2299_v26 = vadd.f32 %v8974_v2, %v2260_v43  ;;  %v8981_v37 = vld [vmem:[#allocation157_spill] sm:$0xff]  ;;  %v3433_v43 = vrot.slane %v3421_v53, 1  ;;  %v8984_v2 = vld [vmem:[#allocation154_spill] sm:$0xff] }
 0x3a2   :  { %v7599_v41 = vpop.permute.xlu2 %3074  ;;  %v2350_v22 = vadd.f32 %v8975_v9, %v2325_v12  ;;  %v3435_v12 = vrot.slane %v3422_v17, 1  ;;  %v8985_v9 = vld [vmem:[#allocation172_spill] sm:$0xff]  ;;  %v7645_v17 = vstv %s4912_s29  ;;  %s4932_s29 = sld [smem:[#allocation11 + $0x53]] }
 0x3a3   :  { %8968 = vst [vmem:[#allocation51_spill] sm:$0xff] %v7599_v41  ;;  %v2297_v4 = vadd.f32 %v8973_v6, %v2258_v28  ;;  %v2326_v31 = vadd.f32 %v8979_v20, %v2299_v26  ;;  %v2393_v41 = vadd.f32 %v8981_v37, %v2352_v46  ;;  %v3423_v26 = vmul.f32 %v7471_v23, %v7608_v56  ;;  %v8987_v46 = vld [vmem:[#allocation140_spill] sm:$0xff] }
 0x3a4   :  { %v2391_v28 = vadd.f32 %v8982_v38, %v2350_v22  ;;  %v8986_v38 = vld [vmem:[#allocation130_spill] sm:$0xff]  ;;  %v7654_v20 = vmul.f32 %v7119_v51, %v7645_v17 }
 0x3a5   :  { %v2351_v5 = vadd.f32 %v8984_v2, %v2326_v31  ;;  %v8988_v31 = vld [vmem:[#allocation153_spill] sm:$0xff] }
 0x3a6   :  { %3380 = vrot.lane.b32.xlu1 %v3370_v19, %s5178_s15  ;;  %v7623_v24 = vpop.permute.xlu0 %2994  ;;  %v2430_v53 = vadd.f32 %v8987_v46, %v2391_v28  ;;  %v8990_v28 = vld [vmem:[#allocation171_spill] sm:$0xff] }
 0x3a7   :  { %3401 = vrot.lane.b32.xlu0 %v3393_v60, %s5178_s15  ;;  %8977 = vst [vmem:[#allocation40_spill] sm:$0xff] %v7623_v24  ;;  %v7625_v14 = vpop.permute.xlu1 %2990  ;;  %v8980_v60 = vld [vmem:[#allocation139_spill] sm:$0xff] }
 0x3a8   :  { %3405 = vrot.lane.b32.xlu2 %v3395_v39, %s5178_s15  ;;  %8978 = vst [vmem:[#allocation33_spill] sm:$0xff] %v7625_v14  ;;  %v2324_v19 = vadd.f32 %v8980_v60, %v2297_v4  ;;  %v2432_v39 = vadd.f32 %v8985_v9, %v2393_v41  ;;  %v3394_v14 = vmul.f32 %v7119_v51, %v3392_v49  ;;  %v8991_v9 = vld [vmem:[#allocation155_spill] sm:$0xff] }
 0x3a9   :  { %v7641_v4 = vmul.f32 %v7477_v16, %v7608_v56  ;;  %v3436_v41 = vsel %vm862_vm6, %v3433_v43, %v3435_v12  ;;  %v3420_v49 = vmul.f32 %v7484_v42, %v7608_v56  ;;  %v2471_v2 = vadd.f32 %v8990_v28, %v2430_v53  ;;  %v8994_v53 = vld [vmem:[#allocation166_spill] sm:$0xff] }
 0x3aa   :  { %v7631_v6 = vpop.permute.xlu2 %3111  ;;  %v2349_v22 = vadd.f32 %v8986_v38, %v2324_v19  ;;  %v8989_v19 = vld [vmem:[#allocation136_spill] sm:$0xff]  ;;  %v2473_v38 = vadd.f32 %v8991_v9, %v2432_v39 }
 0x3ab   :  { %8983 = vst [vmem:[#allocation86_spill] sm:$0xff] %v7631_v6  ;;  %v2392_v37 = vadd.f32 %v8989_v19, %v2351_v5  ;;  %v3438_v46 = vrot.slane %v7641_v4, 1  ;;  %v7666_v6 = vld [vmem:[#allocation3] sm:$0xff]  ;;  %v3432_v9 = vrot.slane %v3420_v49, 1 }
 0x3ac   :  { %v2390_v60 = vadd.f32 %v8988_v31, %v2349_v22  ;;  %v3459_v51 = vmul.f32 %v7666_v6, %v7645_v17  ;;  %v8993_v5 = vld [vmem:[#allocation165_spill] sm:$0xff]  ;;  %v2510_v31 = vadd.f32 %v7017_v50, %v2471_v2 }
 0x3ad   :  { %v2431_v22 = vadd.f32 %v8993_v5, %v2392_v37  ;;  %v3434_v2 = vsel %vm862_vm6, %v3432_v9, %v3433_v43 }
 0x3ae   :  { %3403 = vrot.lane.b32.xlu1 %v3394_v14, %s5178_s15  ;;  %v2429_v39 = vadd.f32 %v8994_v53, %v2390_v60  ;;  %v3471_v24 = vrot.slane %v3459_v51, 1  ;;  %v8995_v60 = vld [vmem:[#allocation148_spill] sm:$0xff] }
 0x3af   :  { %3407 = vrot.lane.b32.xlu0 %v3396_v13, %s5178_s15  ;;  %v7661_v14 = vpop.permute.xlu0 %3031  ;;  %v3437_v13 = vrot.slane %v3423_v26, 1  ;;  %v3472_v26 = vrot.slane %v7654_v20, 1  ;;  %v2472_v4 = vadd.f32 %v6951_v40, %v2431_v22  ;;  %v3463_v20 = vmul.f32 %v7174_v54, %v7645_v17 }
 0x3b0   :  { %3444 = vrot.lane.b32.xlu2 %v3436_v41, %s5178_s15  ;;  %8992 = vst [vmem:[#allocation75_spill] sm:$0xff] %v7661_v14  ;;  %v7663_v12 = vpop.permute.xlu1 %2996  ;;  %v2512_v41 = vadd.f32 %v7015_v29, %v2473_v38  ;;  %v7681_v14 = vld [vmem:[#allocation3 + $0x10] sm:$0x3f]  ;;  %v2470_v5 = vadd.f32 %v8995_v60, %v2429_v39  ;;  %v8996_v29 = vld [vmem:[#allocation168_spill] sm:$0xff] }
 0x3b1   :  { %v3461_v37 = vmul.f32 %v7681_v14, %v7645_v17  ;;  %v2551_v38 = vadd.f32 %v8996_v29, %v2510_v31  ;;  %v3439_v50 = vsel %vm862_vm6, %v3437_v13, %v3438_v46  ;;  %v3473_v40 = vsel %vm862_vm6, %v3471_v24, %v3472_v26  ;;  %v8997_v13 = vld [vmem:[#allocation160_spill] sm:$0xff] }
 0x3b2   :  { %v7676_v19 = vpop.permute.xlu2 %3150  ;;  %v2553_v28 = vadd.f32 %v7138_v8, %v2512_v41  ;;  %v7692_v8 = vld [vmem:[#allocation2 + $0x28] sm:$0x3f]  ;;  %v2509_v51 = vadd.f32 %v6949_v35, %v2470_v5  ;;  %v2511_v22 = vadd.f32 %v8997_v13, %v2472_v4  ;;  %v3499_v31 = vstv %s7670_s30  ;;  %s4933_s30 = sld [smem:[#allocation11 + $0x29]] }
 0x3b3   :  { %v3425_v49 = vmul.f32 %v7692_v8, %v7608_v56  ;;  %v2590_v43 = vadd.f32 %v7136_v57, %v2551_v38  ;;  %v3474_v41 = vrot.slane %v3461_v37, 1  ;;  %v3464_v56 = vmul.f32 %v7342_v33, %v7645_v17 }
 0x3b4   :  { %v2592_v53 = vadd.f32 %v6967_v61, %v2553_v28  ;;  %v2552_v54 = vadd.f32 %v7076_v34, %v2511_v22  ;;  %v2550_v35 = vadd.f32 %v7078_v59, %v2509_v51  ;;  %v3477_v28 = vrot.slane %v3463_v20, 1  ;;  %v7722_v34 = vld [vmem:[#allocation3 + $0x18] sm:$0xff] }
 0x3b5   :  { %v2631_v57 = vadd.f32 %v7243_v55, %v2590_v43  ;;  %v3440_v37 = vrot.slane %v3425_v49, 1  ;;  %v3479_v5 = vrot.slane %v3464_v56, 1  ;;  %v3500_v29 = vmul.f32 %v7484_v42, %v3499_v31 }
 0x3b6   :  { %3442 = vrot.lane.b32.xlu1 %v3434_v2, %s5178_s15  ;;  %v2633_v4 = vadd.f32 %v7241_v47, %v2592_v53  ;;  %v2591_v9 = vadd.f32 %v7195_v62, %v2552_v54  ;;  %v7720_v38 = vmul.f32 %v7577_v15, %v3499_v31  ;;  %v3462_v59 = vmul.f32 %v7722_v34, %v7645_v17 }
 0x3b7   :  { %3446 = vrot.lane.b32.xlu0 %v3439_v50, %s5178_s15  ;;  %v2589_v47 = vadd.f32 %v6906_v7, %v2550_v35  ;;  %v2670_v55 = vadd.f32 %v7085_v45, %v2631_v57  ;;  %v3475_v62 = vsel %vm862_vm6, %v3472_v26, %v3474_v41  ;;  %v3480_v50 = vsel %vm862_vm6, %v3477_v28, %v3479_v5 }
 0x3b8   :  { %3481 = vrot.lane.b32.xlu2 %v3473_v40, %s5178_s15  ;;  %v7705_v24 = vpop.permute.xlu1 %3033  ;;  %v2672_v60 = vadd.f32 %v7321_v0, %v2633_v4  ;;  %v3441_v0 = vsel %vm862_vm6, %v3438_v46, %v3440_v37  ;;  %v3503_v2 = vmul.f32 %v7471_v23, %v3499_v31  ;;  %v3504_v17 = vmul.f32 %v7477_v16, %v3499_v31  ;;  %v9000_v37 = vld [vmem:[#allocation142_spill] sm:$0xff] }
 0x3b9   :  { %v7703_v39 = vpop.permute.xlu0 %3070  ;;  %v2630_v7 = vadd.f32 %v7193_v58, %v2589_v47  ;;  %v2632_v45 = vadd.f32 %v7023_v10, %v2591_v9  ;;  %v2711_v26 = vadd.f32 %v7319_v63, %v2670_v55  ;;  %v3513_v20 = vrot.slane %v7720_v38, 2  ;;  %v9002_v38 = vld [vmem:[#allocation143_spill] sm:$0xff]  ;;  %v9003_v47 = vld [vmem:[#allocation156_spill] sm:$0xff] }
 0x3ba   :  { %v7714_v61 = vpop.permute.xlu2 %3156  ;;  %v2713_v46 = vadd.f32 %v7201_v52, %v2672_v60  ;;  %v3476_v51 = vrot.slane %v3462_v59, 1  ;;  %v3512_v52 = vrot.slane %v3500_v29, 2  ;;  %v3517_v43 = vrot.slane %v3503_v2, 2  ;;  %v9001_v29 = vld [vmem:[#allocation149_spill] sm:$0xff]  ;;  %v9004_v2 = vld [vmem:[#allocation151_spill] sm:$0xff] }
 0x3bb   :  { %v2671_v13 = vadd.f32 %v7285_v36, %v2632_v45  ;;  %v2669_v22 = vadd.f32 %v7287_v3, %v2630_v7  ;;  %v2750_v58 = vadd.f32 %v7376_v48, %v2711_v26  ;;  %v3518_v53 = vrot.slane %v3504_v17, 2  ;;  %v8999_v48 = vld [vmem:[#allocation147_spill] sm:$0xff]  ;;  %v9006_v26 = vld [vmem:[#allocation164_spill] sm:$0xff] }
 0x3bc   :  { %v2752_v10 = vadd.f32 %v7374_v11, %v2713_v46  ;;  %v3514_v54 = vsel %vm927_vm7, %v3512_v52, %v3513_v20  ;;  %v3505_v36 = vmul.f32 %v7692_v8, %v3499_v31  ;;  %v3502_v3 = vmul.f32 %v7614_v32, %v3499_v31  ;;  %v8998_v11 = vld [vmem:[#allocation141_spill] sm:$0xff]  ;;  %v9005_v7 = vld [vmem:[#allocation167_spill] sm:$0xff] }
 0x3bd   :  { %v2712_v41 = vadd.f32 %v7350_v27, %v2671_v13  ;;  %v2710_v35 = vadd.f32 %v8998_v11, %v2669_v22  ;;  %v2791_v4 = vadd.f32 %v8999_v48, %v2750_v58  ;;  %v3478_v57 = vsel %vm862_vm6, %v3476_v51, %v3477_v28  ;;  %v9007_v51 = vld [vmem:[#allocation152_spill] sm:$0xff]  ;;  %v9008_v52 = vld [vmem:[#allocation161_spill] sm:$0xff] }
 0x3be   :  { %3448 = vrot.lane.b32.xlu1 %v3441_v0, %s5178_s15  ;;  %v2793_v56 = vadd.f32 %v7432_v44, %v2752_v10  ;;  %v7764_v9 = vstv %s7730_s5  ;;  %v3519_v27 = vsel %vm927_vm7, %v3517_v43, %v3518_v53  ;;  %v7769_v44 = vld [vmem:[#allocation3 + $0x8] sm:$0xff]  ;;  %v9009_v48 = vld [vmem:[#allocation137_spill] sm:$0xff]  ;;  %s4934_s5 = sld [smem:[#allocation11 + $0x5a]] }
 0x3bf   :  { %3483 = vrot.lane.b32.xlu0 %v3475_v62, %s5178_s15  ;;  %v3540_v31 = vmul.f32 %v7769_v44, %v7764_v9  ;;  %v3541_v60 = vmul.f32 %v7681_v14, %v7764_v9  ;;  %v2749_v5 = vadd.f32 %v9000_v37, %v2710_v35  ;;  %v2751_v28 = vadd.f32 %v9001_v29, %v2712_v41 }
 0x3c0   :  { %3487 = vrot.lane.b32.xlu2 %v3480_v50, %s5178_s15  ;;  %v7744_v49 = vpop.permute.xlu1 %3072  ;;  %v2830_v59 = vadd.f32 %v9002_v38, %v2791_v4  ;;  %v2832_v55 = vadd.f32 %v9003_v47, %v2793_v56  ;;  %v3515_v50 = vrot.slane %v3502_v3, 2  ;;  %v3520_v56 = vrot.slane %v3505_v36, 2  ;;  %v7794_v3 = vld [vmem:[#allocation3 + $0x20] sm:$0xff] }
 0x3c1   :  { %v7742_v40 = vpop.permute.xlu0 %3076  ;;  %v2792_v17 = vadd.f32 %v9004_v2, %v2751_v28  ;;  %v2790_v45 = vadd.f32 %v9005_v7, %v2749_v5  ;;  %v3552_v10 = vrot.slane %v3540_v31, 2  ;;  %v3554_v58 = vrot.slane %v3541_v60, 2  ;;  %v9011_v5 = vld [vmem:[#allocation169_spill] sm:$0xff]  ;;  %v9012_v28 = vld [vmem:[#allocation163_spill] sm:$0xff]  ;;  %v9014_v7 = vld [vmem:[#allocation170_spill] sm:$0xff] }
 0x3c2   :  { %v7751_v63 = vpop.permute.xlu2 %3193  ;;  %v2859_v46 = vadd.f32 %v9006_v26, %v2832_v55  ;;  %v2857_v13 = vadd.f32 %v9007_v51, %v2830_v59  ;;  %v7798_v11 = vmul.f32 %v7794_v3, %v7764_v9  ;;  %v7801_v35 = vstv %s7758_s1  ;;  %v9013_v59 = vld [vmem:[#allocation144_spill] sm:$0xff]  ;;  %v9015_v26 = vld [vmem:[#allocation30_spill] sm:$0xff]  ;;  %s4935_s1 = sld [smem:[#allocation11 + $0x30]] }
 0x3c3   :  { %v2831_v43 = vadd.f32 %v9008_v52, %v2792_v17  ;;  %v2829_v4 = vadd.f32 %v9009_v48, %v2790_v45  ;;  %v3521_v31 = vsel %vm927_vm7, %v3518_v53, %v3520_v56  ;;  %v3555_v36 = vsel %vm927_vm7, %v3552_v10, %v3554_v58  ;;  %v9017_v48 = vld [vmem:[#allocation26_spill] sm:$0xff] }
 0x3c4   :  { %v2884_v41 = vadd.f32 %v7542_v30, %v2859_v46  ;;  %v3516_v30 = vsel %vm927_vm7, %v3513_v20, %v3515_v50  ;;  %v3539_v60 = vmul.f32 %v7666_v6, %v7764_v9  ;;  %v3581_v37 = vmul.f32 %v7577_v15, %v7801_v35 }
 0x3c5   :  { %v2856_v29 = vadd.f32 %v9011_v5, %v2829_v4  ;;  %v2858_v38 = vadd.f32 %v9012_v28, %v2831_v43  ;;  %v3557_v2 = vrot.slane %v7798_v11, 2  ;;  %v3580_v17 = vmul.f32 %v7484_v42, %v7801_v35  ;;  %v9020_v5 = vld [vmem:[#allocation75_spill] sm:$0xff] }
 0x3c6   :  { %3485 = vrot.lane.b32.xlu1 %v3478_v57, %s5178_s15  ;;  %v9010_v57 = vld [vmem:[#allocation159_spill] sm:$0xff]  ;;  %v2925_v20 = vadd.f32 %v9013_v59, %v2884_v41  ;;  %v3593_v58 = vrot.slane %v3581_v37, 3  ;;  %v3551_v41 = vrot.slane %v3539_v60, 2  ;;  %v7836_v11 = vmul.f32 %v7477_v16, %v7801_v35  ;;  %v9019_v60 = vld [vmem:[#allocation162_spill] sm:$0xff] }
 0x3c7   :  { %3522 = vrot.lane.b32.xlu0 %v3514_v54, %s5178_s15  ;;  %v3542_v54 = vmul.f32 %v7722_v34, %v7764_v9  ;;  %v2883_v45 = vadd.f32 %v9014_v7, %v2858_v38  ;;  %v2881_v46 = vadd.f32 %v9015_v26, %v2856_v29  ;;  %v3592_v56 = vrot.slane %v3580_v17, 3  ;;  %v9021_v28 = vld [vmem:[#allocation55_spill] sm:$0xff] }
 0x3c8   :  { %3526 = vrot.lane.b32.xlu2 %v3519_v27, %s5178_s15  ;;  %v7782_v0 = vpop.permute.xlu1 %3109  ;;  %v2882_v27 = vadd.f32 %v9010_v57, %v2857_v13  ;;  %v2964_v51 = vadd.f32 %v7591_v21, %v2925_v20  ;;  %v9016_v21 = vld [vmem:[#allocation150_spill] sm:$0xff]  ;;  %v3598_v20 = vrot.slane %v7836_v11, 3  ;;  %v9024_v11 = vld [vmem:[#allocation24_spill] sm:$0xff] }
 0x3c9   :  { %v7780_v62 = vpop.permute.xlu0 %3113  ;;  %v3556_v50 = vrot.slane %v3542_v54, 2  ;;  %v2924_v52 = vadd.f32 %v7567_v25, %v2883_v45  ;;  %v3582_v54 = vmul.f32 %v7614_v32, %v7801_v35  ;;  %v3553_v25 = vsel %vm927_vm7, %v3551_v41, %v3552_v10 }
 0x3ca   :  { %v7788_v22 = vpop.permute.xlu2 %3232  ;;  %v2923_v53 = vadd.f32 %v7540_v1, %v2882_v27  ;;  %v3005_v43 = vadd.f32 %v7663_v12, %v2964_v51  ;;  %v3594_v12 = vsel %vm992_vm8, %v3592_v56, %v3593_v58  ;;  %v3544_v27 = vmul.f32 %v7342_v33, %v7764_v9  ;;  %v9022_v33 = vld [vmem:[#allocation40_spill] sm:$0xff] }
 0x3cb   :  { %v3558_v57 = vsel %vm927_vm7, %v3556_v50, %v3557_v2  ;;  %v2963_v37 = vadd.f32 %v9019_v60, %v2924_v52  ;;  %v3595_v59 = vrot.slane %v3582_v54, 3  ;;  %v9023_v50 = vld [vmem:[#allocation33_spill] sm:$0xff]  ;;  %v3583_v54 = vmul.f32 %v7471_v23, %v7801_v35 }
 0x3cc   :  { %v2962_v1 = vadd.f32 %v7593_v18, %v2923_v53  ;;  %v2922_v18 = vadd.f32 %v9016_v21, %v2881_v46  ;;  %v3044_v10 = vadd.f32 %v9021_v28, %v3005_v43  ;;  %v3559_v52 = vrot.slane %v3544_v27, 2  ;;  %v9025_v21 = vld [vmem:[#allocation86_spill] sm:$0xff] }
 0x3cd   :  { %v3004_v9 = vadd.f32 %v9022_v33, %v2963_v37  ;;  %v3618_v43 = vstv %s7830_s11  ;;  %v3596_v41 = vsel %vm992_vm8, %v3593_v58, %v3595_v59  ;;  %v3659_v33 = vstv %s4917_s12  ;;  %s4936_s11 = sld [smem:[#allocation11 + $0x61]] }
 0x3ce   :  { %3524 = vrot.lane.b32.xlu1 %v3516_v30, %s5178_s15  ;;  %v3003_v4 = vadd.f32 %v9017_v48, %v2962_v1  ;;  %v9018_v30 = vld [vmem:[#allocation72_spill] sm:$0xff]  ;;  %v3085_v7 = vadd.f32 %v7742_v40, %v3044_v10  ;;  %v3620_v56 = vmul.f32 %v7769_v44, %v3618_v43  ;;  %v3623_v58 = vmul.f32 %v7794_v3, %v3618_v43  ;;  %s8370_s12 = sld [smem:[#allocation10 + $0x3]] }
 0x3cf   :  { %3528 = vrot.lane.b32.xlu0 %v3521_v31, %s5178_s15  ;;  %v3585_v31 = vmul.f32 %v7692_v8, %v7801_v35  ;;  %v3043_v51 = vadd.f32 %v7705_v24, %v3004_v9  ;;  %v3619_v24 = vmul.f32 %v7666_v6, %v3618_v43 }
 0x3d0   :  { %3563 = vrot.lane.b32.xlu2 %v3555_v36, %s5178_s15  ;;  %v3116_v55 = vpop.permute.xlu1 %3115  ;;  %v2961_v36 = vadd.f32 %v9018_v30, %v2922_v18  ;;  %v3042_v29 = vadd.f32 %v9020_v5, %v3003_v4  ;;  %v3560_v18 = vsel %vm927_vm7, %v3557_v2, %v3559_v52  ;;  %v9026_v4 = vld [vmem:[#allocation51_spill] sm:$0xff]  ;;  %v3597_v30 = vrot.slane %v3583_v54, 3 }
 0x3d1   :  { %v3153_v47 = vpop.permute.xlu0 %3152  ;;  %v3600_v46 = vrot.slane %v3585_v31, 3  ;;  %v3124_v1 = vadd.f32 %v3116_v55, %v3085_v7  ;;  %v3622_v55 = vmul.f32 %v7722_v34, %v3618_v43  ;;  %v3632_v31 = vrot.slane %v3620_v56, 3  ;;  %v7896_v7 = vld [vmem:[#allocation3 + $0x28] sm:$0x3f] }
 0x3d2   :  { %v7826_v13 = vpop.permute.xlu2 %3269  ;;  %v3002_v17 = vadd.f32 %v9023_v50, %v2961_v36  ;;  %v3083_v45 = vadd.f32 %v7744_v49, %v3042_v29  ;;  %v3637_v28 = vrot.slane %v3623_v58, 3  ;;  %v3599_v50 = vsel %vm992_vm8, %v3597_v30, %v3598_v20 }
 0x3d3   :  { %v3601_v48 = vsel %vm992_vm8, %v3598_v20, %v3600_v46  ;;  %v3165_v2 = vadd.f32 %v7714_v61, %v3124_v1  ;;  %v3624_v20 = vmul.f32 %v7896_v7, %v3618_v43 }
 0x3d4   :  { %v3041_v40 = vadd.f32 %v9024_v11, %v3002_v17  ;;  %v3122_v49 = vadd.f32 %v9025_v21, %v3083_v45 }
 0x3d5   :  { %v3639_v11 = vrot.slane %v3624_v20, 3 }
 0x3d6   :  { %3561 = vrot.lane.b32.xlu1 %v3553_v25, %s5178_s15  ;;  %v3082_v35 = vadd.f32 %v7703_v39, %v3041_v40  ;;  %v3163_v25 = vadd.f32 %v3153_v47, %v3122_v49  ;;  %v3636_v39 = vrot.slane %v3622_v55, 3  ;;  %v3631_v47 = vrot.slane %v3619_v24, 3 }
 0x3d7   :  { %3565 = vrot.lane.b32.xlu0 %v3558_v57, %s5178_s15  ;;  %v3084_v57 = vadd.f32 %v9026_v4, %v3043_v51  ;;  %v3663_v40 = vmul.f32 %v7471_v23, %v3659_v33  ;;  %v3698_v49 = vstv %s4918_s26  ;;  %s5180_s26 = smov [#allocation13]  }
 0x3d8   :  { %3602 = vrot.lane.b32.xlu2 %v3594_v12, %s5178_s15  ;;  %v3155_v53 = vpop.permute.xlu1 %3154  ;;  %v3121_v60 = vadd.f32 %v7782_v0, %v3082_v35  ;;  %v3633_v9 = vsel %vm992_vm8, %v3631_v47, %v3632_v31  ;;  %v3638_v0 = vsel %vm992_vm8, %v3636_v39, %v3637_v28  ;;  %v3699_v58 = vmul.f32 %v7666_v6, %v3698_v49 }
 0x3d9   :  { %v3190_v38 = vpop.permute.xlu0 %3189  ;;  %v3123_v36 = vadd.f32 %v7780_v62, %v3084_v57  ;;  %v3621_v62 = vmul.f32 %v7681_v14, %v3618_v43  ;;  %v3664_v43 = vmul.f32 %v7477_v16, %v3659_v33  ;;  %v3703_v39 = vmul.f32 %v7794_v3, %v3698_v49 }
 0x3da   :  { %v7859_v26 = vpop.permute.xlu2 %3275  ;;  %v3162_v61 = vadd.f32 %v7676_v19, %v3121_v60  ;;  %v3711_v30 = vrot.slane %v3699_v58, 4  ;;  %v3704_v47 = vmul.f32 %v7896_v7, %v3698_v49 }
 0x3db   :  { %v3164_v10 = vadd.f32 %v3155_v53, %v3123_v36  ;;  %v3661_v53 = vmul.f32 %v7577_v15, %v3659_v33 }
 0x3dc   :  { %v3201_v17 = vadd.f32 %v3190_v38, %v3162_v61 }
 0x3dd   :  { %v3203_v19 = vadd.f32 %v7751_v63, %v3164_v10  ;;  %v3673_v56 = vrot.slane %v3661_v53, 4  ;;  %v3640_v63 = vsel %vm992_vm8, %v3637_v28, %v3639_v11 }
 0x3de   :  { %3567 = vrot.lane.b32.xlu1 %v3560_v18, %s5178_s15 }
 0x3df   :  { %3604 = vrot.lane.b32.xlu0 %v3596_v41, %s5178_s15  ;;  %v3634_v41 = vrot.slane %v3621_v62, 3  ;;  %v3717_v62 = vrot.slane %v3703_v39, 4 }
 0x3e0   :  { %3608 = vrot.lane.b32.xlu2 %v3601_v48, %s5178_s15  ;;  %v3192_v27 = vpop.permute.xlu1 %3191  ;;  %v3700_v48 = vmul.f32 %v7769_v44, %v3698_v49 }
 0x3e1   :  { %v3196_v12 = vpop.permute.xlu0 %3195  ;;  %v3202_v5 = vadd.f32 %v3192_v27, %v3163_v25  ;;  %v3635_v21 = vsel %vm992_vm8, %v3632_v31, %v3634_v41  ;;  %v3677_v25 = vrot.slane %v3663_v40, 4 }
 0x3e2   :  { %v3204_v37 = vadd.f32 %v3196_v12, %v3165_v2  ;;  %v7882_v29 = vpop.permute.xlu2 %3314  ;;  %v3678_v2 = vrot.slane %v3664_v43, 4  ;;  %v3712_v12 = vrot.slane %v3700_v48, 4 }
 0x3e3   :  { %v3243_v59 = vadd.f32 %v7788_v22, %v3202_v5  ;;  %v3662_v22 = vmul.f32 %v7614_v32, %v3659_v33  ;;  %v3701_v5 = vmul.f32 %v7681_v14, %v3698_v49 }
 0x3e4   :  { %v3679_v36 = vsel %vm1057_vm9, %v3677_v25, %v3678_v2 }
 0x3e5   :  { %v3675_v54 = vrot.slane %v3662_v22, 4  ;;  %v3719_v22 = vrot.slane %v3704_v47, 4 }
 0x3e6   :  { %3606 = vrot.lane.b32.xlu1 %v3599_v50, %s5178_s15  ;;  %v3714_v50 = vrot.slane %v3701_v5, 4  ;;  %v3819_v5 = vstv %s4921_s16 }
 0x3e7   :  { %3641 = vrot.lane.b32.xlu0 %v3633_v9, %s5178_s15  ;;  %v3676_v18 = vsel %vm1057_vm9, %v3673_v56, %v3675_v54  ;;  %v3821_v47 = vmul.f32 %v7577_v15, %v3819_v5 }
 0x3e8   :  { %3645 = vrot.lane.b32.xlu2 %v3638_v0, %s5178_s15  ;;  %v3231_v46 = vpop.permute.xlu1 %3230 }
 0x3e9   :  { %v3235_v45 = vpop.permute.xlu0 %3234  ;;  %v3242_v1 = vadd.f32 %v3231_v46, %v3201_v17  ;;  %v3739_v17 = vstv %s4919_s13  ;;  %v3720_v46 = vsel %vm1057_vm9, %v3717_v62, %v3719_v22  ;;  %s4802_s13 = sshll.u32 %s5180_s26, 4  ;;  %s4803_s13 = int_to_ptr.vmem [resolvable:$true] %s4802_s13 }
 0x3ea   :  { %v3244_v51 = vadd.f32 %v3235_v45, %v3203_v19  ;;  %v7899_v52 = vpop.permute.xlu2 %3351  ;;  %v3715_v19 = vsel %vm1057_vm9, %v3712_v12, %v3714_v50  ;;  %v3702_v45 = vmul.f32 %v7722_v34, %v3698_v49  ;;  %v3742_v48 = vmul.f32 %v7614_v32, %v3739_v17 }
 0x3eb   :  { %v3281_v38 = vadd.f32 %v7826_v13, %v3242_v1  ;;  %v3660_v13 = vmul.f32 %v7484_v42, %v3659_v33  ;;  %v3740_v1 = vmul.f32 %v7484_v42, %v3739_v17  ;;  %v3820_v50 = vmul.f32 %v7484_v42, %v3819_v5 }
 0x3ed   :  { %v3672_v27 = vrot.slane %v3660_v13, 4  ;;  %v3752_v49 = vrot.slane %v3740_v1, 5  ;;  %v3778_v13 = vstv %s4920_s14  ;;  %v7976_v1 = vld [vmem:[#allocation2 + $0x20] sm:$0xff] }
 0x3ee   :  { %3643 = vrot.lane.b32.xlu1 %v3635_v21, %s5178_s15  ;;  %v3781_v58 = vmul.f32 %v7681_v14, %v3778_v13 }
 0x3ef   :  { %3647 = vrot.lane.b32.xlu0 %v3640_v63, %s5178_s15  ;;  %v3674_v60 = vsel %vm1057_vm9, %v3672_v27, %v3673_v56  ;;  %v3716_v63 = vrot.slane %v3702_v45, 4  ;;  %v3755_v27 = vrot.slane %v3742_v48, 5  ;;  %v3832_v45 = vrot.slane %v3820_v50, 6 }
 0x3f0   :  { %3684 = vrot.lane.b32.xlu2 %v3676_v18, %s5178_s15  ;;  %v3237_v55 = vpop.permute.xlu1 %3236  ;;  %v3858_v48 = vstv %s4922_s17  ;;  %s4804_s17 = sshll.u32 %s8584_s4, 4  ;;  %s4805_s17 = int_to_ptr.hbm [resolvable:$true] %s4804_s17 }
 0x3f1   :  { %v3272_v24 = vpop.permute.xlu0 %3271  ;;  %v3245_v4 = vadd.f32 %v3237_v55, %v3204_v37  ;;  %v3713_v37 = vsel %vm1057_vm9, %v3711_v30, %v3712_v12  ;;  %v3780_v55 = vmul.f32 %v7769_v44, %v3778_v13  ;;  %v3794_v30 = vrot.slane %v3781_v58, 5  ;;  %v7986_v58 = vld [vmem:[#allocation2 + $0x18] sm:$0xff] }
 0x3f2   :  { %v3282_v35 = vadd.f32 %v3272_v24, %v3243_v59  ;;  %v7913_v57 = vpop.permute.xlu2 %3376 }
 0x3f3   :  { %v3284_v31 = vadd.f32 %v7859_v26, %v3245_v4  ;;  %v3665_v26 = vmul.f32 %v7692_v8, %v3659_v33  ;;  %v3741_v33 = vmul.f32 %v7577_v15, %v3739_v17 }
 0x3f5   :  { %v3680_v0 = vrot.slane %v3665_v26, 4  ;;  %v3753_v40 = vrot.slane %v3741_v33, 5  ;;  %v3782_v26 = vmul.f32 %v7722_v34, %v3778_v13 }
 0x3f6   :  { %3682 = vrot.lane.b32.xlu1 %v3674_v60, %s5178_s15 }
 0x3f7   :  { %3686 = vrot.lane.b32.xlu0 %v3679_v36, %s5178_s15  ;;  %v3681_v20 = vsel %vm1057_vm9, %v3678_v2, %v3680_v0  ;;  %v3756_v39 = vsel %vm1122_vm10, %v3753_v40, %v3755_v27  ;;  %v3796_v22 = vrot.slane %v3782_v26, 5 }
 0x3f8   :  { %3721 = vrot.lane.b32.xlu2 %v3713_v37, %s5178_s15  ;;  %v3274_v10 = vpop.permute.xlu1 %3273 }
 0x3f9   :  { %v3311_v28 = vpop.permute.xlu0 %3310  ;;  %v3283_v61 = vadd.f32 %v3274_v10, %v3244_v51  ;;  %v3743_v51 = vmul.f32 %v7471_v23, %v3739_v17  ;;  %v3754_v23 = vsel %vm1122_vm10, %v3752_v49, %v3753_v40 }
 0x3fa   :  { %v3322_v59 = vadd.f32 %v3311_v28, %v3281_v38  ;;  %v7926_v9 = vpop.permute.xlu2 %3382  ;;  %v3783_v28 = vmul.f32 %v7794_v3, %v3778_v13 }
 0x3fb   :  { %v3324_v53 = vadd.f32 %v7882_v29, %v3283_v61  ;;  %v3744_v29 = vmul.f32 %v7477_v16, %v3739_v17  ;;  %v3757_v21 = vrot.slane %v3743_v51, 5  ;;  %v3718_v16 = vsel %vm1057_vm9, %v3716_v63, %v3717_v62 }
 0x3fd   :  { %v3758_v43 = vrot.slane %v3744_v29, 5  ;;  %v3822_v29 = vmul.f32 %v7614_v32, %v3819_v5 }
 0x3fe   :  { %3688 = vrot.lane.b32.xlu1 %v3681_v20, %s5178_s15 }
 0x3ff   :  { %3723 = vrot.lane.b32.xlu0 %v3715_v19, %s5178_s15  ;;  %v3759_v24 = vsel %vm1122_vm10, %v3757_v21, %v3758_v43  ;;  %v3833_v19 = vrot.slane %v3821_v47, 6 }
 0x400   :  { %3727 = vrot.lane.b32.xlu2 %v3720_v46, %s5178_s15  ;;  %v3313_v56 = vpop.permute.xlu1 %3312 }
 0x401   :  { %v3317_v41 = vpop.permute.xlu0 %3316  ;;  %v3323_v11 = vadd.f32 %v3313_v56, %v3282_v35  ;;  %v3834_v42 = vsel %vm1187_vm11, %v3832_v45, %v3833_v19 }
 0x402   :  { %v3325_v54 = vadd.f32 %v3317_v41, %v3284_v31  ;;  %v7940_v38 = vpop.permute.xlu2 %3405  ;;  %v3792_v31 = vrot.slane %v3780_v55, 5  ;;  %v3824_v41 = vmul.f32 %v7976_v1, %v3819_v5 }
 0x403   :  { %v3362_v18 = vadd.f32 %v7899_v52, %v3323_v11  ;;  %v3745_v52 = vmul.f32 %v7692_v8, %v3739_v17  ;;  %v3797_v17 = vrot.slane %v3783_v28, 5  ;;  %v3825_v11 = vmul.f32 %v7692_v8, %v3819_v5 }
 0x404   :  { %v3795_v10 = vsel %vm1122_vm10, %v3792_v31, %v3794_v30  ;;  %v3838_v49 = vrot.slane %v3824_v41, 6 }
 0x405   :  { %v3760_v36 = vrot.slane %v3745_v52, 5  ;;  %v3798_v46 = vsel %vm1122_vm10, %v3796_v22, %v3797_v17  ;;  %v3823_v52 = vmul.f32 %v7986_v58, %v3819_v5 }
 0x406   :  { %3725 = vrot.lane.b32.xlu1 %v3718_v16, %s5178_s15  ;;  %v3840_v16 = vrot.slane %v3825_v11, 6 }
 0x407   :  { %3762 = vrot.lane.b32.xlu0 %v3754_v23, %s5178_s15  ;;  %v3761_v37 = vsel %vm1122_vm10, %v3758_v43, %v3760_v36  ;;  %v3835_v43 = vrot.slane %v3822_v29, 6  ;;  %v3837_v5 = vrot.slane %v3823_v52, 6 }
 0x408   :  { %3766 = vrot.lane.b32.xlu2 %v3759_v24, %s5178_s15  ;;  %v3350_v4 = vpop.permute.xlu1 %3349 }
 0x409   :  { %v3354_v35 = vpop.permute.xlu0 %3353  ;;  %v3361_v2 = vadd.f32 %v3350_v4, %v3322_v59  ;;  %v3836_v24 = vsel %vm1187_vm11, %v3833_v19, %v3835_v43  ;;  %v3863_v4 = vmul.f32 %v7794_v3, %v3858_v48  ;;  %v3839_v47 = vsel %vm1187_vm11, %v3837_v5, %v3838_v49 }
 0x40a   :  { %v3363_v25 = vadd.f32 %v3354_v35, %v3324_v53  ;;  %v7953_v12 = vpop.permute.xlu2 %3444  ;;  %v3841_v35 = vsel %vm1187_vm11, %v3838_v49, %v3840_v16 }
 0x40b   :  { %v3388_v60 = vadd.f32 %v7913_v57, %v3361_v2  ;;  %v3779_v57 = vmul.f32 %v7666_v6, %v3778_v13 }
 0x40d   :  { %v3791_v20 = vrot.slane %v3779_v57, 5  ;;  %v3861_v57 = vmul.f32 %v7681_v14, %v3858_v48 }
 0x40e   :  { %3764 = vrot.lane.b32.xlu1 %v3756_v39, %s5178_s15  ;;  %v3877_v39 = vrot.slane %v3863_v4, 6 }
 0x40f   :  { %3768 = vrot.lane.b32.xlu0 %v3761_v37, %s5178_s15  ;;  %v3793_v51 = vsel %vm1122_vm10, %v3791_v20, %v3792_v31 }
 0x410   :  { %3803 = vrot.lane.b32.xlu2 %v3795_v10, %s5178_s15  ;;  %v3356_v61 = vpop.permute.xlu1 %3355 }
 0x411   :  { %v3379_v59 = vpop.permute.xlu0 %3378  ;;  %v3364_v0 = vadd.f32 %v3356_v61, %v3325_v54  ;;  %v3864_v61 = vmul.f32 %v7896_v7, %v3858_v48 }
 0x412   :  { %v3389_v62 = vadd.f32 %v3379_v59, %v3362_v18  ;;  %v7967_v53 = vpop.permute.xlu2 %3481 }
 0x413   :  { %v3391_v33 = vadd.f32 %v7926_v9, %v3364_v0  ;;  %v3784_v9 = vmul.f32 %v7896_v7, %v3778_v13  ;;  %v3860_v13 = vmul.f32 %v7769_v44, %v3858_v48  ;;  %v3879_v19 = vrot.slane %v3864_v61, 6 }
 0x415   :  { %v3799_v18 = vrot.slane %v3784_v9, 5  ;;  %v3880_v45 = vsel %vm1187_vm11, %v3877_v39, %v3879_v19 }
 0x416   :  { %3801 = vrot.lane.b32.xlu1 %v3793_v51, %s5178_s15 }
 0x417   :  { %3805 = vrot.lane.b32.xlu0 %v3798_v46, %s5178_s15  ;;  %v3800_v55 = vsel %vm1122_vm10, %v3797_v17, %v3799_v18  ;;  %v3874_v17 = vrot.slane %v3861_v57, 6 }
 0x418   :  { %3842 = vrot.lane.b32.xlu2 %v3834_v42, %s5178_s15  ;;  %v3381_v54 = vpop.permute.xlu1 %3380 }
 0x419   :  { %v3402_v56 = vpop.permute.xlu0 %3401  ;;  %v3390_v63 = vadd.f32 %v3381_v54, %v3363_v25  ;;  %v3859_v25 = vmul.f32 %v7666_v6, %v3858_v48 }
 0x41a   :  { %v3413_v40 = vadd.f32 %v3402_v56, %v3388_v60  ;;  %v3488_v21 = vpop.permute.xlu2 %3487  ;;  %v3872_v60 = vrot.slane %v3860_v13, 6  ;;  %v3951_v13 = vstv %s4925_s21 }
 0x41b   :  { %v3415_v23 = vadd.f32 %v7940_v38, %v3390_v63  ;;  %v3862_v38 = vmul.f32 %v7722_v34, %v3858_v48  ;;  %v3871_v26 = vrot.slane %v3859_v25, 6  ;;  %v3956_v4 = vmul.f32 %v7976_v1, %v3951_v13 }
 0x41c   :  { %v3875_v46 = vsel %vm1187_vm11, %v3872_v60, %v3874_v17 }
 0x41d   :  { %v3876_v37 = vrot.slane %v3862_v38, 6  ;;  %v3873_v10 = vsel %vm1187_vm11, %v3871_v26, %v3872_v60  ;;  %v3955_v38 = vmul.f32 %v7986_v58, %v3951_v13  ;;  %v3970_v5 = vrot.slane %v3956_v4, 1 }
 0x41e   :  { %3807 = vrot.lane.b32.xlu1 %v3800_v55, %s5178_s15 }
 0x41f   :  { %3844 = vrot.lane.b32.xlu0 %v3836_v24, %s5178_s15  ;;  %v3878_v59 = vsel %vm1187_vm11, %v3876_v37, %v3877_v39  ;;  %v3969_v60 = vrot.slane %v3955_v38, 1 }
 0x420   :  { %3848 = vrot.lane.b32.xlu2 %v3841_v35, %s5178_s15  ;;  %v3404_v27 = vpop.permute.xlu1 %3403  ;;  %v3953_v35 = vmul.f32 %v7577_v15, %v3951_v13 }
 0x421   :  { %v3408_v2 = vpop.permute.xlu0 %3407  ;;  %v3414_v30 = vadd.f32 %v3404_v27, %v3389_v62  ;;  %v3971_v57 = vsel %vm862_vm6, %v3969_v60, %v3970_v5 }
 0x422   :  { %v3416_v31 = vadd.f32 %v3408_v2, %v3391_v33  ;;  %v3527_v36 = vpop.permute.xlu2 %3526  ;;  %v3899_v33 = vstv %s4923_s18 }
 0x423   :  { %v3455_v28 = vadd.f32 %v7953_v12, %v3414_v30  ;;  %v3901_v51 = vmul.f32 %v7577_v15, %v3899_v33  ;;  %v3902_v11 = vmul.f32 %v7986_v58, %v3899_v33  ;;  %v3903_v55 = vmul.f32 %v7976_v1, %v3899_v33 }
 0x424   :  { %v3965_v15 = vrot.slane %v3953_v35, 1 }
 0x426   :  { %3846 = vrot.lane.b32.xlu1 %v3839_v47, %s5178_s15  ;;  %v3990_v47 = vstv %s4926_s22 }
 0x427   :  { %3881 = vrot.lane.b32.xlu0 %v3873_v10, %s5178_s15  ;;  %v3954_v10 = vmul.f32 %v7614_v32, %v3951_v13  ;;  %v3993_v61 = vmul.f32 %v7681_v14, %v3990_v47 }
 0x428   :  { %3885 = vrot.lane.b32.xlu2 %v3878_v59, %s5178_s15  ;;  %v3443_v62 = vpop.permute.xlu1 %3442  ;;  %v3992_v59 = vmul.f32 %v7769_v44, %v3990_v47 }
 0x429   :  { %v3447_v50 = vpop.permute.xlu0 %3446  ;;  %v3454_v0 = vadd.f32 %v3443_v62, %v3413_v40  ;;  %v8013_v40 = vld [vmem:[#allocation2] sm:$0xff]  ;;  %v3967_v17 = vrot.slane %v3954_v10, 1 }
 0x42a   :  { %v3456_v12 = vadd.f32 %v3447_v50, %v3415_v23  ;;  %v3564_v22 = vpop.permute.xlu2 %3563  ;;  %v3900_v63 = vmul.f32 %v8013_v40, %v3899_v33  ;;  %v3952_v25 = vmul.f32 %v8013_v40, %v3951_v13  ;;  %v3957_v50 = vmul.f32 %v7692_v8, %v3951_v13 }
 0x42b   :  { %v3493_v20 = vadd.f32 %v7967_v53, %v3454_v0  ;;  %v3924_v53 = vstv %s4924_s19  ;;  %v4004_v19 = vrot.slane %v3992_v59, 1  ;;  %v3968_v14 = vsel %vm862_vm6, %v3965_v15, %v3967_v17 }
 0x42c   :  { %v3925_v43 = vmul.f32 %v7666_v6, %v3924_v53  ;;  %v3926_v24 = vmul.f32 %v7769_v44, %v3924_v53  ;;  %v3928_v52 = vmul.f32 %v7794_v3, %v3924_v53  ;;  %v3964_v37 = vrot.slane %v3952_v25, 1 }
 0x42d   :  { %v3927_v26 = vmul.f32 %v7722_v34, %v3924_v53  ;;  %v3972_v33 = vrot.slane %v3957_v50, 1  ;;  %v3996_v25 = vmul.f32 %v7896_v7, %v3990_v47 }
 0x42e   :  { %3883 = vrot.lane.b32.xlu1 %v3875_v46, %s5178_s15  ;;  %v4031_v46 = vstv %s4927_s25 }
 0x42f   :  { %3887 = vrot.lane.b32.xlu0 %v3880_v45, %s5178_s15  ;;  %v4036_v35 = vmul.f32 %v7976_v1, %v4031_v46  ;;  %v4035_v4 = vmul.f32 %v7986_v58, %v4031_v46  ;;  %s4929_s15 = sld [smem:[#allocation11 + $0x1b]] }
 0x430   :  { %3910 = vrot.lane.b32.xlu2 %v3901_v51, %s5179_s20  ;;  %v3449_v42 = vpop.permute.xlu1 %3448  ;;  %v3973_v51 = vsel %vm862_vm6, %v3970_v5, %v3972_v33 }
 0x431   :  { %v3484_v29 = vpop.permute.xlu0 %3483  ;;  %v3457_v9 = vadd.f32 %v3449_v42, %v3416_v31  ;;  %v3995_v42 = vmul.f32 %v7794_v3, %v3990_v47  ;;  %v4050_v60 = vrot.slane %v4036_v35, 2  ;;  %v4049_v5 = vrot.slane %v4035_v4, 2 }
 0x432   :  { %v3494_v41 = vadd.f32 %v3484_v29, %v3455_v28  ;;  %v3603_v56 = vpop.permute.xlu2 %3602  ;;  %v3966_v28 = vsel %vm862_vm6, %v3964_v37, %v3965_v15  ;;  %v3994_v29 = vmul.f32 %v7722_v34, %v3990_v47 }
 0x433   :  { %v3496_v54 = vadd.f32 %v3488_v21, %v3457_v9  ;;  %v8053_v9 = vld [vmem:[#allocation2 + $0x8] sm:$0xff] }
 0x434   :  { %v8056_v53 = vmul.f32 %v8053_v9, %v4031_v46 }
 0x436   :  { %3908 = vrot.lane.b32.xlu1 %v3900_v63, %s5179_s20  ;;  %v4032_v63 = vmul.f32 %v8013_v40, %v4031_v46 }
 0x437   :  { %3912 = vrot.lane.b32.xlu0 %v3902_v11, %s5179_s20 }
 0x438   :  { %3933 = vrot.lane.b32.xlu2 %v3925_v43, %s5179_s20  ;;  %v3486_v18 = vpop.permute.xlu1 %3485  ;;  %v4044_v13 = vrot.slane %v4032_v63, 2 }
 0x439   :  { %v3523_v49 = vpop.permute.xlu0 %3522  ;;  %v3495_v16 = vadd.f32 %v3486_v18, %v3456_v12 }
 0x43a   :  { %v3534_v23 = vadd.f32 %v3523_v49, %v3493_v20  ;;  %v8020_v21 = vpop.permute.xlu2 %3608  ;;  %v4006_v20 = vrot.slane %v3993_v61, 1  ;;  %v4051_v61 = vsel %vm927_vm7, %v4049_v5, %v4050_v60 }
 0x43b   :  { %v3536_v48 = vadd.f32 %v3527_v36, %v3495_v16  ;;  %v4009_v16 = vrot.slane %v3995_v42, 1 }
 0x43e   :  { %3914 = vrot.lane.b32.xlu1 %v3903_v55, %s5179_s20 }
 0x43f   :  { %3935 = vrot.lane.b32.xlu0 %v3926_v24, %s5179_s20 }
 0x440   :  { %3939 = vrot.lane.b32.xlu2 %v3928_v52, %s5179_s20  ;;  %v3525_v27 = vpop.permute.xlu1 %3524 }
 0x441   :  { %v3529_v2 = vpop.permute.xlu0 %3528  ;;  %v3535_v30 = vadd.f32 %v3525_v27, %v3494_v41  ;;  %v4007_v41 = vsel %vm862_vm6, %v4004_v19, %v4006_v20 }
 0x442   :  { %v3537_v31 = vadd.f32 %v3529_v2, %v3496_v54  ;;  %v8032_v36 = vpop.permute.xlu2 %3645 }
 0x443   :  { %v3574_v39 = vadd.f32 %v3564_v22, %v3535_v30 }
 0x446   :  { %3937 = vrot.lane.b32.xlu1 %v3927_v26, %s5179_s20 }
 0x447   :  { %3974 = vrot.lane.b32.xlu0 %v3966_v28, %s5179_s20  ;;  %v4070_v28 = vstv %s4928_s27 }
 0x448   :  { %3978 = vrot.lane.b32.xlu2 %v3971_v57, %s5179_s20  ;;  %v3562_v12 = vpop.permute.xlu1 %3561  ;;  %v8081_v57 = vld [vmem:[#allocation2 + $0x10] sm:$0x3f]  ;;  %v4076_v50 = vmul.f32 %v7896_v7, %v4070_v28  ;;  %v4072_v42 = vmul.f32 %v7769_v44, %v4070_v28 }
 0x449   :  { %v3566_v62 = vpop.permute.xlu0 %3565  ;;  %v3573_v22 = vadd.f32 %v3562_v12, %v3534_v23  ;;  %v4008_v23 = vrot.slane %v3994_v29, 1  ;;  %v4034_v59 = vmul.f32 %v8081_v57, %v4031_v46 }
 0x44a   :  { %v3575_v0 = vadd.f32 %v3566_v62, %v3536_v48  ;;  %v8044_v32 = vpop.permute.xlu2 %3684  ;;  %v4045_v48 = vrot.slane %v8056_v53, 2 }
 0x44b   :  { %v3614_v45 = vadd.f32 %v3603_v56, %v3573_v22  ;;  %v3991_v56 = vmul.f32 %v7666_v6, %v3990_v47  ;;  %v4010_v52 = vsel %vm862_vm6, %v4008_v23, %v4009_v16  ;;  %v4075_v47 = vmul.f32 %v7794_v3, %v4070_v28 }
 0x44c   :  { %v4046_v38 = vsel %vm927_vm7, %v4044_v13, %v4045_v48  ;;  %v4047_v20 = vrot.slane %v4034_v59, 2 }
 0x44d   :  { %v4003_v24 = vrot.slane %v3991_v56, 1 }
 0x44e   :  { %3976 = vrot.lane.b32.xlu1 %v3968_v14, %s5179_s20  ;;  %v4048_v29 = vsel %vm927_vm7, %v4045_v48, %v4047_v20 }
 0x44f   :  { %3980 = vrot.lane.b32.xlu0 %v3973_v51, %s5179_s20  ;;  %v4005_v6 = vsel %vm862_vm6, %v4003_v24, %v4004_v19  ;;  %v4089_v19 = vrot.slane %v4075_v47, 2 }
 0x450   :  { %4015 = vrot.lane.b32.xlu2 %v4007_v41, %s5179_s20  ;;  %v3568_v11 = vpop.permute.xlu1 %3567  ;;  %v8097_v41 = vld [vmem:[#allocation3 + $0x10] sm:$0x3f] }
 0x451   :  { %v3605_v54 = vpop.permute.xlu0 %3604  ;;  %v3576_v49 = vadd.f32 %v3568_v11, %v3537_v31  ;;  %v4073_v53 = vmul.f32 %v8097_v41, %v4070_v28  ;;  %v8106_v11 = vld [vmem:[#allocation2 + $0x28] sm:$0x3f] }
 0x452   :  { %v3615_v43 = vadd.f32 %v3605_v54, %v3574_v39  ;;  %v8061_v18 = vpop.permute.xlu2 %3721  ;;  %v4011_v39 = vrot.slane %v3996_v25, 1 }
 0x453   :  { %v3617_v55 = vadd.f32 %v8020_v21, %v3576_v49  ;;  %v4037_v21 = vmul.f32 %v7692_v8, %v4031_v46  ;;  %v4111_v46 = vstv %s4929_s15  ;;  %v4086_v13 = vrot.slane %v4073_v53, 2 }
 0x454   :  { %v4012_v8 = vsel %vm862_vm6, %v4009_v16, %v4011_v39  ;;  %v4116_v14 = vmul.f32 %v7976_v1, %v4111_v46  ;;  %v4114_v54 = vmul.f32 %v8081_v57, %v4111_v46  ;;  %v4117_v63 = vmul.f32 %v8106_v11, %v4111_v46 }
 0x455   :  { %v4052_v37 = vrot.slane %v4037_v21, 2  ;;  %v4115_v25 = vmul.f32 %v7986_v58, %v4111_v46 }
 0x456   :  { %4013 = vrot.lane.b32.xlu1 %v4005_v6, %s5179_s20  ;;  %v4130_v23 = vrot.slane %v4116_v14, 3  ;;  %v4127_v6 = vrot.slane %v4114_v54, 3  ;;  %v4132_v35 = vrot.slane %v4117_v63, 3  ;;  %v8147_v54 = vld [vmem:[#allocation3 + $0x18] sm:$0xff] }
 0x457   :  { %4017 = vrot.lane.b32.xlu0 %v4010_v52, %s5179_s20  ;;  %v4053_v10 = vsel %vm927_vm7, %v4050_v60, %v4052_v37  ;;  %v4112_v60 = vmul.f32 %v8013_v40, %v4111_v46 }
 0x458   :  { %4054 = vrot.lane.b32.xlu2 %v4046_v38, %s5179_s20  ;;  %v3607_v27 = vpop.permute.xlu1 %3606  ;;  %v4133_v4 = vsel %vm992_vm8, %v4130_v23, %v4132_v35 }
 0x459   :  { %v3642_v2 = vpop.permute.xlu0 %3641  ;;  %v3616_v30 = vadd.f32 %v3607_v27, %v3575_v0  ;;  %v8119_v27 = vld [vmem:[#allocation3] sm:$0xff]  ;;  %v4124_v59 = vrot.slane %v4112_v60, 3  ;;  %v8172_v60 = vld [vmem:[#allocation3 + $0x8] sm:$0xff] }
 0x45a   :  { %v3653_v31 = vadd.f32 %v3642_v2, %v3614_v45  ;;  %v8075_v15 = vpop.permute.xlu2 %3727  ;;  %v4091_v45 = vrot.slane %v4076_v50, 2 }
 0x45b   :  { %v3655_v26 = vadd.f32 %v8032_v36, %v3616_v30  ;;  %v4074_v36 = vmul.f32 %v7722_v34, %v4070_v28 }
 0x45c   :  { %v4092_v34 = vsel %vm927_vm7, %v4089_v19, %v4091_v45 }
 0x45d   :  { %v4088_v33 = vrot.slane %v4074_v36, 2  ;;  %v8127_v36 = vstv %s4931_s28 }
 0x45e   :  { %4019 = vrot.lane.b32.xlu1 %v4012_v8, %s5179_s20  ;;  %v4150_v8 = vstv %s4930_s0 }
 0x45f   :  { %4060 = vrot.lane.b32.xlu0 %v4053_v10, %s5179_s20  ;;  %v4090_v56 = vsel %vm927_vm7, %v4088_v33, %v4089_v19  ;;  %v4197_v33 = vmul.f32 %v8106_v11, %v8127_v36  ;;  %v4154_v63 = vmul.f32 %v8147_v54, %v4150_v8 }
 0x460   :  { %4058 = vrot.lane.b32.xlu2 %v4051_v61, %s5179_s20  ;;  %v3644_v12 = vpop.permute.xlu1 %3643  ;;  %v4152_v61 = vmul.f32 %v7769_v44, %v4150_v8  ;;  %v4156_v44 = vmul.f32 %v7896_v7, %v4150_v8 }
 0x461   :  { %v3648_v62 = vpop.permute.xlu0 %3647  ;;  %v3654_v22 = vadd.f32 %v3644_v12, %v3615_v43  ;;  %v4155_v12 = vmul.f32 %v7794_v3, %v4150_v8  ;;  %v4212_v53 = vrot.slane %v4197_v33, 4 }
 0x462   :  { %v3656_v0 = vadd.f32 %v3648_v62, %v3617_v55  ;;  %v8090_v17 = vpop.permute.xlu2 %3766  ;;  %v4084_v55 = vrot.slane %v4072_v42, 2  ;;  %v4153_v62 = vmul.f32 %v8097_v41, %v4150_v8  ;;  %v4164_v20 = vrot.slane %v4152_v61, 3 }
 0x463   :  { %v3695_v51 = vadd.f32 %v8044_v32, %v3654_v22  ;;  %v4113_v32 = vmul.f32 %v8053_v9, %v4111_v46  ;;  %v4169_v14 = vrot.slane %v4155_v12, 3 }
 0x464   :  { %v4087_v21 = vsel %vm927_vm7, %v4084_v55, %v4086_v13 }
 0x465   :  { %v4125_v52 = vrot.slane %v4113_v32, 3 }
 0x466   :  { %4056 = vrot.lane.b32.xlu1 %v4048_v29, %s5179_s20  ;;  %v4171_v29 = vrot.slane %v4156_v44, 3 }
 0x467   :  { %4099 = vrot.lane.b32.xlu0 %v4092_v34, %s5179_s20  ;;  %v4128_v2 = vsel %vm992_vm8, %v4125_v52, %v4127_v6 }
 0x468   :  { %4097 = vrot.lane.b32.xlu2 %v4090_v56, %s5179_s20  ;;  %v3683_v49 = vpop.permute.xlu1 %3682  ;;  %v4172_v32 = vsel %vm992_vm8, %v4169_v14, %v4171_v29 }
 0x469   :  { %v3687_v43 = vpop.permute.xlu0 %3686  ;;  %v3694_v48 = vadd.f32 %v3683_v49, %v3653_v31  ;;  %v4195_v49 = vmul.f32 %v7986_v58, %v8127_v36 }
 0x46a   :  { %v3696_v16 = vadd.f32 %v3687_v43, %v3655_v26  ;;  %v8109_v24 = vpop.permute.xlu2 %3803  ;;  %v4129_v26 = vrot.slane %v4115_v25, 3 }
 0x46b   :  { %v3733_v38 = vadd.f32 %v8061_v18, %v3694_v48  ;;  %v4071_v18 = vmul.f32 %v8119_v27, %v4070_v28  ;;  %v4209_v6 = vrot.slane %v4195_v49, 4 }
 0x46c   :  { %v4131_v28 = vsel %vm992_vm8, %v4129_v26, %v4130_v23 }
 0x46d   :  { %v4083_v10 = vrot.slane %v4071_v18, 2  ;;  %v8164_v18 = vld [vmem:[#allocation3 + $0x20] sm:$0xff] }
 0x46e   :  { %4095 = vrot.lane.b32.xlu1 %v4087_v21, %s5179_s20  ;;  %v4193_v21 = vmul.f32 %v8053_v9, %v8127_v36 }
 0x46f   :  { %4140 = vrot.lane.b32.xlu0 %v4133_v4, %s5179_s20  ;;  %v4085_v50 = vsel %vm927_vm7, %v4083_v10, %v4084_v55  ;;  %v4230_v4 = vstv %s4932_s29 }
 0x470   :  { %4136 = vrot.lane.b32.xlu2 %v4128_v2, %s5179_s20  ;;  %v3689_v30 = vpop.permute.xlu1 %3688  ;;  %v4236_v26 = vmul.f32 %v7896_v7, %v4230_v4 }
 0x471   :  { %v3724_v31 = vpop.permute.xlu0 %3723  ;;  %v3697_v37 = vadd.f32 %v3689_v30, %v3656_v0  ;;  %v4126_v0 = vsel %vm992_vm8, %v4124_v59, %v4125_v52  ;;  %v4168_v52 = vrot.slane %v4154_v63, 3  ;;  %v4194_v30 = vmul.f32 %v8081_v57, %v8127_v36 }
 0x472   :  { %v3734_v5 = vadd.f32 %v3724_v31, %v3695_v51  ;;  %v8123_v39 = vpop.permute.xlu2 %3842  ;;  %v4166_v51 = vrot.slane %v4153_v62, 3  ;;  %v4235_v31 = vmul.f32 %v8164_v18, %v4230_v4 }
 0x473   :  { %v3736_v47 = vadd.f32 %v8075_v15, %v3697_v37  ;;  %v4196_v15 = vmul.f32 %v7976_v1, %v8127_v36  ;;  %v4170_v2 = vsel %vm992_vm8, %v4168_v52, %v4169_v14  ;;  %v4233_v37 = vmul.f32 %v8097_v41, %v4230_v4 }
 0x474   :  { %v4167_v56 = vsel %vm992_vm8, %v4164_v20, %v4166_v51  ;;  %v4207_v62 = vrot.slane %v4194_v30, 4  ;;  %v4231_v51 = vmul.f32 %v8119_v27, %v4230_v4 }
 0x475   :  { %v4210_v34 = vrot.slane %v4196_v15, 4  ;;  %v4251_v15 = vrot.slane %v4236_v26, 4 }
 0x476   :  { %4093 = vrot.lane.b32.xlu1 %v4085_v50, %s5179_s20  ;;  %v4249_v50 = vrot.slane %v4235_v31, 4  ;;  %v4243_v63 = vrot.slane %v4231_v51, 4 }
 0x477   :  { %4138 = vrot.lane.b32.xlu0 %v4131_v28, %s5179_s20  ;;  %v4213_v43 = vsel %vm1057_vm9, %v4210_v34, %v4212_v53 }
 0x478   :  { %4134 = vrot.lane.b32.xlu2 %v4126_v0, %s5179_s20  ;;  %v3726_v19 = vpop.permute.xlu1 %3725  ;;  %v4246_v0 = vrot.slane %v4233_v37, 4 }
 0x479   :  { %v3763_v22 = vpop.permute.xlu0 %3762  ;;  %v3735_v45 = vadd.f32 %v3726_v19, %v3696_v16 }
 0x47a   :  { %v3774_v3 = vadd.f32 %v3763_v22, %v3733_v38  ;;  %v8142_v46 = vpop.permute.xlu2 %3848  ;;  %v4252_v22 = vsel %vm1057_vm9, %v4249_v50, %v4251_v15 }
 0x47b   :  { %v3776_v42 = vadd.f32 %v8090_v17, %v3735_v45  ;;  %v4151_v17 = vmul.f32 %v8119_v27, %v4150_v8 }
 0x47d   :  { %v4163_v35 = vrot.slane %v4151_v17, 3 }
 0x47e   :  { %4179 = vrot.lane.b32.xlu1 %v4172_v32, %s5179_s20 }
 0x47f   :  { %4175 = vrot.lane.b32.xlu0 %v4167_v56, %s5179_s20  ;;  %v4165_v25 = vsel %vm992_vm8, %v4163_v35, %v4164_v20  ;;  %v4234_v20 = vmul.f32 %v8147_v54, %v4230_v4  ;;  %v4271_v56 = vstv %s4933_s30 }
 0x480   :  { %4220 = vrot.lane.b32.xlu2 %v4213_v43, %s5179_s20  ;;  %v3765_v16 = vpop.permute.xlu1 %3764  ;;  %v4273_v43 = vmul.f32 %v8053_v9, %v4271_v56  ;;  %v4274_v49 = vmul.f32 %v8081_v57, %v4271_v56 }
 0x481   :  { %v3769_v23 = vpop.permute.xlu0 %3768  ;;  %v3775_v55 = vadd.f32 %v3765_v16, %v3734_v5  ;;  %v4232_v5 = vmul.f32 %v8172_v60, %v4230_v4  ;;  %v8199_v16 = vstv %s4934_s5 }
 0x482   :  { %v3777_v48 = vadd.f32 %v3769_v23, %v3736_v47  ;;  %v8157_v13 = vpop.permute.xlu2 %3885  ;;  %v4205_v47 = vrot.slane %v4193_v21, 4  ;;  %v4276_v23 = vmul.f32 %v7976_v1, %v4271_v56  ;;  %v4285_v35 = vrot.slane %v4273_v43, 5 }
 0x483   :  { %v3814_v38 = vadd.f32 %v8109_v24, %v3775_v55  ;;  %v4211_v24 = vsel %vm1057_vm9, %v4209_v6, %v4210_v34  ;;  %v4244_v12 = vrot.slane %v4232_v5, 4  ;;  %v4277_v55 = vmul.f32 %v8106_v11, %v4271_v56 }
 0x484   :  { %v4208_v19 = vsel %vm1057_vm9, %v4205_v47, %v4207_v62  ;;  %v4290_v31 = vrot.slane %v4276_v23, 5 }
 0x485   :  { %v4247_v33 = vsel %vm1057_vm9, %v4244_v12, %v4246_v0 }
 0x486   :  { %4177 = vrot.lane.b32.xlu1 %v4170_v2, %s5179_s20  ;;  %v4287_v2 = vrot.slane %v4274_v49, 5 }
 0x487   :  { %4173 = vrot.lane.b32.xlu0 %v4165_v25, %s5179_s20 }
 0x488   :  { %4218 = vrot.lane.b32.xlu2 %v4211_v24, %s5179_s20  ;;  %v3802_v8 = vpop.permute.xlu1 %3801  ;;  %v4292_v24 = vrot.slane %v4277_v55, 5  ;;  %v4288_v26 = vsel %vm1122_vm10, %v4285_v35, %v4287_v2  ;;  %v4311_v55 = vmul.f32 %v8119_v27, %v8199_v16  ;;  %v4390_v2 = vstv %s4936_s11 }
 0x489   :  { %v3806_v10 = vpop.permute.xlu0 %3805  ;;  %v3813_v61 = vadd.f32 %v3802_v8, %v3774_v3  ;;  %v4192_v3 = vmul.f32 %v8013_v40, %v8127_v36  ;;  %v4275_v8 = vmul.f32 %v7986_v58, %v4271_v56 }
 0x48a   :  { %v3815_v59 = vadd.f32 %v3806_v10, %v3776_v42  ;;  %v8178_v28 = vpop.permute.xlu2 %3910  ;;  %v4248_v42 = vrot.slane %v4234_v20, 4  ;;  %v4293_v10 = vsel %vm1122_vm10, %v4290_v31, %v4292_v24  ;;  %v4392_v24 = vmul.f32 %v8172_v60, %v4390_v2 }
 0x48b   :  { %v3854_v44 = vadd.f32 %v8123_v39, %v3813_v61  ;;  %v4204_v53 = vrot.slane %v4192_v3, 4  ;;  %v4289_v0 = vrot.slane %v4275_v8, 5 }
 0x48c   :  { %v4250_v36 = vsel %vm1057_vm9, %v4248_v42, %v4249_v50 }
 0x48d   :  { %v4206_v17 = vsel %vm1057_vm9, %v4204_v53, %v4205_v47  ;;  %v4314_v47 = vmul.f32 %v8147_v54, %v8199_v16  ;;  %v4291_v3 = vsel %vm1122_vm10, %v4289_v0, %v4290_v31 }
 0x48e   :  { %4216 = vrot.lane.b32.xlu1 %v4208_v19, %s5179_s20 }
 0x48f   :  { %4259 = vrot.lane.b32.xlu0 %v4252_v22, %s5179_s20  ;;  %v4328_v15 = vrot.slane %v4314_v47, 5  ;;  %v4351_v22 = vstv %s4935_s1  ;;  %v4391_v47 = vmul.f32 %v8119_v27, %v4390_v2 }
 0x490   :  { %4255 = vrot.lane.b32.xlu2 %v4247_v33, %s5179_s20  ;;  %v3808_v45 = vpop.permute.xlu1 %3807  ;;  %v4356_v20 = vmul.f32 %v7976_v1, %v4351_v22  ;;  %v4354_v1 = vmul.f32 %v8081_v57, %v4351_v22 }
 0x491   :  { %v3845_v39 = vpop.permute.xlu0 %3844  ;;  %v3816_v34 = vadd.f32 %v3808_v45, %v3777_v48  ;;  %v4245_v48 = vsel %vm1057_vm9, %v4243_v63, %v4244_v12  ;;  %v4313_v45 = vmul.f32 %v8097_v41, %v8199_v16  ;;  %v4403_v0 = vrot.slane %v4391_v47, 6 }
 0x492   :  { %v3855_v14 = vadd.f32 %v3845_v39, %v3814_v38  ;;  %v8191_v29 = vpop.permute.xlu2 %3933  ;;  %v4316_v38 = vmul.f32 %v7896_v7, %v8199_v16  ;;  %v4312_v39 = vmul.f32 %v8172_v60, %v8199_v16  ;;  %v4370_v53 = vrot.slane %v4356_v20, 6 }
 0x493   :  { %v3857_v32 = vadd.f32 %v8142_v46, %v3816_v34  ;;  %v4315_v46 = vmul.f32 %v8164_v18, %v8199_v16  ;;  %v4326_v49 = vrot.slane %v4313_v45, 5  ;;  %v4393_v16 = vmul.f32 %v8097_v41, %v4390_v2 }
 0x494   :  { %v4331_v37 = vrot.slane %v4316_v38, 5  ;;  %v4324_v43 = vrot.slane %v4312_v39, 5 }
 0x495   :  { %v4329_v30 = vrot.slane %v4315_v46, 5 }
 0x496   :  { %4214 = vrot.lane.b32.xlu1 %v4206_v17, %s5179_s20  ;;  %v4367_v17 = vrot.slane %v4354_v1, 6 }
 0x497   :  { %4257 = vrot.lane.b32.xlu0 %v4250_v36, %s5179_s20  ;;  %v4332_v7 = vsel %vm1122_vm10, %v4329_v30, %v4331_v37  ;;  %v4330_v51 = vsel %vm1122_vm10, %v4328_v15, %v4329_v30 }
 0x498   :  { %4253 = vrot.lane.b32.xlu2 %v4245_v48, %s5179_s20  ;;  %v3847_v6 = vpop.permute.xlu1 %3846  ;;  %v4327_v48 = vsel %vm1122_vm10, %v4324_v43, %v4326_v49 }
 0x499   :  { %v3882_v52 = vpop.permute.xlu0 %3881  ;;  %v3856_v21 = vadd.f32 %v3847_v6, %v3815_v59  ;;  %v4352_v6 = vmul.f32 %v8013_v40, %v4351_v22 }
 0x49a   :  { %v3893_v4 = vadd.f32 %v3882_v52, %v3854_v44  ;;  %v8210_v25 = vpop.permute.xlu2 %3939 }
 0x49b   :  { %v3895_v5 = vadd.f32 %v8157_v13, %v3856_v21  ;;  %v4272_v13 = vmul.f32 %v8013_v40, %v4271_v56  ;;  %v4364_v30 = vrot.slane %v4352_v6, 6 }
 0x49d   :  { %v4284_v44 = vrot.slane %v4272_v13, 5 }
 0x49e   :  { %4300 = vrot.lane.b32.xlu1 %v4293_v10, %s5179_s20 }
 0x49f   :  { %4296 = vrot.lane.b32.xlu0 %v4288_v26, %s5179_s20  ;;  %v4286_v33 = vsel %vm1122_vm10, %v4284_v44, %v4285_v35  ;;  %v4395_v26 = vmul.f32 %v8164_v18, %v4390_v2 }
 0x4a0   :  { %4339 = vrot.lane.b32.xlu2 %v4332_v7, %s5179_s20  ;;  %v3884_v61 = vpop.permute.xlu1 %3883  ;;  %v4404_v7 = vrot.slane %v4392_v24, 6 }
 0x4a1   :  { %v3888_v59 = vpop.permute.xlu0 %3887  ;;  %v3894_v62 = vadd.f32 %v3884_v61, %v3855_v14  ;;  %v4357_v14 = vmul.f32 %v8106_v11, %v4351_v22  ;;  %v4355_v11 = vmul.f32 %v7986_v58, %v4351_v22  ;;  %v4323_v58 = vrot.slane %v4311_v55, 5 }
 0x4a2   :  { %v3896_v50 = vadd.f32 %v3888_v59, %v3857_v32  ;;  %v8223_v12 = vpop.permute.xlu2 %3978  ;;  %v4406_v61 = vrot.slane %v4393_v16, 6  ;;  %v4409_v18 = vrot.slane %v4395_v26, 6  ;;  %v4405_v27 = vsel %vm1187_vm11, %v4403_v0, %v4404_v7 }
 0x4a3   :  { %v3921_v19 = vadd.f32 %v8178_v28, %v3894_v62  ;;  %v4353_v28 = vmul.f32 %v8053_v9, %v4351_v22  ;;  %v4372_v23 = vrot.slane %v4357_v14, 6  ;;  %v4369_v21 = vrot.slane %v4355_v11, 6 }
 0x4a4   :  { %v4325_v37 = vsel %vm1122_vm10, %v4323_v58, %v4324_v43  ;;  %v4407_v15 = vsel %vm1187_vm11, %v4404_v7, %v4406_v61  ;;  %v4394_v22 = vmul.f32 %v8147_v54, %v4390_v2 }
 0x4a5   :  { %v4365_v36 = vrot.slane %v4353_v28, 6  ;;  %v4373_v57 = vsel %vm1187_vm11, %v4370_v53, %v4372_v23 }
 0x4a6   :  { %4298 = vrot.lane.b32.xlu1 %v4291_v3, %s5179_s20  ;;  %v4408_v39 = vrot.slane %v4394_v22, 6 }
 0x4a7   :  { %4294 = vrot.lane.b32.xlu0 %v4286_v33, %s5179_s20  ;;  %v4368_v46 = vsel %vm1187_vm11, %v4365_v36, %v4367_v17  ;;  %v4366_v40 = vsel %vm1187_vm11, %v4364_v30, %v4365_v36 }
 0x4a8   :  { %4337 = vrot.lane.b32.xlu2 %v4330_v51, %s5179_s20  ;;  %v3909_v42 = vpop.permute.xlu1 %3908  ;;  %v4410_v51 = vsel %vm1187_vm11, %v4408_v39, %v4409_v18 }
 0x4a9   :  { %v3913_v34 = vpop.permute.xlu0 %3912  ;;  %v3920_v32 = vadd.f32 %v3909_v42, %v3893_v4 }
 0x4aa   :  { %v3922_v56 = vadd.f32 %v3913_v34, %v3895_v5  ;;  %v8240_v63 = vpop.permute.xlu2 %4015  ;;  %v4371_v5 = vsel %vm1187_vm11, %v4369_v21, %v4370_v53 }
 0x4ab   :  { %v3945_v9 = vadd.f32 %v8191_v29, %v3920_v32 }
 0x4ae   :  { %4335 = vrot.lane.b32.xlu1 %v4327_v48, %s5179_s20 }
 0x4af   :  { %4380 = vrot.lane.b32.xlu0 %v4373_v57, %s5179_s20 }
 0x4b0   :  { %4376 = vrot.lane.b32.xlu2 %v4368_v46, %s5179_s20  ;;  %v3915_v29 = vpop.permute.xlu1 %3914 }
 0x4b1   :  { %v3936_v52 = vpop.permute.xlu0 %3935  ;;  %v3923_v38 = vadd.f32 %v3915_v29, %v3896_v50 }
 0x4b2   :  { %v3946_v35 = vadd.f32 %v3936_v52, %v3921_v19  ;;  %v4055_v4 = vpop.permute.xlu2 %4054 }
 0x4b3   :  { %v3948_v31 = vadd.f32 %v8210_v25, %v3923_v38  ;;  %v5060_v25 = vld [vmem:[#allocation3 + $0x28] sm:$0x3f] }
 0x4b4   :  { %v4396_v10 = vmul.f32 %v5060_v25, %v4390_v2 }
 0x4b6   :  { %4333 = vrot.lane.b32.xlu1 %v4325_v37, %s5179_s20  ;;  %v4411_v50 = vrot.slane %v4396_v10, 6 }
 0x4b7   :  { %4378 = vrot.lane.b32.xlu0 %v4371_v5, %s5179_s20 }
 0x4b8   :  { %4374 = vrot.lane.b32.xlu2 %v4366_v40, %s5179_s20  ;;  %v3938_v60 = vpop.permute.xlu1 %3937  ;;  %v4412_v44 = vsel %vm1187_vm11, %v4409_v18, %v4411_v50 }
 0x4b9   :  { %v3975_v8 = vpop.permute.xlu0 %3974  ;;  %v3947_v59 = vadd.f32 %v3938_v60, %v3922_v56 }
 0x4ba   :  { %v3986_v13 = vadd.f32 %v3975_v8, %v3945_v9  ;;  %v4059_v41 = vpop.permute.xlu2 %4058 }
 0x4bb   :  { %v3988_v62 = vadd.f32 %v8223_v12, %v3947_v59 }
 0x4be   :  { %4419 = vrot.lane.b32.xlu1 %v4412_v44, %s5179_s20 }
 0x4bf   :  { %4415 = vrot.lane.b32.xlu0 %v4407_v15, %s5179_s20 }
 0x4c0   :  { %4413 = vrot.lane.b32.xlu2 %v4405_v27, %s5179_s20  ;;  %v3977_v20 = vpop.permute.xlu1 %3976 }
 0x4c1   :  { %v3981_v19 = vpop.permute.xlu0 %3980  ;;  %v3987_v3 = vadd.f32 %v3977_v20, %v3946_v35 }
 0x4c2   :  { %v3989_v33 = vadd.f32 %v3981_v19, %v3948_v31  ;;  %v4098_v12 = vpop.permute.xlu2 %4097 }
 0x4c3   :  { %v4026_v45 = vadd.f32 %v8240_v63, %v3987_v3 }
 0x4c6   :  { %4417 = vrot.lane.b32.xlu1 %v4410_v51, %s5179_s20 }
 0x4c8   :  { %v4014_v28 = vpop.permute.xlu1 %4013 }
 0x4c9   :  { %v4018_v54 = vpop.permute.xlu0 %4017  ;;  %v4025_v14 = vadd.f32 %v4014_v28, %v3986_v13 }
 0x4ca   :  { %v4027_v1 = vadd.f32 %v4018_v54, %v3988_v62  ;;  %v4137_v34 = vpop.permute.xlu2 %4136 }
 0x4cb   :  { %v4066_v53 = vadd.f32 %v4055_v4, %v4025_v14 }
 0x4cc   :  { %v4068_v42 = vadd.f32 %v4059_v41, %v4027_v1 }
 0x4ce   :  { %v4107_v56 = vadd.f32 %v4098_v12, %v4068_v42 }
 0x4d0   :  { %v4020_v43 = vpop.permute.xlu1 %4019 }
 0x4d1   :  { %v4061_v32 = vpop.permute.xlu0 %4060  ;;  %v4028_v49 = vadd.f32 %v4020_v43, %v3989_v33 }
 0x4d2   :  { %v4135_v36 = vpop.permute.xlu2 %4134 }
 0x4d3   :  { %v4069_v17 = vadd.f32 %v4061_v32, %v4028_v49 }
 0x4d8   :  { %v4057_v9 = vpop.permute.xlu1 %4056 }
 0x4d9   :  { %v4100_v23 = vpop.permute.xlu0 %4099  ;;  %v4067_v57 = vadd.f32 %v4057_v9, %v4026_v45 }
 0x4da   :  { %v4108_v63 = vadd.f32 %v4100_v23, %v4069_v17  ;;  %v4221_v48 = vpop.permute.xlu2 %4220 }
 0x4e0   :  { %v4096_v46 = vpop.permute.xlu1 %4095 }
 0x4e1   :  { %v4141_v11 = vpop.permute.xlu0 %4140  ;;  %v4106_v52 = vadd.f32 %v4096_v46, %v4067_v57 }
 0x4e2   :  { %v4149_v55 = vadd.f32 %v4141_v11, %v4108_v63  ;;  %v4219_v29 = vpop.permute.xlu2 %4218 }
 0x4e3   :  { %v4147_v59 = vadd.f32 %v4137_v34, %v4106_v52 }
 0x4e8   :  { %v4094_v35 = vpop.permute.xlu1 %4093 }
 0x4e9   :  { %v4139_v6 = vpop.permute.xlu0 %4138  ;;  %v4105_v4 = vadd.f32 %v4094_v35, %v4066_v53 }
 0x4ea   :  { %v4148_v38 = vadd.f32 %v4139_v6, %v4107_v56  ;;  %v4256_v21 = vpop.permute.xlu2 %4255 }
 0x4eb   :  { %v4146_v13 = vadd.f32 %v4135_v36, %v4105_v4 }
 0x4f0   :  { %v4180_v2 = vpop.permute.xlu1 %4179 }
 0x4f1   :  { %v4176_v58 = vpop.permute.xlu0 %4175  ;;  %v4188_v62 = vadd.f32 %v4180_v2, %v4149_v55 }
 0x4f2   :  { %v4254_v24 = vpop.permute.xlu2 %4253  ;;  %v4186_v50 = vadd.f32 %v4176_v58, %v4147_v59 }
 0x4f3   :  { %v4229_v22 = vadd.f32 %v4221_v48, %v4188_v62 }
 0x4f8   :  { %v4178_v30 = vpop.permute.xlu1 %4177 }
 0x4f9   :  { %v4174_v31 = vpop.permute.xlu0 %4173  ;;  %v4187_v39 = vadd.f32 %v4178_v30, %v4148_v38 }
 0x4fa   :  { %v4340_v16 = vpop.permute.xlu2 %4339  ;;  %v4185_v41 = vadd.f32 %v4174_v31, %v4146_v13 }
 0x4fb   :  { %v4228_v34 = vadd.f32 %v4219_v29, %v4187_v39 }
 0x500   :  { %v4217_v37 = vpop.permute.xlu1 %4216 }
 0x501   :  { %v4260_v5 = vpop.permute.xlu0 %4259  ;;  %v4227_v44 = vadd.f32 %v4217_v37, %v4186_v50 }
 0x502   :  { %v4338_v25 = vpop.permute.xlu2 %4337  ;;  %v4268_v19 = vadd.f32 %v4260_v5, %v4229_v22 }
 0x503   :  { %v4266_v20 = vadd.f32 %v4256_v21, %v4227_v44 }
 0x508   :  { %v4215_v40 = vpop.permute.xlu1 %4214 }
 0x509   :  { %v4258_v26 = vpop.permute.xlu0 %4257  ;;  %v4226_v0 = vadd.f32 %v4215_v40, %v4185_v41 }
 0x50a   :  { %v4377_v60 = vpop.permute.xlu2 %4376  ;;  %v4267_v56 = vadd.f32 %v4258_v26, %v4228_v34 }
 0x50b   :  { %v4265_v27 = vadd.f32 %v4254_v24, %v4226_v0 }
 0x510   :  { %v4301_v8 = vpop.permute.xlu1 %4300 }
 0x511   :  { %v4297_v10 = vpop.permute.xlu0 %4296  ;;  %v4309_v51 = vadd.f32 %v4301_v8, %v4268_v19 }
 0x512   :  { %v4375_v15 = vpop.permute.xlu2 %4374  ;;  %v4307_v45 = vadd.f32 %v4297_v10, %v4266_v20 }
 0x513   :  { %v4348_v42 = vadd.f32 %v4340_v16, %v4309_v51 }
 0x518   :  { %v4299_v47 = vpop.permute.xlu1 %4298 }
 0x519   :  { %v4295_v7 = vpop.permute.xlu0 %4294  ;;  %v4308_v23 = vadd.f32 %v4299_v47, %v4267_v56 }
 0x51a   :  { %v4306_v33 = vadd.f32 %v4295_v7, %v4265_v27  ;;  %v4414_v14 = vpop.permute.xlu2 %4413 }
 0x51b   :  { %v4347_v11 = vadd.f32 %v4338_v25, %v4308_v23 }
 0x520   :  { %v4336_v18 = vpop.permute.xlu1 %4335 }
 0x521   :  { %v4381_v61 = vpop.permute.xlu0 %4380  ;;  %v4346_v28 = vadd.f32 %v4336_v18, %v4307_v45 }
 0x522   :  { %v4389_v32 = vadd.f32 %v4381_v61, %v4348_v42 }
 0x523   :  { %v4387_v49 = vadd.f32 %v4377_v60, %v4346_v28  ;;  %v9027_v28 = vld [vmem:[#allocation19_spill] sm:$0xff] }
 0x528   :  { %v4334_v12 = vpop.permute.xlu1 %4333 }
 0x529   :  { %v4379_v3 = vpop.permute.xlu0 %4378  ;;  %v4345_v54 = vadd.f32 %v4334_v12, %v4306_v33 }
 0x52a   :  { %v4388_v55 = vadd.f32 %v4379_v3, %v4347_v11 }
 0x52b   :  { %v4386_v1 = vadd.f32 %v4375_v15, %v4345_v54 }
 0x52d   :  { %v4425_v53 = vadd.f32 %v4414_v14, %v4386_v1 }
 0x52f   :  { %v4937_v43 = vmul.f32 -1.442695, %v4425_v53 }
 0x530   :  { %v4420_v17 = vpop.permute.xlu1 %4419 }
 0x531   :  { %v4416_v36 = vpop.permute.xlu0 %4415  ;;  %4965 = vpow2.f32 %v4937_v43  ;;  %v4428_v63 = vadd.f32 %v4420_v17, %v4389_v32 }
 0x532   :  { %v4426_v9 = vadd.f32 %v4416_v36, %v4387_v49 }
 0x533   :  { %v4940_v48 = vmul.f32 -1.442695, %v4428_v63 }
 0x534   :  { %v4938_v57 = vmul.f32 -1.442695, %v4426_v9 }
 0x536   :  { %4967 = vpow2.f32 %v4938_v57 }
 0x537   :  { %4969 = vpow2.f32 %v4940_v48  ;;  %v4966_v46 = vpop.eup %4965 }
 0x538   :  { %v4441_v52 = vadd.f32 1.0, %v4966_v46  ;;  %v4418_v29 = vpop.permute.xlu1 %4417 }
 0x539   :  { %v4427_v6 = vadd.f32 %v4418_v29, %v4388_v55  ;;  %v9028_v55 = vld [vmem:[#allocation20_spill] sm:$0xff] }
 0x53a   :  { %4971 = vrcp.f32 %v4441_v52  ;;  %v4456_v5 = vand.u32 2147483648, %v4441_v52  ;;  %v4454_v8 = vand.u32 2147483647, %v4441_v52  ;;  %vm4450_vm13 = vweird.f32 %v4441_v52 }
 0x53b   :  { %v4939_v38 = vmul.f32 -1.442695, %v4427_v6 }
 0x53c   :  { %v4968_v35 = vpop.eup %4967  ;;  %v4457_v60 = vor.u32 1.1754944e-38, %v4456_v5  ;;  %vm4455_vm1 = vcmp.eq.f32.partialorder %v4454_v8, 8.507059e+37 }
 0x53d   :  { %v4970_v4 = vpop.eup %4969  ;;  %v4442_v21 = vadd.f32 1.0, %v4968_v35  ;;  %4973 = vpow2.f32 %v4939_v38 }
 0x53e   :  { %v4444_v58 = vadd.f32 1.0, %v4970_v4 }
 0x53f   :  { %4975 = vrcp.f32 %v4442_v21  ;;  %v4469_v13 = vand.u32 2147483647, %v4442_v21  ;;  %v4471_v59 = vand.u32 2147483648, %v4442_v21  ;;  %vm4465_vm3 = vweird.f32 %v4442_v21 }
 0x540   :  { %4977 = vrcp.f32 %v4444_v58  ;;  %v4972_v2 = vpop.eup %4971  ;;  %v4499_v61 = vand.u32 2147483647, %v4444_v58  ;;  %v4501_v50 = vand.u32 2147483648, %v4444_v58  ;;  %vm4495_vm6 = vweird.f32 %v4444_v58 }
 0x541   :  { %v4446_v31 = vmul.f32 %v4972_v2, %v4441_v52  ;;  %vm4451_vm12 = vweird.f32 %v4972_v2  ;;  %vm4470_vm5 = vcmp.eq.f32.partialorder %v4469_v13, 8.507059e+37  ;;  %v4472_v27 = vor.u32 1.1754944e-38, %v4471_v59 }
 0x542   :  { %vm4452_vm14 = vmor %vm4450_vm13, %vm4451_vm12  ;;  %v4502_v20 = vor.u32 1.1754944e-38, %v4501_v50  ;;  %vm4500_vm8 = vcmp.eq.f32.partialorder %v4499_v61, 8.507059e+37 }
 0x543   :  { %v4974_v30 = vpop.eup %4973  ;;  %v4447_v24 = vsub.f32 1.0, %v4446_v31 }
 0x544   :  { %v8275_v16 = vadd.f32 1.0, %v4974_v30 }
 0x545   :  { %v4976_v37 = vpop.eup %4975  ;;  %v4448_v40 = vmul.f32 %v4972_v2, %v4447_v24 }
 0x546   :  { %v4978_v26 = vpop.eup %4977  ;;  %v4461_v25 = vmul.f32 %v4976_v37, %v4442_v21  ;;  %4979 = vrcp.f32 %v8275_v16  ;;  %vm4466_vm15 = vweird.f32 %v4976_v37  ;;  %vm4480_vm12 = vweird.f32 %v8275_v16 }
 0x547   :  { %v4491_v10 = vmul.f32 %v4978_v26, %v4444_v58  ;;  %v4449_v47 = vadd.f32 %v4972_v2, %v4448_v40  ;;  %vm4496_vm0 = vweird.f32 %v4978_v26  ;;  %vm4467_vm4 = vmor %vm4465_vm3, %vm4466_vm15  ;;  %v4484_v34 = vand.u32 2147483647, %v8275_v16 }
 0x548   :  { %v4462_v7 = vsub.f32 1.0, %v4461_v25  ;;  %vm4497_vm7 = vmor %vm4495_vm6, %vm4496_vm0  ;;  %v4486_v42 = vand.u32 2147483648, %v8275_v16  ;;  %vm4667_vm0 = vcmask 261120   ;;  %vm4671_vm3 = vcmask 523264  }
 0x549   :  { %v4492_v41 = vsub.f32 1.0, %v4491_v10  ;;  %v4453_v62 = vsel %vm4452_vm14, %v4972_v2, %v4449_v47  ;;  %vm4485_vm15 = vcmp.eq.f32.partialorder %v4484_v34, 8.507059e+37  ;;  %vm4677_vm6 = vcmask 916480  }
 0x54a   :  { %v4463_v18 = vmul.f32 %v4976_v37, %v4462_v7  ;;  %v4458_v44 = vsel %vm4455_vm1, %v4457_v60, %v4453_v62  ;;  %v4487_v46 = vor.u32 1.1754944e-38, %v4486_v42  ;;  %v8343_v42 = vld [vmem:[#allocation4 + $0x8] sm:$0xff]  ;;  %vm4669_vm1 = vcmask 392192  }
 0x54b   :  { %v4493_v0 = vmul.f32 %v4978_v26, %v4492_v41  ;;  %v4505_v45 = vrot.slane %v4458_v44, 4  ;;  %v4510_v17 = vperm.slane %v4458_v44, %v9027_v28 }
 0x54c   :  { %v4464_v15 = vadd.f32 %v4976_v37, %v4463_v18  ;;  %v4980_v22 = vpop.eup %4979 }
 0x54d   :  { %v4494_v19 = vadd.f32 %v4978_v26, %v4493_v0  ;;  %v4476_v33 = vmul.f32 %v4980_v22, %v8275_v16  ;;  %vm4481_vm13 = vweird.f32 %v4980_v22  ;;  %v4506_v11 = vsel %vm458_vm2, 0.0, %v4505_v45 }
 0x54e   :  { %v4468_v3 = vsel %vm4467_vm4, %v4976_v37, %v4464_v15  ;;  %vm4482_vm14 = vmor %vm4480_vm12, %vm4481_vm13  ;;  %v4527_v58 = vrot.slane %v4510_v17, 4  ;;  %v4514_v2 = vperm.slane %v4506_v11, %v9027_v28  ;;  %vm4673_vm4 = vcmask 654336  }
 0x54f   :  { %v4473_v12 = vsel %vm4470_vm5, %v4472_v27, %v4468_v3  ;;  %v4498_v39 = vsel %vm4497_vm7, %v4978_v26, %v4494_v19  ;;  %v4477_v51 = vsub.f32 1.0, %v4476_v33  ;;  %vm4675_vm5 = vcmask 785408  }
 0x550   :  { %v4503_v54 = vsel %vm4500_vm8, %v4502_v20, %v4498_v39  ;;  %v4562_v1 = vperm.slane %v4473_v12, %v9027_v28  ;;  %v4557_v14 = vrot.slane %v4473_v12, 4  ;;  %v4539_v60 = vrot.slane %v4514_v2, 4 }
 0x551   :  { %v4567_v53 = vrot.slane %v4503_v54, 4  ;;  %v4572_v56 = vperm.slane %v4503_v54, %v9027_v28  ;;  %v4478_v32 = vmul.f32 %v4980_v22, %v4477_v51 }
 0x552   :  { %v4579_v43 = vrot.slane %v4562_v1, 4  ;;  %v4558_v49 = vsel %vm458_vm2, 0.0, %v4557_v14 }
 0x553   :  { %v4577_v36 = vrot.slane %v4572_v56, 4  ;;  %v4566_v23 = vperm.slane %v4558_v49, %v9027_v28  ;;  %v4568_v9 = vsel %vm458_vm2, 0.0, %v4567_v53  ;;  %v4479_v63 = vadd.f32 %v4980_v22, %v4478_v32 }
 0x554   :  { %v4580_v57 = vsel %vm458_vm2, %v4572_v56, %v4579_v43  ;;  %v4576_v48 = vperm.slane %v4568_v9, %v9027_v28 }
 0x555   :  { %v4588_v52 = vperm.slane %v4580_v57, %v9028_v55  ;;  %v4578_v29 = vsel %vm458_vm2, %v4577_v36, %v4562_v1  ;;  %v4591_v6 = vrot.slane %v4566_v23, 4  ;;  %v4483_v38 = vsel %vm4482_vm14, %v4980_v22, %v4479_v63 }
 0x556   :  { %v8296_v35 = vperm.slane %v4578_v29, %v9028_v55  ;;  %v4589_v4 = vrot.slane %v4576_v48, 4  ;;  %v4488_v21 = vsel %vm4485_vm15, %v4487_v46, %v4483_v38 }
 0x557   :  { %4642 = vrot.lane.b32.xlu1 %v4588_v52, %s5168_s9  ;;  %v4592_v31 = vsel %vm458_vm2, %v4576_v48, %v4591_v6  ;;  %v4515_v24 = vrot.slane %v4488_v21, 4  ;;  %v4520_v5 = vperm.slane %v4488_v21, %v9027_v28  ;;  %v4603_v59 = vrot.slane %v4588_v52, 4 }
 0x558   :  { %v4601_v30 = vrot.slane %v8296_v35, 4  ;;  %v4590_v37 = vsel %vm458_vm2, %v4589_v4, %v4566_v23  ;;  %v4600_v12 = vperm.slane %v4592_v31, %v9028_v55  ;;  %v8355_v4 = vld [vmem:[#allocation4] sm:$0xff] }
 0x559   :  { %v4528_v26 = vsel %vm458_vm2, %v4520_v5, %v4527_v58  ;;  %v4525_v40 = vrot.slane %v4520_v5, 4  ;;  %v4516_v25 = vsel %vm458_vm2, 0.0, %v4515_v24  ;;  %v4596_v41 = vperm.slane %v4590_v37, %v9028_v55 }
 0x55a   :  { %v4602_v16 = vsel %vm458_vm2, 0.0, %v4601_v30  ;;  %v4524_v10 = vperm.slane %v4516_v25, %v9027_v28  ;;  %v4536_v7 = vperm.slane %v4528_v26, %v9028_v55  ;;  %v4604_v0 = vsel %vm458_vm2, 0.0, %v4603_v59 }
 0x55b   :  { %4638 = vrot.lane.b32.xlu0 %v4602_v16, %s5169_s10  ;;  %v4526_v8 = vsel %vm458_vm2, %v4525_v40, %v4510_v17  ;;  %v4605_v15 = vrot.slane %v4596_v41, 4  ;;  %v4607_v45 = vrot.slane %v4600_v12, 4 }
 0x55c   :  { %v8312_v47 = vperm.slane %v4526_v8, %v9028_v55  ;;  %v4537_v13 = vrot.slane %v4524_v10, 4  ;;  %v4540_v61 = vsel %vm458_vm2, %v4524_v10, %v4539_v60  ;;  %v4551_v22 = vrot.slane %v4536_v7, 4 }
 0x55d   :  { %v4606_v44 = vsel %vm458_vm2, 0.0, %v4605_v15  ;;  %v4548_v3 = vperm.slane %v4540_v61, %v9028_v55  ;;  %v4608_v54 = vsel %vm458_vm2, 0.0, %v4607_v45 }
 0x55e   :  { %v4549_v18 = vrot.slane %v8312_v47, 4  ;;  %v4538_v50 = vsel %vm458_vm2, %v4537_v13, %v4514_v2  ;;  %v4552_v19 = vsel %vm458_vm2, 0.0, %v4551_v22 }
 0x55f   :  { %4614 = vrot.lane.b32.xlu1 %v4536_v7, %s5168_s9  ;;  %v4544_v27 = vperm.slane %v4538_v50, %v9028_v55  ;;  %v4555_v39 = vrot.slane %v4548_v3, 4  ;;  %s4823_s9 = sld [smem:[#allocation9 + $0x2]] }
 0x560   :  { %v4550_v62 = vsel %vm458_vm2, 0.0, %v4549_v18 }
 0x561   :  { %4610 = vrot.lane.b32.xlu2 %v4550_v62, %s5169_s10  ;;  %v4553_v20 = vrot.slane %v4544_v27, 4  ;;  %v4556_v51 = vsel %vm458_vm2, 0.0, %v4555_v39  ;;  %s8340_s10 = sld [smem:[#allocation9 + $0x3]] }
 0x563   :  { %4646 = vrot.lane.b32.xlu0 %v4604_v0, %s5167_s8  ;;  %v4554_v33 = vsel %vm458_vm2, 0.0, %v4553_v20  ;;  %vm4665_vm2 = vcmask 130048  }
 0x565   :  { %v92_v14 = vstv %s4823_s9 }
 0x566   :  { %v94_v32 = vmul.f32 %v8343_v42, %v92_v14  ;;  %v93_v2 = vmul.f32 %v8355_v4, %v92_v14 }
 0x567   :  { %4654 = vrot.lane.b32.xlu1 %v4606_v44, %s5165_s6  ;;  %v106_v34 = vstv %s8340_s10 }
 0x568   :  { %v108_v43 = vmul.f32 %v8343_v42, %v106_v34  ;;  %v4825_v17 = vrot.slane %v94_v32, 10  ;;  %v107_v31 = vmul.f32 %v8355_v4, %v106_v34  ;;  %v4824_v5 = vrot.slane %v93_v2, 10 }
 0x569   :  { %4650 = vrot.lane.b32.xlu2 %v4596_v41, %s5166_s7 }
 0x56a   :  { %v4828_v63 = vrot.slane %v108_v43, 11  ;;  %v4827_v16 = vrot.slane %v107_v31, 11  ;;  %v254_v43 = vstv %s8370_s12 }
 0x56b   :  { %4618 = vrot.lane.b32.xlu0 %v4552_v19, %s5167_s8  ;;  %s73_s8 = sld [smem:[#allocation9]] }
 0x56f   :  { %4626 = vrot.lane.b32.xlu1 %v4554_v33, %s5165_s6  ;;  %s4820_s6 = sld [smem:[#allocation9 + $0x1]] }
 0x571   :  { %4622 = vrot.lane.b32.xlu2 %v4544_v27, %s5166_s7  ;;  %v74_v28 = vstv %s73_s8  ;;  %s8364_s7 = sld [smem:[#allocation10 + $0x2]] }
 0x572   :  { %v76_v53 = vmul.f32 %v8343_v42, %v74_v28  ;;  %v75_v21 = vmul.f32 %v8355_v4, %v74_v28 }
 0x573   :  { %4658 = vrot.lane.b32.xlu0 %v4600_v12, %s5163_s2 }
 0x575   :  { %v78_v1 = vstv %s4820_s6 }
 0x576   :  { %v80_v56 = vmul.f32 %v8343_v42, %v78_v1  ;;  %v79_v58 = vmul.f32 %v8355_v4, %v78_v1 }
 0x577   :  { %4634 = vrot.lane.b32.xlu1 %v4556_v51, %s5164_s3 }
 0x578   :  { %v4822_v36 = vrot.slane %v80_v56, 9  ;;  %v4821_v24 = vrot.slane %v79_v58, 9 }
 0x579   :  { %4662 = vrot.lane.b32.xlu2 %v4608_v54, %s5164_s3  ;;  %s8360_s3 = sld [smem:[#allocation10]] }
 0x57a   :  { %v90_v9 = vadd.f32 %v4822_v36, %v76_v53  ;;  %v89_v37 = vadd.f32 %v4821_v24, %v75_v21 }
 0x57b   :  { %4630 = vrot.lane.b32.xlu0 %v4548_v3, %s5163_s2  ;;  %s8349_s2 = sld [smem:[#allocation10 + $0x1]]  ;;  %v210_v3 = vstv %s8364_s7 }
 0x57c   :  { %v104_v57 = vadd.f32 %v4825_v17, %v90_v9  ;;  %v103_v25 = vadd.f32 %v4824_v5, %v89_v37 }
 0x57e   :  { %v118_v48 = vadd.f32 %v4828_v63, %v104_v57  ;;  %v117_v8 = vadd.f32 %v4827_v16, %v103_v25 }
 0x57f   :  { %v122_v60 = vstv %s8360_s3 }
 0x580   :  { %v8352_v55 = vmax.f32 %v118_v48, 0.0  ;;  %v119_v13 = vmax.f32 %v117_v8, 0.0 }
 0x581   :  { %v166_v46 = vstv %s8349_s2 }
 0x582   :  { %v168_v6 = vmul.f32 %v166_v46, %v8352_v55  ;;  %v123_v61 = vmul.f32 %v122_v60, %v119_v13  ;;  %v167_v19 = vmul.f32 %v166_v46, %v119_v13  ;;  %v211_v45 = vmul.f32 %v210_v3, %v119_v13 }
 0x583   :  { %v212_v54 = vmul.f32 %v210_v3, %v8352_v55  ;;  %v256_v46 = vmul.f32 %v254_v43, %v8352_v55 }
 0x584   :  { %v4833_v38 = vmul.f32 -2.0, %v168_v6  ;;  %v4829_v62 = vmul.f32 -2.0, %v123_v61  ;;  %v4832_v39 = vmul.f32 -2.0, %v167_v19  ;;  %v4835_v56 = vmul.f32 -2.0, %v211_v45 }
 0x585   :  { %v4836_v32 = vmul.f32 -2.0, %v212_v54  ;;  %v4839_v16 = vmul.f32 -2.0, %v256_v46 }
 0x586   :  { %v175_v30 = vmul.f32 1.442695, %v4833_v38  ;;  %v129_v27 = vmul.f32 1.442695, %v4829_v62  ;;  %v173_v34 = vmul.f32 1.442695, %v4832_v39 }
 0x587   :  { %v217_v63 = vmul.f32 1.442695, %v4835_v56  ;;  %v219_v57 = vmul.f32 1.442695, %v4836_v32 }
 0x588   :  { %4981 = vpow2.f32 %v175_v30 }
 0x58e   :  { %v4982_v7 = vpop.eup %4981 }
 0x58f   :  { %v8366_v59 = vadd.f32 1.0, %v4982_v7 }
 0x591   :  { %4983 = vrcp.f32 %v8366_v59  ;;  %vm199_vm7 = vweird.f32 %v8366_v59  ;;  %v205_v58 = vand.u32 2147483648, %v8366_v59  ;;  %v203_v24 = vand.u32 2147483647, %v8366_v59 }
 0x592   :  { %4985 = vpow2.f32 %v129_v27 }
 0x593   :  { %vm204_vm13 = vcmp.eq.f32.partialorder %v203_v24, 8.507059e+37 }
 0x5bb   :  { %v4611_v11 = vpop.permute.xlu2 %4610 }
 0x5bc   :  { %v4666_v50 = vsel %vm4665_vm2, %v8312_v47, %v4611_v11  ;;  %v8375_v47 = vpop.eup %4983 }
 0x5bd   :  { %v195_v1 = vmul.f32 %v8375_v47, %v8366_v59  ;;  %v4986_v48 = vpop.eup %4985  ;;  %vm200_vm8 = vweird.f32 %v8375_v47 }
 0x5be   :  { %v133_v6 = vadd.f32 1.0, %v4986_v48  ;;  %vm8397_vm12 = vmor %vm199_vm7, %vm200_vm8 }
 0x5bf   :  { %v196_v36 = vsub.f32 1.0, %v195_v1 }
 0x5c0   :  { %vm140_vm14 = vweird.f32 %v133_v6 }
 0x5c1   :  { %v197_v11 = vmul.f32 %v8375_v47, %v196_v36 }
 0x5c3   :  { %v4651_v26 = vpop.permute.xlu2 %4650  ;;  %v198_v30 = vadd.f32 %v8375_v47, %v197_v11 }
 0x5c5   :  { %v202_v7 = vsel %vm8397_vm12, %v8375_v47, %v198_v30 }
 0x5c9   :  { %v4643_v49 = vpop.permute.xlu1 %4642 }
 0x5cb   :  { %v4623_v0 = vpop.permute.xlu2 %4622 }
 0x5cd   :  { %v4639_v23 = vpop.permute.xlu0 %4638 }
 0x5ce   :  { %v4679_v41 = vsel %vm4665_vm2, %v8296_v35, %v4639_v23  ;;  %v124_v35 = vmul.f32 %v122_v60, %v8352_v55  ;;  %v255_v23 = vmul.f32 %v254_v43, %v119_v13 }
 0x5cf   :  { %v4680_v44 = vsel %vm4667_vm0, %v4679_v41, %v4643_v49  ;;  %v263_v41 = vmul.f32 1.442695, %v4839_v16 }
 0x5d0   :  { %v4830_v12 = vmul.f32 -2.0, %v124_v35 }
 0x5d1   :  { %v4615_v52 = vpop.permute.xlu1 %4614 }
 0x5d2   :  { %v4668_v15 = vsel %vm4667_vm0, %v4666_v50, %v4615_v52  ;;  %v131_v14 = vmul.f32 1.442695, %v4830_v12  ;;  %v4838_v52 = vmul.f32 -2.0, %v255_v23  ;;  %v146_v50 = vand.u32 2147483648, %v133_v6 }
 0x5d4   :  { %4987 = vpow2.f32 %v131_v14  ;;  %v261_v2 = vmul.f32 1.442695, %v4838_v52  ;;  %v147_v45 = vor.u32 1.1754944e-38, %v146_v50 }
 0x5d5   :  { %v4647_v29 = vpop.permute.xlu0 %4646  ;;  %4989 = vpow2.f32 %v173_v34 }
 0x5d6   :  { %v4681_v22 = vsel %vm4669_vm1, %v4680_v44, %v4647_v29  ;;  %v4663_v29 = vpop.permute.xlu2 %4662  ;;  %4991 = vpow2.f32 %v217_v63 }
 0x5d7   :  { %v4682_v51 = vsel %vm4671_vm3, %v4681_v22, %v4651_v26  ;;  %4993 = vpow2.f32 %v219_v57 }
 0x5d8   :  { %4995 = vrcp.f32 %v133_v6 }
 0x5d9   :  { %v4655_v10 = vpop.permute.xlu1 %4654  ;;  %4997 = vpow2.f32 %v261_v2 }
 0x5da   :  { %v4683_v28 = vsel %vm4673_vm4, %v4682_v51, %v4655_v10  ;;  %v4988_v55 = vpop.eup %4987  ;;  %v206_v10 = vor.u32 1.1754944e-38, %v205_v58 }
 0x5db   :  { %v4990_v26 = vpop.eup %4989  ;;  %v8402_v25 = vadd.f32 1.0, %v4988_v55 }
 0x5dc   :  { %v177_v8 = vadd.f32 1.0, %v4990_v26  ;;  %v4992_v60 = vpop.eup %4991 }
 0x5dd   :  { %v4619_v40 = vpop.permute.xlu0 %4618  ;;  %4999 = vrcp.f32 %v8402_v25  ;;  %v4994_v59 = vpop.eup %4993  ;;  %v8411_v62 = vadd.f32 1.0, %v4992_v60  ;;  %vm155_vm0 = vweird.f32 %v8402_v25  ;;  %v161_v14 = vand.u32 2147483648, %v8402_v25 }
 0x5de   :  { %v4670_v20 = vsel %vm4669_vm1, %v4668_v15, %v4619_v40  ;;  %5001 = vrcp.f32 %v177_v8  ;;  %v4996_v61 = vpop.eup %4995  ;;  %v188_v27 = vand.u32 2147483647, %v177_v8  ;;  %v8417_v35 = vadd.f32 1.0, %v4994_v59 }
 0x5df   :  { %v4672_v53 = vsel %vm4671_vm3, %v4670_v20, %v4623_v0  ;;  %v8413_v0 = vsel %vm204_vm13, %v206_v10, %v202_v7  ;;  %v136_v15 = vmul.f32 %v4996_v61, %v133_v6  ;;  %5003 = vrcp.f32 %v8411_v62  ;;  %v4998_v19 = vpop.eup %4997 }
 0x5e0   :  { %vm141_vm15 = vweird.f32 %v4996_v61  ;;  %5005 = vpow2.f32 %v263_v41  ;;  %v4700_v12 = vrot.slane %v8413_v0, 7  ;;  %vm184_vm3 = vweird.f32 %v177_v8 }
 0x5e1   :  { %v4627_v33 = vpop.permute.xlu1 %4626  ;;  %v137_v20 = vsub.f32 1.0, %v136_v15  ;;  %5007 = vrcp.f32 %v8417_v35  ;;  %vm8433_vm1 = vmor %vm140_vm14, %vm141_vm15  ;;  %v232_v23 = vand.u32 2147483647, %v8411_v62  ;;  %v234_v46 = vand.u32 2147483648, %v8411_v62 }
 0x5e2   :  { %v4674_v49 = vsel %vm4673_vm4, %v4672_v53, %v4627_v33  ;;  %v190_v33 = vand.u32 2147483648, %v177_v8  ;;  %vm8438_vm4 = vcmp.eq.f32.partialorder %v188_v27, 8.507059e+37  ;;  %v249_v2 = vand.u32 2147483648, %v8417_v35 }
 0x5e3   :  { %v8420_v3 = vpop.eup %4999  ;;  %v138_v51 = vmul.f32 %v4996_v61, %v137_v20  ;;  %vm243_vm14 = vweird.f32 %v8417_v35  ;;  %v162_v26 = vor.u32 1.1754944e-38, %v161_v14 }
 0x5e4   :  { %v5002_v47 = vpop.eup %5001  ;;  %v151_v54 = vmul.f32 %v8420_v3, %v8402_v25  ;;  %v191_v43 = vor.u32 1.1754944e-38, %v190_v33  ;;  %vm156_vm8 = vweird.f32 %v8420_v3  ;;  %v250_v41 = vor.u32 1.1754944e-38, %v249_v2 }
 0x5e5   :  { %v4659_v18 = vpop.permute.xlu0 %4658  ;;  %v180_v34 = vmul.f32 %v5002_v47, %v177_v8  ;;  %v139_v56 = vadd.f32 %v4996_v61, %v138_v51  ;;  %v5004_v36 = vpop.eup %5003  ;;  %vm8473_vm15 = vmor %vm155_vm0, %vm156_vm8 }
 0x5e6   :  { %v4684_v9 = vsel %vm4675_vm5, %v4683_v28, %v4659_v18  ;;  %v144_v18 = vand.u32 2147483647, %v133_v6  ;;  %v159_v28 = vand.u32 2147483647, %v8402_v25  ;;  %v152_v32 = vsub.f32 1.0, %v151_v54 }
 0x5e7   :  { %v4685_v21 = vsel %vm4677_vm6, %v4684_v9, %v4663_v29  ;;  %v5006_v9 = vpop.eup %5005  ;;  %v143_v63 = vsel %vm8433_vm1, %v4996_v61, %v139_v56  ;;  %v224_v11 = vmul.f32 %v5004_v36, %v8411_v62  ;;  %v247_v6 = vand.u32 2147483647, %v8417_v35 }
 0x5e8   :  { %v4690_v40 = vrot.slane %v4685_v21, 4  ;;  %vm8423_vm2 = vcmp.eq.f32.partialorder %v144_v18, 8.507059e+37  ;;  %v153_v57 = vmul.f32 %v8420_v3, %v152_v32  ;;  %vm8449_vm7 = vcmp.eq.f32.partialorder %v159_v28, 8.507059e+37  ;;  %v5008_v52 = vpop.eup %5007 }
 0x5e9   :  { %v4635_v31 = vpop.permute.xlu1 %4634  ;;  %v225_v21 = vsub.f32 1.0, %v224_v11  ;;  %vm229_vm13 = vweird.f32 %v5004_v36  ;;  %v239_v58 = vmul.f32 %v5008_v52, %v8417_v35  ;;  %v8468_v24 = vadd.f32 1.0, %v5006_v9 }
 0x5ea   :  { %v154_v55 = vadd.f32 %v8420_v3, %v153_v57  ;;  %vm244_vm1 = vweird.f32 %v5008_v52  ;;  %v235_v25 = vor.u32 1.1754944e-38, %v234_v46  ;;  %vm8489_vm0 = vcmp.eq.f32.partialorder %v247_v6, 8.507059e+37 }
 0x5eb   :  { %v240_v16 = vsub.f32 1.0, %v239_v58  ;;  %v4704_v54 = vmul.f32 %v8343_v42, %v4700_v12  ;;  %v293_v11 = vand.u32 2147483648, %v8468_v24 }
 0x5ec   :  { %v158_v15 = vsel %vm8473_vm15, %v8420_v3, %v154_v55 }
 0x5ed   :  { %v4631_v17 = vpop.permute.xlu0 %4630  ;;  %v241_v7 = vmul.f32 %v5008_v52, %v240_v16  ;;  %v163_v28 = vsel %vm8449_vm7, %v162_v26, %v158_v15 }
 0x5ee   :  { %v4676_v38 = vsel %vm4675_vm5, %v4674_v49, %v4631_v17  ;;  %v8442_v49 = vadd.f32 1.0, %v4998_v19  ;;  %v181_v17 = vsub.f32 1.0, %v180_v34  ;;  %vm185_vm5 = vweird.f32 %v5002_v47 }
 0x5ef   :  { %v4678_v37 = vsel %vm4677_vm6, %v4676_v38, %v4635_v31  ;;  %vm228_vm6 = vweird.f32 %v8411_v62  ;;  %vm8459_vm12 = vmor %vm184_vm3, %vm185_vm5  ;;  %v148_v31 = vsel %vm8423_vm2, %v147_v45, %v143_v63  ;;  %vm8485_vm3 = vcmp.eq.f32.partialorder %v232_v23, 8.507059e+37 }
 0x5f0   :  { %v8408_v13 = vsel %vm1057_vm9, %v4678_v37, %v4690_v40  ;;  %v182_v29 = vmul.f32 %v5002_v47, %v181_v17  ;;  %5009 = vrcp.f32 %v8442_v49  ;;  %v226_v37 = vmul.f32 %v5004_v36, %v225_v21  ;;  %vm8481_vm2 = vmor %vm228_vm6, %vm229_vm13 }
 0x5f1   :  { %v4692_v44 = vrot.slane %v8408_v13, 1  ;;  %v4705_v22 = vrot.slane %v8408_v13, 7  ;;  %v4686_v18 = vmul.f32 %v8355_v4, %v148_v31  ;;  %vm8498_vm5 = vmor %vm243_vm14, %vm244_vm1  ;;  %vm272_vm6 = vweird.f32 %v8442_v49 }
 0x5f2   :  { %v183_v30 = vadd.f32 %v5002_v47, %v182_v29  ;;  %v227_v60 = vadd.f32 %v5004_v36, %v226_v37  ;;  %5011 = vrcp.f32 %v8468_v24  ;;  %v242_v19 = vadd.f32 %v5008_v52, %v241_v7 }
 0x5f3   :  { %v276_v33 = vand.u32 2147483647, %v8442_v49  ;;  %v278_v39 = vand.u32 2147483648, %v8442_v49  ;;  %v4717_v14 = vrot.slane %v8408_v13, 6  ;;  %v4729_v32 = vrot.slane %v8408_v13, 5 }
 0x5f4   :  { %v187_v40 = vsel %vm8459_vm12, %v5002_v47, %v183_v30  ;;  %v231_v27 = vsel %vm8481_vm2, %v5004_v36, %v227_v60  ;;  %v246_v45 = vsel %vm8498_vm5, %v5008_v52, %v242_v19  ;;  %v4695_v0 = vmul.f32 %v8408_v13, %v4686_v18 }
 0x5f5   :  { %v192_v50 = vsel %vm8438_vm4, %v191_v43, %v187_v40  ;;  %v236_v35 = vsel %vm8485_vm3, %v235_v25, %v231_v27  ;;  %v251_v1 = vsel %vm8489_vm0, %v250_v41, %v246_v45  ;;  %vm8535_vm7 = vcmp.eq.f32.partialorder %v276_v33, 8.507059e+37 }
 0x5f6   :  { %v5010_v61 = vpop.eup %5009  ;;  %v4699_v51 = vrot.slane %v192_v50, 7  ;;  %v4711_v3 = vrot.slane %v236_v35, 6  ;;  %v279_v17 = vor.u32 1.1754944e-38, %v278_v39  ;;  %v4712_v23 = vrot.slane %v251_v1, 6 }
 0x5f7   :  { %v268_v20 = vmul.f32 %v5010_v61, %v8442_v49  ;;  %vm273_vm4 = vweird.f32 %v5010_v61  ;;  %v4687_v57 = vmul.f32 %v8343_v42, %v163_v28  ;;  %vm287_vm12 = vweird.f32 %v8468_v24 }
 0x5f8   :  { %v4703_v53 = vmul.f32 %v8355_v4, %v4699_v51  ;;  %v4715_v56 = vmul.f32 %v8355_v4, %v4711_v3  ;;  %v5012_v43 = vpop.eup %5011  ;;  %vm8531_vm8 = vmor %vm272_vm6, %vm273_vm4  ;;  %v291_v49 = vand.u32 2147483647, %v8468_v24  ;;  %v4736_v38 = vperm.slane %v4695_v0, 4 }
 0x5f9   :  { %v269_v47 = vsub.f32 1.0, %v268_v20  ;;  %v283_v63 = vmul.f32 %v5012_v43, %v8468_v24  ;;  %vm288_vm13 = vweird.f32 %v5012_v43  ;;  %v4716_v58 = vmul.f32 %v8343_v42, %v4712_v23 }
 0x5fa   :  { %v4707_v48 = vmul.f32 %v4705_v22, %v4703_v53  ;;  %v4719_v46 = vmul.f32 %v4717_v14, %v4715_v56  ;;  %vm4773_vm14 = vcmask 1040384   ;;  %v4696_v31 = vmul.f32 %v4692_v44, %v4687_v57  ;;  %vm289_vm15 = vmor %vm287_vm12, %vm288_vm13 }
 0x5fb   :  { %v270_v34 = vmul.f32 %v5010_v61, %v269_v47  ;;  %v284_v29 = vsub.f32 1.0, %v283_v63  ;;  %v4708_v5 = vmul.f32 %v4704_v54, %v8408_v13  ;;  %vm292_vm1 = vcmp.eq.f32.partialorder %v291_v49, 8.507059e+37 }
 0x5fc   :  { %v4746_v6 = vperm.slane %v4707_v48, 5  ;;  %v4745_v55 = vperm.slane %v4707_v48, 1  ;;  %v294_v37 = vor.u32 1.1754944e-38, %v293_v11  ;;  %v4756_v16 = vperm.slane %v4719_v46, 6 }
 0x5fd   :  { %v271_v9 = vadd.f32 %v5010_v61, %v270_v34  ;;  %v285_v2 = vmul.f32 %v5012_v43, %v284_v29  ;;  %v4735_v10 = vperm.slane %v4695_v0, 0  ;;  %v4720_v25 = vmul.f32 %v4716_v58, %v4705_v22 }
 0x5fe   :  { %v4775_v8 = vsel %vm4773_vm14, %v4736_v38, %v4746_v6  ;;  %v4755_v44 = vperm.slane %v4719_v46, 2  ;;  %v4738_v59 = vperm.slane %v4696_v31, 4  ;;  %v4748_v18 = vperm.slane %v4708_v5, 5 }
 0x5ff   :  { %v275_v52 = vsel %vm8531_vm8, %v5010_v61, %v271_v9  ;;  %v286_v26 = vadd.f32 %v5012_v43, %v285_v2  ;;  %v4774_v41 = vsel %vm4773_vm14, %v4735_v10, %v4745_v55  ;;  %v4779_v61 = vsel %vm1187_vm11, %v4775_v8, %v4756_v16 }
 0x600   :  { %v280_v21 = vsel %vm8535_vm7, %v279_v17, %v275_v52  ;;  %v4737_v62 = vperm.slane %v4696_v31, 0  ;;  %v4758_v27 = vperm.slane %v4720_v25, 6  ;;  %v4778_v19 = vsel %vm1187_vm11, %v4774_v41, %v4755_v44 }
 0x601   :  { %v4723_v30 = vrot.slane %v280_v21, 5  ;;  %v290_v60 = vsel %vm289_vm15, %v5012_v43, %v286_v26  ;;  %v4777_v20 = vsel %vm4773_vm14, %v4738_v59, %v4748_v18  ;;  %v4757_v33 = vperm.slane %v4720_v25, 2 }
 0x602   :  { %v295_v24 = vsel %vm292_vm1, %v294_v37, %v290_v60  ;;  %v4781_v3 = vsel %vm1187_vm11, %v4777_v20, %v4758_v27 }
 0x603   :  { %v4727_v40 = vmul.f32 %v8355_v4, %v4723_v30  ;;  %v4724_v50 = vrot.slane %v295_v24, 5  ;;  %v4747_v4 = vperm.slane %v4708_v5, 1 }
 0x605   :  { %v4731_v7 = vmul.f32 %v4729_v32, %v4727_v40  ;;  %v4728_v13 = vmul.f32 %v8343_v42, %v4724_v50  ;;  %v4776_v47 = vsel %vm4773_vm14, %v4737_v62, %v4747_v4 }
 0x606   :  { %v4780_v42 = vsel %vm1187_vm11, %v4776_v47, %v4757_v33 }
 0x607   :  { %v4766_v15 = vperm.slane %v4731_v7, 7  ;;  %v4765_v22 = vperm.slane %v4731_v7, 3  ;;  %v4732_v45 = vmul.f32 %v4728_v13, %v4717_v14 }
 0x609   :  { %v4783_v35 = vsel %vm1122_vm10, %v4779_v61, %v4766_v15  ;;  %v4782_v51 = vsel %vm1122_vm10, %v4778_v19, %v4765_v22  ;;  %v4768_v28 = vperm.slane %v4732_v45, 7  ;;  %v4767_v1 = vperm.slane %v4732_v45, 3 }
 0x60a   :  { %v4790_v39 = vrot.slane %v4783_v35, 4 }
 0x60b   :  { %v4785_v14 = vsel %vm1122_vm10, %v4781_v3, %v4768_v28  ;;  %v4784_v53 = vsel %vm1122_vm10, %v4780_v42, %v4767_v1 }
 0x60c   :  { %v4792_v54 = vsel %vm1057_vm9, %v4782_v51, %v4790_v39  ;;  %v4791_v34 = vrot.slane %v4785_v14, 4 }
 0x60d   :  { %4796 = vst [vmem:[#allocation13] sm:$0xff] %v4792_v54 }
 0x60e   :  { %v4793_v56 = vsel %vm1057_vm9, %v4784_v53, %v4791_v34 }
 0x60f   :  { %4797 = vst [vmem:[#allocation13 + $0x8] sm:$0xff] %v4793_v56 }
 0x610   :  { %4810 = dma.vmem_to_hbm [thread:$0]  %s4803_s13, 256, %s4805_s17, [#allocation6], %s5158_s23, %s5158_s23, %s5159_s24  }
 0x611   :  { %5155 = dma.done.wait [#allocation6], 256  }
 0x612   :  { %5156 = vsyncadd [#allocation6], 4294967040 }
 0x613   :  { %4815 = vsyncpa [#allocation5], 1 }
 0x614   :  { %4816 = vsyncpa [#allocation6], 1 }
 0x615   :  { %4817 = vsyncpa [#allocation7], 1 }
 0x616   :  { %4818 = vsyncpa [#allocation8], 1 }
 0x617   :  { %4819 = vsyncpa [#allocation12], 1 }

</bundles_post_ra>
